<compile_context>
chip_gen: v7x
topology: tpu7x:2x2x1
jax: 0.10.0
libtpu: 0.0.40
codegen_flags: <defaults>
</compile_context>

<pallas_src>
import functools

import jax
import jax.numpy as jnp
from jax.experimental import pallas as pl
from jax.experimental.pallas import tpu as pltpu

EPS = 1e-5

# Unpadded / padded sizes.
COLS_RAW, COLS_PAD = 38, 128
H1_RAW, H1 = 1000, 1024
H2_RAW, H2 = 500, 512
H3_RAW, H3 = 100, 128
OUT_PAD = 128


def _round_up(x, m):
    return (x + m - 1) // m * m


def _bn_batch(h, gamma, beta, inv_n):
    """BatchNorm1d forward with batch statistics (training mode, biased var,
    eps=1e-5).

    Two-pass mean/var (matches PyTorch numerics), applied as a single fused
    scale/shift pass:
        scale = gamma / sqrt(var + eps)
        shift = beta  - mean * scale
        out   = h * scale + shift
    Shared verbatim between the Pallas kernel body and the pure-JAX reference
    so both paths evaluate an identical expression tree.
    """
    mean = jnp.sum(h, axis=0, keepdims=True) * inv_n
    diff = h - mean
    var = jnp.sum(diff * diff, axis=0, keepdims=True) * inv_n
    inv_std = 1.0 / jnp.sqrt(var + EPS)
    scale = gamma * inv_std
    shift = beta - mean * scale
    return h * scale + shift


def survnet_kernel(
    x_ref, cols_ref,
    w1_ref, b1_ref, g1_ref, be1_ref,
    w2a_ref, w2b_ref, b2_ref, g2_ref, be2_ref,
    w3_ref, b3_ref, g3_ref, be3_ref,
    w4_ref, b4_ref,
    out_ref,
    *, inv_n,
):
    x = x_ref[...]        # [N, F_pad]   bf16
    cols = cols_ref[...]  # [N, 128]     bf16 (38 real cols, zero padded)

    # fc1 -> ReLU -> BN1   (bf16 MXU matmul, f32 accumulation / BN math)
    h1 = jnp.dot(x, w1_ref[...], preferred_element_type=jnp.float32) + b1_ref[...]
    h1 = jnp.maximum(h1, 0.0)
    h1 = _bn_batch(h1, g1_ref[...], be1_ref[...], inv_n)
    # dropout(p=0.1): identity (eval-mode)

    # fc2 over concat([h1, cols]) == h1 @ W2a + cols @ W2b + b2
    h2 = (
        jnp.dot(h1.astype(jnp.bfloat16), w2a_ref[...],
                preferred_element_type=jnp.float32)
        + jnp.dot(cols, w2b_ref[...], preferred_element_type=jnp.float32)
        + b2_ref[...]
    )
    h2 = jnp.maximum(h2, 0.0)
    h2 = _bn_batch(h2, g2_ref[...], be2_ref[...], inv_n)

    # fc3 -> ReLU -> BN3
    h3 = (
        jnp.dot(h2.astype(jnp.bfloat16), w3_ref[...],
                preferred_element_type=jnp.float32)
        + b3_ref[...]
    )
    h3 = jnp.maximum(h3, 0.0)
    h3 = _bn_batch(h3, g3_ref[...], be3_ref[...], inv_n)

    # fc4 (output lanes padded to 128 -> dense stores; sliced in the wrapper)
    out_ref[...] = (
        jnp.dot(h3.astype(jnp.bfloat16), w4_ref[...],
                preferred_element_type=jnp.float32)
        + b4_ref[...]
    )


def _pack_inputs(imfeat, cols_list):
    """Pad imfeat / the 38 scalar columns to lane multiples and cast to bf16.

    Used by both the kernel wrapper and the pure-JAX reference so the two
    paths consume the exact same arrays.
    """
    N, F = imfeat.shape
    f_pad = _round_up(F, 128)
    cols = jnp.concatenate(cols_list, axis=1)                        # [N, 38]
    cols = jnp.pad(cols, ((0, 0), (0, COLS_PAD - cols.shape[1])))
    x = jnp.pad(imfeat, ((0, 0), (0, f_pad - F)))
    return x.astype(jnp.bfloat16), cols.astype(jnp.bfloat16)


def survnet_2_3_forward(imfeat, cols_list, params):
    """imfeat: [N, in_features] f32; cols_list: 38 arrays of shape [N, 1]."""
    N = imfeat.shape[0]
    # Monolithic single-block design: activations + weights must fit VMEM.
    assert N <= 2048, "monolithic kernel: batch too large for single VMEM block"

    x, cols = _pack_inputs(imfeat, cols_list)

    args = (
        x, cols,
        params["w1"], params["b1"], params["g1"], params["be1"],
        params["w2a"], params["w2b"], params["b2"], params["g2"], params["be2"],
        params["w3"], params["b3"], params["g3"], params["be3"],
        params["w4"], params["b4"],
    )
    vmem_spec = pl.BlockSpec(memory_space=pltpu.MemorySpace.VMEM)
    out_pad = pl.pallas_call(
        functools.partial(survnet_kernel, inv_n=1.0 / N),
        out_shape=jax.ShapeDtypeStruct((N, OUT_PAD), jnp.float32),
        in_specs=[vmem_spec] * len(args),
        out_specs=vmem_spec,
        compiler_params=pltpu.CompilerParams(vmem_limit_bytes=32 << 20),
    )(*args)
    return out_pad[:, : params["out_features"]]


def init_params(key, in_features, out_features):
    """Deterministic init mimicking nn.Linear (uniform +/- 1/sqrt(fan_in)),
    stored padded to lane multiples; weights cast to bf16."""

    def linear(key, fan_in, fan_out):
        kw, kb = jax.random.split(key)
        bound = 1.0 / jnp.sqrt(jnp.float32(fan_in))
        w = jax.random.uniform(kw, (fan_in, fan_out), jnp.float32, -bound, bound)
        b = jax.random.uniform(kb, (1, fan_out), jnp.float32, -bound, bound)
        return w, b

    k1, k2, k3, k4 = jax.random.split(key, 4)
    w1, b1 = linear(k1, in_features, H1_RAW)
    w2, b2 = linear(k2, H1_RAW + COLS_RAW, H2_RAW)   # fc2 takes concat(x4, 38 cols)
    w3, b3 = linear(k3, H2_RAW, H3_RAW)
    w4, b4 = linear(k4, H3_RAW, out_features)

    f_pad = _round_up(in_features, 128)

    def padw(w, rows, cols):
        return jnp.pad(
            w, ((0, rows - w.shape[0]), (0, cols - w.shape[1]))
        ).astype(jnp.bfloat16)

    def padb(b, cols):
        return jnp.pad(b, ((0, 0), (0, cols - b.shape[1]))).astype(jnp.float32)

    return {
        "out_features": out_features,
        "w1": padw(w1, f_pad, H1), "b1": padb(b1, H1),
        "w2a": padw(w2[:H1_RAW, :], H1, H2),
        "w2b": padw(w2[H1_RAW:, :], COLS_PAD, H2),
        "b2": padb(b2, H2),
        "w3": padw(w3, H2, H3), "b3": padb(b3, H3),
        "w4": padw(w4, H3, OUT_PAD), "b4": padb(b4, OUT_PAD),
        # BatchNorm1d affine params (default init gamma=1, beta=0); padded
        # feature columns are identically zero, and their gamma is zero too,
        # so padding never leaks into real outputs.
        "g1": padb(jnp.ones((1, H1_RAW), jnp.float32), H1),
        "be1": jnp.zeros((1, H1), jnp.float32),
        "g2": padb(jnp.ones((1, H2_RAW), jnp.float32), H2),
        "be2": jnp.zeros((1, H2), jnp.float32),
        "g3": padb(jnp.ones((1, H3_RAW), jnp.float32), H3),
        "be3": jnp.zeros((1, H3), jnp.float32),
    }


def _reference(imfeat, cols_list, params):
    """Pure-JAX reference with the exact same math as the kernel (same padded
    params, same bf16 matmul inputs / f32 accumulation, same `_bn_batch`)."""
    N = imfeat.shape[0]
    inv_n = 1.0 / N
    x, cols = _pack_inputs(imfeat, cols_list)

    h1 = jnp.dot(x, params["w1"], preferred_element_type=jnp.float32) + params["b1"]
    h1 = jnp.maximum(h1, 0.0)
    h1 = _bn_batch(h1, params["g1"], params["be1"], inv_n)

    h2 = (
        jnp.dot(h1.astype(jnp.bfloat16), params["w2a"],
                preferred_element_type=jnp.float32)
        + jnp.dot(cols, params["w2b"], preferred_element_type=jnp.float32)
        + params["b2"]
    )
    h2 = jnp.maximum(h2, 0.0)
    h2 = _bn_batch(h2, params["g2"], params["be2"], inv_n)

    h3 = (
        jnp.dot(h2.astype(jnp.bfloat16), params["w3"],
                preferred_element_type=jnp.float32)
        + params["b3"]
    )
    h3 = jnp.maximum(h3, 0.0)
    h3 = _bn_batch(h3, params["g3"], params["be3"], inv_n)

    out = (
        jnp.dot(h3.astype(jnp.bfloat16), params["w4"],
                preferred_element_type=jnp.float32)
        + params["b4"]
    )
    return out[:, : params["out_features"]]


if __name__ == "__main__":
    N = 128            # batch: fills the MXU rows; still a small problem size
    IN_FEATURES = 244  # 244 radiomic features (matches the spec)
    OUT_FEATURES = 15  # num_durations (LogisticHazard label transform)

    key = jax.random.PRNGKey(0)
    kx, kc, kp = jax.random.split(key, 3)

    imfeat = jax.random.normal(kx, (N, IN_FEATURES), jnp.float32)
    col_keys = jax.random.split(kc, COLS_RAW)
    cols_list = [jax.random.normal(k, (N, 1), jnp.float32) for k in col_keys]

    params = init_params(kp, IN_FEATURES, OUT_FEATURES)

    out = survnet_2_3_forward(imfeat, cols_list, params)
    out = jax.block_until_ready(out)

    ref = _reference(imfeat, cols_list, params)
    assert out.shape == (N, OUT_FEATURES)
    # Residual divergence is only Mosaic-vs-XLA matmul accumulation order and
    # elementwise lowering differences propagated through three batch-norms;
    # 1e-2 abs/rel is a conservative bound for a bf16-matmul 4-layer net.
    assert jnp.allclose(out, ref, atol=1e-2, rtol=1e-2), "mismatch vs JAX reference"

    print("KERNEL_OK")
</pallas_src>

<mosaic_0001>
module attributes {stable_mosaic.version = 11 : i64} {
  func.func @survnet_kernel(%arg0: memref<128x256xbf16, #tpu.memory_space<vmem>>, %arg1: memref<128x128xbf16, #tpu.memory_space<vmem>>, %arg2: memref<256x1024xbf16, #tpu.memory_space<vmem>>, %arg3: memref<1x1024xf32, #tpu.memory_space<vmem>>, %arg4: memref<1x1024xf32, #tpu.memory_space<vmem>>, %arg5: memref<1x1024xf32, #tpu.memory_space<vmem>>, %arg6: memref<1024x512xbf16, #tpu.memory_space<vmem>>, %arg7: memref<128x512xbf16, #tpu.memory_space<vmem>>, %arg8: memref<1x512xf32, #tpu.memory_space<vmem>>, %arg9: memref<1x512xf32, #tpu.memory_space<vmem>>, %arg10: memref<1x512xf32, #tpu.memory_space<vmem>>, %arg11: memref<512x128xbf16, #tpu.memory_space<vmem>>, %arg12: memref<1x128xf32, #tpu.memory_space<vmem>>, %arg13: memref<1x128xf32, #tpu.memory_space<vmem>>, %arg14: memref<1x128xf32, #tpu.memory_space<vmem>>, %arg15: memref<128x128xbf16, #tpu.memory_space<vmem>>, %arg16: memref<1x128xf32, #tpu.memory_space<vmem>>, %arg17: memref<128x128xf32, #tpu.memory_space<vmem>>) attributes {dimension_semantics = [], scalar_prefetch = 0 : i64, scratch_operands = 0 : i64, tpu.core_type = #tpu.core_type<tc>} {
    %c0 = arith.constant 0 : index
    %c0_0 = arith.constant 0 : index
    %0 = vector.load %arg0[%c0, %c0_0] : memref<128x256xbf16, #tpu.memory_space<vmem>>, vector<128x256xbf16>
    %c0_1 = arith.constant 0 : index
    %c0_2 = arith.constant 0 : index
    %1 = vector.load %arg1[%c0_1, %c0_2] : memref<128x128xbf16, #tpu.memory_space<vmem>>, vector<128x128xbf16>
    %c0_3 = arith.constant 0 : index
    %c0_4 = arith.constant 0 : index
    %2 = vector.load %arg2[%c0_3, %c0_4] : memref<256x1024xbf16, #tpu.memory_space<vmem>>, vector<256x1024xbf16>
    %cst = arith.constant dense<0.000000e+00> : vector<128x1024xf32>
    %3 = tpu.matmul %0, %2, %cst {dimension_numbers = #tpu.dot_dimension_numbers<[1], [0], [0], [1], [0, 0, 1, 1], [], []>} : vector<128x256xbf16>, vector<256x1024xbf16>, vector<128x1024xf32> -> vector<128x1024xf32>
    %c0_5 = arith.constant 0 : index
    %c0_6 = arith.constant 0 : index
    %4 = vector.load %arg3[%c0_5, %c0_6] : memref<1x1024xf32, #tpu.memory_space<vmem>>, vector<1x1024xf32>
    %5 = vector.broadcast %4 : vector<1x1024xf32> to vector<128x1024xf32>
    %6 = arith.addf %3, %5 : vector<128x1024xf32>
    %cst_7 = arith.constant 0.000000e+00 : f32
    %7 = vector.broadcast %cst_7 : f32 to vector<128x1024xf32>
    %8 = arith.maximumf %6, %7 : vector<128x1024xf32>
    %c0_8 = arith.constant 0 : index
    %c0_9 = arith.constant 0 : index
    %9 = vector.load %arg4[%c0_8, %c0_9] : memref<1x1024xf32, #tpu.memory_space<vmem>>, vector<1x1024xf32>
    %c0_10 = arith.constant 0 : index
    %c0_11 = arith.constant 0 : index
    %10 = vector.load %arg5[%c0_10, %c0_11] : memref<1x1024xf32, #tpu.memory_space<vmem>>, vector<1x1024xf32>
    %cst_12 = arith.constant dense<0.000000e+00> : vector<1024xf32>
    %11 = vector.multi_reduction <add>, %8, %cst_12 [0] : vector<128x1024xf32> to vector<1024xf32>
    %12 = vector.shape_cast %11 : vector<1024xf32> to vector<1x1024xf32>
    %cst_13 = arith.constant 7.812500e-03 : f32
    %13 = vector.broadcast %cst_13 : f32 to vector<1x1024xf32>
    %14 = arith.mulf %12, %13 : vector<1x1024xf32>
    %15 = vector.broadcast %14 : vector<1x1024xf32> to vector<128x1024xf32>
    %16 = arith.subf %8, %15 : vector<128x1024xf32>
    %17 = arith.mulf %16, %16 : vector<128x1024xf32>
    %cst_14 = arith.constant dense<0.000000e+00> : vector<1024xf32>
    %18 = vector.multi_reduction <add>, %17, %cst_14 [0] : vector<128x1024xf32> to vector<1024xf32>
    %19 = vector.shape_cast %18 : vector<1024xf32> to vector<1x1024xf32>
    %cst_15 = arith.constant 7.812500e-03 : f32
    %20 = vector.broadcast %cst_15 : f32 to vector<1x1024xf32>
    %21 = arith.mulf %19, %20 : vector<1x1024xf32>
    %cst_16 = arith.constant 9.99999974E-6 : f32
    %22 = vector.broadcast %cst_16 : f32 to vector<1x1024xf32>
    %23 = arith.addf %21, %22 : vector<1x1024xf32>
    %24 = math.sqrt %23 : vector<1x1024xf32>
    %cst_17 = arith.constant 1.000000e+00 : f32
    %25 = vector.broadcast %cst_17 : f32 to vector<1x1024xf32>
    %26 = arith.divf %25, %24 : vector<1x1024xf32>
    %27 = arith.mulf %9, %26 : vector<1x1024xf32>
    %28 = arith.mulf %14, %27 : vector<1x1024xf32>
    %29 = arith.subf %10, %28 : vector<1x1024xf32>
    %30 = vector.broadcast %27 : vector<1x1024xf32> to vector<128x1024xf32>
    %31 = arith.mulf %8, %30 : vector<128x1024xf32>
    %32 = vector.broadcast %29 : vector<1x1024xf32> to vector<128x1024xf32>
    %33 = arith.addf %31, %32 : vector<128x1024xf32>
    %34 = arith.truncf %33 : vector<128x1024xf32> to vector<128x1024xbf16>
    %c0_18 = arith.constant 0 : index
    %c0_19 = arith.constant 0 : index
    %35 = vector.load %arg6[%c0_18, %c0_19] : memref<1024x512xbf16, #tpu.memory_space<vmem>>, vector<1024x512xbf16>
    %cst_20 = arith.constant dense<0.000000e+00> : vector<128x512xf32>
    %36 = tpu.matmul %34, %35, %cst_20 {dimension_numbers = #tpu.dot_dimension_numbers<[1], [0], [0], [1], [0, 0, 1, 1], [], []>} : vector<128x1024xbf16>, vector<1024x512xbf16>, vector<128x512xf32> -> vector<128x512xf32>
    %c0_21 = arith.constant 0 : index
    %c0_22 = arith.constant 0 : index
    %37 = vector.load %arg7[%c0_21, %c0_22] : memref<128x512xbf16, #tpu.memory_space<vmem>>, vector<128x512xbf16>
    %cst_23 = arith.constant dense<0.000000e+00> : vector<128x512xf32>
    %38 = tpu.matmul %1, %37, %cst_23 {dimension_numbers = #tpu.dot_dimension_numbers<[1], [0], [0], [1], [0, 0, 1, 1], [], []>} : vector<128x128xbf16>, vector<128x512xbf16>, vector<128x512xf32> -> vector<128x512xf32>
    %39 = arith.addf %36, %38 : vector<128x512xf32>
    %c0_24 = arith.constant 0 : index
    %c0_25 = arith.constant 0 : index
    %40 = vector.load %arg8[%c0_24, %c0_25] : memref<1x512xf32, #tpu.memory_space<vmem>>, vector<1x512xf32>
    %41 = vector.broadcast %40 : vector<1x512xf32> to vector<128x512xf32>
    %42 = arith.addf %39, %41 : vector<128x512xf32>
    %cst_26 = arith.constant 0.000000e+00 : f32
    %43 = vector.broadcast %cst_26 : f32 to vector<128x512xf32>
    %44 = arith.maximumf %42, %43 : vector<128x512xf32>
    %c0_27 = arith.constant 0 : index
    %c0_28 = arith.constant 0 : index
    %45 = vector.load %arg9[%c0_27, %c0_28] : memref<1x512xf32, #tpu.memory_space<vmem>>, vector<1x512xf32>
    %c0_29 = arith.constant 0 : index
    %c0_30 = arith.constant 0 : index
    %46 = vector.load %arg10[%c0_29, %c0_30] : memref<1x512xf32, #tpu.memory_space<vmem>>, vector<1x512xf32>
    %cst_31 = arith.constant dense<0.000000e+00> : vector<512xf32>
    %47 = vector.multi_reduction <add>, %44, %cst_31 [0] : vector<128x512xf32> to vector<512xf32>
    %48 = vector.shape_cast %47 : vector<512xf32> to vector<1x512xf32>
    %cst_32 = arith.constant 7.812500e-03 : f32
    %49 = vector.broadcast %cst_32 : f32 to vector<1x512xf32>
    %50 = arith.mulf %48, %49 : vector<1x512xf32>
    %51 = vector.broadcast %50 : vector<1x512xf32> to vector<128x512xf32>
    %52 = arith.subf %44, %51 : vector<128x512xf32>
    %53 = arith.mulf %52, %52 : vector<128x512xf32>
    %cst_33 = arith.constant dense<0.000000e+00> : vector<512xf32>
    %54 = vector.multi_reduction <add>, %53, %cst_33 [0] : vector<128x512xf32> to vector<512xf32>
    %55 = vector.shape_cast %54 : vector<512xf32> to vector<1x512xf32>
    %cst_34 = arith.constant 7.812500e-03 : f32
    %56 = vector.broadcast %cst_34 : f32 to vector<1x512xf32>
    %57 = arith.mulf %55, %56 : vector<1x512xf32>
    %cst_35 = arith.constant 9.99999974E-6 : f32
    %58 = vector.broadcast %cst_35 : f32 to vector<1x512xf32>
    %59 = arith.addf %57, %58 : vector<1x512xf32>
    %60 = math.sqrt %59 : vector<1x512xf32>
    %cst_36 = arith.constant 1.000000e+00 : f32
    %61 = vector.broadcast %cst_36 : f32 to vector<1x512xf32>
    %62 = arith.divf %61, %60 : vector<1x512xf32>
    %63 = arith.mulf %45, %62 : vector<1x512xf32>
    %64 = arith.mulf %50, %63 : vector<1x512xf32>
    %65 = arith.subf %46, %64 : vector<1x512xf32>
    %66 = vector.broadcast %63 : vector<1x512xf32> to vector<128x512xf32>
    %67 = arith.mulf %44, %66 : vector<128x512xf32>
    %68 = vector.broadcast %65 : vector<1x512xf32> to vector<128x512xf32>
    %69 = arith.addf %67, %68 : vector<128x512xf32>
    %70 = arith.truncf %69 : vector<128x512xf32> to vector<128x512xbf16>
    %c0_37 = arith.constant 0 : index
    %c0_38 = arith.constant 0 : index
    %71 = vector.load %arg11[%c0_37, %c0_38] : memref<512x128xbf16, #tpu.memory_space<vmem>>, vector<512x128xbf16>
    %cst_39 = arith.constant dense<0.000000e+00> : vector<128x128xf32>
    %72 = tpu.matmul %70, %71, %cst_39 {dimension_numbers = #tpu.dot_dimension_numbers<[1], [0], [0], [1], [0, 0, 1, 1], [], []>} : vector<128x512xbf16>, vector<512x128xbf16>, vector<128x128xf32> -> vector<128x128xf32>
    %c0_40 = arith.constant 0 : index
    %c0_41 = arith.constant 0 : index
    %73 = vector.load %arg12[%c0_40, %c0_41] : memref<1x128xf32, #tpu.memory_space<vmem>>, vector<1x128xf32>
    %74 = vector.broadcast %73 : vector<1x128xf32> to vector<128x128xf32>
    %75 = arith.addf %72, %74 : vector<128x128xf32>
    %cst_42 = arith.constant 0.000000e+00 : f32
    %76 = vector.broadcast %cst_42 : f32 to vector<128x128xf32>
    %77 = arith.maximumf %75, %76 : vector<128x128xf32>
    %c0_43 = arith.constant 0 : index
    %c0_44 = arith.constant 0 : index
    %78 = vector.load %arg13[%c0_43, %c0_44] : memref<1x128xf32, #tpu.memory_space<vmem>>, vector<1x128xf32>
    %c0_45 = arith.constant 0 : index
    %c0_46 = arith.constant 0 : index
    %79 = vector.load %arg14[%c0_45, %c0_46] : memref<1x128xf32, #tpu.memory_space<vmem>>, vector<1x128xf32>
    %cst_47 = arith.constant dense<0.000000e+00> : vector<128xf32>
    %80 = vector.multi_reduction <add>, %77, %cst_47 [0] : vector<128x128xf32> to vector<128xf32>
    %81 = vector.shape_cast %80 : vector<128xf32> to vector<1x128xf32>
    %cst_48 = arith.constant 7.812500e-03 : f32
    %82 = vector.broadcast %cst_48 : f32 to vector<1x128xf32>
    %83 = arith.mulf %81, %82 : vector<1x128xf32>
    %84 = vector.broadcast %83 : vector<1x128xf32> to vector<128x128xf32>
    %85 = arith.subf %77, %84 : vector<128x128xf32>
    %86 = arith.mulf %85, %85 : vector<128x128xf32>
    %cst_49 = arith.constant dense<0.000000e+00> : vector<128xf32>
    %87 = vector.multi_reduction <add>, %86, %cst_49 [0] : vector<128x128xf32> to vector<128xf32>
    %88 = vector.shape_cast %87 : vector<128xf32> to vector<1x128xf32>
    %cst_50 = arith.constant 7.812500e-03 : f32
    %89 = vector.broadcast %cst_50 : f32 to vector<1x128xf32>
    %90 = arith.mulf %88, %89 : vector<1x128xf32>
    %cst_51 = arith.constant 9.99999974E-6 : f32
    %91 = vector.broadcast %cst_51 : f32 to vector<1x128xf32>
    %92 = arith.addf %90, %91 : vector<1x128xf32>
    %93 = math.sqrt %92 : vector<1x128xf32>
    %cst_52 = arith.constant 1.000000e+00 : f32
    %94 = vector.broadcast %cst_52 : f32 to vector<1x128xf32>
    %95 = arith.divf %94, %93 : vector<1x128xf32>
    %96 = arith.mulf %78, %95 : vector<1x128xf32>
    %97 = arith.mulf %83, %96 : vector<1x128xf32>
    %98 = arith.subf %79, %97 : vector<1x128xf32>
    %99 = vector.broadcast %96 : vector<1x128xf32> to vector<128x128xf32>
    %100 = arith.mulf %77, %99 : vector<128x128xf32>
    %101 = vector.broadcast %98 : vector<1x128xf32> to vector<128x128xf32>
    %102 = arith.addf %100, %101 : vector<128x128xf32>
    %103 = arith.truncf %102 : vector<128x128xf32> to vector<128x128xbf16>
    %c0_53 = arith.constant 0 : index
    %c0_54 = arith.constant 0 : index
    %104 = vector.load %arg15[%c0_53, %c0_54] : memref<128x128xbf16, #tpu.memory_space<vmem>>, vector<128x128xbf16>
    %cst_55 = arith.constant dense<0.000000e+00> : vector<128x128xf32>
    %105 = tpu.matmul %103, %104, %cst_55 {dimension_numbers = #tpu.dot_dimension_numbers<[1], [0], [0], [1], [0, 0, 1, 1], [], []>} : vector<128x128xbf16>, vector<128x128xbf16>, vector<128x128xf32> -> vector<128x128xf32>
    %c0_56 = arith.constant 0 : index
    %c0_57 = arith.constant 0 : index
    %106 = vector.load %arg16[%c0_56, %c0_57] : memref<1x128xf32, #tpu.memory_space<vmem>>, vector<1x128xf32>
    %107 = vector.broadcast %106 : vector<1x128xf32> to vector<128x128xf32>
    %108 = arith.addf %105, %107 : vector<128x128xf32>
    %c0_58 = arith.constant 0 : index
    %c0_59 = arith.constant 0 : index
    %109 = vector.load %arg17[%c0_58, %c0_59] : memref<128x128xf32, #tpu.memory_space<vmem>>, vector<128x128xf32>
    tpu.vector_store %arg17[%c0_58, %c0_59], %108 {strides = array<i32>} : memref<128x128xf32, #tpu.memory_space<vmem>>, vector<128x128xf32>,
    return
  }
}

</mosaic_0001>

<bundles_post_ra>
// kernel: tpu_custom_call.1
= control target key start
LH: loop header
LB: loop body
LE: loop exit
PB: predicated region body
PF: predicated region fallthrough
CT: control target
= control target key end

     0   :  { %s12004_s0 = inlined_call_operand.hbm [shape: bf16[128,256], index: 0, kind: input, shape index: {}]   ;;  %s12005_s1 = inlined_call_operand.hbm [shape: bf16[128,128], index: 1, kind: input, shape index: {}]   ;;  %s12006_s2 = inlined_call_operand.hbm [shape: bf16[256,1024], index: 2, kind: input, shape index: {}]   ;;  %s12007_s3 = inlined_call_operand.vmem [shape: f32[1,1024], index: 3, kind: input, shape index: {}]   ;;  %s12008_s4 = inlined_call_operand.hbm [shape: f32[1,1024], index: 4, kind: input, shape index: {}]   ;;  %s12009_s5 = inlined_call_operand.vmem [shape: f32[1,1024], index: 5, kind: input, shape index: {}]   ;;  %s12010_s6 = inlined_call_operand.hbm [shape: bf16[1024,512], index: 6, kind: input, shape index: {}]   ;;  %s12011_s7 = inlined_call_operand.hbm [shape: bf16[128,512], index: 7, kind: input, shape index: {}]   ;;  %s12012_s8 = inlined_call_operand.vmem [shape: f32[1,512], index: 8, kind: input, shape index: {}]   ;;  %s12013_s9 = inlined_call_operand.vmem [shape: f32[1,512], index: 9, kind: input, shape index: {}]   ;;  %s12014_s10 = inlined_call_operand.vmem [shape: f32[1,512], index: 10, kind: input, shape index: {}]   ;;  %s12015_s11 = inlined_call_operand.hbm [shape: bf16[512,128], index: 11, kind: input, shape index: {}]   ;;  %s12016_s12 = inlined_call_operand.vmem [shape: f32[1,128], index: 12, kind: input, shape index: {}]   ;;  %s12017_s13 = inlined_call_operand.vmem [shape: f32[1,128], index: 13, kind: input, shape index: {}]   ;;  %s12018_s14 = inlined_call_operand.vmem [shape: f32[1,128], index: 14, kind: input, shape index: {}]   ;;  %s12019_s15 = inlined_call_operand.hbm [shape: bf16[128,128], index: 15, kind: input, shape index: {}]   ;;  %s12020_s16 = inlined_call_operand.vmem [shape: f32[1,128], index: 16, kind: input, shape index: {}]   ;;  %s12021_s17 = inlined_call_operand.hbm [shape: f32[128,128], index: 17, kind: output, shape index: {}]  }
   0x1   :  { %12328 = sst [smem:[#allocation160_spill]] %s12004_s0 }
   0x2   :  { %12329 = sst [smem:[#allocation161_spill]] %s12005_s1 }
   0x3   :  { %12330 = sst [smem:[#allocation162_spill]] %s12021_s17 }
   0x4   :  { %22 = vsyncpa [#allocation3], 0 }
   0x5   :  { %23 = vsyncpa [#allocation6], 0 }
   0x6   :  { %24 = vsyncpa [#allocation9], 0 }
   0x7   :  { %25 = vsyncpa [#allocation12], 0 }
   0x8   :  { %26 = vsyncpa [#allocation15], 0 }
   0x9   :  { %27 = vsyncpa [#allocation4], 0  ;;  %s9090_s24 = smov [#allocation5]   ;;  %s12331_s28 = sld [smem:[#allocation161_spill]] }
   0xa   :  { %s45_s25 = sshll.u32 %s9090_s24, 4  ;;  %s46_s25 = int_to_ptr.vmem [resolvable:$true] %s45_s25 }
   0xf   :  { %s8880_s29 = scalar_lea.hbm %s12331_s28, 1024 }
  0x10   :  { %p8881_p0 = scmp.ne.s32.totalorder %s12331_s28, %s8880_s29  ;;  %p8884_p1 = scmp.lt.u32.totalorder %s8880_s29, %s12331_s28 }
  0x12   :  { %p8886_p2 = pnand %p8884_p1, %p8881_p0 }
  0x14   :  { %8889 = shalt.err (!%p8886_p2)
}
  0x15   :  { %s8890_s1 = scalar_lea.vmem %s46_s25, 1024  ;;  %p8895_p4 = scmp.lt.s32.totalorder %s46_s25, %s46_s25 }
  0x16   :  { %p8891_p3 = scmp.ne.s32.totalorder %s46_s25, %s8890_s1  ;;  %p8896_p5 = scmp.lt.s32.totalorder %s8890_s1, %s8890_s1 }
  0x18   :  { %p8897_p6 = por %p8896_p5, %p8895_p4 }
  0x1a   :  { %p8898_p7 = pnand %p8897_p6, %p8891_p3 }
  0x1c   :  { %8901 = shalt.err (!%p8898_p7)
}
  0x1d   :  { %s12025_s20 = smov 64   ;;  %s12027_s21 = smov 4  }
  0x1e   :  { %51 = dma.hbm_to_vmem [thread:$0]  %s12331_s28, 1024, %s46_s25, [#allocation6], %s12025_s20, %s12025_s20, %s12027_s21  }
  0x1f   :  { %s9093_s24 = smov [#allocation8]   ;;  %s8902_s0 = scalar_lea.hbm %s12008_s4, 128 }
  0x20   :  { %s72_s26 = sshll.u32 %s9093_s24, 4  ;;  %p8903_p8 = scmp.ne.s32.totalorder %s12008_s4, %s8902_s0  ;;  %s73_s26 = int_to_ptr.vmem [resolvable:$true] %s72_s26 }
  0x21   :  { %p8906_p9 = scmp.lt.u32.totalorder %s8902_s0, %s12008_s4 }
  0x23   :  { %p8908_p10 = pnand %p8906_p9, %p8903_p8 }
  0x25   :  { %8911 = shalt.err (!%p8908_p10)
}
  0x26   :  { %s8912_s17 = scalar_lea.vmem %s73_s26, 128  ;;  %p8917_p12 = scmp.lt.s32.totalorder %s73_s26, %s73_s26 }
  0x27   :  { %p8913_p11 = scmp.ne.s32.totalorder %s73_s26, %s8912_s17  ;;  %p8918_p13 = scmp.lt.s32.totalorder %s8912_s17, %s8912_s17 }
  0x29   :  { %p8919_p0 = por %p8918_p13, %p8917_p12 }
  0x2b   :  { %p8920_p1 = pnand %p8919_p0, %p8913_p11 }
  0x2d   :  { %8923 = shalt.err (!%p8920_p1)
}
  0x2e   :  { %75 = dma.hbm_to_vmem [thread:$0]  %s12008_s4, 128, %s73_s26, [#allocation9]  }
  0x2f   :  { %s9094_s22 = smov [#allocation11]   ;;  %s9095_s24 = smov [#allocation2]  }
  0x30   :  { %s95_s23 = sshll.u32 %s9094_s22, 4  ;;  %s33_s27 = sshll.u32 %s9095_s24, 4  ;;  %s96_s23 = int_to_ptr.vmem [resolvable:$true] %s95_s23  ;;  %s9226_s27 = int_to_ptr.vmem [resolvable:$true] %s33_s27 }
  0x31   :  { %s8924_s30 = scalar_lea.hbm %s12011_s7, 4096 }
  0x32   :  { %p8925_p2 = scmp.ne.s32.totalorder %s12011_s7, %s8924_s30  ;;  %p8928_p3 = scmp.lt.u32.totalorder %s8924_s30, %s12011_s7 }
  0x34   :  { %p8930_p4 = pnand %p8928_p3, %p8925_p2 }
  0x36   :  { %8933 = shalt.err (!%p8930_p4)
}
  0x37   :  { %s8934_s4 = scalar_lea.vmem %s96_s23, 4096  ;;  %p8939_p6 = scmp.lt.s32.totalorder %s96_s23, %s96_s23 }
  0x38   :  { %p8935_p5 = scmp.ne.s32.totalorder %s96_s23, %s8934_s4  ;;  %p8940_p7 = scmp.lt.s32.totalorder %s8934_s4, %s8934_s4 }
  0x3a   :  { %p8941_p8 = por %p8940_p7, %p8939_p6 }
  0x3c   :  { %p8942_p9 = pnand %p8941_p8, %p8935_p5 }
  0x3e   :  { %8945 = shalt.err (!%p8942_p9)
}
  0x3f   :  { %s9096_s26 = smov 256   ;;  %s9097_s25 = smov 16  }
  0x40   :  { %101 = dma.hbm_to_vmem [thread:$0]  %s12011_s7, 4096, %s96_s23, [#allocation12], %s9096_s26, %s9096_s26, %s9097_s25  }
  0x41   :  { %s12332_s0 = sld [smem:[#allocation160_spill]] }
  0x47   :  { %s8946_s30 = scalar_lea.hbm %s12332_s0, 2048 }
  0x48   :  { %p8947_p10 = scmp.ne.s32.totalorder %s12332_s0, %s8946_s30  ;;  %p8950_p11 = scmp.lt.u32.totalorder %s8946_s30, %s12332_s0 }
  0x4a   :  { %p8952_p12 = pnand %p8950_p11, %p8947_p10 }
  0x4c   :  { %8955 = shalt.err (!%p8952_p12)
}
  0x4d   :  { %s8956_s4 = scalar_lea.vmem %s9226_s27, 2048  ;;  %p8961_p0 = scmp.lt.s32.totalorder %s9226_s27, %s9226_s27 }
  0x4e   :  { %p8957_p13 = scmp.ne.s32.totalorder %s9226_s27, %s8956_s4  ;;  %p8962_p1 = scmp.lt.s32.totalorder %s8956_s4, %s8956_s4 }
  0x50   :  { %p8963_p2 = por %p8962_p1, %p8961_p0 }
  0x52   :  { %p8964_p3 = pnand %p8963_p2, %p8957_p13 }
  0x54   :  { %8967 = shalt.err (!%p8964_p3)
}
  0x55   :  { %s12029_s7 = smov 128   ;;  %s12030_s23 = smov 8  }
  0x56   :  { %39 = dma.hbm_to_vmem [thread:$0]  %s12332_s0, 2048, %s9226_s27, [#allocation3], %s12029_s7, %s12029_s7, %s12030_s23  }
  0x57   :  { %s9100_s24 = smov [#allocation7]   ;;  %s8968_s17 = scalar_lea.hbm %s12006_s2, 16384 }
  0x58   :  { %s57_s29 = sshll.u32 %s9100_s24, 4  ;;  %p8969_p4 = scmp.ne.s32.totalorder %s12006_s2, %s8968_s17  ;;  %s58_s29 = int_to_ptr.vmem [resolvable:$true] %s57_s29 }
  0x59   :  { %p8972_p5 = scmp.lt.u32.totalorder %s8968_s17, %s12006_s2 }
  0x5b   :  { %p8974_p6 = pnand %p8972_p5, %p8969_p4 }
  0x5d   :  { %8977 = shalt.err (!%p8974_p6)
}
  0x5e   :  { %s8978_s21 = scalar_lea.vmem %s58_s29, 16384  ;;  %p8983_p8 = scmp.lt.s32.totalorder %s58_s29, %s58_s29 }
  0x5f   :  { %p8979_p7 = scmp.ne.s32.totalorder %s58_s29, %s8978_s21  ;;  %p8984_p9 = scmp.lt.s32.totalorder %s8978_s21, %s8978_s21 }
  0x61   :  { %p8985_p10 = por %p8984_p9, %p8983_p8 }
  0x63   :  { %p8986_p11 = pnand %p8985_p10, %p8979_p7 }
  0x65   :  { %8989 = shalt.err (!%p8986_p11)
}
  0x66   :  { %s9101_s27 = smov 512   ;;  %s9102_s0 = smov 32  }
  0x67   :  { %63 = dma.hbm_to_vmem [thread:$0]  %s12006_s2, 16384, %s58_s29, [#allocation6], %s9101_s27, %s9101_s27, %s9102_s0  }
  0x68   :  { %s9103_s24 = smov [#allocation10]   ;;  %s9104_s20 = smov [#allocation13]  }
  0x69   :  { %s83_s30 = sshll.u32 %s9103_s24, 4  ;;  %s113_s18 = sshll.u32 %s9104_s20, 4  ;;  %s84_s30 = int_to_ptr.vmem [resolvable:$true] %s83_s30  ;;  %s114_s18 = int_to_ptr.vmem [resolvable:$true] %s113_s18 }
  0x6a   :  { %s8990_s1 = scalar_lea.hbm %s12010_s6, 32768 }
  0x6b   :  { %p8991_p12 = scmp.ne.s32.totalorder %s12010_s6, %s8990_s1  ;;  %p8994_p13 = scmp.lt.u32.totalorder %s8990_s1, %s12010_s6 }
  0x6d   :  { %p8996_p0 = pnand %p8994_p13, %p8991_p12 }
  0x6f   :  { %8999 = shalt.err (!%p8996_p0)
}
  0x70   :  { %s9000_s2 = scalar_lea.vmem %s84_s30, 32768  ;;  %p9005_p2 = scmp.lt.s32.totalorder %s84_s30, %s84_s30 }
  0x71   :  { %p9001_p1 = scmp.ne.s32.totalorder %s84_s30, %s9000_s2  ;;  %p9006_p3 = scmp.lt.s32.totalorder %s9000_s2, %s9000_s2 }
  0x73   :  { %p9007_p4 = por %p9006_p3, %p9005_p2 }
  0x75   :  { %p9008_p5 = pnand %p9007_p4, %p9001_p1 }
  0x77   :  { %9011 = shalt.err (!%p9008_p5)
}
  0x78   :  { %89 = dma.hbm_to_vmem [thread:$0]  %s12010_s6, 32768, %s84_s30, [#allocation9], %s9096_s26, %s9096_s26, %s9097_s25  }
  0x79   :  { %s9012_s23 = scalar_lea.hbm %s12015_s11, 4096 }
  0x7a   :  { %p9013_p6 = scmp.ne.s32.totalorder %s12015_s11, %s9012_s23  ;;  %p9016_p7 = scmp.lt.u32.totalorder %s9012_s23, %s12015_s11 }
  0x7c   :  { %p9018_p8 = pnand %p9016_p7, %p9013_p6 }
  0x7e   :  { %9021 = shalt.err (!%p9018_p8)
}
  0x7f   :  { %s9022_s17 = scalar_lea.vmem %s114_s18, 4096  ;;  %p9027_p10 = scmp.lt.s32.totalorder %s114_s18, %s114_s18 }
  0x80   :  { %p9023_p9 = scmp.ne.s32.totalorder %s114_s18, %s9022_s17  ;;  %p9028_p11 = scmp.lt.s32.totalorder %s9022_s17, %s9022_s17 }
  0x82   :  { %p9029_p12 = por %p9028_p11, %p9027_p10 }
  0x84   :  { %p9030_p13 = pnand %p9029_p12, %p9023_p9 }
  0x86   :  { %9033 = shalt.err (!%p9030_p13)
}
  0x87   :  { %s12333_s6 = smov 4   ;;  %s12334_s26 = smov 64  }
  0x88   :  { %119 = dma.hbm_to_vmem [thread:$0]  %s12015_s11, 4096, %s114_s18, [#allocation12], %s12334_s26, %s12334_s26, %s12333_s6  }
  0x89   :  { %s9105_s19 = smov [#allocation14]   ;;  %s9034_s2 = scalar_lea.hbm %s12019_s15, 1024 }
  0x8a   :  { %s131_s1 = sshll.u32 %s9105_s19, 4  ;;  %p9035_p0 = scmp.ne.s32.totalorder %s12019_s15, %s9034_s2  ;;  %s132_s1 = int_to_ptr.vmem [resolvable:$true] %s131_s1 }
  0x8b   :  { %p9038_p1 = scmp.lt.u32.totalorder %s9034_s2, %s12019_s15 }
  0x8d   :  { %p9040_p2 = pnand %p9038_p1, %p9035_p0 }
  0x8f   :  { %9043 = shalt.err (!%p9040_p2)
}
  0x90   :  { %s9044_s23 = scalar_lea.vmem %s132_s1, 1024  ;;  %p9049_p4 = scmp.lt.s32.totalorder %s132_s1, %s132_s1 }
  0x91   :  { %p9045_p3 = scmp.ne.s32.totalorder %s132_s1, %s9044_s23  ;;  %p9050_p5 = scmp.lt.s32.totalorder %s9044_s23, %s9044_s23 }
  0x93   :  { %p9051_p6 = por %p9050_p5, %p9049_p4 }
  0x95   :  { %p9052_p7 = pnand %p9051_p6, %p9045_p3 }
  0x97   :  { %9055 = shalt.err (!%p9052_p7)
}
  0x98   :  { %137 = dma.hbm_to_vmem [thread:$0]  %s12019_s15, 1024, %s132_s1, [#allocation15], %s12334_s26, %s12334_s26, %s12333_s6  }
  0x99   :  { %9078 = dma.done.wait [#allocation3], 2048  }
  0x9a   :  { %9079 = vsyncadd [#allocation3], 4294965248 }
  0x9b   :  { %9080 = dma.done.wait [#allocation6], 17408  }
  0x9c   :  { %9081 = vsyncadd [#allocation6], 4294949888 }
  0x9d   :  { %9082 = dma.done.wait [#allocation9], 32896  }
  0x9e   :  { %9083 = vsyncadd [#allocation9], 4294934400 }
  0x9f   :  { %9084 = dma.done.wait [#allocation12], 8192  }
  0xa0   :  { %9085 = vsyncadd [#allocation12], 4294959104 }
  0xa1   :  { %9086 = dma.done.wait [#allocation15], 1024  }
  0xa2   :  { %9087 = vsyncadd [#allocation15], 4294966272  ;;  %v197_v0 = vld [vmem:[#allocation7] sm:$0xff]  ;;  %v198_v2 = vld [vmem:[#allocation7 + $0x8] sm:$0xff] }
  0xa3   :  { %v201_v1 = vld [vmem:[#allocation7 + $0x20] sm:$0xff]  ;;  %v202_v4 = vld [vmem:[#allocation7 + $0x28] sm:$0xff] }
  0xa4   :  { %v7391_v3 = vcombine.high %v197_v0, %v201_v1  ;;  %v7390_v5 = vcombine.low %v197_v0, %v201_v1  ;;  %v205_v6 = vld [vmem:[#allocation7 + $0x40] sm:$0xff]  ;;  %v7393_v8 = vcombine.high %v198_v2, %v202_v4  ;;  %v7392_v9 = vcombine.low %v198_v2, %v202_v4  ;;  %v206_v11 = vld [vmem:[#allocation7 + $0x48] sm:$0xff] }
  0xa5   :  { %v209_v7 = vld [vmem:[#allocation7 + $0x60] sm:$0xff]  ;;  %v210_v12 = vld [vmem:[#allocation7 + $0x68] sm:$0xff] }
  0xa6   :  { %v7399_v10 = vcombine.high %v205_v6, %v209_v7  ;;  %v213_v13 = vld [vmem:[#allocation7 + $0x80] sm:$0xff]  ;;  %1087 = vmatprep.subr.bf16.mxu0 %v7391_v3  ;;  %v7401_v14 = vcombine.high %v206_v11, %v210_v12  ;;  %v214_v16 = vld [vmem:[#allocation7 + $0x88] sm:$0xff]  ;;  %1200 = vmatprep.subr.bf16.mxu1 %v7393_v8  ;;  %v7398_v18 = vcombine.low %v205_v6, %v209_v7 }
  0xa7   :  { %v217_v15 = vld [vmem:[#allocation7 + $0xa0] sm:$0xff]  ;;  %v218_v17 = vld [vmem:[#allocation7 + $0xa8] sm:$0xff]  ;;  %1088 = vmatpush1.bf16.msra.mxu0 %v7390_v5  ;;  %1201 = vmatpush1.bf16.msra.mxu1 %v7392_v9  ;;  %v7400_v19 = vcombine.low %v206_v11, %v210_v12 }
  0xa8   :  { %1089 = vmatprep.subr.bf16.mxu0 %v7399_v10  ;;  %v7407_v20 = vcombine.high %v213_v13, %v217_v15  ;;  %1202 = vmatprep.subr.bf16.mxu1 %v7401_v14  ;;  %v7409_v21 = vcombine.high %v214_v16, %v218_v17  ;;  %v221_v22 = vld [vmem:[#allocation7 + $0xc0] sm:$0xff]  ;;  %v222_v24 = vld [vmem:[#allocation7 + $0xc8] sm:$0xff]  ;;  %v7406_v26 = vcombine.low %v213_v13, %v217_v15 }
  0xa9   :  { %v225_v23 = vld [vmem:[#allocation7 + $0xe0] sm:$0xff]  ;;  %v226_v25 = vld [vmem:[#allocation7 + $0xe8] sm:$0xff]  ;;  %v7408_v27 = vcombine.low %v214_v16, %v218_v17 }
  0xaa   :  { %v7415_v28 = vcombine.high %v221_v22, %v225_v23  ;;  %v7417_v29 = vcombine.high %v222_v24, %v226_v25  ;;  %v229_v30 = vld [vmem:[#allocation7 + $0x100] sm:$0xff]  ;;  %v230_v32 = vld [vmem:[#allocation7 + $0x108] sm:$0xff]  ;;  %v7414_v34 = vcombine.low %v221_v22, %v225_v23  ;;  %v7416_v35 = vcombine.low %v222_v24, %v226_v25 }
  0xab   :  { %1090 = vmatpush1.bf16.msra.mxu0 %v7398_v18  ;;  %1203 = vmatpush1.bf16.msra.mxu1 %v7400_v19  ;;  %v233_v31 = vld [vmem:[#allocation7 + $0x120] sm:$0xff]  ;;  %v234_v33 = vld [vmem:[#allocation7 + $0x128] sm:$0xff] }
  0xac   :  { %1091 = vmatprep.subr.bf16.mxu0 %v7407_v20  ;;  %1204 = vmatprep.subr.bf16.mxu1 %v7409_v21  ;;  %v7423_v36 = vcombine.high %v229_v30, %v233_v31  ;;  %v7425_v37 = vcombine.high %v230_v32, %v234_v33  ;;  %v237_v38 = vld [vmem:[#allocation7 + $0x140] sm:$0xff]  ;;  %v238_v40 = vld [vmem:[#allocation7 + $0x148] sm:$0xff]  ;;  %v7422_v42 = vcombine.low %v229_v30, %v233_v31 }
  0xad   :  { %v241_v39 = vld [vmem:[#allocation7 + $0x160] sm:$0xff]  ;;  %v242_v41 = vld [vmem:[#allocation7 + $0x168] sm:$0xff]  ;;  %v7424_v43 = vcombine.low %v230_v32, %v234_v33 }
  0xae   :  { %v7431_v44 = vcombine.high %v237_v38, %v241_v39  ;;  %v7433_v45 = vcombine.high %v238_v40, %v242_v41  ;;  %v245_v46 = vld [vmem:[#allocation7 + $0x180] sm:$0xff]  ;;  %v246_v48 = vld [vmem:[#allocation7 + $0x188] sm:$0xff]  ;;  %v7430_v50 = vcombine.low %v237_v38, %v241_v39  ;;  %v7432_v51 = vcombine.low %v238_v40, %v242_v41 }
  0xaf   :  { %1092 = vmatpush1.bf16.msra.mxu0 %v7406_v26  ;;  %1205 = vmatpush1.bf16.msra.mxu1 %v7408_v27  ;;  %v249_v47 = vld [vmem:[#allocation7 + $0x1a0] sm:$0xff]  ;;  %v250_v49 = vld [vmem:[#allocation7 + $0x1a8] sm:$0xff] }
  0xb0   :  { %1093 = vmatprep.subr.bf16.mxu0 %v7415_v28  ;;  %1206 = vmatprep.subr.bf16.mxu1 %v7417_v29  ;;  %v7439_v52 = vcombine.high %v245_v46, %v249_v47  ;;  %v7441_v53 = vcombine.high %v246_v48, %v250_v49  ;;  %v253_v54 = vld [vmem:[#allocation7 + $0x1c0] sm:$0xff]  ;;  %v254_v57 = vld [vmem:[#allocation7 + $0x1c8] sm:$0xff]  ;;  %v7438_v59 = vcombine.low %v245_v46, %v249_v47 }
  0xb1   :  { %v257_v55 = vld [vmem:[#allocation7 + $0x1e0] sm:$0xff]  ;;  %v258_v58 = vld [vmem:[#allocation7 + $0x1e8] sm:$0xff]  ;;  %v7440_v60 = vcombine.low %v246_v48, %v250_v49 }
  0xb2   :  { %v8323_v56 = vld [vmem:[#allocation2 + $0x4] ss:$8 sps:$4 sm:$0xff]   ;;  %v7447_v61 = vcombine.high %v253_v54, %v257_v55  ;;  %v7449_v62 = vcombine.high %v254_v57, %v258_v58  ;;  %v7446_v3 = vcombine.low %v253_v54, %v257_v55  ;;  %v7448_v4 = vcombine.low %v254_v57, %v258_v58 }
  0xb3   :  { %1094 = vmatpush1.bf16.msra.mxu0 %v7414_v34  ;;  %1207 = vmatpush1.bf16.msra.mxu1 %v7416_v35  ;;  %v261_v63 = vld [vmem:[#allocation7 + $0x200] sm:$0xff]  ;;  %v262_v1 = vld [vmem:[#allocation7 + $0x208] sm:$0xff] }
  0xb4   :  { %1095 = vmatprep.subr.bf16.mxu0 %v7423_v36  ;;  %1208 = vmatprep.subr.bf16.mxu1 %v7425_v37  ;;  %v265_v0 = vld [vmem:[#allocation7 + $0x220] sm:$0xff]  ;;  %v266_v2 = vld [vmem:[#allocation7 + $0x228] sm:$0xff] }
  0xb5   :  { %1119 = vmatprep.mubr.bf16.mxu0 %v8323_v56  ;;  %1232 = vmatprep.mubr.bf16.mxu1 %v8323_v56  ;;  %v7455_v5 = vcombine.high %v261_v63, %v265_v0  ;;  %v7457_v6 = vcombine.high %v262_v1, %v266_v2  ;;  %v269_v7 = vld [vmem:[#allocation7 + $0x240] sm:$0xff]  ;;  %v270_v9 = vld [vmem:[#allocation7 + $0x248] sm:$0xff]  ;;  %v7454_v11 = vcombine.low %v261_v63, %v265_v0  ;;  %v200_v0 = vld [vmem:[#allocation7 + $0x18] sm:$0xff] }
  0xb6   :  { %v273_v8 = vld [vmem:[#allocation7 + $0x260] sm:$0xff]  ;;  %v274_v10 = vld [vmem:[#allocation7 + $0x268] sm:$0xff]  ;;  %v7456_v12 = vcombine.low %v262_v1, %v266_v2  ;;  %v204_v1 = vld [vmem:[#allocation7 + $0x38] sm:$0xff] }
  0xb7   :  { %1096 = vmatpush1.bf16.msra.mxu0 %v7422_v42  ;;  %1209 = vmatpush1.bf16.msra.mxu1 %v7424_v43  ;;  %v7463_v13 = vcombine.high %v269_v7, %v273_v8  ;;  %v7465_v14 = vcombine.high %v270_v9, %v274_v10  ;;  %v277_v15 = vld [vmem:[#allocation7 + $0x280] sm:$0xff]  ;;  %v278_v17 = vld [vmem:[#allocation7 + $0x288] sm:$0xff]  ;;  %v7462_v19 = vcombine.low %v269_v7, %v273_v8 }
  0xb8   :  { %1097 = vmatprep.subr.bf16.mxu0 %v7431_v44  ;;  %1210 = vmatprep.subr.bf16.mxu1 %v7433_v45  ;;  %v281_v16 = vld [vmem:[#allocation7 + $0x2a0] sm:$0xff]  ;;  %v282_v18 = vld [vmem:[#allocation7 + $0x2a8] sm:$0xff]  ;;  %v7464_v20 = vcombine.low %v270_v9, %v274_v10  ;;  %v208_v9 = vld [vmem:[#allocation7 + $0x58] sm:$0xff] }
  0xb9   :  { %v7471_v21 = vcombine.high %v277_v15, %v281_v16  ;;  %v7473_v22 = vcombine.high %v278_v17, %v282_v18  ;;  %v285_v23 = vld [vmem:[#allocation7 + $0x2c0] sm:$0xff]  ;;  %v286_v25 = vld [vmem:[#allocation7 + $0x2c8] sm:$0xff]  ;;  %v7470_v27 = vcombine.low %v277_v15, %v281_v16  ;;  %v7472_v28 = vcombine.low %v278_v17, %v282_v18  ;;  %v212_v10 = vld [vmem:[#allocation7 + $0x78] sm:$0xff] }
  0xba   :  { %v289_v24 = vld [vmem:[#allocation7 + $0x2e0] sm:$0xff]  ;;  %v290_v26 = vld [vmem:[#allocation7 + $0x2e8] sm:$0xff]  ;;  %v219_v15 = vld [vmem:[#allocation7 + $0xb0] sm:$0xff]  ;;  %v7396_v16 = vcombine.low %v200_v0, %v204_v1 }
  0xbb   :  { %1098 = vmatpush1.bf16.msra.mxu0 %v7430_v50  ;;  %1211 = vmatpush1.bf16.msra.mxu1 %v7432_v51  ;;  %v7479_v29 = vcombine.high %v285_v23, %v289_v24  ;;  %v7481_v30 = vcombine.high %v286_v25, %v290_v26  ;;  %v293_v31 = vld [vmem:[#allocation7 + $0x300] sm:$0xff]  ;;  %v294_v33 = vld [vmem:[#allocation7 + $0x308] sm:$0xff]  ;;  %v7478_v35 = vcombine.low %v285_v23, %v289_v24  ;;  %v216_v18 = vld [vmem:[#allocation7 + $0x98] sm:$0xff] }
  0xbc   :  { %1099 = vmatprep.subr.bf16.mxu0 %v7439_v52  ;;  %1212 = vmatprep.subr.bf16.mxu1 %v7441_v53  ;;  %v297_v32 = vld [vmem:[#allocation7 + $0x320] sm:$0xff]  ;;  %v298_v34 = vld [vmem:[#allocation7 + $0x328] sm:$0xff]  ;;  %v7480_v36 = vcombine.low %v286_v25, %v290_v26  ;;  %v227_v23 = vld [vmem:[#allocation7 + $0xf0] sm:$0xff]  ;;  %v7404_v24 = vcombine.low %v208_v9, %v212_v10 }
  0xbd   :  { %v7487_v37 = vcombine.high %v293_v31, %v297_v32  ;;  %v7489_v38 = vcombine.high %v294_v33, %v298_v34  ;;  %v301_v39 = vld [vmem:[#allocation7 + $0x340] sm:$0xff]  ;;  %v302_v41 = vld [vmem:[#allocation7 + $0x348] sm:$0xff]  ;;  %v7486_v43 = vcombine.low %v293_v31, %v297_v32  ;;  %v7488_v44 = vcombine.low %v294_v33, %v298_v34  ;;  %v9326_v25 = vld [vmem:[#allocation2 + $0x10] ss:$8 sps:$4 sm:$0xff]  }
  0xbe   :  { %v305_v40 = vld [vmem:[#allocation7 + $0x360] sm:$0xff]  ;;  %v306_v42 = vld [vmem:[#allocation7 + $0x368] sm:$0xff]  ;;  %v231_v32 = vld [vmem:[#allocation7 + $0x110] sm:$0xff] }
  0xbf   :  { %1100 = vmatpush1.bf16.msra.mxu0 %v7438_v59  ;;  %1213 = vmatpush1.bf16.msra.mxu1 %v7440_v60  ;;  %v7495_v45 = vcombine.high %v301_v39, %v305_v40  ;;  %v7497_v46 = vcombine.high %v302_v41, %v306_v42  ;;  %v309_v47 = vld [vmem:[#allocation7 + $0x380] sm:$0xff]  ;;  %v310_v49 = vld [vmem:[#allocation7 + $0x388] sm:$0xff]  ;;  %v7494_v51 = vcombine.low %v301_v39, %v305_v40  ;;  %v199_v60 = vld [vmem:[#allocation7 + $0x10] sm:$0xff] }
  0xc0   :  { %1101 = vmatprep.subr.bf16.mxu0 %v7447_v61  ;;  %1214 = vmatprep.subr.bf16.mxu1 %v7449_v62  ;;  %v313_v48 = vld [vmem:[#allocation7 + $0x3a0] sm:$0xff]  ;;  %v314_v50 = vld [vmem:[#allocation7 + $0x3a8] sm:$0xff]  ;;  %v7496_v54 = vcombine.low %v302_v41, %v306_v42  ;;  %v203_v61 = vld [vmem:[#allocation7 + $0x30] sm:$0xff] }
  0xc1   :  { %v317_v52 = vld [vmem:[#allocation7 + $0x3c0] sm:$0xff]  ;;  %v7503_v55 = vcombine.high %v309_v47, %v313_v48  ;;  %v318_v56 = vld [vmem:[#allocation7 + $0x3c8] sm:$0xff]  ;;  %v7505_v58 = vcombine.high %v310_v49, %v314_v50  ;;  %v7502_v59 = vcombine.low %v309_v47, %v313_v48  ;;  %v7504_v62 = vcombine.low %v310_v49, %v314_v50  ;;  %v235_v33 = vld [vmem:[#allocation7 + $0x130] sm:$0xff] }
  0xc2   :  { %v321_v53 = vld [vmem:[#allocation7 + $0x3e0] sm:$0xff]  ;;  %v322_v57 = vld [vmem:[#allocation7 + $0x3e8] sm:$0xff]  ;;  %v7395_v8 = vcombine.high %v199_v60, %v203_v61  ;;  %v239_v40 = vld [vmem:[#allocation7 + $0x150] sm:$0xff]  ;;  %v7426_v48 = vcombine.low %v231_v32, %v235_v33 }
  0xc3   :  { %1102 = vmatpush1.bf16.msra.mxu0 %v7446_v3  ;;  %1215 = vmatpush1.bf16.msra.mxu1 %v7448_v4  ;;  %v7511_v63 = vcombine.high %v317_v52, %v321_v53  ;;  %v7513_v2 = vcombine.high %v318_v56, %v322_v57  ;;  %v7510_v3 = vcombine.low %v317_v52, %v321_v53  ;;  %v207_v4 = vld [vmem:[#allocation7 + $0x50] sm:$0xff]  ;;  %v9320_v7 = vld [vmem:[#allocation2] ss:$8 sps:$4 sm:$0xff]   ;;  %v9330_v31 = vld [vmem:[#allocation2 + $0x24] ss:$8 sps:$4 sm:$0xff]  }
  0xc4   :  { %1103 = vmatprep.subr.bf16.mxu0 %v7455_v5  ;;  %1216 = vmatprep.subr.bf16.mxu1 %v7457_v6  ;;  %v211_v5 = vld [vmem:[#allocation7 + $0x70] sm:$0xff]  ;;  %v7512_v6 = vcombine.low %v318_v56, %v322_v57 }
  0xc5   :  { %v7403_v17 = vcombine.high %v207_v4, %v211_v5  ;;  %v243_v41 = vld [vmem:[#allocation7 + $0x170] sm:$0xff] }
  0xc6   :  { %v9338_v49 = vld [vmem:[#allocation2 + $0x34] ss:$8 sps:$4 sm:$0xff]   ;;  %v7435_v53 = vcombine.high %v239_v40, %v243_v41  ;;  %v7434_v57 = vcombine.low %v239_v40, %v243_v41 }
  0xc7   :  { %1104 = vmatpush1.bf16.msra.mxu0 %v7454_v11  ;;  %1217 = vmatpush1.bf16.msra.mxu1 %v7456_v12  ;;  %v7397_v11 = vcombine.high %v200_v0, %v204_v1  ;;  %v7394_v12 = vcombine.low %v199_v60, %v203_v61  ;;  %v247_v50 = vld [vmem:[#allocation7 + $0x190] sm:$0xff]  ;;  %v260_v0 = vld [vmem:[#allocation7 + $0x1f8] sm:$0xff] }
  0xc8   :  { %1105 = vmatprep.subr.bf16.mxu0 %v7463_v13  ;;  %1218 = vmatprep.subr.bf16.mxu1 %v7465_v14  ;;  %v9322_v13 = vld [vmem:[#allocation2 + $0x14] ss:$8 sps:$4 sm:$0xff]   ;;  %v9342_v61 = vld [vmem:[#allocation2 + $0x30] ss:$8 sps:$4 sm:$0xff]  }
  0xc9   :  { %v215_v14 = vld [vmem:[#allocation7 + $0x90] sm:$0xff]  ;;  %v292_v40 = vld [vmem:[#allocation7 + $0x2f8] sm:$0xff] }
  0xca   :  { %v7411_v26 = vcombine.high %v215_v14, %v219_v15 }
  0xcb   :  { %1106 = vmatpush1.bf16.msra.mxu0 %v7462_v19  ;;  %1219 = vmatpush1.bf16.msra.mxu1 %v7464_v20  ;;  %v220_v19 = vld [vmem:[#allocation7 + $0xb8] sm:$0xff]  ;;  %v7405_v20 = vcombine.high %v208_v9, %v212_v10 }
  0xcc   :  { %1107 = vmatprep.subr.bf16.mxu0 %v7471_v21  ;;  %1220 = vmatprep.subr.bf16.mxu1 %v7473_v22  ;;  %v7402_v21 = vcombine.low %v207_v4, %v211_v5  ;;  %v223_v22 = vld [vmem:[#allocation7 + $0xd0] sm:$0xff]  ;;  %v7412_v34 = vcombine.low %v216_v18, %v220_v19  ;;  %v264_v9 = vld [vmem:[#allocation7 + $0x218] sm:$0xff] }
  0xcd   :  { %v7418_v39 = vcombine.low %v223_v22, %v227_v23  ;;  %v263_v4 = vld [vmem:[#allocation7 + $0x210] sm:$0xff]  ;;  %v268_v10 = vld [vmem:[#allocation7 + $0x238] sm:$0xff] }
  0xce   :  { %v267_v5 = vld [vmem:[#allocation7 + $0x230] sm:$0xff] }
  0xcf   :  { %1108 = vmatpush1.bf16.msra.mxu0 %v7470_v27  ;;  %1221 = vmatpush1.bf16.msra.mxu1 %v7472_v28  ;;  %v224_v27 = vld [vmem:[#allocation7 + $0xd8] sm:$0xff] }
  0xd0   :  { %1109 = vmatprep.subr.bf16.mxu0 %v7479_v29  ;;  %1222 = vmatprep.subr.bf16.mxu1 %v7481_v30  ;;  %v228_v28 = vld [vmem:[#allocation7 + $0xf8] sm:$0xff]  ;;  %v7413_v29 = vcombine.high %v216_v18, %v220_v19  ;;  %v7410_v30 = vcombine.low %v215_v14, %v219_v15  ;;  %v271_v14 = vld [vmem:[#allocation7 + $0x250] sm:$0xff]  ;;  %v7459_v18 = vcombine.high %v263_v4, %v267_v5 }
  0xd1   :  { %v7420_v42 = vcombine.low %v224_v27, %v228_v28  ;;  %v275_v15 = vld [vmem:[#allocation7 + $0x270] sm:$0xff]  ;;  %v272_v19 = vld [vmem:[#allocation7 + $0x258] sm:$0xff] }
  0xd3   :  { %1110 = vmatpush1.bf16.msra.mxu0 %v7478_v35  ;;  %1223 = vmatpush1.bf16.msra.mxu1 %v7480_v36  ;;  %v7419_v35 = vcombine.high %v223_v22, %v227_v23  ;;  %v232_v36 = vld [vmem:[#allocation7 + $0x118] sm:$0xff]  ;;  %v7458_v22 = vcombine.low %v263_v4, %v267_v5 }
  0xd4   :  { %1111 = vmatprep.subr.bf16.mxu0 %v7487_v37  ;;  %1224 = vmatprep.subr.bf16.mxu1 %v7489_v38  ;;  %v236_v37 = vld [vmem:[#allocation7 + $0x138] sm:$0xff]  ;;  %v7421_v38 = vcombine.high %v224_v27, %v228_v28  ;;  %v7460_v27 = vcombine.low %v264_v9, %v268_v10  ;;  %v7467_v28 = vcombine.high %v271_v14, %v275_v15 }
  0xd5   :  { %v7429_v47 = vcombine.high %v232_v36, %v236_v37  ;;  %v7428_v52 = vcombine.low %v232_v36, %v236_v37  ;;  %v9354_v23 = vld [vmem:[#allocation2 + $0x54] ss:$8 sps:$4 sm:$0xff]   ;;  %v9358_v37 = vld [vmem:[#allocation2 + $0x50] ss:$8 sps:$4 sm:$0xff]  }
  0xd7   :  { %1112 = vmatpush1.bf16.msra.mxu0 %v7486_v43  ;;  %1225 = vmatpush1.bf16.msra.mxu1 %v7488_v44  ;;  %v9334_v43 = vld [vmem:[#allocation2 + $0x20] ss:$8 sps:$4 sm:$0xff]   ;;  %v7427_v44 = vcombine.high %v231_v32, %v235_v33  ;;  %v7466_v33 = vcombine.low %v271_v14, %v275_v15  ;;  %v8346_v15 = vld [vmem:[#allocation2 + $0x70] ss:$8 sps:$4 sm:$0xff]  }
  0xd8   :  { %1113 = vmatprep.subr.bf16.mxu0 %v7495_v45  ;;  %1226 = vmatprep.subr.bf16.mxu1 %v7497_v46  ;;  %v240_v45 = vld [vmem:[#allocation7 + $0x158] sm:$0xff] }
  0xd9   :  { %v244_v46 = vld [vmem:[#allocation7 + $0x178] sm:$0xff] }
  0xda   :  { %v7437_v56 = vcombine.high %v240_v45, %v244_v46  ;;  %v7436_v60 = vcombine.low %v240_v45, %v244_v46  ;;  %v295_v45 = vld [vmem:[#allocation7 + $0x310] sm:$0xff] }
  0xdb   :  { %1114 = vmatpush1.bf16.msra.mxu0 %v7494_v51  ;;  %1227 = vmatpush1.bf16.msra.mxu1 %v7496_v54  ;;  %v251_v51 = vld [vmem:[#allocation7 + $0x1b0] sm:$0xff]  ;;  %v248_v54 = vld [vmem:[#allocation7 + $0x198] sm:$0xff] }
  0xdc   :  { %1115 = vmatprep.subr.bf16.mxu0 %v7503_v55  ;;  %1228 = vmatprep.subr.bf16.mxu1 %v7505_v58  ;;  %v252_v55 = vld [vmem:[#allocation7 + $0x1b8] sm:$0xff]  ;;  %v255_v58 = vld [vmem:[#allocation7 + $0x1d0] sm:$0xff] }
  0xdd   :  { %v7445_v1 = vcombine.high %v248_v54, %v252_v55  ;;  %v299_v46 = vld [vmem:[#allocation7 + $0x330] sm:$0xff] }
  0xdf   :  { %1116 = vmatpush1.bf16.msra.mxu0 %v7502_v59  ;;  %1229 = vmatpush1.bf16.msra.mxu1 %v7504_v62  ;;  %v259_v59 = vld [vmem:[#allocation7 + $0x1f0] sm:$0xff]  ;;  %v7443_v62 = vcombine.high %v247_v50, %v251_v51 }
  0xe0   :  { %1117 = vmatprep.subr.bf16.mxu0 %v7511_v63  ;;  %1230 = vmatprep.subr.bf16.mxu1 %v7513_v2  ;;  %v256_v63 = vld [vmem:[#allocation7 + $0x1d8] sm:$0xff]  ;;  %v7442_v2 = vcombine.low %v247_v50, %v251_v51 }
  0xe1   :  { %v296_v50 = vld [vmem:[#allocation7 + $0x318] sm:$0xff] }
  0xe2   :  { %v300_v51 = vld [vmem:[#allocation7 + $0x338] sm:$0xff] }
  0xe3   :  { %1118 = vmatpush1.bf16.msra.mxu0 %v7510_v3  ;;  %1231 = vmatpush1.bf16.msra.mxu1 %v7512_v6  ;;  %v9346_v3 = vld [vmem:[#allocation2 + $0x44] ss:$8 sps:$4 sm:$0xff]   ;;  %v7444_v6 = vcombine.low %v248_v54, %v252_v55  ;;  %v303_v54 = vld [vmem:[#allocation7 + $0x350] sm:$0xff]  ;;  %v7492_v4 = vcombine.low %v296_v50, %v300_v51 }
  0xe4   :  { %1313 = vmatprep.subr.bf16.mxu0 %v7395_v8  ;;  %1426 = vmatprep.subr.bf16.mxu1 %v7397_v11  ;;  %v7451_v8 = vcombine.high %v255_v58, %v259_v59  ;;  %v7453_v11 = vcombine.high %v256_v63, %v260_v0  ;;  %v307_v55 = vld [vmem:[#allocation7 + $0x370] sm:$0xff] }
  0xe5   :  { %v7499_v5 = vcombine.high %v303_v54, %v307_v55 }
  0xe6   :  { %1120 = vmatmul.mubr.bf16.vlgmr.msra.gmra.mrb[0].mxu0 %v9320_v7  ;;  %1233 = vmatmul.mubr.bf16.vlgmr.msra.gmra.mrb[0].mxu1 %v9320_v7 }
  0xe7   :  { %1314 = vmatpush1.bf16.msra.mxu0 %v7394_v12  ;;  %1427 = vmatpush1.bf16.msra.mxu1 %v7396_v16  ;;  %v7450_v12 = vcombine.low %v255_v58, %v259_v59  ;;  %v7452_v16 = vcombine.low %v256_v63, %v260_v0  ;;  %v7491_v58 = vcombine.high %v295_v45, %v299_v46  ;;  %v304_v59 = vld [vmem:[#allocation7 + $0x358] sm:$0xff] }
  0xe8   :  { %1315 = vmatprep.subr.bf16.mxu0 %v7403_v17  ;;  %1428 = vmatprep.subr.bf16.mxu1 %v7405_v20  ;;  %v9350_v17 = vld [vmem:[#allocation2 + $0x40] ss:$8 sps:$4 sm:$0xff]   ;;  %v276_v20 = vld [vmem:[#allocation7 + $0x278] sm:$0xff]  ;;  %v7490_v63 = vcombine.low %v295_v45, %v299_v46 }
  0xe9   :  { %1129 = vmatprep.mubr.bf16.mxu0 %v9322_v13  ;;  %1242 = vmatprep.mubr.bf16.mxu1 %v9322_v13  ;;  %v7469_v32 = vcombine.high %v272_v19, %v276_v20  ;;  %v7468_v36 = vcombine.low %v272_v19, %v276_v20  ;;  %v9370_v0 = vld [vmem:[#allocation2 + $0x74] ss:$8 sps:$4 sm:$0xff]  }
  0xea   :  { %v324_v19 = vld [vmem:[#allocation7 + $0x3f8] sm:$0xff] }
  0xeb   :  { %1316 = vmatpush1.bf16.msra.mxu0 %v7402_v21  ;;  %1429 = vmatpush1.bf16.msra.mxu1 %v7404_v24  ;;  %v7461_v21 = vcombine.high %v264_v9, %v268_v10  ;;  %v279_v24 = vld [vmem:[#allocation7 + $0x290] sm:$0xff]  ;;  %v7498_v10 = vcombine.low %v303_v54, %v307_v55 }
  0xec   :  { %1317 = vmatprep.subr.bf16.mxu0 %v7411_v26  ;;  %1430 = vmatprep.subr.bf16.mxu1 %v7413_v29  ;;  %v283_v26 = vld [vmem:[#allocation7 + $0x2b0] sm:$0xff]  ;;  %v280_v29 = vld [vmem:[#allocation7 + $0x298] sm:$0xff] }
  0xee   :  { %1130 = vmatmul.mubr.bf16.gmra.mrb[4].mxu0 %v9326_v25  ;;  %1243 = vmatmul.mubr.bf16.gmra.mrb[4].mxu1 %v9326_v25 }
  0xef   :  { %1318 = vmatpush1.bf16.msra.mxu0 %v7410_v30  ;;  %1431 = vmatpush1.bf16.msra.mxu1 %v7412_v34  ;;  %v284_v30 = vld [vmem:[#allocation7 + $0x2b8] sm:$0xff]  ;;  %v287_v34 = vld [vmem:[#allocation7 + $0x2d0] sm:$0xff] }
  0xf0   :  { %1319 = vmatprep.subr.bf16.mxu0 %v7419_v35  ;;  %1432 = vmatprep.subr.bf16.mxu1 %v7421_v38  ;;  %v291_v35 = vld [vmem:[#allocation7 + $0x2f0] sm:$0xff]  ;;  %v7475_v38 = vcombine.high %v279_v24, %v283_v26  ;;  %v7477_v41 = vcombine.high %v280_v29, %v284_v30 }
  0xf1   :  { %1139 = vmatprep.mubr.bf16.mxu0 %v9330_v31  ;;  %1252 = vmatprep.mubr.bf16.mxu1 %v9330_v31 }
  0xf3   :  { %1320 = vmatpush1.bf16.msra.mxu0 %v7418_v39  ;;  %1433 = vmatpush1.bf16.msra.mxu1 %v7420_v42  ;;  %v288_v39 = vld [vmem:[#allocation7 + $0x2d8] sm:$0xff]  ;;  %v7474_v42 = vcombine.low %v279_v24, %v283_v26 }
  0xf4   :  { %1321 = vmatprep.subr.bf16.mxu0 %v7427_v44  ;;  %1434 = vmatprep.subr.bf16.mxu1 %v7429_v47  ;;  %v9362_v44 = vld [vmem:[#allocation2 + $0x64] ss:$8 sps:$4 sm:$0xff]   ;;  %v7476_v47 = vcombine.low %v280_v29, %v284_v30 }
  0xf5   :  { %v8879_v29 = vld [vmem:[#allocation2 + $0x4] ss:$8 sps:$4 sm:$0xff]  }
  0xf6   :  { %1140 = vmatmul.mubr.bf16.gmra.mrb[8].mxu0 %v9334_v43  ;;  %1253 = vmatmul.mubr.bf16.gmra.mrb[8].mxu1 %v9334_v43 }
  0xf7   :  { %1322 = vmatpush1.bf16.msra.mxu0 %v7426_v48  ;;  %1435 = vmatpush1.bf16.msra.mxu1 %v7428_v52  ;;  %v7483_v48 = vcombine.high %v287_v34, %v291_v35  ;;  %v7485_v52 = vcombine.high %v288_v39, %v292_v40 }
  0xf8   :  { %1323 = vmatprep.subr.bf16.mxu0 %v7435_v53  ;;  %1436 = vmatprep.subr.bf16.mxu1 %v7437_v56  ;;  %v7482_v53 = vcombine.low %v287_v34, %v291_v35  ;;  %v7484_v56 = vcombine.low %v288_v39, %v292_v40  ;;  %v9422_v35 = vld [vmem:[%s12007_s3] sm:$0xff] }
  0xf9   :  { %1149 = vmatprep.mubr.bf16.mxu0 %v9338_v49  ;;  %1262 = vmatprep.mubr.bf16.mxu1 %v9338_v49 }
  0xfb   :  { %1324 = vmatpush1.bf16.msra.mxu0 %v7434_v57  ;;  %1437 = vmatpush1.bf16.msra.mxu1 %v7436_v60  ;;  %v9366_v57 = vld [vmem:[#allocation2 + $0x60] ss:$8 sps:$4 sm:$0xff]   ;;  %v308_v60 = vld [vmem:[#allocation7 + $0x378] sm:$0xff] }
  0xfc   :  { %1325 = vmatprep.subr.bf16.mxu0 %v7443_v62  ;;  %1438 = vmatprep.subr.bf16.mxu1 %v7445_v1  ;;  %v7493_v62 = vcombine.high %v296_v50, %v300_v51  ;;  %v311_v1 = vld [vmem:[#allocation7 + $0x390] sm:$0xff]  ;;  %v7501_v9 = vcombine.high %v304_v59, %v308_v60  ;;  %v7500_v14 = vcombine.low %v304_v59, %v308_v60 }
  0xfe   :  { %1150 = vmatmul.mubr.bf16.gmra.mrb[12].mxu0 %v9342_v61  ;;  %1263 = vmatmul.mubr.bf16.gmra.mrb[12].mxu1 %v9342_v61 }
  0xff   :  { %1326 = vmatpush1.bf16.msra.mxu0 %v7442_v2  ;;  %1439 = vmatpush1.bf16.msra.mxu1 %v7444_v6  ;;  %v315_v2 = vld [vmem:[#allocation7 + $0x3b0] sm:$0xff]  ;;  %v312_v6 = vld [vmem:[#allocation7 + $0x398] sm:$0xff] }
 0x100   :  { %1327 = vmatprep.subr.bf16.mxu0 %v7451_v8  ;;  %1440 = vmatprep.subr.bf16.mxu1 %v7453_v11  ;;  %v316_v8 = vld [vmem:[#allocation7 + $0x3b8] sm:$0xff]  ;;  %v319_v11 = vld [vmem:[#allocation7 + $0x3d0] sm:$0xff] }
 0x101   :  { %1159 = vmatprep.mubr.bf16.mxu0 %v9346_v3  ;;  %1272 = vmatprep.mubr.bf16.mxu1 %v9346_v3  ;;  %v7509_v20 = vcombine.high %v312_v6, %v316_v8 }
 0x103   :  { %1328 = vmatpush1.bf16.msra.mxu0 %v7450_v12  ;;  %1441 = vmatpush1.bf16.msra.mxu1 %v7452_v16  ;;  %v323_v12 = vld [vmem:[#allocation7 + $0x3f0] sm:$0xff]  ;;  %v7507_v16 = vcombine.high %v311_v1, %v315_v2 }
 0x104   :  { %1329 = vmatprep.subr.bf16.mxu0 %v7459_v18  ;;  %1442 = vmatprep.subr.bf16.mxu1 %v7461_v21  ;;  %v320_v18 = vld [vmem:[#allocation7 + $0x3d8] sm:$0xff]  ;;  %v7506_v21 = vcombine.low %v311_v1, %v315_v2  ;;  %v7515_v24 = vcombine.high %v319_v11, %v323_v12 }
 0x105   :  { %v7517_v26 = vcombine.high %v320_v18, %v324_v19 }
 0x106   :  { %1160 = vmatmul.mubr.bf16.gmra.mrb[16].mxu0 %v9350_v17  ;;  %1273 = vmatmul.mubr.bf16.gmra.mrb[16].mxu1 %v9350_v17 }
 0x107   :  { %1330 = vmatpush1.bf16.msra.mxu0 %v7458_v22  ;;  %1443 = vmatpush1.bf16.msra.mxu1 %v7460_v27  ;;  %v7508_v22 = vcombine.low %v312_v6, %v316_v8  ;;  %v7514_v27 = vcombine.low %v319_v11, %v323_v12 }
 0x108   :  { %1331 = vmatprep.subr.bf16.mxu0 %v7467_v28  ;;  %1444 = vmatprep.subr.bf16.mxu1 %v7469_v32  ;;  %v7516_v28 = vcombine.low %v320_v18, %v324_v19 }
 0x109   :  { %1169 = vmatprep.mubr.bf16.mxu0 %v9354_v23  ;;  %1282 = vmatprep.mubr.bf16.mxu1 %v9354_v23 }
 0x10b   :  { %1332 = vmatpush1.bf16.msra.mxu0 %v7466_v33  ;;  %1445 = vmatpush1.bf16.msra.mxu1 %v7468_v36 }
 0x10c   :  { %1333 = vmatprep.subr.bf16.mxu0 %v7475_v38  ;;  %1446 = vmatprep.subr.bf16.mxu1 %v7477_v41 }
 0x10e   :  { %1170 = vmatmul.mubr.bf16.gmra.mrb[20].mxu0 %v9358_v37  ;;  %1283 = vmatmul.mubr.bf16.gmra.mrb[20].mxu1 %v9358_v37 }
 0x10f   :  { %1334 = vmatpush1.bf16.msra.mxu0 %v7474_v42  ;;  %1447 = vmatpush1.bf16.msra.mxu1 %v7476_v47 }
 0x110   :  { %1335 = vmatprep.subr.bf16.mxu0 %v7483_v48  ;;  %1448 = vmatprep.subr.bf16.mxu1 %v7485_v52 }
 0x111   :  { %1179 = vmatprep.mubr.bf16.mxu0 %v9362_v44  ;;  %1292 = vmatprep.mubr.bf16.mxu1 %v9362_v44 }
 0x113   :  { %1336 = vmatpush1.bf16.msra.mxu0 %v7482_v53  ;;  %1449 = vmatpush1.bf16.msra.mxu1 %v7484_v56 }
 0x114   :  { %1337 = vmatprep.subr.bf16.mxu0 %v7491_v58  ;;  %1450 = vmatprep.subr.bf16.mxu1 %v7493_v62 }
 0x116   :  { %1180 = vmatmul.mubr.bf16.gmra.mrb[24].mxu0 %v9366_v57  ;;  %1293 = vmatmul.mubr.bf16.gmra.mrb[24].mxu1 %v9366_v57 }
 0x117   :  { %1338 = vmatpush1.bf16.msra.mxu0 %v7490_v63  ;;  %1451 = vmatpush1.bf16.msra.mxu1 %v7492_v4 }
 0x118   :  { %1339 = vmatprep.subr.bf16.mxu0 %v7499_v5  ;;  %1452 = vmatprep.subr.bf16.mxu1 %v7501_v9 }
 0x119   :  { %1189 = vmatprep.mubr.bf16.mxu0 %v9370_v0  ;;  %1302 = vmatprep.mubr.bf16.mxu1 %v9370_v0 }
 0x11b   :  { %1340 = vmatpush1.bf16.msra.mxu0 %v7498_v10  ;;  %1453 = vmatpush1.bf16.msra.mxu1 %v7500_v14 }
 0x11c   :  { %1341 = vmatprep.subr.bf16.mxu0 %v7507_v16  ;;  %1454 = vmatprep.subr.bf16.mxu1 %v7509_v20 }
 0x11e   :  { %1190 = vmatmul.mubr.bf16.gmra.mrb[28].mxu0 %v8346_v15  ;;  %1303 = vmatmul.mubr.bf16.gmra.mrb[28].mxu1 %v8346_v15 }
 0x11f   :  { %1342 = vmatpush1.bf16.msra.mxu0 %v7506_v21  ;;  %1455 = vmatpush1.bf16.msra.mxu1 %v7508_v22 }
 0x120   :  { %1343 = vmatprep.subr.bf16.mxu0 %v7515_v24  ;;  %1456 = vmatprep.subr.bf16.mxu1 %v7517_v26 }
 0x121   :  { %1345 = vmatprep.mubr.bf16.mxu0 %v8879_v29  ;;  %1458 = vmatprep.mubr.bf16.mxu1 %v8879_v29 }
 0x123   :  { %1344 = vmatpush1.bf16.msra.mxu0 %v7514_v27  ;;  %1457 = vmatpush1.bf16.msra.mxu1 %v7516_v28 }
 0x126   :  { %1346 = vmatmul.mubr.bf16.vlgmr.msra.gmra.mrb[32].mxu0 %v9320_v7  ;;  %1459 = vmatmul.mubr.bf16.vlgmr.msra.gmra.mrb[32].mxu1 %v9320_v7 }
 0x127   :  { %1355 = vmatprep.mubr.bf16.mxu0 %v9322_v13  ;;  %1468 = vmatprep.mubr.bf16.mxu1 %v9322_v13  ;;  %v327_v13 = vlaneseq }
 0x12e   :  { %1356 = vmatmul.mubr.bf16.gmra.mrb[36].mxu0 %v9326_v25  ;;  %1469 = vmatmul.mubr.bf16.gmra.mrb[36].mxu1 %v9326_v25 }
 0x12f   :  { %1365 = vmatprep.mubr.bf16.mxu0 %v9330_v31  ;;  %1478 = vmatprep.mubr.bf16.mxu1 %v9330_v31 }
 0x136   :  { %1366 = vmatmul.mubr.bf16.gmra.mrb[40].mxu0 %v9334_v43  ;;  %1479 = vmatmul.mubr.bf16.gmra.mrb[40].mxu1 %v9334_v43 }
 0x137   :  { %1375 = vmatprep.mubr.bf16.mxu0 %v9338_v49  ;;  %1488 = vmatprep.mubr.bf16.mxu1 %v9338_v49 }
 0x13e   :  { %1376 = vmatmul.mubr.bf16.gmra.mrb[44].mxu0 %v9342_v61  ;;  %1489 = vmatmul.mubr.bf16.gmra.mrb[44].mxu1 %v9342_v61 }
 0x13f   :  { %1385 = vmatprep.mubr.bf16.mxu0 %v9346_v3  ;;  %1498 = vmatprep.mubr.bf16.mxu1 %v9346_v3 }
 0x146   :  { %1386 = vmatmul.mubr.bf16.gmra.mrb[48].mxu0 %v9350_v17  ;;  %1499 = vmatmul.mubr.bf16.gmra.mrb[48].mxu1 %v9350_v17 }
 0x147   :  { %1395 = vmatprep.mubr.bf16.mxu0 %v9354_v23  ;;  %1508 = vmatprep.mubr.bf16.mxu1 %v9354_v23  ;;  %v9412_v23 = vshrl.u32 %v327_v13, 7 }
 0x149   :  { %12335 = vst [vmem:[#allocation23_spill] sm:$0xff] %v9412_v23  ;;  %v9415_v32 = vsub.s32 0, %v9412_v23  ;;  %v9425_v36 = vsub.s32 2, %v9412_v23  ;;  %v9473_v9 = vsub.s32 1, %v9412_v23  ;;  %v9479_v14 = vsub.s32 3, %v9412_v23 }
 0x14b   :  { %12336 = vst [vmem:[#allocation24_spill] sm:$0xff] %v9415_v32  ;;  %12337 = vst [vmem:[#allocation25_spill] sm:$0xff] %v9425_v36  ;;  %v9435_v42 = vrot.slane %v9422_v35, %v9415_v32 }
 0x14c   :  { %12344 = vst [vmem:[#allocation32_spill] sm:$0xff] %v9473_v9  ;;  %12345 = vst [vmem:[#allocation33_spill] sm:$0xff] %v9479_v14 }
 0x14e   :  { %1396 = vmatmul.mubr.bf16.gmra.mrb[52].mxu0 %v9358_v37  ;;  %1509 = vmatmul.mubr.bf16.gmra.mrb[52].mxu1 %v9358_v37 }
 0x14f   :  { %1405 = vmatprep.mubr.bf16.mxu0 %v9362_v44  ;;  %1518 = vmatprep.mubr.bf16.mxu1 %v9362_v44  ;;  %v9439_v44 = vrot.slane %v9422_v35, %v9425_v36 }
 0x156   :  { %1406 = vmatmul.mubr.bf16.gmra.mrb[56].mxu0 %v9366_v57  ;;  %1519 = vmatmul.mubr.bf16.gmra.mrb[56].mxu1 %v9366_v57 }
 0x157   :  { %1415 = vmatprep.mubr.bf16.mxu0 %v9370_v0  ;;  %1528 = vmatprep.mubr.bf16.mxu1 %v9370_v0 }
 0x15e   :  { %1416 = vmatmul.mubr.bf16.gmra.mrb[60].mxu0 %v8346_v15  ;;  %1529 = vmatmul.mubr.bf16.gmra.mrb[60].mxu1 %v8346_v15 }
 0x1b9   :  { %v1121_v7 = vpop.f32.mrb[0].mxu0  ;;  %v1234_v25 = vpop.f32.mrb[0].mxu1 }
 0x1ba   :  { %v9404_v31 = vpop.f32.mrb[1].mxu0  ;;  %v9406_v43 = vpop.f32.mrb[1].mxu1  ;;  %v1122_v48 = vadd.f32 %v1121_v7, %v9435_v42  ;;  %v1235_v53 = vadd.f32 %v1234_v25, %v9439_v44  ;;  %v9498_v7 = vrot.slane %v9422_v35, %v9473_v9 }
 0x1bb   :  { %v1125_v49 = vpop.f32.mrb[2].mxu0  ;;  %v1238_v61 = vpop.f32.mrb[2].mxu1 }
 0x1bc   :  { %v9408_v3 = vpop.f32.mrb[3].mxu0  ;;  %v9410_v17 = vpop.f32.mrb[3].mxu1  ;;  %v1126_v45 = vadd.f32 %v1125_v49, %v9435_v42  ;;  %v1239_v46 = vadd.f32 %v1238_v61, %v9439_v44  ;;  %v9459_v63 = vmax.f32 %v1122_v48, 0.0  ;;  %v9464_v2 = vmax.f32 %v1235_v53, 0.0 }
 0x1bd   :  { %v9507_v61 = vrot.slane %v9422_v35, %v9479_v14  ;;  %v1124_v48 = vadd.f32 %v9404_v31, %v9498_v7 }
 0x1be   :  { %v9451_v57 = vmax.f32 %v1126_v45, 0.0  ;;  %v9455_v60 = vmax.f32 %v1239_v46, 0.0  ;;  %12340 = vst [vmem:[#allocation28_spill] sm:$0xff] %v9459_v63  ;;  %12342 = vst [vmem:[#allocation30_spill] sm:$0xff] %v9464_v2  ;;  %v1128_v45 = vadd.f32 %v9408_v3, %v9498_v7 }
 0x1c0   :  { %12338 = vst [vmem:[#allocation26_spill] sm:$0xff] %v9451_v57  ;;  %12339 = vst [vmem:[#allocation27_spill] sm:$0xff] %v9455_v60  ;;  %v1669_v6 = vadd.f32 %v9451_v57, %v9459_v63  ;;  %v1711_v10 = vadd.f32 %v9455_v60, %v9464_v2 }
 0x1c1   :  { %v1131_v30 = vpop.f32.mrb[4].mxu0  ;;  %v1244_v33 = vpop.f32.mrb[4].mxu1 }
 0x1c2   :  { %v9417_v34 = vpop.f32.mrb[5].mxu0  ;;  %v9427_v37 = vpop.f32.mrb[5].mxu1  ;;  %v1132_v50 = vadd.f32 %v1131_v30, %v9435_v42  ;;  %v1245_v54 = vadd.f32 %v1244_v33, %v9439_v44 }
 0x1c3   :  { %v1135_v38 = vpop.f32.mrb[6].mxu0  ;;  %v1248_v39 = vpop.f32.mrb[6].mxu1  ;;  %v1134_v3 = vadd.f32 %v9417_v34, %v9498_v7 }
 0x1c4   :  { %v9429_v40 = vpop.f32.mrb[7].mxu0  ;;  %v9431_v41 = vpop.f32.mrb[7].mxu1  ;;  %v9461_v0 = vmax.f32 %v1132_v50, 0.0  ;;  %v1136_v1 = vadd.f32 %v1135_v38, %v9435_v42  ;;  %v9466_v4 = vmax.f32 %v1245_v54, 0.0  ;;  %v1249_v5 = vadd.f32 %v1248_v39, %v9439_v44 }
 0x1c5   :  { %v1241_v50 = vadd.f32 %v9410_v17, %v9507_v61  ;;  %v1247_v17 = vadd.f32 %v9427_v37, %v9507_v61 }
 0x1c6   :  { %12341 = vst [vmem:[#allocation29_spill] sm:$0xff] %v9461_v0  ;;  %12343 = vst [vmem:[#allocation31_spill] sm:$0xff] %v9466_v4  ;;  %v1670_v15 = vadd.f32 %v1669_v6, %v9461_v0  ;;  %v9482_v16 = vmax.f32 %v1136_v1, 0.0  ;;  %v1712_v20 = vadd.f32 %v1711_v10, %v9466_v4  ;;  %v9487_v21 = vmax.f32 %v1249_v5, 0.0 }
 0x1c8   :  { %12346 = vst [vmem:[#allocation34_spill] sm:$0xff] %v9482_v16  ;;  %12347 = vst [vmem:[#allocation35_spill] sm:$0xff] %v9487_v21  ;;  %v1671_v30 = vadd.f32 %v1670_v15, %v9482_v16  ;;  %v1713_v38 = vadd.f32 %v1712_v20, %v9487_v21  ;;  %v9547_v20 = vmax.f32 %v1124_v48, 0.0 }
 0x1c9   :  { %v1141_v47 = vpop.f32.mrb[8].mxu0  ;;  %v1254_v51 = vpop.f32.mrb[8].mxu1 }
 0x1ca   :  { %v9445_v52 = vpop.f32.mrb[9].mxu0  ;;  %v9449_v55 = vpop.f32.mrb[9].mxu1  ;;  %v1142_v8 = vadd.f32 %v1141_v47, %v9435_v42  ;;  %v1255_v11 = vadd.f32 %v1254_v51, %v9439_v44  ;;  %12355 = vst [vmem:[#allocation43_spill] sm:$0xff] %v9547_v20 }
 0x1cb   :  { %v1145_v56 = vpop.f32.mrb[10].mxu0  ;;  %v1258_v58 = vpop.f32.mrb[10].mxu1 }
 0x1cc   :  { %v9453_v59 = vpop.f32.mrb[11].mxu0  ;;  %v9457_v62 = vpop.f32.mrb[11].mxu1  ;;  %v9491_v26 = vmax.f32 %v1142_v8, 0.0  ;;  %v1146_v27 = vadd.f32 %v1145_v56, %v9435_v42  ;;  %v9500_v13 = vmax.f32 %v1255_v11, 0.0  ;;  %v1259_v25 = vadd.f32 %v1258_v58, %v9439_v44 }
 0x1cd   :  { %v1237_v56 = vadd.f32 %v9406_v43, %v9507_v61  ;;  %v9541_v11 = vmax.f32 %v1128_v45, 0.0  ;;  %v1138_v45 = vadd.f32 %v9429_v40, %v9498_v7  ;;  %v1144_v40 = vadd.f32 %v9445_v52, %v9498_v7 }
 0x1ce   :  { %12348 = vst [vmem:[#allocation36_spill] sm:$0xff] %v9491_v26  ;;  %12349 = vst [vmem:[#allocation37_spill] sm:$0xff] %v9500_v13  ;;  %v1672_v46 = vadd.f32 %v1671_v30, %v9491_v26  ;;  %v9516_v47 = vmax.f32 %v1146_v27, 0.0  ;;  %v1714_v51 = vadd.f32 %v1713_v38, %v9500_v13  ;;  %v9523_v53 = vmax.f32 %v1259_v25, 0.0 }
 0x1cf   :  { %12354 = vst [vmem:[#allocation42_spill] sm:$0xff] %v9541_v11  ;;  %v9555_v25 = vmax.f32 %v1237_v56, 0.0  ;;  %v9557_v30 = vmax.f32 %v1134_v3, 0.0  ;;  %v9589_v14 = vmax.f32 %v1138_v45, 0.0  ;;  %v9604_v45 = vmax.f32 %v1144_v40, 0.0 }
 0x1d0   :  { %12350 = vst [vmem:[#allocation38_spill] sm:$0xff] %v9516_v47  ;;  %12351 = vst [vmem:[#allocation39_spill] sm:$0xff] %v9523_v53  ;;  %v1673_v34 = vadd.f32 %v1672_v46, %v9516_v47  ;;  %v1715_v37 = vadd.f32 %v1714_v51, %v9523_v53  ;;  %v1251_v51 = vadd.f32 %v9431_v41, %v9507_v61 }
 0x1d1   :  { %v1151_v12 = vpop.f32.mrb[12].mxu0  ;;  %v1264_v18 = vpop.f32.mrb[12].mxu1  ;;  %12357 = vst [vmem:[#allocation45_spill] sm:$0xff] %v9555_v25  ;;  %12358 = vst [vmem:[#allocation46_spill] sm:$0xff] %v9557_v30 }
 0x1d2   :  { %v9484_v19 = vpop.f32.mrb[13].mxu0  ;;  %v9489_v22 = vpop.f32.mrb[13].mxu1  ;;  %v1152_v33 = vadd.f32 %v1151_v12, %v9435_v42  ;;  %v1265_v39 = vadd.f32 %v1264_v18, %v9439_v44  ;;  %12364 = vst [vmem:[#allocation52_spill] sm:$0xff] %v9589_v14  ;;  %v9595_v9 = vmax.f32 %v1251_v51, 0.0  ;;  %12367 = vst [vmem:[#allocation55_spill] sm:$0xff] %v9604_v45 }
 0x1d3   :  { %v1155_v24 = vpop.f32.mrb[14].mxu0  ;;  %v1268_v28 = vpop.f32.mrb[14].mxu1 }
 0x1d4   :  { %v9494_v29 = vpop.f32.mrb[15].mxu0  ;;  %v9503_v49 = vpop.f32.mrb[15].mxu1  ;;  %v9529_v58 = vmax.f32 %v1152_v33, 0.0  ;;  %v1156_v1 = vadd.f32 %v1155_v24, %v9435_v42  ;;  %v9536_v6 = vmax.f32 %v1265_v39, 0.0  ;;  %v1269_v8 = vadd.f32 %v1268_v28, %v9439_v44  ;;  %12365 = vst [vmem:[#allocation53_spill] sm:$0xff] %v9595_v9 }
 0x1d5   :  { %v9549_v24 = vmax.f32 %v1241_v50, 0.0  ;;  %v9562_v39 = vmax.f32 %v1247_v17, 0.0  ;;  %v1690_v50 = vadd.f32 %v9541_v11, %v9547_v20 }
 0x1d6   :  { %12352 = vst [vmem:[#allocation40_spill] sm:$0xff] %v9529_v58  ;;  %12353 = vst [vmem:[#allocation41_spill] sm:$0xff] %v9536_v6  ;;  %v1674_v33 = vadd.f32 %v1673_v34, %v9529_v58  ;;  %v9560_v38 = vmax.f32 %v1156_v1, 0.0  ;;  %v1716_v46 = vadd.f32 %v1715_v37, %v9536_v6  ;;  %v9567_v48 = vmax.f32 %v1269_v8, 0.0 }
 0x1d7   :  { %12356 = vst [vmem:[#allocation44_spill] sm:$0xff] %v9549_v24  ;;  %12360 = vst [vmem:[#allocation48_spill] sm:$0xff] %v9562_v39  ;;  %v1732_v3 = vadd.f32 %v9549_v24, %v9555_v25  ;;  %v1691_v8 = vadd.f32 %v1690_v50, %v9557_v30 }
 0x1d8   :  { %12359 = vst [vmem:[#allocation47_spill] sm:$0xff] %v9560_v38  ;;  %12361 = vst [vmem:[#allocation49_spill] sm:$0xff] %v9567_v48  ;;  %v1675_v34 = vadd.f32 %v1674_v33, %v9560_v38  ;;  %v1717_v52 = vadd.f32 %v1716_v46, %v9567_v48  ;;  %v1257_v33 = vadd.f32 %v9449_v55, %v9507_v61 }
 0x1d9   :  { %v1161_v54 = vpop.f32.mrb[16].mxu0  ;;  %v1274_v5 = vpop.f32.mrb[16].mxu1  ;;  %v1148_v46 = vadd.f32 %v9453_v59, %v9498_v7  ;;  %v1154_v55 = vadd.f32 %v9484_v19, %v9498_v7  ;;  %v1692_v24 = vadd.f32 %v1691_v8, %v9589_v14  ;;  %v1267_v8 = vadd.f32 %v9489_v22, %v9507_v61 }
 0x1da   :  { %v9532_v31 = vpop.f32.mrb[17].mxu0  ;;  %v9539_v10 = vpop.f32.mrb[17].mxu1  ;;  %v1162_v12 = vadd.f32 %v1161_v54, %v9435_v42  ;;  %v1275_v27 = vadd.f32 %v1274_v5, %v9439_v44 }
 0x1db   :  { %v1165_v43 = vpop.f32.mrb[18].mxu0  ;;  %v1278_v15 = vpop.f32.mrb[18].mxu1  ;;  %v1693_v19 = vadd.f32 %v1692_v24, %v9604_v45  ;;  %v1158_v24 = vadd.f32 %v9494_v29, %v9498_v7 }
 0x1dc   :  { %v9545_v18 = vpop.f32.mrb[19].mxu0  ;;  %v9553_v28 = vpop.f32.mrb[19].mxu1  ;;  %v9573_v54 = vmax.f32 %v1162_v12, 0.0  ;;  %v1166_v56 = vadd.f32 %v1165_v43, %v9435_v42  ;;  %v9580_v1 = vmax.f32 %v1275_v27, 0.0  ;;  %v1279_v5 = vadd.f32 %v1278_v15, %v9439_v44 }
 0x1dd   :  { %v1733_v43 = vadd.f32 %v1732_v3, %v9562_v39 }
 0x1de   :  { %12362 = vst [vmem:[#allocation50_spill] sm:$0xff] %v9573_v54  ;;  %12363 = vst [vmem:[#allocation51_spill] sm:$0xff] %v9580_v1  ;;  %v1676_v50 = vadd.f32 %v1675_v34, %v9573_v54  ;;  %v9609_v39 = vmax.f32 %v1279_v5, 0.0  ;;  %v1261_v5 = vadd.f32 %v9457_v62, %v9507_v61 }
 0x1df   :  { %v1734_v59 = vadd.f32 %v1733_v43, %v9595_v9 }
 0x1e0   :  { %12368 = vst [vmem:[#allocation56_spill] sm:$0xff] %v9609_v39 }
 0x1e1   :  { %v1171_v17 = vpop.f32.mrb[20].mxu0  ;;  %v1284_v12 = vpop.f32.mrb[20].mxu1 }
 0x1e2   :  { %v1172_v41 = vadd.f32 %v1171_v17, %v9435_v42  ;;  %v9586_v37 = vpop.f32.mrb[21].mxu0  ;;  %v1285_v27 = vadd.f32 %v1284_v12, %v9439_v44  ;;  %v9593_v36 = vpop.f32.mrb[21].mxu1  ;;  %v9600_v17 = vmax.f32 %v1166_v56, 0.0  ;;  %v1718_v12 = vadd.f32 %v1717_v52, %v9580_v1 }
 0x1e3   :  { %v1175_v15 = vpop.f32.mrb[22].mxu0  ;;  %v1288_v32 = vpop.f32.mrb[22].mxu1  ;;  %v9623_v52 = vmax.f32 %v1257_v33, 0.0  ;;  %v9657_v1 = vmax.f32 %v1261_v5, 0.0 }
 0x1e4   :  { %12366 = vst [vmem:[#allocation54_spill] sm:$0xff] %v9600_v17  ;;  %v9602_v3 = vpop.f32.mrb[23].mxu0  ;;  %v9611_v51 = vpop.f32.mrb[23].mxu1  ;;  %v9615_v34 = vmax.f32 %v1172_v41, 0.0  ;;  %v1176_v56 = vadd.f32 %v1175_v15, %v9435_v42  ;;  %v9619_v40 = vmax.f32 %v1285_v27, 0.0  ;;  %v1289_v25 = vadd.f32 %v1288_v32, %v9439_v44 }
 0x1e5   :  { %12371 = vst [vmem:[#allocation59_spill] sm:$0xff] %v9623_v52  ;;  %v1677_v30 = vadd.f32 %v1676_v50, %v9600_v17  ;;  %v9629_v41 = vmax.f32 %v1148_v46, 0.0  ;;  %v1719_v27 = vadd.f32 %v1718_v12, %v9609_v39  ;;  %v9634_v32 = vmax.f32 %v1154_v55, 0.0  ;;  %12377 = vst [vmem:[#allocation65_spill] sm:$0xff] %v9657_v1 }
 0x1e6   :  { %12369 = vst [vmem:[#allocation57_spill] sm:$0xff] %v9615_v34  ;;  %12370 = vst [vmem:[#allocation58_spill] sm:$0xff] %v9619_v40  ;;  %v9637_v33 = vmax.f32 %v1176_v56, 0.0  ;;  %v9645_v22 = vmax.f32 %v1289_v25, 0.0 }
 0x1e7   :  { %12372 = vst [vmem:[#allocation60_spill] sm:$0xff] %v9629_v41  ;;  %12373 = vst [vmem:[#allocation61_spill] sm:$0xff] %v9634_v32  ;;  %v1678_v43 = vadd.f32 %v1677_v30, %v9615_v34  ;;  %v1720_v46 = vadd.f32 %v1719_v27, %v9619_v40  ;;  %v1735_v30 = vadd.f32 %v1734_v59, %v9623_v52  ;;  %v9668_v52 = vmax.f32 %v1267_v8, 0.0 }
 0x1e8   :  { %12374 = vst [vmem:[#allocation62_spill] sm:$0xff] %v9637_v33  ;;  %12375 = vst [vmem:[#allocation63_spill] sm:$0xff] %v9645_v22  ;;  %v1694_v29 = vadd.f32 %v1693_v19, %v9629_v41  ;;  %v1164_v59 = vadd.f32 %v9532_v31, %v9498_v7  ;;  %v9670_v40 = vmax.f32 %v1158_v24, 0.0  ;;  %v1271_v41 = vadd.f32 %v9503_v49, %v9507_v61 }
 0x1e9   :  { %v1181_v15 = vpop.f32.mrb[24].mxu0  ;;  %v1294_v9 = vpop.f32.mrb[24].mxu1  ;;  %12379 = vst [vmem:[#allocation67_spill] sm:$0xff] %v9668_v52  ;;  %v1721_v5 = vadd.f32 %v1720_v46, %v9645_v22  ;;  %v1168_v24 = vadd.f32 %v9545_v18, %v9498_v7  ;;  %v1277_v49 = vadd.f32 %v9539_v10, %v9507_v61 }
 0x1ea   :  { %v1182_v62 = vadd.f32 %v1181_v15, %v9435_v42  ;;  %v9640_v50 = vpop.f32.mrb[25].mxu0  ;;  %v1295_v12 = vadd.f32 %v1294_v9, %v9439_v44  ;;  %v9648_v55 = vpop.f32.mrb[25].mxu1  ;;  %12380 = vst [vmem:[#allocation68_spill] sm:$0xff] %v9670_v40  ;;  %v9682_v8 = vmax.f32 %v1164_v59, 0.0 }
 0x1eb   :  { %v1185_v45 = vpop.f32.mrb[26].mxu0  ;;  %v1298_v14 = vpop.f32.mrb[26].mxu1  ;;  %v9709_v48 = vmax.f32 %v1168_v24, 0.0 }
 0x1ec   :  { %v9651_v56 = vmax.f32 %v1182_v62, 0.0  ;;  %v1186_v15 = vadd.f32 %v1185_v45, %v9435_v42  ;;  %v9654_v39 = vpop.f32.mrb[27].mxu0  ;;  %v9659_v25 = vmax.f32 %v1295_v12, 0.0  ;;  %v1299_v9 = vadd.f32 %v1298_v14, %v9439_v44  ;;  %v9662_v27 = vpop.f32.mrb[27].mxu1  ;;  %12383 = vst [vmem:[#allocation71_spill] sm:$0xff] %v9682_v8 }
 0x1ed   :  { %v1679_v62 = vadd.f32 %v1678_v43, %v9637_v33  ;;  %v1695_v45 = vadd.f32 %v1694_v29, %v9634_v32  ;;  %v1736_v14 = vadd.f32 %v1735_v30, %v9657_v1  ;;  %v1174_v1 = vadd.f32 %v9586_v37, %v9498_v7  ;;  %12387 = vst [vmem:[#allocation75_spill] sm:$0xff] %v9709_v48 }
 0x1ee   :  { %12376 = vst [vmem:[#allocation64_spill] sm:$0xff] %v9651_v56  ;;  %12378 = vst [vmem:[#allocation66_spill] sm:$0xff] %v9659_v25  ;;  %v9674_v12 = vmax.f32 %v1186_v15, 0.0  ;;  %v1722_v31 = vadd.f32 %v1721_v5, %v9659_v25  ;;  %v9680_v43 = vmax.f32 %v1299_v9, 0.0 }
 0x1ef   :  { %v1680_v19 = vadd.f32 %v1679_v62, %v9651_v56  ;;  %v1737_v32 = vadd.f32 %v1736_v14, %v9668_v52  ;;  %v1696_v30 = vadd.f32 %v1695_v45, %v9670_v40  ;;  %v9700_v45 = vmax.f32 %v1271_v41, 0.0 }
 0x1f0   :  { %12381 = vst [vmem:[#allocation69_spill] sm:$0xff] %v9674_v12  ;;  %12382 = vst [vmem:[#allocation70_spill] sm:$0xff] %v9680_v43  ;;  %v1723_v10 = vadd.f32 %v1722_v31, %v9680_v43  ;;  %v1281_v41 = vadd.f32 %v9553_v28, %v9507_v61 }
 0x1f1   :  { %v1191_v29 = vpop.f32.mrb[28].mxu0  ;;  %v1304_v62 = vpop.f32.mrb[28].mxu1  ;;  %v1681_v18 = vadd.f32 %v1680_v19, %v9674_v12  ;;  %12385 = vst [vmem:[#allocation73_spill] sm:$0xff] %v9700_v45  ;;  %v1697_v37 = vadd.f32 %v1696_v30, %v9682_v8  ;;  %v1178_v30 = vadd.f32 %v9602_v3, %v9498_v7 }
 0x1f2   :  { %v1192_v46 = vadd.f32 %v1191_v29, %v9435_v42  ;;  %v1193_v15 = vpop.f32.mrb[29].mxu0  ;;  %v1305_v9 = vadd.f32 %v1304_v62, %v9439_v44  ;;  %v9692_v5 = vpop.f32.mrb[29].mxu1 }
 0x1f3   :  { %v1195_v59 = vpop.f32.mrb[30].mxu0  ;;  %v1308_v14 = vpop.f32.mrb[30].mxu1  ;;  %v1698_v28 = vadd.f32 %v1697_v37, %v9709_v48  ;;  %v1188_v48 = vadd.f32 %v9654_v39, %v9498_v7 }
 0x1f4   :  { %v9697_v29 = vmax.f32 %v1192_v46, 0.0  ;;  %v1196_v25 = vadd.f32 %v1195_v59, %v9435_v42  ;;  %v1197_v52 = vpop.f32.mrb[31].mxu0  ;;  %v9703_v40 = vmax.f32 %v1305_v9, 0.0  ;;  %v1309_v62 = vadd.f32 %v1308_v14, %v9439_v44  ;;  %v9706_v22 = vpop.f32.mrb[31].mxu1 }
 0x1f5   :  { %v9714_v42 = vmax.f32 %v1277_v49, 0.0  ;;  %v9721_v44 = vmax.f32 %v1174_v1, 0.0  ;;  %v1738_v59 = vadd.f32 %v1737_v32, %v9700_v45  ;;  %v9740_v32 = vmax.f32 %v1281_v41, 0.0 }
 0x1f6   :  { %12384 = vst [vmem:[#allocation72_spill] sm:$0xff] %v9697_v29  ;;  %12386 = vst [vmem:[#allocation74_spill] sm:$0xff] %v9703_v40  ;;  %v1682_v19 = vadd.f32 %v1681_v18, %v9697_v29  ;;  %v9712_v46 = vmax.f32 %v1196_v25, 0.0  ;;  %v1724_v31 = vadd.f32 %v1723_v10, %v9703_v40  ;;  %v9719_v9 = vmax.f32 %v1309_v62, 0.0 }
 0x1f7   :  { %12389 = vst [vmem:[#allocation77_spill] sm:$0xff] %v9714_v42  ;;  %12391 = vst [vmem:[#allocation79_spill] sm:$0xff] %v9721_v44  ;;  %v1287_v25 = vadd.f32 %v9593_v36, %v9507_v61  ;;  %v1184_v18 = vadd.f32 %v9640_v50, %v9498_v7  ;;  %v1739_v62 = vadd.f32 %v1738_v59, %v9714_v42  ;;  %v9747_v40 = vmax.f32 %v1178_v30, 0.0 }
 0x1f8   :  { %12388 = vst [vmem:[#allocation76_spill] sm:$0xff] %v9712_v46  ;;  %12390 = vst [vmem:[#allocation78_spill] sm:$0xff] %v9719_v9  ;;  %v1683_v24 = vadd.f32 %v1682_v19, %v9712_v46  ;;  %v1725_v1 = vadd.f32 %v1724_v31, %v9719_v9  ;;  %v1699_v37 = vadd.f32 %v1698_v28, %v9721_v44  ;;  %v9774_v6 = vmax.f32 %v1188_v48, 0.0 }
 0x1f9   :  { %v9729_v49 = vpop.f32.mrb[32].mxu0  ;;  %v9735_v10 = vpop.f32.mrb[32].mxu1  ;;  %12392 = vst [vmem:[#allocation80_spill] sm:$0xff] %v9740_v32  ;;  %12393 = vst [vmem:[#allocation81_spill] sm:$0xff] %v9747_v40  ;;  %v9753_v9 = vmax.f32 %v1287_v25, 0.0  ;;  %v1291_v59 = vadd.f32 %v9611_v51, %v9507_v61  ;;  %v9759_v42 = vmax.f32 %v1184_v18, 0.0  ;;  %v1194_v44 = vadd.f32 %v1193_v15, %v9498_v7 }
 0x1fa   :  { %v1684_v14 = vrot.slane %v1683_v24, 4  ;;  %v9737_v3 = vpop.f32.mrb[33].mxu0  ;;  %v9742_v19 = vpop.f32.mrb[33].mxu1  ;;  %v1726_v30 = vrot.slane %v1725_v1, 4  ;;  %v1700_v25 = vadd.f32 %v1699_v37, %v9747_v40  ;;  %12397 = vst [vmem:[#allocation85_spill] sm:$0xff] %v9774_v6  ;;  %v1301_v15 = vadd.f32 %v9662_v27, %v9507_v61 }
 0x1fb   :  { %v9744_v36 = vpop.f32.mrb[34].mxu0  ;;  %v9749_v45 = vpop.f32.mrb[34].mxu1  ;;  %12394 = vst [vmem:[#allocation82_spill] sm:$0xff] %v9753_v9  ;;  %12395 = vst [vmem:[#allocation83_spill] sm:$0xff] %v9759_v42  ;;  %v9769_v43 = vmax.f32 %v1291_v59, 0.0  ;;  %v1198_v48 = vadd.f32 %v1197_v52, %v9498_v7 }
 0x1fc   :  { %v1685_v50 = vadd.f32 %v1684_v14, %v1683_v24  ;;  %v9751_v31 = vpop.f32.mrb[35].mxu0  ;;  %v9757_v41 = vpop.f32.mrb[35].mxu1  ;;  %v1740_v24 = vadd.f32 %v1739_v62, %v9740_v32  ;;  %v1297_v14 = vadd.f32 %v9648_v55, %v9507_v61  ;;  %v1701_v39 = vadd.f32 %v1700_v25, %v9759_v42 }
 0x1fd   :  { %12396 = vst [vmem:[#allocation84_spill] sm:$0xff] %v9769_v43  ;;  %v1727_v62 = vadd.f32 %v1726_v30, %v1725_v1 }
 0x1fe   :  { %v1686_v28 = vrot.slane %v1685_v50, 2  ;;  %v1741_v51 = vadd.f32 %v1740_v24, %v9753_v9  ;;  %v9780_v37 = vmax.f32 %v1297_v14, 0.0  ;;  %v1307_v14 = vadd.f32 %v9692_v5, %v9507_v61 }
 0x1ff   :  { %v1702_v27 = vadd.f32 %v1701_v39, %v9774_v6  ;;  %v9811_v5 = vmax.f32 %v1198_v48, 0.0  ;;  %v1311_v39 = vadd.f32 %v9706_v22, %v9507_v61 }
 0x200   :  { %v1687_v8 = vadd.f32 %v1686_v28, %v1685_v50  ;;  %12398 = vst [vmem:[#allocation86_spill] sm:$0xff] %v9780_v37  ;;  %v9788_v28 = vmax.f32 %v1194_v44, 0.0  ;;  %v1742_v30 = vadd.f32 %v1741_v51, %v9769_v43  ;;  %v1728_v44 = vrot.slane %v1727_v62, 2 }
 0x201   :  { %v9771_v18 = vpop.f32.mrb[36].mxu0  ;;  %v9776_v32 = vpop.f32.mrb[36].mxu1  ;;  %12402 = vst [vmem:[#allocation90_spill] sm:$0xff] %v9811_v5  ;;  %v9813_v43 = vmax.f32 %v1307_v14, 0.0 }
 0x202   :  { %v1688_v46 = vrot.slane %v1687_v8, 1  ;;  %v9778_v55 = vpop.f32.mrb[37].mxu0  ;;  %v9784_v50 = vpop.f32.mrb[37].mxu1  ;;  %12399 = vst [vmem:[#allocation87_spill] sm:$0xff] %v9788_v28  ;;  %v1703_v7 = vadd.f32 %v1702_v27, %v9788_v28 }
 0x203   :  { %v9786_v59 = vpop.f32.mrb[38].mxu0  ;;  %v9791_v25 = vpop.f32.mrb[38].mxu1  ;;  %12403 = vst [vmem:[#allocation91_spill] sm:$0xff] %v9813_v43 }
 0x204   :  { %v1689_v24 = vadd.f32 %v1688_v46, %v1687_v8  ;;  %v9793_v1 = vpop.f32.mrb[39].mxu0  ;;  %v9798_v9 = vpop.f32.mrb[39].mxu1  ;;  %v1743_v8 = vadd.f32 %v1742_v30, %v9780_v37  ;;  %v9804_v46 = vmax.f32 %v1301_v15, 0.0  ;;  %v1729_v30 = vadd.f32 %v1728_v44, %v1727_v62 }
 0x205   :  { %v1704_v14 = vadd.f32 %v1703_v7, %v9811_v5  ;;  %v9834_v62 = vmax.f32 %v1311_v39, 0.0 }
 0x206   :  { %v9801_v42 = vmul.f32 0.0078125, %v1689_v24  ;;  %12401 = vst [vmem:[#allocation89_spill] sm:$0xff] %v9804_v46  ;;  %v1744_v27 = vadd.f32 %v1743_v8, %v9804_v46  ;;  %v1730_v46 = vrot.slane %v1729_v30, 1 }
 0x207   :  { %12407 = vst [vmem:[#allocation95_spill] sm:$0xff] %v9834_v62 }
 0x208   :  { %12400 = vst [vmem:[#allocation88_spill] sm:$0xff] %v9801_v42  ;;  %v1845_v52 = vsub.f32 %v9459_v63, %v9801_v42  ;;  %v1853_v51 = vsub.f32 %v9451_v57, %v9801_v42  ;;  %v1745_v22 = vadd.f32 %v1744_v27, %v9813_v43  ;;  %v1861_v8 = vsub.f32 %v9461_v0, %v9801_v42 }
 0x209   :  { %v9817_v24 = vpop.f32.mrb[40].mxu0  ;;  %v9819_v15 = vpop.f32.mrb[40].mxu1  ;;  %v1869_v7 = vsub.f32 %v9482_v16, %v9801_v42  ;;  %v9864_v16 = vsub.s32 4, %v9412_v23 }
 0x20a   :  { %v9821_v6 = vpop.f32.mrb[41].mxu0  ;;  %v9824_v63 = vpop.f32.mrb[41].mxu1  ;;  %v1973_v48 = vmul.f32 %v1845_v52, %v1845_v52  ;;  %v1981_v57 = vmul.f32 %v1853_v51, %v1853_v51  ;;  %v1746_v52 = vadd.f32 %v1745_v22, %v9834_v62  ;;  %v1989_v5 = vmul.f32 %v1861_v8, %v1861_v8 }
 0x20b   :  { %12404 = vst [vmem:[#allocation92_spill] sm:$0xff] %v9824_v63  ;;  %v9826_v28 = vpop.f32.mrb[42].mxu0  ;;  %v9829_v37 = vpop.f32.mrb[42].mxu1  ;;  %12415 = vst [vmem:[#allocation103_spill] sm:$0xff] %v9864_v16 }
 0x20c   :  { %12405 = vst [vmem:[#allocation93_spill] sm:$0xff] %v9826_v28  ;;  %v9831_v61 = vpop.f32.mrb[43].mxu0  ;;  %v9836_v44 = vpop.f32.mrb[43].mxu1  ;;  %v2101_v63 = vadd.f32 %v1981_v57, %v1973_v48  ;;  %v1705_v28 = vrot.slane %v1704_v14, 4  ;;  %v1747_v62 = vrot.slane %v1746_v52, 4 }
 0x20d   :  { %12406 = vst [vmem:[#allocation94_spill] sm:$0xff] %v9831_v61  ;;  %12408 = vst [vmem:[#allocation96_spill] sm:$0xff] %v9836_v44  ;;  %v1731_v61 = vadd.f32 %v1730_v46, %v1729_v30  ;;  %v1877_v46 = vsub.f32 %v9491_v26, %v9801_v42  ;;  %v1997_v30 = vmul.f32 %v1869_v7, %v1869_v7 }
 0x20e   :  { %v2102_v0 = vadd.f32 %v2101_v63, %v1989_v5  ;;  %v1706_v57 = vadd.f32 %v1705_v28, %v1704_v14  ;;  %v9870_v5 = vsub.s32 5, %v9412_v23  ;;  %v1748_v14 = vadd.f32 %v1747_v62, %v1746_v52 }
 0x20f   :  { %v9861_v8 = vmul.f32 0.0078125, %v1731_v61  ;;  %v1885_v61 = vsub.f32 %v9516_v47, %v9801_v42  ;;  %v2005_v7 = vmul.f32 %v1877_v46, %v1877_v46  ;;  %v9889_v62 = vrot.slane %v9422_v35, %v9864_v16 }
 0x210   :  { %v2103_v63 = vadd.f32 %v2102_v0, %v1997_v30  ;;  %v1707_v28 = vrot.slane %v1706_v57, 2  ;;  %12417 = vst [vmem:[#allocation105_spill] sm:$0xff] %v9870_v5  ;;  %v1749_v16 = vrot.slane %v1748_v14, 2 }
 0x211   :  { %v9841_v51 = vpop.f32.mrb[44].mxu0  ;;  %v9845_v27 = vpop.f32.mrb[44].mxu1  ;;  %12414 = vst [vmem:[#allocation102_spill] sm:$0xff] %v9861_v8  ;;  %v1847_v26 = vsub.f32 %v9464_v2, %v9861_v8  ;;  %v1855_v0 = vsub.f32 %v9455_v60, %v9861_v8  ;;  %v9901_v60 = vrot.slane %v9422_v35, %v9870_v5 }
 0x212   :  { %12409 = vst [vmem:[#allocation97_spill] sm:$0xff] %v9841_v51  ;;  %v9847_v39 = vpop.f32.mrb[45].mxu0  ;;  %v9849_v43 = vpop.f32.mrb[45].mxu1  ;;  %v2104_v2 = vadd.f32 %v2103_v63, %v2005_v7  ;;  %v2013_v7 = vmul.f32 %v1885_v61, %v1885_v61  ;;  %v1750_v61 = vadd.f32 %v1749_v16, %v1748_v14 }
 0x213   :  { %12410 = vst [vmem:[#allocation98_spill] sm:$0xff] %v9849_v43  ;;  %v9851_v44 = vpop.f32.mrb[46].mxu0  ;;  %v9853_v48 = vpop.f32.mrb[46].mxu1  ;;  %v9867_v43 = vsub.s32 6, %v9412_v23  ;;  %v1975_v5 = vmul.f32 %v1847_v26, %v1847_v26  ;;  %v1350_v26 = vadd.f32 %v9737_v3, %v9901_v60 }
 0x214   :  { %12411 = vst [vmem:[#allocation99_spill] sm:$0xff] %v9853_v48  ;;  %v9855_v22 = vpop.f32.mrb[47].mxu0  ;;  %v9857_v51 = vpop.f32.mrb[47].mxu1 }
 0x215   :  { %12412 = vst [vmem:[#allocation100_spill] sm:$0xff] %v9855_v22  ;;  %12413 = vst [vmem:[#allocation101_spill] sm:$0xff] %v9857_v51  ;;  %v9873_v51 = vsub.s32 7, %v9412_v23  ;;  %v9893_v52 = vrot.slane %v9422_v35, %v9867_v43  ;;  %v1708_v23 = vadd.f32 %v1707_v28, %v1706_v57  ;;  %v1893_v28 = vsub.f32 %v9529_v58, %v9801_v42 }
 0x216   :  { %12416 = vst [vmem:[#allocation104_spill] sm:$0xff] %v9867_v43  ;;  %v1352_v43 = vadd.f32 %v9744_v36, %v9889_v62  ;;  %v1354_v36 = vadd.f32 %v9751_v31, %v9901_v60  ;;  %v1901_v31 = vsub.f32 %v9560_v38, %v9801_v42 }
 0x217   :  { %12418 = vst [vmem:[#allocation106_spill] sm:$0xff] %v9873_v51  ;;  %v1465_v63 = vadd.f32 %v9749_v45, %v9893_v52  ;;  %v1709_v58 = vrot.slane %v1708_v23, 1 }
 0x219   :  { %v9875_v22 = vpop.f32.mrb[48].mxu0  ;;  %v9883_v30 = vpop.f32.mrb[48].mxu1 }
 0x21a   :  { %12419 = vst [vmem:[#allocation107_spill] sm:$0xff] %v9875_v22  ;;  %12420 = vst [vmem:[#allocation108_spill] sm:$0xff] %v9883_v30  ;;  %v9885_v48 = vpop.f32.mrb[49].mxu0  ;;  %v9895_v47 = vpop.f32.mrb[49].mxu1  ;;  %v9909_v22 = vrot.slane %v9422_v35, %v9873_v51  ;;  %v1461_v35 = vadd.f32 %v9735_v10, %v9893_v52  ;;  %v2105_v51 = vadd.f32 %v2104_v2, %v2013_v7  ;;  %v9939_v7 = vmax.f32 %v1465_v63, 0.0 }
 0x21b   :  { %12421 = vst [vmem:[#allocation109_spill] sm:$0xff] %v9885_v48  ;;  %v9897_v46 = vpop.f32.mrb[50].mxu0  ;;  %v9903_v30 = vpop.f32.mrb[50].mxu1  ;;  %v1710_v63 = vadd.f32 %v1709_v58, %v1708_v23 }
 0x21c   :  { %12422 = vst [vmem:[#allocation110_spill] sm:$0xff] %v9897_v46  ;;  %12423 = vst [vmem:[#allocation111_spill] sm:$0xff] %v9903_v30  ;;  %v9905_v48 = vpop.f32.mrb[51].mxu0  ;;  %v9915_v57 = vpop.f32.mrb[51].mxu1  ;;  %v1983_v30 = vmul.f32 %v1855_v0, %v1855_v0  ;;  %v1467_v45 = vadd.f32 %v9757_v41, %v9909_v22  ;;  %v9933_v0 = vmax.f32 %v1352_v43, 0.0  ;;  %v2021_v41 = vmul.f32 %v1893_v28, %v1893_v28 }
 0x21d   :  { %12424 = vst [vmem:[#allocation112_spill] sm:$0xff] %v9905_v48  ;;  %12425 = vst [vmem:[#allocation113_spill] sm:$0xff] %v9915_v57  ;;  %v1348_v48 = vadd.f32 %v9729_v49, %v9889_v62  ;;  %v1863_v57 = vsub.f32 %v9466_v4, %v9861_v8  ;;  %v1463_v49 = vadd.f32 %v9742_v19, %v9909_v22  ;;  %v9947_v3 = vmax.f32 %v1461_v35, 0.0 }
 0x21e   :  { %12426 = vst [vmem:[#allocation114_spill] sm:$0xff] %v9933_v0  ;;  %v2143_v2 = vadd.f32 %v1983_v30, %v1975_v5  ;;  %12428 = vst [vmem:[#allocation116_spill] sm:$0xff] %v9939_v7  ;;  %v9949_v19 = vmax.f32 %v1354_v36, 0.0  ;;  %v9951_v43 = vmax.f32 %v1467_v45, 0.0  ;;  %v2106_v28 = vadd.f32 %v2105_v51, %v2021_v41 }
 0x21f   :  { %v9945_v14 = vmax.f32 %v1348_v48, 0.0  ;;  %12431 = vst [vmem:[#allocation119_spill] sm:$0xff] %v9947_v3  ;;  %v1871_v5 = vsub.f32 %v9487_v21, %v9861_v8  ;;  %v1991_v30 = vmul.f32 %v1863_v57, %v1863_v57  ;;  %v1751_v35 = vrot.slane %v1750_v61, 1 }
 0x220   :  { %12432 = vst [vmem:[#allocation120_spill] sm:$0xff] %v9949_v19  ;;  %12433 = vst [vmem:[#allocation121_spill] sm:$0xff] %v9951_v43  ;;  %v9965_v36 = vmax.f32 %v1463_v49, 0.0  ;;  %v1909_v51 = vsub.f32 %v9573_v54, %v9801_v42  ;;  %v2029_v57 = vmul.f32 %v1901_v31, %v1901_v31  ;;  %v9977_v58 = vadd.f32 %v9939_v7, %v9947_v3  ;;  %v12447_v7 = vld [vmem:[#allocation76_spill] sm:$0xff] }
 0x221   :  { %v9935_v10 = vpop.f32.mrb[52].mxu0  ;;  %v9941_v4 = vpop.f32.mrb[52].mxu1  ;;  %12430 = vst [vmem:[#allocation118_spill] sm:$0xff] %v9945_v14  ;;  %v9969_v45 = vadd.f32 %v9933_v0, %v9945_v14  ;;  %v2144_v23 = vadd.f32 %v2143_v2, %v1991_v30  ;;  %v1358_v41 = vadd.f32 %v9771_v18, %v9889_v62  ;;  %v1471_v54 = vadd.f32 %v9776_v32, %v9893_v52  ;;  %v12449_v14 = vld [vmem:[#allocation41_spill] sm:$0xff] }
 0x222   :  { %12427 = vst [vmem:[#allocation115_spill] sm:$0xff] %v9935_v10  ;;  %v9943_v16 = vpop.f32.mrb[53].mxu0  ;;  %v9953_v10 = vpop.f32.mrb[53].mxu1  ;;  %12437 = vst [vmem:[#allocation125_spill] sm:$0xff] %v9965_v36  ;;  %v9985_v49 = vadd.f32 %v9951_v43, %v9965_v36  ;;  %v2107_v31 = vadd.f32 %v2106_v28, %v2029_v57  ;;  %v1879_v2 = vsub.f32 %v9500_v13, %v9861_v8  ;;  %v9993_v21 = vmul.f32 0.0078125, %v1710_v63 }
 0x223   :  { %12429 = vst [vmem:[#allocation117_spill] sm:$0xff] %v9943_v16  ;;  %v9955_v46 = vpop.f32.mrb[54].mxu0  ;;  %v9959_v38 = vpop.f32.mrb[54].mxu1  ;;  %v9963_v16 = vmax.f32 %v1350_v26, 0.0  ;;  %v1999_v30 = vmul.f32 %v1871_v5, %v1871_v5  ;;  %v1925_v43 = vsub.f32 %v9615_v34, %v9801_v42  ;;  %v1752_v36 = vadd.f32 %v1751_v35, %v1750_v61 }
 0x224   :  { %12434 = vst [vmem:[#allocation122_spill] sm:$0xff] %v9955_v46  ;;  %v9961_v48 = vpop.f32.mrb[55].mxu0  ;;  %v9971_v46 = vpop.f32.mrb[55].mxu1  ;;  %v10001_v18 = vadd.f32 %v9778_v55, %v9901_v60  ;;  %v1933_v32 = vsub.f32 %v9637_v33, %v9801_v42  ;;  %v1941_v28 = vsub.f32 %v9651_v56, %v9801_v42  ;;  %v2037_v5 = vmul.f32 %v1909_v51, %v1909_v51 }
 0x225   :  { %12435 = vst [vmem:[#allocation123_spill] sm:$0xff] %v9961_v48  ;;  %12436 = vst [vmem:[#allocation124_spill] sm:$0xff] %v9963_v16  ;;  %v9981_v26 = vadd.f32 %v9949_v19, %v9963_v16  ;;  %v1917_v19 = vsub.f32 %v9600_v17, %v9801_v42  ;;  %v2145_v63 = vadd.f32 %v2144_v23, %v1999_v30  ;;  %v10015_v35 = vmax.f32 %v1358_v41, 0.0 }
 0x226   :  { %12438 = vst [vmem:[#allocation126_spill] sm:$0xff] %v9971_v46  ;;  %v1887_v61 = vsub.f32 %v9523_v53, %v9861_v8  ;;  %v10017_v55 = vmax.f32 %v1471_v54, 0.0  ;;  %v10021_v34 = vadd.f32 %v9784_v50, %v9909_v22  ;;  %v2108_v51 = vadd.f32 %v2107_v31, %v2037_v5 }
 0x227   :  { %v2007_v23 = vmul.f32 %v1879_v2, %v1879_v2  ;;  %v1846_v30 = vsub.f32 %v9547_v20, %v9993_v21  ;;  %v1854_v53 = vsub.f32 %v9541_v11, %v9993_v21  ;;  %v1949_v50 = vsub.f32 %v9674_v12, %v9801_v42 }
 0x228   :  { %12442 = vst [vmem:[#allocation130_spill] sm:$0xff] %v10017_v55  ;;  %v1957_v13 = vsub.f32 %v9697_v29, %v9801_v42  ;;  %v1965_v31 = vsub.f32 %v12447_v7, %v9801_v42  ;;  %v2045_v2 = vmul.f32 %v1917_v19, %v1917_v19  ;;  %v2053_v20 = vmul.f32 %v1925_v43, %v1925_v43 }
 0x229   :  { %v10003_v16 = vpop.f32.mrb[56].mxu0  ;;  %v10009_v57 = vpop.f32.mrb[56].mxu1  ;;  %v2061_v3 = vmul.f32 %v1933_v32, %v1933_v32  ;;  %v10043_v0 = vmul.f32 %v1941_v28, %v1941_v28  ;;  %v2146_v11 = vadd.f32 %v2145_v63, %v2007_v23  ;;  %v2015_v42 = vmul.f32 %v1887_v61, %v1887_v61  ;;  %v12453_v28 = vld [vmem:[#allocation58_spill] sm:$0xff]  ;;  %v12454_v23 = vld [vmem:[#allocation63_spill] sm:$0xff] }
 0x22a   :  { %12439 = vst [vmem:[#allocation127_spill] sm:$0xff] %v10003_v16  ;;  %12440 = vst [vmem:[#allocation128_spill] sm:$0xff] %v10009_v57  ;;  %v10011_v17 = vpop.f32.mrb[57].mxu0  ;;  %v10023_v33 = vpop.f32.mrb[57].mxu1  ;;  %v2109_v19 = vadd.f32 %v2108_v51, %v2045_v2  ;;  %v1982_v43 = vmul.f32 %v1854_v53, %v1854_v53  ;;  %v10053_v32 = vmul.f32 %v1949_v50, %v1949_v50  ;;  %v12458_v61 = vld [vmem:[#allocation46_spill] sm:$0xff] }
 0x22b   :  { %12441 = vst [vmem:[#allocation129_spill] sm:$0xff] %v10011_v17  ;;  %12443 = vst [vmem:[#allocation131_spill] sm:$0xff] %v10023_v33  ;;  %v10025_v56 = vpop.f32.mrb[58].mxu0  ;;  %v10031_v41 = vpop.f32.mrb[58].mxu1  ;;  %v12452_v33 = vld [vmem:[#allocation56_spill] sm:$0xff]  ;;  %v1927_v63 = vsub.f32 %v12453_v28, %v9861_v8  ;;  %v10059_v17 = vmul.f32 0.0078125, %v1752_v36  ;;  %v10065_v46 = vmul.f32 %v1965_v31, %v1965_v31  ;;  %v2147_v51 = vadd.f32 %v2146_v11, %v2015_v42 }
 0x22c   :  { %12444 = vst [vmem:[#allocation132_spill] sm:$0xff] %v10025_v56  ;;  %12445 = vst [vmem:[#allocation133_spill] sm:$0xff] %v10031_v41  ;;  %v10033_v54 = vpop.f32.mrb[59].mxu0  ;;  %v10041_v5 = vpop.f32.mrb[59].mxu1  ;;  %v12450_v41 = vld [vmem:[#allocation49_spill] sm:$0xff]  ;;  %v12451_v56 = vld [vmem:[#allocation51_spill] sm:$0xff]  ;;  %v1919_v7 = vsub.f32 %v12452_v33, %v9861_v8  ;;  %v1862_v53 = vsub.f32 %v12458_v61, %v9993_v21  ;;  %v2110_v42 = vadd.f32 %v2109_v19, %v2053_v20 }
 0x22d   :  { %12446 = vst [vmem:[#allocation134_spill] sm:$0xff] %v10033_v54  ;;  %12448 = vst [vmem:[#allocation135_spill] sm:$0xff] %v10041_v5  ;;  %v1895_v54 = vsub.f32 %v12449_v14, %v9861_v8  ;;  %v1903_v12 = vsub.f32 %v12450_v41, %v9861_v8  ;;  %v1911_v29 = vsub.f32 %v12451_v56, %v9861_v8  ;;  %v12461_v2 = vld [vmem:[#allocation66_spill] sm:$0xff] }
 0x22e   :  { %v1974_v5 = vmul.f32 %v1846_v30, %v1846_v30  ;;  %v1935_v14 = vsub.f32 %v12454_v23, %v9861_v8  ;;  %v10063_v56 = vmul.f32 %v1957_v13, %v1957_v13  ;;  %12457 = vst [vmem:[#allocation138_spill] sm:$0xff] %v10065_v46  ;;  %v10075_v28 = vsub.f32 %v12461_v2, %v9861_v8  ;;  %v12463_v36 = vld [vmem:[#allocation70_spill] sm:$0xff] }
 0x22f   :  { %v10079_v23 = vsub.f32 %v12463_v36, %v9861_v8  ;;  %v2023_v13 = vmul.f32 %v1895_v54, %v1895_v54  ;;  %v2031_v33 = vmul.f32 %v1903_v12, %v1903_v12  ;;  %v2039_v61 = vmul.f32 %v1911_v29, %v1911_v29  ;;  %v12471_v54 = vld [vmem:[#allocation45_spill] sm:$0xff]  ;;  %v12472_v36 = vld [vmem:[#allocation44_spill] sm:$0xff] }
 0x230   :  { %12456 = vst [vmem:[#allocation137_spill] sm:$0xff] %v10063_v56  ;;  %12462 = vst [vmem:[#allocation141_spill] sm:$0xff] %v10075_v28  ;;  %v10085_v46 = vmul.f32 %v1919_v7, %v1919_v7  ;;  %v2122_v56 = vadd.f32 %v1982_v43, %v1974_v5  ;;  %v10091_v2 = vmul.f32 %v1927_v63, %v1927_v63  ;;  %v12474_v29 = vld [vmem:[#allocation52_spill] sm:$0xff]  ;;  %v12475_v5 = vld [vmem:[#allocation55_spill] sm:$0xff] }
 0x231   :  { %v10061_v41 = vpop.f32.mrb[60].mxu0  ;;  %v10069_v30 = vpop.f32.mrb[60].mxu1  ;;  %12464 = vst [vmem:[#allocation142_spill] sm:$0xff] %v10079_v23  ;;  %v10093_v28 = vmul.f32 %v1935_v14, %v1935_v14  ;;  %v1848_v12 = vsub.f32 %v12471_v54, %v10059_v17  ;;  %v1856_v23 = vsub.f32 %v12472_v36, %v10059_v17  ;;  %v2148_v20 = vadd.f32 %v2147_v51, %v2023_v13  ;;  %v12476_v63 = vld [vmem:[#allocation60_spill] sm:$0xff]  ;;  %v12479_v36 = vld [vmem:[#allocation71_spill] sm:$0xff] }
 0x232   :  { %12455 = vst [vmem:[#allocation136_spill] sm:$0xff] %v10061_v41  ;;  %12459 = vst [vmem:[#allocation139_spill] sm:$0xff] %v10069_v30  ;;  %v10071_v50 = vpop.f32.mrb[61].mxu0  ;;  %v10081_v31 = vpop.f32.mrb[61].mxu1  ;;  %v1870_v7 = vsub.f32 %v12474_v29, %v9993_v21  ;;  %v1878_v19 = vsub.f32 %v12475_v5, %v9993_v21  ;;  %v1990_v43 = vmul.f32 %v1862_v53, %v1862_v53  ;;  %v12478_v54 = vld [vmem:[#allocation68_spill] sm:$0xff]  ;;  %v12480_v29 = vld [vmem:[#allocation75_spill] sm:$0xff] }
 0x233   :  { %12460 = vst [vmem:[#allocation140_spill] sm:$0xff] %v10071_v50  ;;  %12465 = vst [vmem:[#allocation143_spill] sm:$0xff] %v10081_v31  ;;  %v10083_v11 = vpop.f32.mrb[62].mxu0  ;;  %v10087_v50 = vpop.f32.mrb[62].mxu1  ;;  %v1886_v14 = vsub.f32 %v12476_v63, %v9993_v21  ;;  %v8349_v51 = vld [vmem:[#allocation11 + $0x4] ss:$16 sps:$4 sm:$0xff]   ;;  %v1918_v31 = vsub.f32 %v12480_v29, %v9993_v21  ;;  %v1984_v16 = vmul.f32 %v1856_v23, %v1856_v23 }
 0x234   :  { %12466 = vst [vmem:[#allocation144_spill] sm:$0xff] %v10083_v11  ;;  %12467 = vst [vmem:[#allocation145_spill] sm:$0xff] %v10087_v50  ;;  %v10089_v30 = vpop.f32.mrb[63].mxu0  ;;  %v10099_v8 = vpop.f32.mrb[63].mxu1  ;;  %v1902_v50 = vsub.f32 %v12478_v54, %v9993_v21  ;;  %v8352_v13 = vld [vmem:[#allocation11 + $0xc] ss:$16 sps:$4 sm:$0xff]   ;;  %v2111_v11 = vadd.f32 %v2110_v42, %v2061_v3  ;;  %v2123_v41 = vadd.f32 %v2122_v56, %v1990_v43  ;;  %3381 = vmatprep.subr.bf16.mxu0 %v8349_v51 }
 0x235   :  { %12468 = vst [vmem:[#allocation146_spill] sm:$0xff] %v10089_v30  ;;  %12469 = vst [vmem:[#allocation147_spill] sm:$0xff] %v10091_v2  ;;  %v12481_v53 = vld [vmem:[#allocation79_spill] sm:$0xff]  ;;  %v8350_v2 = vld [vmem:[#allocation11 + $0x8] ss:$16 sps:$4 sm:$0xff]   ;;  %v2149_v3 = vadd.f32 %v2148_v20, %v2031_v33  ;;  %v1998_v42 = vmul.f32 %v1870_v7, %v1870_v7  ;;  %v2006_v48 = vmul.f32 %v1878_v19, %v1878_v19  ;;  %v10124_v29 = vmax.f32 %v10001_v18, 0.0 }
 0x236   :  { %12470 = vst [vmem:[#allocation148_spill] sm:$0xff] %v10093_v28  ;;  %12473 = vst [vmem:[#allocation149_spill] sm:$0xff] %v10099_v8  ;;  %v12477_v28 = vld [vmem:[#allocation61_spill] sm:$0xff]  ;;  %v1910_v8 = vsub.f32 %v12479_v36, %v9993_v21  ;;  %v1926_v5 = vsub.f32 %v12481_v53, %v9993_v21  ;;  %v12482_v54 = vld [vmem:[#allocation83_spill] sm:$0xff]  ;;  %v1976_v36 = vmul.f32 %v1848_v12, %v1848_v12  ;;  %3494 = vmatprep.subr.bf16.mxu1 %v8352_v13 }
 0x237   :  { %v1894_v30 = vsub.f32 %v12477_v28, %v9993_v21  ;;  %v8347_v63 = vld [vmem:[#allocation11] ss:$16 sps:$4 sm:$0xff]   ;;  %v1934_v28 = vsub.f32 %v9747_v40, %v9993_v21  ;;  %v10121_v57 = vsub.f32 %v12482_v54, %v9993_v21  ;;  %v2014_v56 = vmul.f32 %v1886_v14, %v1886_v14  ;;  %v12483_v40 = vld [vmem:[#allocation48_spill] sm:$0xff]  ;;  %3495 = vmatpush1.bf16.msra.mxu1 %v8350_v2  ;;  %v8355_v12 = vld [vmem:[#allocation11 + $0x24] ss:$16 sps:$4 sm:$0xff]  }
 0x238   :  { %3382 = vmatpush1.bf16.msra.mxu0 %v8347_v63  ;;  %v10128_v53 = vmul.f32 %v1902_v50, %v1902_v50  ;;  %v1864_v54 = vsub.f32 %v12483_v40, %v10059_v17  ;;  %v8358_v23 = vld [vmem:[#allocation11 + $0x2c] ss:$16 sps:$4 sm:$0xff]   ;;  %v2112_v33 = vadd.f32 %v2111_v11, %v10043_v0  ;;  %v10133_v20 = vmul.f32 %v1910_v8, %v1910_v8  ;;  %v8353_v19 = vld [vmem:[#allocation11 + $0x20] ss:$16 sps:$4 sm:$0xff]   ;;  %v8356_v14 = vld [vmem:[#allocation11 + $0x28] ss:$16 sps:$4 sm:$0xff]  }
 0x239   :  { %v10126_v43 = vmul.f32 %v1894_v30, %v1894_v30  ;;  %v10135_v7 = vmul.f32 %v1918_v31, %v1918_v31  ;;  %v2124_v18 = vadd.f32 %v2123_v41, %v1998_v42  ;;  %v10137_v63 = vmul.f32 %v1926_v5, %v1926_v5  ;;  %3383 = vmatprep.subr.bf16.mxu0 %v8355_v12  ;;  %v12484_v41 = vld [vmem:[#allocation53_spill] sm:$0xff]  ;;  %v8362_v42 = vld [vmem:[#allocation11 + $0x48] ss:$16 sps:$4 sm:$0xff]  }
 0x23a   :  { %v10139_v30 = vmul.f32 %v1934_v28, %v1934_v28  ;;  %v2164_v50 = vadd.f32 %v1984_v16, %v1976_v36  ;;  %3496 = vmatprep.subr.bf16.mxu1 %v8358_v23  ;;  %v2150_v51 = vadd.f32 %v2149_v3, %v2039_v61  ;;  %v1754_v2 = vadd.f32 %v9969_v45, %v10015_v35  ;;  %v12485_v28 = vld [vmem:[#allocation59_spill] sm:$0xff]  ;;  %v8364_v45 = vld [vmem:[#allocation11 + $0x4c] ss:$16 sps:$4 sm:$0xff]  }
 0x23b   :  { %v1796_v8 = vadd.f32 %v9977_v58, %v10017_v55  ;;  %v1775_v0 = vadd.f32 %v9981_v26, %v10124_v29  ;;  %v1872_v31 = vsub.f32 %v12484_v41, %v10059_v17  ;;  %v1880_v16 = vsub.f32 %v12485_v28, %v10059_v17  ;;  %3497 = vmatpush1.bf16.msra.mxu1 %v8356_v14  ;;  %v8361_v11 = vld [vmem:[#allocation11 + $0x44] ss:$16 sps:$4 sm:$0xff]   ;;  %v8359_v3 = vld [vmem:[#allocation11 + $0x40] ss:$16 sps:$4 sm:$0xff]   ;;  %v12510_v40 = vld [vmem:[#allocation108_spill] sm:$0xff] }
 0x23c   :  { %3384 = vmatpush1.bf16.msra.mxu0 %v8353_v19  ;;  %v1992_v36 = vmul.f32 %v1864_v54, %v1864_v54  ;;  %v1362_v61 = vadd.f32 %v9786_v59, %v9889_v62  ;;  %v10154_v5 = vadd.f32 %v2112_v33, %v10053_v32  ;;  %v2125_v58 = vadd.f32 %v2124_v18, %v2006_v48  ;;  %v12486_v54 = vld [vmem:[#allocation65_spill] sm:$0xff]  ;;  %v12487_v59 = vld [vmem:[#allocation67_spill] sm:$0xff] }
 0x23d   :  { %v1475_v26 = vadd.f32 %v9791_v25, %v9893_v52  ;;  %v1364_v13 = vadd.f32 %v9793_v1, %v9901_v60  ;;  %v1888_v12 = vsub.f32 %v12486_v54, %v10059_v17  ;;  %v10164_v23 = vsub.f32 %v12487_v59, %v10059_v17  ;;  %3385 = vmatprep.subr.bf16.mxu0 %v8361_v11  ;;  %v12489_v18 = vld [vmem:[#allocation73_spill] sm:$0xff]  ;;  %v12509_v41 = vld [vmem:[#allocation107_spill] sm:$0xff] }
 0x23e   :  { %v2165_v19 = vadd.f32 %v2164_v50, %v1992_v36  ;;  %v1368_v32 = vadd.f32 %v9817_v24, %v9889_v62  ;;  %v10169_v48 = vadd.f32 %v2150_v51, %v10085_v46  ;;  %v10172_v25 = vmax.f32 %v10021_v34, 0.0  ;;  %3498 = vmatprep.subr.bf16.mxu1 %v8364_v45  ;;  %v8367_v34 = vld [vmem:[#allocation11 + $0x64] ss:$16 sps:$4 sm:$0xff]   ;;  %v8368_v45 = vld [vmem:[#allocation11 + $0x68] ss:$16 sps:$4 sm:$0xff]  }
 0x23f   :  { %v1481_v1 = vadd.f32 %v9819_v15, %v9893_v52  ;;  %v1370_v33 = vadd.f32 %v9821_v6, %v9901_v60  ;;  %v10180_v50 = vsub.f32 %v12489_v18, %v10059_v17  ;;  %v2000_v24 = vmul.f32 %v1872_v31, %v1872_v31  ;;  %3499 = vmatpush1.bf16.msra.mxu1 %v8362_v42  ;;  %v8365_v6 = vld [vmem:[#allocation11 + $0x60] ss:$16 sps:$4 sm:$0xff]   ;;  %v12491_v31 = vld [vmem:[#allocation92_spill] sm:$0xff] }
 0x240   :  { %12488 = vst [vmem:[#allocation150_spill] sm:$0xff] %v10172_v25  ;;  %3386 = vmatpush1.bf16.msra.mxu0 %v8359_v3  ;;  %v10182_v14 = vmax.f32 %v1362_v61, 0.0  ;;  %v1477_v46 = vadd.f32 %v9798_v9, %v9909_v22  ;;  %v2126_v51 = vadd.f32 %v2125_v58, %v2014_v56  ;;  %v2008_v36 = vmul.f32 %v1880_v16, %v1880_v16  ;;  %v12492_v18 = vld [vmem:[#allocation93_spill] sm:$0xff]  ;;  %v8370_v9 = vld [vmem:[#allocation11 + $0x6c] ss:$16 sps:$4 sm:$0xff]  }
 0x241   :  { %v10186_v15 = vmax.f32 %v1475_v26, 0.0  ;;  %v10188_v11 = vmax.f32 %v1364_v13, 0.0  ;;  %v2166_v3 = vadd.f32 %v2165_v19, %v2000_v24  ;;  %v10190_v59 = vmax.f32 %v1368_v32, 0.0  ;;  %3387 = vmatprep.subr.bf16.mxu0 %v8367_v34  ;;  %v12495_v58 = vld [vmem:[#allocation94_spill] sm:$0xff]  ;;  %3500 = vmatprep.subr.bf16.mxu1 %v8370_v9 }
 0x242   :  { %v1483_v61 = vadd.f32 %v12491_v31, %v9909_v22  ;;  %v1372_v54 = vadd.f32 %v12492_v18, %v9889_v62  ;;  %v10196_v42 = vmax.f32 %v1481_v1, 0.0  ;;  %v10198_v56 = vmax.f32 %v1370_v33, 0.0  ;;  %v12497_v18 = vld [vmem:[#allocation97_spill] sm:$0xff]  ;;  %v8374_v9 = vld [vmem:[#allocation11 + $0x88] ss:$16 sps:$4 sm:$0xff]  }
 0x243   :  { %12490 = vst [vmem:[#allocation151_spill] sm:$0xff] %v10186_v15  ;;  %v1485_v16 = vadd.f32 %v9829_v37, %v9893_v52  ;;  %v1374_v26 = vadd.f32 %v12495_v58, %v9901_v60  ;;  %v1817_v13 = vadd.f32 %v9985_v49, %v10172_v25  ;;  %v1755_v19 = vadd.f32 %v1754_v2, %v10182_v14  ;;  %v8373_v33 = vld [vmem:[#allocation11 + $0x84] ss:$16 sps:$4 sm:$0xff]   ;;  %v8371_v49 = vld [vmem:[#allocation11 + $0x80] ss:$16 sps:$4 sm:$0xff]  }
 0x244   :  { %12493 = vst [vmem:[#allocation92_spill] sm:$0xff] %v10196_v42  ;;  %12494 = vst [vmem:[#allocation93_spill] sm:$0xff] %v10198_v56  ;;  %3388 = vmatpush1.bf16.msra.mxu0 %v8365_v6  ;;  %v10207_v32 = vmax.f32 %v1477_v46, 0.0  ;;  %v1378_v1 = vadd.f32 %v12497_v18, %v9889_v62  ;;  %v1797_v24 = vadd.f32 %v1796_v8, %v10186_v15  ;;  %3501 = vmatpush1.bf16.msra.mxu1 %v8368_v45  ;;  %v8376_v8 = vld [vmem:[#allocation11 + $0x8c] ss:$16 sps:$4 sm:$0xff]  }
 0x245   :  { %v1776_v37 = vadd.f32 %v1775_v0, %v10188_v11  ;;  %v1491_v34 = vadd.f32 %v9845_v27, %v9893_v52  ;;  %v1380_v6 = vadd.f32 %v9847_v39, %v9901_v60  ;;  %v2167_v2 = vadd.f32 %v2166_v3, %v2008_v36  ;;  %3389 = vmatprep.subr.bf16.mxu0 %v8373_v33  ;;  %v12502_v45 = vld [vmem:[#allocation96_spill] sm:$0xff] }
 0x246   :  { %12496 = vst [vmem:[#allocation94_spill] sm:$0xff] %v10207_v32  ;;  %v1756_v46 = vadd.f32 %v1755_v19, %v10190_v59  ;;  %v10218_v31 = vmax.f32 %v1483_v61, 0.0  ;;  %v10220_v58 = vmax.f32 %v1372_v54, 0.0  ;;  %v1798_v0 = vadd.f32 %v1797_v24, %v10196_v42  ;;  %3502 = vmatprep.subr.bf16.mxu1 %v8376_v8  ;;  %v8379_v61 = vld [vmem:[#allocation11 + $0xa4] ss:$16 sps:$4 sm:$0xff]  }
 0x247   :  { %v1777_v18 = vadd.f32 %v1776_v37, %v10198_v56  ;;  %v10224_v27 = vmax.f32 %v1485_v16, 0.0  ;;  %v10226_v28 = vmax.f32 %v1374_v26, 0.0  ;;  %v2127_v39 = vadd.f32 %v2126_v51, %v10126_v43  ;;  %v8377_v26 = vld [vmem:[#allocation11 + $0xa0] ss:$16 sps:$4 sm:$0xff]   ;;  %v8380_v43 = vld [vmem:[#allocation11 + $0xa8] ss:$16 sps:$4 sm:$0xff]  }
 0x248   :  { %12498 = vst [vmem:[#allocation97_spill] sm:$0xff] %v10218_v31  ;;  %12499 = vst [vmem:[#allocation152_spill] sm:$0xff] %v10220_v58  ;;  %3390 = vmatpush1.bf16.msra.mxu0 %v8371_v49  ;;  %v2016_v36 = vmul.f32 %v1888_v12, %v1888_v12  ;;  %v1487_v3 = vadd.f32 %v12502_v45, %v9909_v22  ;;  %v10231_v54 = vmax.f32 %v1378_v1, 0.0  ;;  %v10234_v33 = vmax.f32 %v1491_v34, 0.0  ;;  %v12505_v51 = vld [vmem:[#allocation98_spill] sm:$0xff]  ;;  %v12506_v37 = vld [vmem:[#allocation99_spill] sm:$0xff] }
 0x249   :  { %12500 = vst [vmem:[#allocation153_spill] sm:$0xff] %v10224_v27  ;;  %12501 = vst [vmem:[#allocation154_spill] sm:$0xff] %v10226_v28  ;;  %v1818_v19 = vadd.f32 %v1817_v13, %v10207_v32  ;;  %v10236_v24 = vmax.f32 %v1380_v6, 0.0  ;;  %v1382_v16 = vadd.f32 %v9851_v44, %v9889_v62  ;;  %3503 = vmatpush1.bf16.msra.mxu1 %v8374_v9  ;;  %v12507_v13 = vld [vmem:[#allocation100_spill] sm:$0xff]  ;;  %3391 = vmatprep.subr.bf16.mxu0 %v8379_v61  ;;  %v8385_v61 = vld [vmem:[#allocation11 + $0xc4] ss:$16 sps:$4 sm:$0xff]  }
 0x24a   :  { %12503 = vst [vmem:[#allocation96_spill] sm:$0xff] %v10234_v33  ;;  %v1757_v12 = vadd.f32 %v1756_v46, %v10220_v58  ;;  %v1493_v1 = vadd.f32 %v12505_v51, %v9909_v22  ;;  %v1495_v49 = vadd.f32 %v12506_v37, %v9893_v52  ;;  %v1384_v34 = vadd.f32 %v12507_v13, %v9901_v60  ;;  %v8382_v6 = vld [vmem:[#allocation11 + $0xac] ss:$16 sps:$4 sm:$0xff]  }
 0x24b   :  { %12504 = vst [vmem:[#allocation155_spill] sm:$0xff] %v10236_v24  ;;  %v2168_v8 = vadd.f32 %v2167_v2, %v2016_v36  ;;  %v1819_v45 = vadd.f32 %v1818_v19, %v10218_v31  ;;  %v1799_v44 = vadd.f32 %v1798_v0, %v10224_v27  ;;  %v1778_v9 = vadd.f32 %v1777_v18, %v10226_v28  ;;  %v8388_v2 = vld [vmem:[#allocation11 + $0xcc] ss:$16 sps:$4 sm:$0xff]   ;;  %v12511_v18 = vld [vmem:[#allocation109_spill] sm:$0xff] }
 0x24c   :  { %3392 = vmatpush1.bf16.msra.mxu0 %v8377_v26  ;;  %v10250_v46 = vmax.f32 %v1487_v3, 0.0  ;;  %v1758_v51 = vadd.f32 %v1757_v12, %v10231_v54  ;;  %v1388_v37 = vadd.f32 %v12509_v41, %v9889_v62  ;;  %v1501_v13 = vadd.f32 %v12510_v40, %v9893_v52  ;;  %3504 = vmatprep.subr.bf16.mxu1 %v8382_v6  ;;  %v8383_v26 = vld [vmem:[#allocation11 + $0xc0] ss:$16 sps:$4 sm:$0xff]   ;;  %v8386_v12 = vld [vmem:[#allocation11 + $0xc8] ss:$16 sps:$4 sm:$0xff]  }
 0x24d   :  { %v1800_v36 = vadd.f32 %v1799_v44, %v10234_v33  ;;  %v1779_v0 = vadd.f32 %v1778_v9, %v10236_v24  ;;  %v10259_v19 = vmax.f32 %v1382_v16, 0.0  ;;  %v1390_v3 = vadd.f32 %v12511_v18, %v9901_v60  ;;  %3505 = vmatpush1.bf16.msra.mxu1 %v8380_v43  ;;  %v12515_v6 = vld [vmem:[#allocation101_spill] sm:$0xff]  ;;  %3393 = vmatprep.subr.bf16.mxu0 %v8385_v61  ;;  %v12520_v18 = vld [vmem:[#allocation110_spill] sm:$0xff] }
 0x24e   :  { %12508 = vst [vmem:[#allocation98_spill] sm:$0xff] %v10250_v46  ;;  %v10263_v31 = vmax.f32 %v1493_v1, 0.0  ;;  %v10265_v41 = vmax.f32 %v1495_v49, 0.0  ;;  %v10267_v40 = vmax.f32 %v1384_v34, 0.0  ;;  %v1497_v32 = vadd.f32 %v12515_v6, %v9909_v22  ;;  %3506 = vmatprep.subr.bf16.mxu1 %v8388_v2  ;;  %v12516_v16 = vld [vmem:[#allocation77_spill] sm:$0xff]  ;;  %v12518_v49 = vld [vmem:[#allocation80_spill] sm:$0xff] }
 0x24f   :  { %v10273_v44 = vsub.f32 %v12516_v16, %v10059_v17  ;;  %v2024_v43 = vmul.f32 %v10164_v23, %v10164_v23  ;;  %v10277_v9 = vmax.f32 %v1388_v37, 0.0  ;;  %v1503_v1 = vadd.f32 %v9895_v47, %v9909_v22  ;;  %v8391_v16 = vld [vmem:[#allocation11 + $0xe4] ss:$16 sps:$4 sm:$0xff]   ;;  %v8394_v25 = vld [vmem:[#allocation11 + $0xec] ss:$16 sps:$4 sm:$0xff]  }
 0x250   :  { %12512 = vst [vmem:[#allocation99_spill] sm:$0xff] %v10263_v31  ;;  %12513 = vst [vmem:[#allocation100_spill] sm:$0xff] %v10265_v41  ;;  %3394 = vmatpush1.bf16.msra.mxu0 %v8383_v26  ;;  %v10283_v34 = vsub.f32 %v12518_v49, %v10059_v17  ;;  %v1820_v61 = vadd.f32 %v1819_v45, %v10250_v46  ;;  %v10286_v2 = vmax.f32 %v1501_v13, 0.0  ;;  %v10292_v47 = vmax.f32 %v1390_v3, 0.0  ;;  %v8389_v26 = vld [vmem:[#allocation11 + $0xe0] ss:$16 sps:$4 sm:$0xff]  }
 0x251   :  { %12514 = vst [vmem:[#allocation107_spill] sm:$0xff] %v10267_v40  ;;  %12517 = vst [vmem:[#allocation108_spill] sm:$0xff] %v10277_v9  ;;  %v1392_v6 = vadd.f32 %v12520_v18, %v9889_v62  ;;  %v2128_v23 = vadd.f32 %v2127_v39, %v10128_v53  ;;  %v2169_v37 = vadd.f32 %v2168_v8, %v2024_v43  ;;  %3507 = vmatpush1.bf16.msra.mxu1 %v8386_v12  ;;  %v8392_v49 = vld [vmem:[#allocation11 + $0xe8] ss:$16 sps:$4 sm:$0xff]   ;;  %v12524_v8 = vld [vmem:[#allocation111_spill] sm:$0xff] }
 0x252   :  { %12519 = vst [vmem:[#allocation109_spill] sm:$0xff] %v10286_v2  ;;  %v1759_v24 = vadd.f32 %v1758_v51, %v10259_v19  ;;  %12521 = vst [vmem:[#allocation101_spill] sm:$0xff] %v10292_v47  ;;  %v1821_v28 = vadd.f32 %v1820_v61, %v10263_v31  ;;  %v1801_v45 = vadd.f32 %v1800_v36, %v10265_v41  ;;  %v10297_v46 = vmax.f32 %v1497_v32, 0.0  ;;  %v12525_v3 = vld [vmem:[#allocation112_spill] sm:$0xff]  ;;  %v12527_v32 = vld [vmem:[#allocation115_spill] sm:$0xff] }
 0x253   :  { %v1780_v13 = vadd.f32 %v1779_v0, %v10267_v40  ;;  %3395 = vmatprep.subr.bf16.mxu0 %v8391_v16  ;;  %3508 = vmatprep.subr.bf16.mxu1 %v8394_v25  ;;  %v10300_v39 = vmax.f32 %v1503_v1, 0.0  ;;  %v1505_v51 = vadd.f32 %v12524_v8, %v9893_v52  ;;  %v1394_v12 = vadd.f32 %v12525_v3, %v9901_v60  ;;  %v8401_v16 = vld [vmem:[#allocation10 + $0xc] ss:$16 sps:$4 sm:$0xff]   ;;  %v12532_v3 = vld [vmem:[#allocation113_spill] sm:$0xff] }
 0x254   :  { %12522 = vst [vmem:[#allocation110_spill] sm:$0xff] %v10297_v46  ;;  %v1760_v53 = vadd.f32 %v1759_v24, %v10277_v9  ;;  %3396 = vmatpush1.bf16.msra.mxu0 %v8389_v26  ;;  %v1802_v43 = vadd.f32 %v1801_v45, %v10286_v2  ;;  %v10307_v36 = vmax.f32 %v1392_v6, 0.0  ;;  %v1398_v0 = vadd.f32 %v12527_v32, %v9889_v62  ;;  %v8398_v24 = vld [vmem:[#allocation10 + $0x4] ss:$16 sps:$4 sm:$0xff]   ;;  %v12531_v6 = vld [vmem:[#allocation82_spill] sm:$0xff] }
 0x255   :  { %12523 = vst [vmem:[#allocation156_spill] sm:$0xff] %v10300_v39  ;;  %v1511_v25 = vadd.f32 %v9941_v4, %v9893_v52  ;;  %v1781_v1 = vadd.f32 %v1780_v13, %v10292_v47  ;;  %v10314_v61 = vmax.f32 %v1505_v51, 0.0  ;;  %v10316_v18 = vmax.f32 %v1394_v12, 0.0  ;;  %v12530_v26 = vld [vmem:[#allocation117_spill] sm:$0xff]  ;;  %3509 = vmatpush1.bf16.msra.mxu1 %v8392_v49  ;;  %4887 = vmatprep.subr.bf16.mxu0 %v8398_v24 }
 0x256   :  { %12526 = vst [vmem:[#allocation111_spill] sm:$0xff] %v10307_v36  ;;  %v1400_v8 = vadd.f32 %v12530_v26, %v9901_v60  ;;  %v1928_v45 = vsub.f32 %v12531_v6, %v10059_v17  ;;  %v1507_v32 = vadd.f32 %v12532_v3, %v9909_v22  ;;  %v10324_v31 = vmax.f32 %v1398_v0, 0.0  ;;  %5339 = vmatprep.subr.bf16.mxu1 %v8401_v16 }
 0x257   :  { %12528 = vst [vmem:[#allocation112_spill] sm:$0xff] %v10314_v61  ;;  %12529 = vst [vmem:[#allocation115_spill] sm:$0xff] %v10316_v18  ;;  %v10326_v4 = vmax.f32 %v1511_v25, 0.0  ;;  %v2129_v13 = vadd.f32 %v2128_v23, %v10133_v20  ;;  %v2032_v51 = vmul.f32 %v10180_v50, %v10180_v50  ;;  %v1822_v12 = vadd.f32 %v1821_v28, %v10297_v46  ;;  %v12536_v25 = vld [vmem:[#allocation122_spill] sm:$0xff] }
 0x258   :  { %12533 = vst [vmem:[#allocation117_spill] sm:$0xff] %v10324_v31  ;;  %v10332_v49 = vmax.f32 %v1400_v8, 0.0  ;;  %v1761_v26 = vadd.f32 %v1760_v53, %v10307_v36  ;;  %v1803_v6 = vadd.f32 %v1802_v43, %v10314_v61  ;;  %v1513_v0 = vadd.f32 %v9953_v10, %v9909_v22  ;;  %v12538_v8 = vld [vmem:[#allocation123_spill] sm:$0xff] }
 0x259   :  { %12534 = vst [vmem:[#allocation113_spill] sm:$0xff] %v10326_v4  ;;  %v1402_v24 = vadd.f32 %v12536_v25, %v9889_v62  ;;  %v2170_v16 = vadd.f32 %v2169_v37, %v2032_v51  ;;  %v1823_v20 = vadd.f32 %v1822_v12, %v10300_v39  ;;  %v1782_v23 = vadd.f32 %v1781_v1, %v10316_v18  ;;  %v12540_v37 = vld [vmem:[#allocation127_spill] sm:$0xff]  ;;  %v12541_v1 = vld [vmem:[#allocation128_spill] sm:$0xff] }
 0x25a   :  { %12535 = vst [vmem:[#allocation157_spill] sm:$0xff] %v10332_v49  ;;  %v1515_v28 = vadd.f32 %v9959_v38, %v9893_v52  ;;  %v10344_v50 = vmax.f32 %v1507_v32, 0.0  ;;  %v1762_v53 = vadd.f32 %v1761_v26, %v10324_v31  ;;  %v1804_v43 = vadd.f32 %v1803_v6, %v10326_v4  ;;  %v12545_v6 = vld [vmem:[#allocation126_spill] sm:$0xff] }
 0x25b   :  { %v1404_v10 = vadd.f32 %v12538_v8, %v9901_v60  ;;  %v1783_v3 = vadd.f32 %v1782_v23, %v10332_v49  ;;  %v10351_v25 = vmax.f32 %v1402_v24, 0.0  ;;  %v1408_v51 = vadd.f32 %v12540_v37, %v9889_v62  ;;  %v12546_v8 = vld [vmem:[#allocation147_spill] sm:$0xff]  ;;  %v12547_v24 = vld [vmem:[#allocation84_spill] sm:$0xff] }
 0x25c   :  { %12537 = vst [vmem:[#allocation122_spill] sm:$0xff] %v10344_v50  ;;  %v1521_v12 = vadd.f32 %v12541_v1, %v9893_v52  ;;  %v10357_v38 = vmax.f32 %v1513_v0, 0.0  ;;  %v10359_v32 = vmax.f32 %v1515_v28, 0.0  ;;  %v1517_v39 = vadd.f32 %v12545_v6, %v9909_v22  ;;  %v12550_v6 = vld [vmem:[#allocation129_spill] sm:$0xff] }
 0x25d   :  { %12539 = vst [vmem:[#allocation123_spill] sm:$0xff] %v10351_v25  ;;  %v10361_v26 = vmax.f32 %v1404_v10, 0.0  ;;  %v10367_v23 = vadd.f32 %v10169_v48, %v12546_v8  ;;  %v10371_v46 = vsub.f32 %v12547_v24, %v10059_v17  ;;  %v2040_v37 = vmul.f32 %v10273_v44, %v10273_v44 }
 0x25e   :  { %12542 = vst [vmem:[#allocation127_spill] sm:$0xff] %v10357_v38  ;;  %12543 = vst [vmem:[#allocation128_spill] sm:$0xff] %v10359_v32  ;;  %v10375_v0 = vmax.f32 %v1408_v51, 0.0  ;;  %v2048_v28 = vmul.f32 %v10283_v34, %v10283_v34  ;;  %v1824_v10 = vadd.f32 %v1823_v20, %v10344_v50  ;;  %v10380_v1 = vmax.f32 %v1521_v12, 0.0 }
 0x25f   :  { %12544 = vst [vmem:[#allocation158_spill] sm:$0xff] %v10361_v26  ;;  %v1410_v48 = vadd.f32 %v12550_v6, %v9901_v60  ;;  %v2130_v8 = vadd.f32 %v2129_v13, %v10135_v7  ;;  %v2056_v49 = vmul.f32 %v1928_v45, %v1928_v45  ;;  %v2171_v24 = vadd.f32 %v2170_v16, %v2040_v37  ;;  %v12553_v6 = vld [vmem:[#allocation131_spill] sm:$0xff]  ;;  %v12554_v7 = vld [vmem:[#allocation132_spill] sm:$0xff]  ;;  %v12555_v16 = vld [vmem:[#allocation133_spill] sm:$0xff] }
 0x260   :  { %12548 = vst [vmem:[#allocation126_spill] sm:$0xff] %v10375_v0  ;;  %12549 = vst [vmem:[#allocation147_spill] sm:$0xff] %v10380_v1  ;;  %v1763_v18 = vadd.f32 %v1762_v53, %v10351_v25  ;;  %v1825_v44 = vadd.f32 %v1824_v10, %v10357_v38  ;;  %v1805_v51 = vadd.f32 %v1804_v43, %v10359_v32  ;;  %v10389_v34 = vmax.f32 %v1517_v39, 0.0  ;;  %v12556_v43 = vld [vmem:[#allocation134_spill] sm:$0xff]  ;;  %v12557_v39 = vld [vmem:[#allocation136_spill] sm:$0xff] }
 0x261   :  { %v1784_v47 = vadd.f32 %v1783_v3, %v10361_v26  ;;  %v10392_v12 = vmax.f32 %v1410_v48, 0.0  ;;  %v1523_v50 = vadd.f32 %v12553_v6, %v9909_v22  ;;  %v1412_v45 = vadd.f32 %v12554_v7, %v9889_v62  ;;  %v12560_v48 = vld [vmem:[#allocation135_spill] sm:$0xff] }
 0x262   :  { %12551 = vst [vmem:[#allocation129_spill] sm:$0xff] %v10389_v34  ;;  %v1764_v20 = vadd.f32 %v1763_v18, %v10375_v0  ;;  %v1806_v13 = vadd.f32 %v1805_v51, %v10380_v1  ;;  %v1525_v53 = vadd.f32 %v12555_v16, %v9893_v52  ;;  %v1414_v3 = vadd.f32 %v12556_v43, %v9901_v60  ;;  %v12561_v7 = vld [vmem:[#allocation139_spill] sm:$0xff] }
 0x263   :  { %12552 = vst [vmem:[#allocation159_spill] sm:$0xff] %v10392_v12  ;;  %v1418_v37 = vadd.f32 %v12557_v39, %v9889_v62  ;;  %v10405_v18 = vmax.f32 %v1523_v50, 0.0  ;;  %v10407_v10 = vmax.f32 %v1412_v45, 0.0  ;;  %v1527_v6 = vadd.f32 %v12560_v48, %v9909_v22  ;;  %v12565_v45 = vld [vmem:[#allocation140_spill] sm:$0xff]  ;;  %v8415_v32 = vld [vmem:[#allocation10 + $0x60] ss:$16 sps:$4 sm:$0xff]  }
 0x264   :  { %v1531_v38 = vadd.f32 %v12561_v7, %v9893_v52  ;;  %v2172_v51 = vadd.f32 %v2171_v24, %v2048_v28  ;;  %v1826_v26 = vadd.f32 %v1825_v44, %v10389_v34  ;;  %v10414_v16 = vmax.f32 %v1525_v53, 0.0  ;;  %v12567_v24 = vld [vmem:[#allocation143_spill] sm:$0xff]  ;;  %v12568_v44 = vld [vmem:[#allocation144_spill] sm:$0xff] }
 0x265   :  { %12558 = vst [vmem:[#allocation131_spill] sm:$0xff] %v10405_v18  ;;  %12559 = vst [vmem:[#allocation132_spill] sm:$0xff] %v10407_v10  ;;  %v10416_v40 = vmax.f32 %v1418_v37, 0.0  ;;  %v1785_v43 = vadd.f32 %v1784_v47, %v10392_v12  ;;  %v1765_v50 = vadd.f32 %v1764_v20, %v10407_v10  ;;  %v1420_v56 = vadd.f32 %v12565_v45, %v9901_v60  ;;  %v12570_v20 = vld [vmem:[#allocation145_spill] sm:$0xff]  ;;  %v8395_v45 = vld [vmem:[#allocation5] sm:$0xff]  }
 0x266   :  { %12562 = vst [vmem:[#allocation133_spill] sm:$0xff] %v10414_v16  ;;  %v10420_v39 = vmax.f32 %v1531_v38, 0.0  ;;  %v1807_v48 = vadd.f32 %v1806_v13, %v10414_v16  ;;  %v10425_v1 = vmax.f32 %v1414_v3, 0.0  ;;  %v1533_v28 = vadd.f32 %v12567_v24, %v9909_v22  ;;  %v8396_v34 = vld [vmem:[#allocation10] ss:$16 sps:$4 sm:$0xff]   ;;  %v12573_v24 = vld [vmem:[#allocation146_spill] sm:$0xff] }
 0x267   :  { %12563 = vst [vmem:[#allocation134_spill] sm:$0xff] %v10416_v40  ;;  %v1422_v53 = vadd.f32 %v12568_v44, %v9889_v62  ;;  %v1827_v37 = vadd.f32 %v1826_v26, %v10405_v18  ;;  %v10432_v47 = vmax.f32 %v1527_v6, 0.0  ;;  %v1766_v38 = vadd.f32 %v1765_v50, %v10416_v40  ;;  %v8399_v44 = vld [vmem:[#allocation10 + $0x8] ss:$16 sps:$4 sm:$0xff]   ;;  %v8404_v26 = vld [vmem:[#allocation10 + $0x24] ss:$16 sps:$4 sm:$0xff]  }
 0x268   :  { %12564 = vst [vmem:[#allocation136_spill] sm:$0xff] %v10420_v39  ;;  %12566 = vst [vmem:[#allocation135_spill] sm:$0xff] %v10425_v1  ;;  %v1535_v7 = vadd.f32 %v12570_v20, %v9893_v52  ;;  %v1808_v13 = vadd.f32 %v1807_v48, %v10420_v39  ;;  %v10438_v3 = vmax.f32 %v1420_v56, 0.0  ;;  %v1424_v62 = vadd.f32 %v12573_v24, %v9901_v60  ;;  %v12576_v50 = vld [vmem:[#allocation149_spill] sm:$0xff]  ;;  %v8407_v20 = vld [vmem:[#allocation10 + $0x2c] ss:$16 sps:$4 sm:$0xff]  }
 0x269   :  { %12569 = vst [vmem:[#allocation139_spill] sm:$0xff] %v10432_v47  ;;  %v10440_v12 = vmax.f32 %v1422_v53, 0.0  ;;  %v10444_v6 = vmax.f32 %v1533_v28, 0.0  ;;  %v1537_v52 = vadd.f32 %v12576_v50, %v9909_v22  ;;  %v2131_v16 = vadd.f32 %v2130_v8, %v10137_v63  ;;  %v12577_v22 = vld [vmem:[#allocation86_spill] sm:$0xff]  ;;  %v12589_v39 = vld [vmem:[#allocation87_spill] sm:$0xff] }
 0x26a   :  { %12571 = vst [vmem:[#allocation140_spill] sm:$0xff] %v10438_v3  ;;  %v10446_v18 = vmax.f32 %v1535_v7, 0.0  ;;  %v1786_v56 = vadd.f32 %v1785_v43, %v10425_v1  ;;  %v12215_v53 = vmov 0   ;;  %v2173_v60 = vadd.f32 %v2172_v51, %v2056_v49  ;;  %v8405_v50 = vld [vmem:[#allocation10 + $0x28] ss:$16 sps:$4 sm:$0xff]  }
 0x26b   :  { %12572 = vst [vmem:[#allocation143_spill] sm:$0xff] %v10440_v12  ;;  %12574 = vst [vmem:[#allocation144_spill] sm:$0xff] %v10444_v6  ;;  %v1767_v48 = vadd.f32 %v1766_v38, %v10440_v12  ;;  %3413 = vmatprep.mubr.bf16.mxu0 %v12215_v53  ;;  %3526 = vmatprep.mubr.bf16.mxu1 %v12215_v53  ;;  %v1828_v28 = vadd.f32 %v1827_v37, %v10432_v47  ;;  %v10460_v43 = vmax.f32 %v1424_v62, 0.0  ;;  %v8402_v38 = vld [vmem:[#allocation10 + $0x20] ss:$16 sps:$4 sm:$0xff]  }
 0x26c   :  { %12575 = vst [vmem:[#allocation145_spill] sm:$0xff] %v10446_v18  ;;  %v1809_v7 = vadd.f32 %v1808_v13, %v10446_v18  ;;  %3414 = vmatmul.mubr.bf16.vlgmr.msra.gmra.mrb[64].mxu0 %v8395_v45  ;;  %3527 = vmatmul.mubr.bf16.vlgmr.msra.gmra.mrb[64].mxu1 %v8395_v45  ;;  %v1944_v24 = vsub.f32 %v12577_v22, %v10059_v17  ;;  %v10465_v13 = vmax.f32 %v1537_v52, 0.0  ;;  %v8411_v45 = vld [vmem:[#allocation10 + $0x44] ss:$16 sps:$4 sm:$0xff]   ;;  %v8414_v53 = vld [vmem:[#allocation10 + $0x4c] ss:$16 sps:$4 sm:$0xff]  }
 0x26d   :  { %v1787_v63 = vadd.f32 %v1786_v56, %v10438_v3  ;;  %v1768_v8 = vrot.slane %v1767_v48, 4  ;;  %12578 = vst [vmem:[#allocation146_spill] sm:$0xff] %v10460_v43  ;;  %4888 = vmatpush1.bf16.msra.mxu0 %v8396_v34  ;;  %5340 = vmatpush1.bf16.msra.mxu1 %v8399_v44  ;;  %v2064_v49 = vmul.f32 %v10371_v46, %v10371_v46  ;;  %v12580_v56 = vld [vmem:[#allocation148_spill] sm:$0xff]  ;;  %v12581_v22 = vmov 0   ;;  %v12582_v46 = vld [vmem:[#allocation141_spill] sm:$0xff]  ;;  %v8408_v47 = vld [vmem:[#allocation5 + $0x8] sm:$0xff]  }
 0x26e   :  { %v1829_v51 = vadd.f32 %v1828_v28, %v10444_v6  ;;  %v1810_v37 = vrot.slane %v1809_v7, 4  ;;  %12579 = vst [vmem:[#allocation149_spill] sm:$0xff] %v10465_v13  ;;  %4889 = vmatprep.subr.bf16.mxu0 %v8404_v26  ;;  %5341 = vmatprep.subr.bf16.mxu1 %v8407_v20  ;;  %v2153_v62 = vadd.f32 %v10367_v23, %v12580_v56  ;;  %v12583_v52 = vld [vmem:[#allocation85_spill] sm:$0xff] }
 0x26f   :  { %v2132_v34 = vadd.f32 %v2131_v16, %v10139_v30  ;;  %v1769_v44 = vadd.f32 %v1768_v8, %v1767_v48  ;;  %3423 = vmatprep.mubr.bf16.mxu0 %v12581_v22  ;;  %3536 = vmatprep.mubr.bf16.mxu1 %v12581_v22  ;;  %v2071_v28 = vmul.f32 %v12582_v46, %v12582_v46  ;;  %v12584_v3 = vld [vmem:[#allocation137_spill] sm:$0xff]  ;;  %v8412_v8 = vld [vmem:[#allocation10 + $0x48] ss:$16 sps:$4 sm:$0xff]  }
 0x270   :  { %v1950_v6 = vsub.f32 %v12583_v52, %v9993_v21  ;;  %v2174_v26 = vadd.f32 %v2173_v60, %v2064_v49  ;;  %v1811_v20 = vadd.f32 %v1810_v37, %v1809_v7  ;;  %v2114_v1 = vadd.f32 %v10154_v5, %v12584_v3  ;;  %v8409_v48 = vld [vmem:[#allocation10 + $0x40] ss:$16 sps:$4 sm:$0xff]   ;;  %v8417_v5 = vld [vmem:[#allocation10 + $0x64] ss:$16 sps:$4 sm:$0xff]   ;;  %v8420_v3 = vld [vmem:[#allocation10 + $0x6c] ss:$16 sps:$4 sm:$0xff]  }
 0x271   :  { %v2070_v30 = vmul.f32 %v10121_v57, %v10121_v57  ;;  %v1770_v23 = vrot.slane %v1769_v44, 2  ;;  %v1788_v16 = vadd.f32 %v1787_v63, %v10460_v43  ;;  %4890 = vmatpush1.bf16.msra.mxu0 %v8402_v38  ;;  %5342 = vmatpush1.bf16.msra.mxu1 %v8405_v50  ;;  %v12585_v56 = vld [vmem:[#allocation89_spill] sm:$0xff]  ;;  %v2072_v52 = vmul.f32 %v1944_v24, %v1944_v24  ;;  %v12586_v49 = vld [vmem:[#allocation102_spill] sm:$0xff] }
 0x272   :  { %v1952_v46 = vsub.f32 %v12585_v56, %v10059_v17  ;;  %v1812_v60 = vrot.slane %v1811_v20, 2  ;;  %v1830_v7 = vadd.f32 %v1829_v51, %v10465_v13  ;;  %4891 = vmatprep.subr.bf16.mxu0 %v8411_v45  ;;  %5343 = vmatprep.subr.bf16.mxu1 %v8414_v53  ;;  %v12587_v57 = vld [vmem:[#allocation74_spill] sm:$0xff]  ;;  %v2154_v18 = vadd.f32 %v2153_v62, %v2071_v28 }
 0x273   :  { %v1959_v37 = vsub.f32 %v12587_v57, %v12586_v49  ;;  %v2133_v63 = vadd.f32 %v2132_v34, %v2070_v30  ;;  %v1771_v38 = vadd.f32 %v1770_v23, %v1769_v44  ;;  %v12588_v50 = vld [vmem:[#allocation142_spill] sm:$0xff]  ;;  %v1958_v56 = vsub.f32 %v12589_v39, %v9993_v21  ;;  %v12591_v44 = vld [vmem:[#allocation91_spill] sm:$0xff] }
 0x274   :  { %v2079_v43 = vmul.f32 %v12588_v50, %v12588_v50  ;;  %v2175_v24 = vadd.f32 %v2174_v26, %v2072_v52  ;;  %3424 = vmatmul.mubr.bf16.gmra.mrb[68].mxu0 %v8408_v47  ;;  %3537 = vmatmul.mubr.bf16.gmra.mrb[68].mxu1 %v8408_v47  ;;  %v2078_v51 = vmul.f32 %v1950_v6, %v1950_v6  ;;  %v1789_v13 = vrot.slane %v1788_v16, 4  ;;  %v8418_v57 = vld [vmem:[#allocation10 + $0x68] ss:$16 sps:$4 sm:$0xff]   ;;  %v8424_v52 = vld [vmem:[#allocation10 + $0x84] ss:$16 sps:$4 sm:$0xff]  }
 0x275   :  { %v1772_v45 = vrot.slane %v1771_v38, 1  ;;  %v1813_v53 = vadd.f32 %v1812_v60, %v1811_v20  ;;  %4892 = vmatpush1.bf16.msra.mxu0 %v8409_v48  ;;  %5344 = vmatpush1.bf16.msra.mxu1 %v8412_v8  ;;  %v12590_v62 = vld [vmem:[#allocation138_spill] sm:$0xff]  ;;  %v1960_v28 = vsub.f32 %v12591_v44, %v10059_v17  ;;  %v2080_v30 = vmul.f32 %v1952_v46, %v1952_v46 }
 0x276   :  { %v2115_v34 = vadd.f32 %v2114_v1, %v12590_v62  ;;  %v1831_v23 = vrot.slane %v1830_v7, 4  ;;  %4893 = vmatprep.subr.bf16.mxu0 %v8417_v5  ;;  %5345 = vmatprep.subr.bf16.mxu1 %v8420_v3  ;;  %v8427_v26 = vld [vmem:[#allocation10 + $0x8c] ss:$16 sps:$4 sm:$0xff]   ;;  %v2155_v47 = vadd.f32 %v2154_v18, %v2079_v43  ;;  %v2134_v6 = vadd.f32 %v2133_v63, %v2078_v51  ;;  %v12594_v43 = vld [vmem:[#allocation95_spill] sm:$0xff] }
 0x277   :  { %v1773_v50 = vadd.f32 %v1772_v45, %v1771_v38  ;;  %3433 = vmatprep.mubr.bf16.mxu0 %v12581_v22  ;;  %3546 = vmatprep.mubr.bf16.mxu1 %v12581_v22  ;;  %v12592_v20 = vld [vmem:[#allocation78_spill] sm:$0xff]  ;;  %v2087_v1 = vmul.f32 %v1959_v37, %v1959_v37  ;;  %v2176_v46 = vadd.f32 %v2175_v24, %v2080_v30  ;;  %v8421_v62 = vld [vmem:[#allocation5 + $0x10] sm:$0xff]   ;;  %v1814_v44 = vrot.slane %v1813_v53, 1  ;;  %v8422_v45 = vld [vmem:[#allocation10 + $0x80] ss:$16 sps:$4 sm:$0xff]  }
 0x278   :  { %v1967_v48 = vsub.f32 %v12592_v20, %v12586_v49  ;;  %v12593_v8 = vld [vmem:[#allocation90_spill] sm:$0xff]  ;;  %v2086_v5 = vmul.f32 %v1958_v56, %v1958_v56  ;;  %v1790_v18 = vadd.f32 %v1789_v13, %v1788_v16  ;;  %v1968_v63 = vsub.f32 %v12594_v43, %v10059_v17  ;;  %v8430_v16 = vld [vmem:[#allocation10 + $0xa4] ss:$16 sps:$4 sm:$0xff]  }
 0x279   :  { %v1966_v60 = vsub.f32 %v12593_v8, %v9993_v21  ;;  %v10499_v3 = vmul.f32 0.0078125, %v1773_v50  ;;  %4894 = vmatpush1.bf16.msra.mxu0 %v8415_v32  ;;  %5346 = vmatpush1.bf16.msra.mxu1 %v8418_v57  ;;  %v2088_v38 = vmul.f32 %v1960_v28, %v1960_v28  ;;  %v1832_v51 = vadd.f32 %v1831_v23, %v1830_v7  ;;  %v8425_v24 = vld [vmem:[#allocation10 + $0x88] ss:$16 sps:$4 sm:$0xff]   ;;  %v8433_v23 = vld [vmem:[#allocation10 + $0xac] ss:$16 sps:$4 sm:$0xff]  }
 0x27a   :  { %4895 = vmatprep.subr.bf16.mxu0 %v8424_v52  ;;  %5347 = vmatprep.subr.bf16.mxu1 %v8427_v26  ;;  %v2116_v37 = vrot.slane %v2115_v34, 4  ;;  %v2156_v39 = vadd.f32 %v2155_v47, %v2087_v1  ;;  %v2135_v8 = vadd.f32 %v2134_v6, %v2086_v5  ;;  %v12595_v56 = vld [vmem:[#allocation118_spill] sm:$0xff]  ;;  %v2095_v57 = vmul.f32 %v1967_v48, %v1967_v48  ;;  %v8428_v47 = vld [vmem:[#allocation10 + $0xa0] ss:$16 sps:$4 sm:$0xff]  }
 0x27b   :  { %v2177_v30 = vadd.f32 %v2176_v46, %v2088_v38  ;;  %v1849_v50 = vsub.f32 %v12595_v56, %v10499_v3  ;;  %v12596_v13 = vld [vmem:[#allocation114_spill] sm:$0xff]  ;;  %v2094_v43 = vmul.f32 %v1966_v60, %v1966_v60  ;;  %v1815_v28 = vadd.f32 %v1814_v44, %v1813_v53 }
 0x27c   :  { %v1857_v32 = vsub.f32 %v12596_v13, %v10499_v3  ;;  %3434 = vmatmul.mubr.bf16.gmra.mrb[72].mxu0 %v8421_v62  ;;  %v1791_v7 = vrot.slane %v1790_v18, 2  ;;  %3547 = vmatmul.mubr.bf16.gmra.mrb[72].mxu1 %v8421_v62  ;;  %v2096_v52 = vmul.f32 %v1968_v63, %v1968_v63  ;;  %v1833_v26 = vrot.slane %v1832_v51, 2  ;;  %v8431_v5 = vld [vmem:[#allocation10 + $0xa8] ss:$16 sps:$4 sm:$0xff]  }
 0x27d   :  { %4896 = vmatpush1.bf16.msra.mxu0 %v8422_v45  ;;  %v2117_v6 = vadd.f32 %v2116_v37, %v2115_v34  ;;  %v2157_v1 = vadd.f32 %v2156_v39, %v2095_v57  ;;  %v2136_v46 = vadd.f32 %v2135_v8, %v2094_v43  ;;  %5348 = vmatpush1.bf16.msra.mxu1 %v8425_v24  ;;  %v10509_v53 = vmul.f32 0.0078125, %v1815_v28  ;;  %v8434_v39 = vld [vmem:[#allocation5 + $0x18] sm:$0xff]   ;;  %v8440_v57 = vld [vmem:[#allocation10 + $0xcc] ss:$16 sps:$4 sm:$0xff]  }
 0x27e   :  { %v2178_v38 = vadd.f32 %v2177_v30, %v2096_v52  ;;  %v1865_v13 = vsub.f32 %v10015_v35, %v10499_v3  ;;  %v1977_v56 = vmul.f32 %v1849_v50, %v1849_v50  ;;  %v1985_v48 = vmul.f32 %v1857_v32, %v1857_v32  ;;  %4897 = vmatprep.subr.bf16.mxu0 %v8430_v16  ;;  %v12597_v30 = vld [vmem:[#allocation119_spill] sm:$0xff] }
 0x27f   :  { %v1792_v44 = vadd.f32 %v1791_v7, %v1790_v18  ;;  %5349 = vmatprep.subr.bf16.mxu1 %v8433_v23  ;;  %v1873_v60 = vsub.f32 %v10182_v14, %v10499_v3  ;;  %v1834_v62 = vadd.f32 %v1833_v26, %v1832_v51  ;;  %v2118_v34 = vrot.slane %v2117_v6, 2  ;;  %3443 = vmatprep.mubr.bf16.mxu0 %v12581_v22  ;;  %v8437_v18 = vld [vmem:[#allocation10 + $0xc4] ss:$16 sps:$4 sm:$0xff]   ;;  %v12598_v51 = vld [vmem:[#allocation116_spill] sm:$0xff] }
 0x280   :  { %v2158_v8 = vrot.slane %v2157_v1, 4  ;;  %v2137_v43 = vrot.slane %v2136_v46, 4  ;;  %v2179_v63 = vrot.slane %v2178_v38, 4  ;;  %v1881_v45 = vsub.f32 %v10190_v59, %v10499_v3  ;;  %3556 = vmatprep.mubr.bf16.mxu1 %v12581_v22 }
 0x281   :  { %4898 = vmatpush1.bf16.msra.mxu0 %v8428_v47  ;;  %5350 = vmatpush1.bf16.msra.mxu1 %v8431_v5  ;;  %v1993_v37 = vmul.f32 %v1865_v13, %v1865_v13  ;;  %v2185_v24 = vadd.f32 %v1985_v48, %v1977_v56  ;;  %v1851_v50 = vsub.f32 %v12597_v30, %v10509_v53  ;;  %v1793_v16 = vrot.slane %v1792_v44, 1  ;;  %v8435_v56 = vld [vmem:[#allocation10 + $0xc0] ss:$16 sps:$4 sm:$0xff]   ;;  %v8438_v5 = vld [vmem:[#allocation10 + $0xc8] ss:$16 sps:$4 sm:$0xff]  }
 0x282   :  { %v1859_v32 = vsub.f32 %v12598_v51, %v10509_v53  ;;  %v1889_v28 = vsub.f32 %v10220_v58, %v10499_v3  ;;  %v2001_v7 = vmul.f32 %v1873_v60, %v1873_v60  ;;  %v1835_v13 = vrot.slane %v1834_v62, 1  ;;  %4899 = vmatprep.subr.bf16.mxu0 %v8437_v18  ;;  %v8443_v60 = vld [vmem:[#allocation10 + $0xe4] ss:$16 sps:$4 sm:$0xff]   ;;  %5351 = vmatprep.subr.bf16.mxu1 %v8440_v57 }
 0x283   :  { %v2186_v23 = vadd.f32 %v2185_v24, %v1993_v37  ;;  %v10523_v52 = vadd.f32 %v2118_v34, %v2117_v6  ;;  %v10525_v26 = vadd.f32 %v2158_v8, %v2157_v1  ;;  %v10527_v47 = vadd.f32 %v2137_v43, %v2136_v46  ;;  %v8446_v46 = vld [vmem:[#allocation10 + $0xec] ss:$16 sps:$4 sm:$0xff]  }
 0x284   :  { %3444 = vmatmul.mubr.bf16.gmra.mrb[76].mxu0 %v8434_v39  ;;  %3557 = vmatmul.mubr.bf16.gmra.mrb[76].mxu1 %v8434_v39  ;;  %v10529_v48 = vadd.f32 %v2179_v63, %v2178_v38  ;;  %v1897_v51 = vsub.f32 %v10231_v54, %v10499_v3  ;;  %v2009_v30 = vmul.f32 %v1881_v45, %v1881_v45  ;;  %v8441_v63 = vld [vmem:[#allocation10 + $0xe0] ss:$16 sps:$4 sm:$0xff]  }
 0x285   :  { %v2187_v58 = vadd.f32 %v2186_v23, %v2001_v7  ;;  %v1867_v37 = vsub.f32 %v10017_v55, %v10509_v53  ;;  %v1979_v6 = vmul.f32 %v1851_v50, %v1851_v50  ;;  %v1987_v34 = vmul.f32 %v1859_v32, %v1859_v32  ;;  %4900 = vmatpush1.bf16.msra.mxu0 %v8435_v56  ;;  %v8444_v50 = vld [vmem:[#allocation10 + $0xe8] ss:$16 sps:$4 sm:$0xff]  }
 0x286   :  { %v1794_v1 = vadd.f32 %v1793_v16, %v1792_v44  ;;  %v1905_v39 = vsub.f32 %v10259_v19, %v10499_v3  ;;  %v2017_v38 = vmul.f32 %v1889_v28, %v1889_v28  ;;  %v10537_v43 = vadd.f32 %v1835_v13, %v1834_v62  ;;  %5352 = vmatpush1.bf16.msra.mxu1 %v8438_v5  ;;  %v8447_v16 = vld [vmem:[#allocation5 + $0x20] sm:$0xff]  }
 0x287   :  { %v2188_v8 = vadd.f32 %v2187_v58, %v2009_v30  ;;  %v1913_v45 = vsub.f32 %v10277_v9, %v10499_v3  ;;  %v1921_v24 = vsub.f32 %v10307_v36, %v10499_v3  ;;  %v1929_v44 = vsub.f32 %v10324_v31, %v10499_v3  ;;  %4901 = vmatprep.subr.bf16.mxu0 %v8443_v60 }
 0x288   :  { %v1875_v18 = vsub.f32 %v10186_v15, %v10509_v53  ;;  %v1937_v58 = vsub.f32 %v10351_v25, %v10499_v3  ;;  %v1945_v62 = vsub.f32 %v10375_v0, %v10499_v3  ;;  %v2025_v30 = vmul.f32 %v1897_v51, %v1897_v51  ;;  %5353 = vmatprep.subr.bf16.mxu1 %v8446_v46  ;;  %v8450_v51 = vld [vmem:[#allocation10 + $0x104] ss:$16 sps:$4 sm:$0xff]  }
 0x289   :  { %v2189_v32 = vadd.f32 %v2188_v8, %v2017_v38  ;;  %v1883_v57 = vsub.f32 %v10196_v42, %v10509_v53  ;;  %v1995_v28 = vmul.f32 %v1867_v37, %v1867_v37  ;;  %v2227_v7 = vadd.f32 %v1987_v34, %v1979_v6  ;;  %3453 = vmatprep.mubr.bf16.mxu0 %v12581_v22  ;;  %v12599_v42 = vld [vmem:[#allocation124_spill] sm:$0xff]  ;;  %v12611_v25 = vld [vmem:[#allocation107_spill] sm:$0xff] }
 0x28a   :  { %v10553_v23 = vmul.f32 0.0078125, %v1794_v1  ;;  %v1953_v13 = vsub.f32 %v10407_v10, %v10499_v3  ;;  %v2033_v56 = vmul.f32 %v1905_v39, %v1905_v39  ;;  %4902 = vmatpush1.bf16.msra.mxu0 %v8441_v63  ;;  %3566 = vmatprep.mubr.bf16.mxu1 %v12581_v22  ;;  %v1961_v60 = vsub.f32 %v10416_v40, %v10499_v3  ;;  %v8453_v1 = vld [vmem:[#allocation10 + $0x10c] ss:$16 sps:$4 sm:$0xff]   ;;  %v8448_v63 = vld [vmem:[#allocation10 + $0x100] ss:$16 sps:$4 sm:$0xff]  }
 0x28b   :  { %v2190_v5 = vadd.f32 %v2189_v32, %v2025_v30  ;;  %v1891_v37 = vsub.f32 %v10224_v27, %v10509_v53  ;;  %v2003_v6 = vmul.f32 %v1875_v18, %v1875_v18  ;;  %v2228_v34 = vadd.f32 %v2227_v7, %v1995_v28  ;;  %5354 = vmatpush1.bf16.msra.mxu1 %v8444_v50  ;;  %v12600_v18 = vld [vmem:[#allocation120_spill] sm:$0xff] }
 0x28c   :  { %v1969_v46 = vsub.f32 %v10440_v12, %v10499_v3  ;;  %v2041_v38 = vmul.f32 %v1913_v45, %v1913_v45  ;;  %v1899_v8 = vsub.f32 %v10234_v33, %v10509_v53  ;;  %3454 = vmatmul.mubr.bf16.gmra.mrb[80].mxu0 %v8447_v16  ;;  %v2011_v30 = vmul.f32 %v1883_v57, %v1883_v57  ;;  %v8451_v50 = vld [vmem:[#allocation10 + $0x108] ss:$16 sps:$4 sm:$0xff]  }
 0x28d   :  { %v2191_v39 = vadd.f32 %v2190_v5, %v2033_v56  ;;  %v2229_v32 = vadd.f32 %v2228_v34, %v2003_v6  ;;  %v1850_v15 = vsub.f32 %v12599_v42, %v10553_v23  ;;  %v1858_v28 = vsub.f32 %v12600_v18, %v10553_v23  ;;  %3567 = vmatmul.mubr.bf16.gmra.mrb[80].mxu1 %v8447_v16  ;;  %v8456_v56 = vld [vmem:[#allocation10 + $0x124] ss:$16 sps:$4 sm:$0xff]   ;;  %v8459_v34 = vld [vmem:[#allocation10 + $0x12c] ss:$16 sps:$4 sm:$0xff]  }
 0x28e   :  { %v2049_v7 = vmul.f32 %v1921_v24, %v1921_v24  ;;  %v2057_v27 = vmul.f32 %v1929_v44, %v1929_v44  ;;  %v2065_v55 = vmul.f32 %v1937_v58, %v1937_v58  ;;  %4903 = vmatprep.subr.bf16.mxu0 %v8450_v51  ;;  %v2073_v5 = vmul.f32 %v1945_v62, %v1945_v62  ;;  %v8454_v24 = vld [vmem:[#allocation10 + $0x120] ss:$16 sps:$4 sm:$0xff]  }
 0x28f   :  { %v2192_v45 = vadd.f32 %v2191_v39, %v2041_v38  ;;  %v1907_v33 = vsub.f32 %v10265_v41, %v10509_v53  ;;  %v2019_v57 = vmul.f32 %v1891_v37, %v1891_v37  ;;  %v2230_v6 = vadd.f32 %v2229_v32, %v2011_v30  ;;  %5355 = vmatprep.subr.bf16.mxu1 %v8453_v1  ;;  %v8457_v38 = vld [vmem:[#allocation10 + $0x128] ss:$16 sps:$4 sm:$0xff]   ;;  %v8472_v41 = vld [vmem:[#allocation10 + $0x16c] ss:$16 sps:$4 sm:$0xff]  }
 0x290   :  { %v2081_v12 = vmul.f32 %v1953_v13, %v1953_v13  ;;  %v1915_v16 = vsub.f32 %v10286_v2, %v10509_v53  ;;  %v2027_v10 = vmul.f32 %v1899_v8, %v1899_v8  ;;  %4904 = vmatpush1.bf16.msra.mxu0 %v8448_v63  ;;  %v1866_v58 = vsub.f32 %v10124_v29, %v10553_v23  ;;  %v12610_v2 = vld [vmem:[#allocation121_spill] sm:$0xff] }
 0x291   :  { %v2193_v40 = vadd.f32 %v2192_v45, %v2049_v7  ;;  %v2231_v44 = vadd.f32 %v2230_v6, %v2019_v57  ;;  %v1978_v62 = vmul.f32 %v1850_v15, %v1850_v15  ;;  %v1986_v51 = vmul.f32 %v1858_v28, %v1858_v28  ;;  %5356 = vmatpush1.bf16.msra.mxu1 %v8451_v50  ;;  %v8460_v50 = vld [vmem:[#allocation5 + $0x28] sm:$0xff]   ;;  %v12603_v45 = vld [vmem:[#allocation93_spill] sm:$0xff] }
 0x292   :  { %v10577_v37 = vmul.f32 %v1961_v60, %v1961_v60  ;;  %v10579_v1 = vmul.f32 %v1969_v46, %v1969_v46  ;;  %v1923_v39 = vsub.f32 %v10314_v61, %v10509_v53  ;;  %4905 = vmatprep.subr.bf16.mxu0 %v8456_v56  ;;  %v1931_v8 = vsub.f32 %v10326_v4, %v10509_v53  ;;  %v12601_v60 = vld [vmem:[#allocation128_spill] sm:$0xff]  ;;  %v12602_v46 = vld [vmem:[#allocation147_spill] sm:$0xff]  ;;  %v12604_v6 = vld [vmem:[#allocation133_spill] sm:$0xff] }
 0x293   :  { %v2194_v13 = vadd.f32 %v2193_v40, %v2057_v27  ;;  %v2035_v63 = vmul.f32 %v1907_v33, %v1907_v33  ;;  %v2232_v30 = vadd.f32 %v2231_v44, %v2027_v10  ;;  %v1874_v15 = vsub.f32 %v10188_v11, %v10553_v23  ;;  %5357 = vmatprep.subr.bf16.mxu1 %v8459_v34  ;;  %v12609_v61 = vld [vmem:[#allocation125_spill] sm:$0xff] }
 0x294   :  { %v1939_v28 = vsub.f32 %v12601_v60, %v10509_v53  ;;  %v1947_v27 = vsub.f32 %v12602_v46, %v10509_v53  ;;  %v2043_v40 = vmul.f32 %v1915_v16, %v1915_v16  ;;  %4906 = vmatpush1.bf16.msra.mxu0 %v8454_v24  ;;  %v1882_v56 = vsub.f32 %v12603_v45, %v10553_v23  ;;  %v8463_v16 = vld [vmem:[#allocation10 + $0x144] ss:$16 sps:$4 sm:$0xff]  }
 0x295   :  { %v2195_v32 = vadd.f32 %v2194_v13, %v2065_v55  ;;  %v2233_v7 = vadd.f32 %v2232_v30, %v2035_v63  ;;  %v1994_v33 = vmul.f32 %v1866_v58, %v1866_v58  ;;  %v2206_v10 = vadd.f32 %v1986_v51, %v1978_v62  ;;  %5358 = vmatpush1.bf16.msra.mxu1 %v8457_v38  ;;  %v12605_v13 = vld [vmem:[#allocation154_spill] sm:$0xff]  ;;  %v12607_v51 = vld [vmem:[#allocation145_spill] sm:$0xff] }
 0x296   :  { %v1955_v55 = vsub.f32 %v12604_v6, %v10509_v53  ;;  %v2051_v34 = vmul.f32 %v1923_v39, %v1923_v39  ;;  %v10596_v44 = vmul.f32 0.0078125, %v10537_v43  ;;  %3463 = vmatprep.mubr.bf16.mxu0 %v12581_v22  ;;  %v1890_v63 = vsub.f32 %v12605_v13, %v10553_v23  ;;  %3576 = vmatprep.mubr.bf16.mxu1 %v12581_v22  ;;  %v8466_v58 = vld [vmem:[#allocation10 + $0x14c] ss:$16 sps:$4 sm:$0xff]   ;;  %v12608_v39 = vld [vmem:[#allocation155_spill] sm:$0xff] }
 0x297   :  { %v2196_v57 = vadd.f32 %v2195_v32, %v2073_v5  ;;  %v2234_v24 = vadd.f32 %v2233_v7, %v2043_v40  ;;  %v2002_v30 = vmul.f32 %v1874_v15, %v1874_v15  ;;  %v2207_v46 = vadd.f32 %v2206_v10, %v1994_v33  ;;  %v12606_v5 = vld [vmem:[#allocation136_spill] sm:$0xff]  ;;  %3464 = vmatmul.mubr.bf16.gmra.mrb[84].mxu0 %v8460_v50  ;;  %v8461_v40 = vld [vmem:[#allocation10 + $0x140] ss:$16 sps:$4 sm:$0xff]  }
 0x298   :  { %v1963_v62 = vsub.f32 %v12606_v5, %v10509_v53  ;;  %v1971_v38 = vsub.f32 %v12607_v51, %v10509_v53  ;;  %v2059_v43 = vmul.f32 %v1931_v8, %v1931_v8  ;;  %v1898_v32 = vsub.f32 %v12608_v39, %v10553_v23  ;;  %3577 = vmatmul.mubr.bf16.gmra.mrb[84].mxu1 %v8460_v50  ;;  %v8464_v33 = vld [vmem:[#allocation10 + $0x148] ss:$16 sps:$4 sm:$0xff]   ;;  %v8469_v8 = vld [vmem:[#allocation10 + $0x164] ss:$16 sps:$4 sm:$0xff]  }
 0x299   :  { %v2197_v7 = vadd.f32 %v2196_v57, %v2081_v12  ;;  %v2235_v6 = vadd.f32 %v2234_v24, %v2051_v34  ;;  %v2010_v60 = vmul.f32 %v1882_v56, %v1882_v56  ;;  %v2208_v15 = vadd.f32 %v2207_v46, %v2002_v30  ;;  %4907 = vmatprep.subr.bf16.mxu0 %v8463_v16  ;;  %v8467_v24 = vld [vmem:[#allocation10 + $0x160] ss:$16 sps:$4 sm:$0xff]  }
 0x29a   :  { %v2067_v10 = vmul.f32 %v1939_v28, %v1939_v28  ;;  %v2075_v4 = vmul.f32 %v1947_v27, %v1947_v27  ;;  %v1852_v5 = vsub.f32 %v12609_v61, %v10596_v44  ;;  %v1860_v51 = vsub.f32 %v12610_v2, %v10596_v44  ;;  %5359 = vmatprep.subr.bf16.mxu1 %v8466_v58  ;;  %v12612_v27 = vld [vmem:[#allocation101_spill] sm:$0xff] }
 0x29b   :  { %v2236_v0 = vadd.f32 %v2235_v6, %v2059_v43  ;;  %v1906_v12 = vsub.f32 %v12611_v25, %v10553_v23  ;;  %v2018_v57 = vmul.f32 %v1890_v63, %v1890_v63  ;;  %v2209_v56 = vadd.f32 %v2208_v15, %v2010_v60  ;;  %4908 = vmatpush1.bf16.msra.mxu0 %v8461_v40  ;;  %v8470_v6 = vld [vmem:[#allocation10 + $0x168] ss:$16 sps:$4 sm:$0xff]  }
 0x29c   :  { %v2083_v46 = vmul.f32 %v1955_v55, %v1955_v55  ;;  %v2091_v50 = vmul.f32 %v1963_v62, %v1963_v62  ;;  %v2099_v28 = vmul.f32 %v1971_v38, %v1971_v38  ;;  %v1914_v34 = vsub.f32 %v12612_v27, %v10553_v23  ;;  %5360 = vmatpush1.bf16.msra.mxu1 %v8464_v33  ;;  %v12613_v43 = vld [vmem:[#allocation150_spill] sm:$0xff]  ;;  %v8473_v55 = vld [vmem:[#allocation5 + $0x30] sm:$0xff]   ;;  %v12614_v38 = vld [vmem:[#allocation115_spill] sm:$0xff] }
 0x29d   :  { %v2198_v30 = vadd.f32 %v2197_v7, %v10577_v37  ;;  %v2237_v16 = vadd.f32 %v2236_v0, %v2067_v10  ;;  %v2026_v2 = vmul.f32 %v1898_v32, %v1898_v32  ;;  %v2210_v61 = vadd.f32 %v2209_v56, %v2018_v57  ;;  %4909 = vmatprep.subr.bf16.mxu0 %v8469_v8  ;;  %v8476_v0 = vld [vmem:[#allocation10 + $0x184] ss:$16 sps:$4 sm:$0xff]   ;;  %v12616_v7 = vld [vmem:[#allocation158_spill] sm:$0xff]  ;;  %v8474_v10 = vld [vmem:[#allocation10 + $0x180] ss:$16 sps:$4 sm:$0xff]  }
 0x29e   :  { %v1868_v63 = vsub.f32 %v12613_v43, %v10596_v44  ;;  %v1980_v60 = vmul.f32 %v1852_v5, %v1852_v5  ;;  %v1988_v58 = vmul.f32 %v1860_v51, %v1860_v51  ;;  %5361 = vmatprep.subr.bf16.mxu1 %v8472_v41  ;;  %v1922_v40 = vsub.f32 %v12614_v38, %v10553_v23  ;;  %v12615_v37 = vld [vmem:[#allocation157_spill] sm:$0xff]  ;;  %v12617_v5 = vld [vmem:[#allocation159_spill] sm:$0xff]  ;;  %v12618_v41 = vld [vmem:[#allocation94_spill] sm:$0xff] }
 0x29f   :  { %v2238_v62 = vadd.f32 %v2237_v16, %v2075_v4  ;;  %v2034_v15 = vmul.f32 %v1906_v12, %v1906_v12  ;;  %v2211_v31 = vadd.f32 %v2210_v61, %v2026_v2  ;;  %3473 = vmatprep.mubr.bf16.mxu0 %v12581_v22  ;;  %v1930_v32 = vsub.f32 %v12615_v37, %v10553_v23  ;;  %v8479_v8 = vld [vmem:[#allocation10 + $0x18c] ss:$16 sps:$4 sm:$0xff]   ;;  %v8477_v56 = vld [vmem:[#allocation10 + $0x188] ss:$16 sps:$4 sm:$0xff]   ;;  %v8482_v16 = vld [vmem:[#allocation10 + $0x1a4] ss:$16 sps:$4 sm:$0xff]  }
 0x2a0   :  { %v1938_v33 = vsub.f32 %v12616_v7, %v10553_v23  ;;  %v1946_v51 = vsub.f32 %v12617_v5, %v10553_v23  ;;  %v1876_v4 = vsub.f32 %v12618_v41, %v10596_v44  ;;  %4910 = vmatpush1.bf16.msra.mxu0 %v8467_v24  ;;  %v2199_v2 = vadd.f32 %v2198_v30, %v10579_v1  ;;  %v12619_v43 = vld [vmem:[#allocation97_spill] sm:$0xff]  ;;  %v8485_v41 = vld [vmem:[#allocation10 + $0x1ac] ss:$16 sps:$4 sm:$0xff]  }
 0x2a1   :  { %v2239_v61 = vadd.f32 %v2238_v62, %v2083_v46  ;;  %v2042_v12 = vmul.f32 %v1914_v34, %v1914_v34  ;;  %v2212_v57 = vadd.f32 %v2211_v31, %v2034_v15  ;;  %5362 = vmatpush1.bf16.msra.mxu1 %v8470_v6  ;;  %v1884_v7 = vsub.f32 %v12619_v43, %v10596_v44  ;;  %v12620_v1 = vld [vmem:[#allocation98_spill] sm:$0xff]  ;;  %v8480_v30 = vld [vmem:[#allocation10 + $0x1a0] ss:$16 sps:$4 sm:$0xff]  }
 0x2a2   :  { %v1996_v37 = vmul.f32 %v1868_v63, %v1868_v63  ;;  %v2248_v36 = vadd.f32 %v1988_v58, %v1980_v60  ;;  %3586 = vmatprep.mubr.bf16.mxu1 %v12581_v22  ;;  %3474 = vmatmul.mubr.bf16.gmra.mrb[88].mxu0 %v8473_v55  ;;  %v2050_v5 = vmul.f32 %v1922_v40, %v1922_v40  ;;  %v2200_v6 = vrot.slane %v2199_v2, 4  ;;  %v12621_v58 = vld [vmem:[#allocation99_spill] sm:$0xff] }
 0x2a3   :  { %v2240_v24 = vadd.f32 %v2239_v61, %v2091_v50  ;;  %v2213_v9 = vadd.f32 %v2212_v57, %v2042_v12  ;;  %3587 = vmatmul.mubr.bf16.gmra.mrb[88].mxu1 %v8473_v55  ;;  %4911 = vmatprep.subr.bf16.mxu0 %v8476_v0  ;;  %v1892_v31 = vsub.f32 %v12620_v1, %v10596_v44  ;;  %v8483_v50 = vld [vmem:[#allocation10 + $0x1a8] ss:$16 sps:$4 sm:$0xff]   ;;  %v8489_v40 = vld [vmem:[#allocation10 + $0x1c4] ss:$16 sps:$4 sm:$0xff]   ;;  %v2160_v55 = vrot.slane %v10525_v26, 2 }
 0x2a4   :  { %v2004_v46 = vmul.f32 %v1876_v4, %v1876_v4  ;;  %v2249_v34 = vadd.f32 %v2248_v36, %v1996_v37  ;;  %5363 = vmatprep.subr.bf16.mxu1 %v8479_v8  ;;  %4912 = vmatpush1.bf16.msra.mxu0 %v8474_v10  ;;  %v2058_v63 = vmul.f32 %v1930_v32, %v1930_v32  ;;  %v8486_v36 = vld [vmem:[#allocation5 + $0x38] sm:$0xff]   ;;  %v8492_v37 = vld [vmem:[#allocation10 + $0x1cc] ss:$16 sps:$4 sm:$0xff]   ;;  %v2139_v32 = vrot.slane %v10527_v47, 2 }
 0x2a5   :  { %v2214_v60 = vadd.f32 %v2213_v9, %v2050_v5  ;;  %v1900_v62 = vsub.f32 %v12621_v58, %v10596_v44  ;;  %5364 = vmatpush1.bf16.msra.mxu1 %v8477_v56  ;;  %4913 = vmatprep.subr.bf16.mxu0 %v8482_v16  ;;  %v2241_v15 = vadd.f32 %v2240_v24, %v2099_v28  ;;  %v12622_v9 = vld [vmem:[#allocation135_spill] sm:$0xff]  ;;  %v12623_v8 = vld [vmem:[#allocation140_spill] sm:$0xff]  ;;  %v2181_v56 = vrot.slane %v10529_v48, 2 }
 0x2a6   :  { %v2012_v0 = vmul.f32 %v1884_v7, %v1884_v7  ;;  %v2250_v61 = vadd.f32 %v2249_v34, %v2004_v46  ;;  %5365 = vmatprep.subr.bf16.mxu1 %v8485_v41  ;;  %3483 = vmatprep.mubr.bf16.mxu0 %v12581_v22  ;;  %v1954_v5 = vsub.f32 %v12622_v9, %v10553_v23  ;;  %v8487_v41 = vld [vmem:[#allocation10 + $0x1c0] ss:$16 sps:$4 sm:$0xff]   ;;  %v12624_v46 = vld [vmem:[#allocation110_spill] sm:$0xff] }
 0x2a7   :  { %v2066_v4 = vmul.f32 %v1938_v33, %v1938_v33  ;;  %v2215_v10 = vadd.f32 %v2214_v60, %v2058_v63  ;;  %3596 = vmatprep.mubr.bf16.mxu1 %v12581_v22  ;;  %v1962_v12 = vsub.f32 %v12623_v8, %v10553_v23  ;;  %v2074_v28 = vmul.f32 %v1946_v51, %v1946_v51  ;;  %v8490_v33 = vld [vmem:[#allocation10 + $0x1c8] ss:$16 sps:$4 sm:$0xff]   ;;  %v8495_v63 = vld [vmem:[#allocation10 + $0x1e4] ss:$16 sps:$4 sm:$0xff]  }
 0x2a8   :  { %v2020_v7 = vmul.f32 %v1892_v31, %v1892_v31  ;;  %v2251_v57 = vadd.f32 %v2250_v61, %v2012_v0  ;;  %4914 = vmatpush1.bf16.msra.mxu0 %v8480_v30  ;;  %v2201_v16 = vadd.f32 %v2200_v6, %v2199_v2  ;;  %v1908_v34 = vsub.f32 %v12624_v46, %v10596_v44  ;;  %v12625_v60 = vld [vmem:[#allocation146_spill] sm:$0xff]  ;;  %v12626_v2 = vld [vmem:[#allocation156_spill] sm:$0xff] }
 0x2a9   :  { %v2216_v24 = vadd.f32 %v2215_v10, %v2066_v4  ;;  %5366 = vmatpush1.bf16.msra.mxu1 %v8483_v50  ;;  %4915 = vmatprep.subr.bf16.mxu0 %v8489_v40  ;;  %v2242_v22 = vrot.slane %v2241_v15, 4  ;;  %v1970_v58 = vsub.f32 %v12625_v60, %v10553_v23  ;;  %v2028_v51 = vmul.f32 %v1900_v62, %v1900_v62  ;;  %v8498_v30 = vld [vmem:[#allocation10 + $0x1ec] ss:$16 sps:$4 sm:$0xff]   ;;  %v8493_v62 = vld [vmem:[#allocation10 + $0x1e0] ss:$16 sps:$4 sm:$0xff]  }
 0x2aa   :  { %v2252_v31 = vadd.f32 %v2251_v57, %v2020_v7  ;;  %3484 = vmatmul.mubr.bf16.gmra.mrb[92].mxu0 %v8486_v36  ;;  %5367 = vmatprep.subr.bf16.mxu1 %v8492_v37  ;;  %v2082_v0 = vmul.f32 %v1954_v5, %v1954_v5  ;;  %v1916_v6 = vsub.f32 %v12626_v2, %v10596_v44  ;;  %v12627_v4 = vld [vmem:[#allocation122_spill] sm:$0xff]  ;;  %v2202_v7 = vrot.slane %v2201_v16, 2  ;;  %v8543_v2 = vld [vmem:[#allocation10 + $0x2e4] ss:$16 sps:$4 sm:$0xff]  }
 0x2ab   :  { %v2217_v61 = vadd.f32 %v2216_v24, %v2074_v28  ;;  %3597 = vmatmul.mubr.bf16.gmra.mrb[92].mxu1 %v8486_v36  ;;  %v2161_v50 = vadd.f32 %v2160_v55, %v10525_v26  ;;  %v2140_v40 = vadd.f32 %v2139_v32, %v10527_v47  ;;  %v1924_v10 = vsub.f32 %v12627_v4, %v10596_v44  ;;  %v8496_v5 = vld [vmem:[#allocation10 + $0x1e8] ss:$16 sps:$4 sm:$0xff]   ;;  %v8501_v28 = vld [vmem:[#allocation10 + $0x204] ss:$16 sps:$4 sm:$0xff]   ;;  %v8504_v32 = vld [vmem:[#allocation10 + $0x20c] ss:$16 sps:$4 sm:$0xff]  }
 0x2ac   :  { %v2253_v46 = vadd.f32 %v2252_v31, %v2028_v51  ;;  %4916 = vmatpush1.bf16.msra.mxu0 %v8487_v41  ;;  %v2090_v57 = vmul.f32 %v1962_v12, %v1962_v12  ;;  %v2036_v1 = vmul.f32 %v1908_v34, %v1908_v34  ;;  %v2120_v36 = vrot.slane %v10523_v52, 1  ;;  %v12628_v41 = vld [vmem:[#allocation127_spill] sm:$0xff] }
 0x2ad   :  { %v2218_v37 = vadd.f32 %v2217_v61, %v2082_v0  ;;  %5368 = vmatpush1.bf16.msra.mxu1 %v8490_v33  ;;  %4917 = vmatprep.subr.bf16.mxu0 %v8495_v63  ;;  %v2182_v26 = vadd.f32 %v2181_v56, %v10529_v48  ;;  %v2243_v55 = vadd.f32 %v2242_v22, %v2241_v15  ;;  %v2162_v0 = vrot.slane %v2161_v50, 1  ;;  %v12629_v15 = vld [vmem:[#allocation129_spill] sm:$0xff] }
 0x2ae   :  { %v2098_v47 = vmul.f32 %v1970_v58, %v1970_v58  ;;  %5369 = vmatprep.subr.bf16.mxu1 %v8498_v30  ;;  %v1932_v51 = vsub.f32 %v12628_v41, %v10596_v44  ;;  %v2044_v31 = vmul.f32 %v1916_v6, %v1916_v6  ;;  %v2254_v12 = vadd.f32 %v2253_v46, %v2036_v1  ;;  %v12667_v41 = vld [vmem:[#allocation47_spill] sm:$0xff] }
 0x2af   :  { %v2219_v24 = vadd.f32 %v2218_v37, %v2090_v57  ;;  %v2052_v34 = vmul.f32 %v1924_v10, %v1924_v10  ;;  %v2141_v33 = vrot.slane %v2140_v40, 1  ;;  %v2203_v63 = vadd.f32 %v2202_v7, %v2201_v16  ;;  %v12630_v10 = vld [vmem:[#allocation131_spill] sm:$0xff] }
 0x2b0   :  { %4918 = vmatpush1.bf16.msra.mxu0 %v8493_v62  ;;  %v2255_v4 = vadd.f32 %v2254_v12, %v2044_v31  ;;  %v2121_v48 = vadd.f32 %v2120_v36, %v10523_v52  ;;  %v2244_v58 = vrot.slane %v2243_v55, 2  ;;  %v1940_v56 = vsub.f32 %v12629_v15, %v10596_v44  ;;  %v12631_v52 = vld [vmem:[#allocation139_spill] sm:$0xff]  ;;  %v12632_v31 = vld [vmem:[#allocation144_spill] sm:$0xff] }
 0x2b1   :  { %v2220_v61 = vadd.f32 %v2219_v24, %v2098_v47  ;;  %5370 = vmatpush1.bf16.msra.mxu1 %v8496_v5  ;;  %5000 = vmatprep.subr.bf16.mxu0 %v8501_v28  ;;  %v2183_v22 = vrot.slane %v2182_v26, 1  ;;  %v2060_v6 = vmul.f32 %v1932_v51, %v1932_v51  ;;  %v2163_v46 = vadd.f32 %v2162_v0, %v2161_v50  ;;  %v8534_v15 = vld [vmem:[#allocation10 + $0x2ac] ss:$16 sps:$4 sm:$0xff]  }
 0x2b2   :  { %5452 = vmatprep.subr.bf16.mxu1 %v8504_v32  ;;  %v2256_v1 = vadd.f32 %v2255_v4, %v2052_v34  ;;  %v1948_v62 = vsub.f32 %v12630_v10, %v10596_v44  ;;  %v2142_v16 = vadd.f32 %v2141_v33, %v2140_v40  ;;  %v2204_v7 = vrot.slane %v2203_v63, 1  ;;  %v12633_v40 = vld [vmem:[#allocation149_spill] sm:$0xff] }
 0x2b3   :  { %v2221_v30 = vrot.slane %v2220_v61, 4  ;;  %v2245_v5 = vadd.f32 %v2244_v58, %v2243_v55  ;;  %v1956_v28 = vsub.f32 %v12631_v52, %v10596_v44  ;;  %v2068_v36 = vmul.f32 %v1940_v56, %v1940_v56 }
 0x2b4   :  { %v2257_v37 = vadd.f32 %v2256_v1, %v2060_v6  ;;  %v2269_v47 = vmul.f32 0.0078125, %v2121_v48  ;;  %v2184_v24 = vadd.f32 %v2183_v22, %v2182_v26  ;;  %v1964_v51 = vsub.f32 %v12632_v31, %v10596_v44 }
 0x2b5   :  { %v2222_v57 = vadd.f32 %v2221_v30, %v2220_v61  ;;  %v2076_v4 = vmul.f32 %v1948_v62, %v1948_v62  ;;  %v2271_v12 = vmul.f32 0.0078125, %v2163_v46  ;;  %v2270_v0 = vmul.f32 0.0078125, %v2142_v16 }
 0x2b6   :  { %v2258_v50 = vadd.f32 %v2257_v37, %v2068_v36  ;;  %v2205_v34 = vadd.f32 %v2204_v7, %v2203_v63  ;;  %v1972_v33 = vsub.f32 %v12633_v40, %v10596_v44  ;;  %v2246_v61 = vrot.slane %v2245_v5, 1 }
 0x2b7   :  { %v2223_v32 = vrot.slane %v2222_v57, 2  ;;  %v2084_v58 = vmul.f32 %v1956_v28, %v1956_v28  ;;  %v2277_v6 = vadd.f32 1e-05, %v2269_v47  ;;  %v2272_v56 = vmul.f32 0.0078125, %v2184_v24 }
 0x2b8   :  { %v2259_v30 = vadd.f32 %v2258_v50, %v2076_v4  ;;  %v2092_v26 = vmul.f32 %v1964_v51, %v1964_v51  ;;  %v2279_v1 = vadd.f32 1e-05, %v2271_v12  ;;  %v2278_v52 = vadd.f32 1e-05, %v2270_v0 }
 0x2b9   :  { %v2224_v55 = vadd.f32 %v2223_v32, %v2222_v57  ;;  %v2273_v31 = vmul.f32 0.0078125, %v2205_v34  ;;  %v2247_v62 = vadd.f32 %v2246_v61, %v2245_v5  ;;  %v2100_v46 = vmul.f32 %v1972_v33, %v1972_v33 }
 0x2ba   :  { %v2260_v22 = vadd.f32 %v2259_v30, %v2084_v58  ;;  %8827 = vrsqrt.f32 %v2277_v6  ;;  %v10672_v63 = vadd.f32 1e-05, %v2272_v56  ;;  %vm2287_vm0 = vcmp.eq.f32.partialorder %v2277_v6, inf }
 0x2bb   :  { %v2225_v48 = vrot.slane %v2224_v55, 1  ;;  %8829 = vrsqrt.f32 %v2279_v1  ;;  %v10674_v57 = vadd.f32 1e-05, %v2273_v31  ;;  %v2275_v28 = vmul.f32 0.0078125, %v2247_v62 }
 0x2bc   :  { %v2261_v16 = vadd.f32 %v2260_v22, %v2092_v26  ;;  %8831 = vrsqrt.f32 %v2278_v52  ;;  %vm2289_vm1 = vcmp.eq.f32.partialorder %v2277_v6, 0.0  ;;  %vm2301_vm2 = vcmp.eq.f32.partialorder %v2279_v1, inf }
 0x2bd   :  { %v2226_v37 = vadd.f32 %v2225_v48, %v2224_v55  ;;  %8833 = vrsqrt.f32 %v10672_v63  ;;  %v10680_v32 = vadd.f32 1e-05, %v2275_v28  ;;  %vm2294_vm3 = vcmp.eq.f32.partialorder %v2278_v52, inf }
 0x2be   :  { %v2262_v36 = vadd.f32 %v2261_v16, %v2100_v46  ;;  %8835 = vrsqrt.f32 %v10674_v57  ;;  %vm2303_vm4 = vcmp.eq.f32.partialorder %v2279_v1, 0.0  ;;  %vm2308_vm5 = vcmp.eq.f32.partialorder %v10672_v63, inf }
 0x2bf   :  { %v2274_v7 = vmul.f32 0.0078125, %v2226_v37  ;;  %v2290_v37 = vand.u32 2147483648, %v2277_v6  ;;  %vm2296_vm6 = vcmp.eq.f32.partialorder %v2278_v52, 0.0  ;;  %vm2315_vm7 = vcmp.eq.f32.partialorder %v10674_v57, inf }
 0x2c0   :  { %v2263_v24 = vrot.slane %v2262_v36, 4  ;;  %vm2310_vm9 = vcmp.eq.f32.partialorder %v10672_v63, 0.0  ;;  %vm2317_vm10 = vcmp.eq.f32.partialorder %v10674_v57, 0.0  ;;  %vm2329_vm12 = vcmp.eq.f32.partialorder %v10680_v32, inf }
 0x2c1   :  { %v10676_v47 = vadd.f32 1e-05, %v2274_v7  ;;  %v2304_v7 = vand.u32 2147483648, %v2279_v1  ;;  %vm2331_vm13 = vcmp.eq.f32.partialorder %v10680_v32, 0.0 }
 0x2c2   :  { %v2264_v5 = vadd.f32 %v2263_v24, %v2262_v36 }
 0x2c3   :  { %8837 = vrsqrt.f32 %v10676_v47  ;;  %vm2322_vm8 = vcmp.eq.f32.partialorder %v10676_v47, inf  ;;  %vm2324_vm11 = vcmp.eq.f32.partialorder %v10676_v47, 0.0 }
 0x2c4   :  { %v2265_v51 = vrot.slane %v2264_v5, 2  ;;  %v8828_v50 = vpop.eup %8827  ;;  %8839 = vrsqrt.f32 %v10680_v32 }
 0x2c5   :  { %v8830_v31 = vpop.eup %8829  ;;  %v2286_v34 = vmul.f32 %v8828_v50, %v2277_v6 }
 0x2c6   :  { %v2266_v4 = vadd.f32 %v2265_v51, %v2264_v5  ;;  %v8832_v0 = vpop.eup %8831  ;;  %v2300_v55 = vmul.f32 %v8830_v31, %v2279_v1  ;;  %v2297_v51 = vand.u32 2147483648, %v2278_v52  ;;  %v2311_v31 = vand.u32 2147483648, %v10672_v63 }
 0x2c7   :  { %v8834_v61 = vpop.eup %8833  ;;  %v2293_v30 = vmul.f32 %v8832_v0, %v2278_v52  ;;  %v2288_v26 = vsel %vm2287_vm0, %v2277_v6, %v2286_v34 }
 0x2c8   :  { %v2267_v12 = vrot.slane %v2266_v4, 1  ;;  %v8836_v58 = vpop.eup %8835  ;;  %v2307_v22 = vmul.f32 %v8834_v61, %v10672_v63  ;;  %v2302_v46 = vsel %vm2301_vm2, %v2279_v1, %v2300_v55  ;;  %v2291_v5 = vsel %vm2289_vm1, %v2290_v37, %v2288_v26 }
 0x2c9   :  { %v2314_v16 = vmul.f32 %v8836_v58, %v10674_v57  ;;  %v2295_v36 = vsel %vm2294_vm3, %v2278_v52, %v2293_v30  ;;  %v2332_v58 = vand.u32 2147483648, %v10680_v32 }
 0x2ca   :  { %v2268_v33 = vadd.f32 %v2267_v12, %v2266_v4  ;;  %v2305_v4 = vsel %vm2303_vm4, %v2304_v7, %v2302_v46  ;;  %v2309_v50 = vsel %vm2308_vm5, %v10672_v63, %v2307_v22  ;;  %v2298_v6 = vsel %vm2296_vm6, %v2297_v51, %v2295_v36  ;;  %v12634_v51 = vld [vmem:[#allocation23_spill] sm:$0xff] }
 0x2cb   :  { %v2316_v1 = vsel %vm2315_vm7, %v10674_v57, %v2314_v16  ;;  %v2318_v12 = vand.u32 2147483648, %v10674_v57  ;;  %v2312_v52 = vsel %vm2310_vm9, %v2311_v31, %v2309_v50 }
 0x2cc   :  { %v2276_v56 = vmul.f32 0.0078125, %v2268_v33  ;;  %v2325_v33 = vand.u32 2147483648, %v10676_v47 }
 0x2cd   :  { %v8838_v48 = vpop.eup %8837  ;;  %v2319_v61 = vsel %vm2317_vm10, %v2318_v12, %v2316_v1 }
 0x2ce   :  { %v2284_v62 = vadd.f32 1e-05, %v2276_v56  ;;  %v2321_v28 = vmul.f32 %v8838_v48, %v10676_v47  ;;  %v8840_v24 = vpop.eup %8839  ;;  %v9107_v48 = vmov 1966171168  }
 0x2cf   :  { %v2328_v0 = vmul.f32 %v8840_v24, %v10680_v32  ;;  %v2370_v26 = vunpack.c.l.s4 %v9107_v48 }
 0x2d0   :  { %8841 = vrsqrt.f32 %v2284_v62  ;;  %v2323_v34 = vsel %vm2322_vm8, %v10676_v47, %v2321_v28  ;;  %vm2336_vm14 = vcmp.eq.f32.partialorder %v2284_v62, inf  ;;  %v2339_v47 = vand.u32 2147483648, %v2284_v62 }
 0x2d1   :  { %8843 = vrcp.f32 %v2291_v5  ;;  %v2326_v63 = vsel %vm2324_vm11, %v2325_v33, %v2323_v34  ;;  %v2330_v55 = vsel %vm2329_vm12, %v10680_v32, %v2328_v0  ;;  %vm2338_vm15 = vcmp.eq.f32.partialorder %v2284_v62, 0.0 }
 0x2d2   :  { %8845 = vrcp.f32 %v2305_v4  ;;  %v2333_v30 = vsel %vm2331_vm13, %v2332_v58, %v2330_v55  ;;  %v2371_v36 = vunpack.c.0.s8 %v2370_v26  ;;  %v1667_v58 = vld [vmem:[#allocation8] sm:$0xff]  ;;  %v12637_v26 = vld [vmem:[#allocation32_spill] sm:$0xff] }
 0x2d3   :  { %8847 = vrcp.f32 %v2298_v6 }
 0x2d4   :  { %8849 = vrcp.f32 %v2312_v52  ;;  %v10705_v4 = vsub.s32 %v2371_v36, %v12634_v51  ;;  %v12643_v51 = vld [vmem:[#allocation106_spill] sm:$0xff] }
 0x2d5   :  { %8851 = vrcp.f32 %v2319_v61 }
 0x2d6   :  { %8853 = vrcp.f32 %v2326_v63  ;;  %12635 = vst [vmem:[#allocation148_spill] sm:$0xff] %v10705_v4 }
 0x2d7   :  { %8855 = vrcp.f32 %v2333_v30 }
 0x2da   :  { %v8842_v57 = vpop.eup %8841 }
 0x2db   :  { %v2335_v56 = vmul.f32 %v8842_v57, %v2284_v62  ;;  %v8844_v37 = vpop.eup %8843 }
 0x2dc   :  { %v8846_v16 = vpop.eup %8845 }
 0x2dd   :  { %v2337_v22 = vsel %vm2336_vm14, %v2284_v62, %v2335_v56  ;;  %v8848_v7 = vpop.eup %8847  ;;  %v12636_v56 = vld [vmem:[#allocation24_spill] sm:$0xff] }
 0x2de   :  { %v2340_v46 = vsel %vm2338_vm15, %v2339_v47, %v2337_v22  ;;  %v8850_v28 = vpop.eup %8849  ;;  %v2365_v5 = vcombine.low %v8844_v37, %v8848_v7  ;;  %v12638_v22 = vld [vmem:[#allocation25_spill] sm:$0xff]  ;;  %v12640_v7 = vld [vmem:[#allocation103_spill] sm:$0xff] }
 0x2df   :  { %8857 = vrcp.f32 %v2340_v46  ;;  %v8852_v24 = vpop.eup %8851  ;;  %v2366_v50 = vcombine.low %v8846_v16, %v8850_v28  ;;  %v12639_v46 = vld [vmem:[#allocation33_spill] sm:$0xff] }
 0x2e0   :  { %v8854_v32 = vpop.eup %8853  ;;  %v2375_v1 = vrot.slane %v2365_v5, %v10705_v4  ;;  %v12641_v28 = vld [vmem:[#allocation105_spill] sm:$0xff] }
 0x2e1   :  { %v2367_v6 = vcombine.low %v8852_v24, %v8854_v32  ;;  %v8856_v31 = vpop.eup %8855  ;;  %v2382_v62 = vrot.slane %v2366_v50, %v10705_v4  ;;  %v12642_v32 = vld [vmem:[#allocation104_spill] sm:$0xff] }
 0x2e3   :  { %v2389_v0 = vrot.slane %v2367_v6, %v10705_v4  ;;  %v2397_v52 = vcombine.low %v2375_v1, %v2382_v62  ;;  %v12644_v6 = vld [vmem:[#allocation88_spill] sm:$0xff] }
 0x2e5   :  { %v2405_v63 = vrot.slane %v2397_v52, %v10705_v4 }
 0x2e9   :  { %v8858_v12 = vpop.eup %8857 }
 0x2ea   :  { %v2368_v34 = vcombine.low %v8856_v31, %v8858_v12 }
 0x2ec   :  { %v2396_v33 = vrot.slane %v2368_v34, %v10705_v4 }
 0x2ee   :  { %v2398_v61 = vcombine.low %v2389_v0, %v2396_v33 }
 0x2f0   :  { %v2412_v55 = vrot.slane %v2398_v61, %v10705_v4 }
 0x2f2   :  { %v2413_v57 = vcombine.low %v2405_v63, %v2412_v55 }
 0x2f4   :  { %v2415_v30 = vmul.f32 %v2413_v57, %v1667_v58 }
 0x2f6   :  { %v10714_v48 = vrot.slane %v2415_v30, %v12636_v56  ;;  %v10717_v47 = vrot.slane %v2415_v30, %v12637_v26  ;;  %v10720_v37 = vrot.slane %v2415_v30, %v12638_v22  ;;  %v10723_v16 = vrot.slane %v2415_v30, %v12639_v46 }
 0x2f7   :  { %v10726_v36 = vrot.slane %v2415_v30, %v12640_v7  ;;  %v10729_v24 = vrot.slane %v2415_v30, %v12641_v28  ;;  %v10732_v5 = vrot.slane %v2415_v30, %v12642_v32  ;;  %v10735_v50 = vrot.slane %v2415_v30, %v12643_v51 }
 0x2f8   :  { %v2457_v31 = vmul.f32 %v10714_v48, %v12644_v6  ;;  %v2458_v1 = vmul.f32 %v10717_v47, %v9993_v21  ;;  %v2459_v62 = vmul.f32 %v10720_v37, %v12586_v49  ;;  %v2460_v12 = vmul.f32 %v10723_v16, %v10059_v17 }
 0x2f9   :  { %v2461_v0 = vmul.f32 %v10726_v36, %v10499_v3  ;;  %v2462_v34 = vmul.f32 %v10729_v24, %v10553_v23  ;;  %v2463_v52 = vmul.f32 %v10732_v5, %v10509_v53  ;;  %v2464_v33 = vmul.f32 %v10735_v50, %v10596_v44  ;;  %v1668_v44 = vld [vmem:[%s12009_s5] sm:$0xff] }
 0x2fa   :  { %v2473_v61 = vcombine.low %v2457_v31, %v2458_v1  ;;  %v2474_v21 = vcombine.low %v2459_v62, %v2460_v12  ;;  %v12645_v1 = vld [vmem:[#allocation43_spill] sm:$0xff]  ;;  %v12646_v12 = vld [vmem:[#allocation42_spill] sm:$0xff] }
 0x2fb   :  { %v2475_v63 = vcombine.low %v2461_v0, %v2462_v34  ;;  %v2476_v55 = vcombine.low %v2463_v52, %v2464_v33  ;;  %v2525_v62 = vmul.f32 %v10717_v47, %v12645_v1  ;;  %v2533_v0 = vmul.f32 %v10717_v47, %v12646_v12  ;;  %v12647_v52 = vld [vmem:[#allocation28_spill] sm:$0xff]  ;;  %v8499_v12 = vld [vmem:[#allocation10 + $0x200] ss:$16 sps:$4 sm:$0xff]  }
 0x2fc   :  { %v2483_v49 = vrot.slane %v2473_v61, %v10705_v4  ;;  %v2490_v17 = vrot.slane %v2474_v21, %v10705_v4  ;;  %v2524_v33 = vmul.f32 %v10714_v48, %v12647_v52  ;;  %v12648_v61 = vld [vmem:[#allocation26_spill] sm:$0xff] }
 0x2fd   :  { %v2497_v58 = vrot.slane %v2475_v63, %v10705_v4  ;;  %v2504_v3 = vrot.slane %v2476_v55, %v10705_v4  ;;  %v2532_v21 = vmul.f32 %v10714_v48, %v12648_v61  ;;  %v12649_v55 = vld [vmem:[#allocation46_spill] sm:$0xff] }
 0x2fe   :  { %v2505_v57 = vcombine.low %v2483_v49, %v2490_v17  ;;  %v2541_v49 = vmul.f32 %v10717_v47, %v12649_v55  ;;  %v12650_v17 = vld [vmem:[#allocation52_spill] sm:$0xff]  ;;  %v8507_v55 = vld [vmem:[#allocation10 + $0x224] ss:$16 sps:$4 sm:$0xff]  }
 0x2ff   :  { %v2506_v23 = vcombine.low %v2497_v58, %v2504_v3  ;;  %v2549_v58 = vmul.f32 %v10717_v47, %v12650_v17  ;;  %v8502_v52 = vld [vmem:[#allocation10 + $0x208] ss:$16 sps:$4 sm:$0xff]   ;;  %v8510_v17 = vld [vmem:[#allocation10 + $0x22c] ss:$16 sps:$4 sm:$0xff]  }
 0x300   :  { %v2513_v30 = vrot.slane %v2505_v57, %v10705_v4 }
 0x301   :  { %v2520_v53 = vrot.slane %v2506_v23, %v10705_v4 }
 0x303   :  { %v2521_v6 = vcombine.low %v2513_v30, %v2520_v53 }
 0x305   :  { %v10762_v31 = vsub.f32 %v1668_v44, %v2521_v6 }
 0x307   :  { %v10770_v34 = vrot.slane %v10762_v31, %v12637_v26  ;;  %v10778_v63 = vrot.slane %v10762_v31, %v12636_v56  ;;  %v12658_v26 = vld [vmem:[#allocation30_spill] sm:$0xff]  ;;  %v8525_v56 = vld [vmem:[#allocation10 + $0x284] ss:$16 sps:$4 sm:$0xff]  }
 0x309   :  { %v2694_v3 = vadd.f32 %v10770_v34, %v2525_v62  ;;  %v2702_v57 = vadd.f32 %v10770_v34, %v2533_v0  ;;  %v2693_v23 = vadd.f32 %v10778_v63, %v2524_v33  ;;  %v2701_v30 = vadd.f32 %v10778_v63, %v2532_v21  ;;  %v12651_v62 = vld [vmem:[#allocation29_spill] sm:$0xff]  ;;  %v12652_v33 = vld [vmem:[#allocation34_spill] sm:$0xff] }
 0x30a   :  { %v2710_v53 = vadd.f32 %v10770_v34, %v2541_v49  ;;  %v2718_v44 = vadd.f32 %v10770_v34, %v2549_v58  ;;  %v2540_v0 = vmul.f32 %v10714_v48, %v12651_v62  ;;  %v2548_v21 = vmul.f32 %v10714_v48, %v12652_v33  ;;  %v8505_v49 = vld [vmem:[#allocation10 + $0x220] ss:$16 sps:$4 sm:$0xff]  }
 0x30b   :  { %v2822_v6 = vpack.c.bf16 %v2702_v57, %v2694_v3  ;;  %v2821_v1 = vpack.c.bf16 %v2701_v30, %v2693_v23  ;;  %v12653_v58 = vld [vmem:[#allocation55_spill] sm:$0xff]  ;;  %v12654_v57 = vld [vmem:[#allocation60_spill] sm:$0xff] }
 0x30c   :  { %v2830_v61 = vpack.c.bf16 %v2718_v44, %v2710_v53  ;;  %v2557_v3 = vmul.f32 %v10717_v47, %v12653_v58  ;;  %v2565_v23 = vmul.f32 %v10717_v47, %v12654_v57  ;;  %v8508_v30 = vld [vmem:[#allocation10 + $0x228] ss:$16 sps:$4 sm:$0xff]   ;;  %v2709_v53 = vadd.f32 %v10778_v63, %v2540_v0  ;;  %v8511_v33 = vld [vmem:[#allocation10 + $0x240] ss:$16 sps:$4 sm:$0xff]   ;;  %v8519_v57 = vld [vmem:[#allocation10 + $0x264] ss:$16 sps:$4 sm:$0xff]  }
 0x30d   :  { %4919 = vmatprep.mubr.bf16.mxu0 %v2822_v6  ;;  %5371 = vmatprep.mubr.bf16.mxu1 %v2822_v6  ;;  %v2717_v44 = vadd.f32 %v10778_v63, %v2548_v21  ;;  %v8513_v6 = vld [vmem:[#allocation10 + $0x244] ss:$16 sps:$4 sm:$0xff]   ;;  %v10804_v58 = vrot.slane %v10762_v31, %v12638_v22  ;;  %v12655_v0 = vld [vmem:[#allocation36_spill] sm:$0xff]  ;;  %v2526_v22 = vmul.f32 %v10720_v37, %v12658_v26 }
 0x30e   :  { %4920 = vmatmul.mubr.bf16.vlgmr.msra.gmra.mrb[64].mxu0 %v2821_v1  ;;  %5372 = vmatmul.mubr.bf16.vlgmr.msra.gmra.mrb[64].mxu1 %v2821_v1  ;;  %v8516_v1 = vld [vmem:[#allocation10 + $0x24c] ss:$16 sps:$4 sm:$0xff]   ;;  %v2734_v62 = vadd.f32 %v10770_v34, %v2565_v23  ;;  %v2556_v21 = vmul.f32 %v10714_v48, %v12655_v0  ;;  %v12661_v0 = vld [vmem:[#allocation31_spill] sm:$0xff] }
 0x30f   :  { %4929 = vmatprep.mubr.bf16.mxu0 %v2830_v61  ;;  %5001 = vmatpush1.bf16.msra.mxu0 %v8499_v12  ;;  %v2726_v12 = vadd.f32 %v10770_v34, %v2557_v3  ;;  %v8522_v23 = vld [vmem:[#allocation10 + $0x26c] ss:$16 sps:$4 sm:$0xff]   ;;  %v2695_v26 = vadd.f32 %v10804_v58, %v2526_v22 }
 0x310   :  { %5381 = vmatprep.mubr.bf16.mxu1 %v2830_v61  ;;  %5453 = vmatpush1.bf16.msra.mxu1 %v8502_v52  ;;  %v2829_v52 = vpack.c.bf16 %v2717_v44, %v2709_v53  ;;  %v8514_v61 = vld [vmem:[#allocation10 + $0x248] ss:$16 sps:$4 sm:$0xff]  }
 0x311   :  { %5002 = vmatprep.subr.bf16.mxu0 %v8507_v55  ;;  %5454 = vmatprep.subr.bf16.mxu1 %v8510_v17  ;;  %v12656_v55 = vld [vmem:[#allocation38_spill] sm:$0xff]  ;;  %v2838_v3 = vpack.c.bf16 %v2734_v62, %v2726_v12  ;;  %v12660_v44 = vld [vmem:[#allocation68_spill] sm:$0xff]  ;;  %v12662_v12 = vld [vmem:[#allocation35_spill] sm:$0xff] }
 0x312   :  { %v2564_v17 = vmul.f32 %v10714_v48, %v12656_v55  ;;  %v2550_v62 = vmul.f32 %v10720_v37, %v12662_v12  ;;  %v8517_v55 = vld [vmem:[#allocation10 + $0x260] ss:$16 sps:$4 sm:$0xff]  }
 0x313   :  { %5003 = vmatpush1.bf16.msra.mxu0 %v8505_v49  ;;  %v12657_v49 = vld [vmem:[#allocation61_spill] sm:$0xff] }
 0x314   :  { %5455 = vmatpush1.bf16.msra.mxu1 %v8508_v30  ;;  %5004 = vmatprep.subr.bf16.mxu0 %v8513_v6  ;;  %v2573_v4 = vmul.f32 %v10717_v47, %v12657_v49  ;;  %v12659_v30 = vld [vmem:[#allocation27_spill] sm:$0xff]  ;;  %v2581_v6 = vmul.f32 %v10717_v47, %v12660_v44  ;;  %v2725_v49 = vadd.f32 %v10778_v63, %v2556_v21 }
 0x315   :  { %5456 = vmatprep.subr.bf16.mxu1 %v8516_v1  ;;  %v2534_v53 = vmul.f32 %v10720_v37, %v12659_v30  ;;  %v2542_v1 = vmul.f32 %v10720_v37, %v12661_v0  ;;  %v2733_v44 = vadd.f32 %v10778_v63, %v2564_v17  ;;  %v2719_v22 = vadd.f32 %v10804_v58, %v2550_v62  ;;  %v12664_v17 = vld [vmem:[#allocation40_spill] sm:$0xff]  ;;  %v12666_v62 = vld [vmem:[#allocation41_spill] sm:$0xff] }
 0x316   :  { %4930 = vmatmul.mubr.bf16.gmra.mrb[68].mxu0 %v2829_v52  ;;  %5382 = vmatmul.mubr.bf16.gmra.mrb[68].mxu1 %v2829_v52  ;;  %v8520_v52 = vld [vmem:[#allocation10 + $0x268] ss:$16 sps:$4 sm:$0xff]   ;;  %v2742_v0 = vadd.f32 %v10770_v34, %v2573_v4  ;;  %v2750_v40 = vadd.f32 %v10770_v34, %v2581_v6  ;;  %v2572_v10 = vmul.f32 %v10714_v48, %v12664_v17  ;;  %v12665_v6 = vld [vmem:[#allocation39_spill] sm:$0xff]  ;;  %v12668_v17 = vld [vmem:[#allocation49_spill] sm:$0xff] }
 0x317   :  { %4939 = vmatprep.mubr.bf16.mxu0 %v2838_v3  ;;  %5005 = vmatpush1.bf16.msra.mxu0 %v8511_v33  ;;  %v2703_v30 = vadd.f32 %v10804_v58, %v2534_v53  ;;  %v8528_v33 = vld [vmem:[#allocation10 + $0x28c] ss:$16 sps:$4 sm:$0xff]   ;;  %v2711_v21 = vadd.f32 %v10804_v58, %v2542_v1  ;;  %v12663_v53 = vld [vmem:[#allocation37_spill] sm:$0xff] }
 0x318   :  { %5391 = vmatprep.mubr.bf16.mxu1 %v2838_v3  ;;  %5457 = vmatpush1.bf16.msra.mxu1 %v8514_v61  ;;  %v2558_v61 = vmul.f32 %v10720_v37, %v12663_v53  ;;  %v8523_v3 = vld [vmem:[#allocation10 + $0x280] ss:$16 sps:$4 sm:$0xff]   ;;  %v8531_v53 = vld [vmem:[#allocation10 + $0x2a4] ss:$16 sps:$4 sm:$0xff]  }
 0x319   :  { %5006 = vmatprep.subr.bf16.mxu0 %v8519_v57  ;;  %5458 = vmatprep.subr.bf16.mxu1 %v8522_v23  ;;  %v10828_v12 = vpack.c.bf16 %v2703_v30, %v2695_v26  ;;  %v10836_v4 = vpack.c.bf16 %v2719_v22, %v2711_v21  ;;  %v2566_v57 = vmul.f32 %v10720_v37, %v12665_v6  ;;  %v8526_v26 = vld [vmem:[#allocation10 + $0x288] ss:$16 sps:$4 sm:$0xff]  }
 0x31a   :  { %v2837_v23 = vpack.c.bf16 %v2733_v44, %v2725_v49  ;;  %v2727_v1 = vadd.f32 %v10804_v58, %v2558_v61  ;;  %v2574_v30 = vmul.f32 %v10720_v37, %v12666_v62  ;;  %v2580_v21 = vmul.f32 %v10714_v48, %v12667_v41  ;;  %v12670_v44 = vld [vmem:[#allocation75_spill] sm:$0xff] }
 0x31b   :  { %5007 = vmatpush1.bf16.msra.mxu0 %v8517_v55  ;;  %v2846_v55 = vpack.c.bf16 %v2750_v40, %v2742_v0  ;;  %v2735_v22 = vadd.f32 %v10804_v58, %v2566_v57  ;;  %v2597_v61 = vmul.f32 %v10717_v47, %v12670_v44  ;;  %v8529_v0 = vld [vmem:[#allocation10 + $0x2a0] ss:$16 sps:$4 sm:$0xff]   ;;  %v2741_v41 = vadd.f32 %v10778_v63, %v2572_v10  ;;  %v8532_v57 = vld [vmem:[#allocation10 + $0x2a8] ss:$16 sps:$4 sm:$0xff]   ;;  %v8537_v62 = vld [vmem:[#allocation10 + $0x2c4] ss:$16 sps:$4 sm:$0xff]  }
 0x31c   :  { %5459 = vmatpush1.bf16.msra.mxu1 %v8520_v52  ;;  %5008 = vmatprep.subr.bf16.mxu0 %v8525_v56  ;;  %v2582_v52 = vmul.f32 %v10720_v37, %v12668_v17  ;;  %v12669_v56 = vld [vmem:[#allocation71_spill] sm:$0xff]  ;;  %v2743_v40 = vadd.f32 %v10804_v58, %v2574_v30 }
 0x31d   :  { %5460 = vmatprep.subr.bf16.mxu1 %v8528_v33  ;;  %v2589_v49 = vmul.f32 %v10717_v47, %v12669_v56  ;;  %v10854_v33 = vpack.c.bf16 %v2735_v22, %v2727_v1  ;;  %v12671_v56 = vld [vmem:[#allocation51_spill] sm:$0xff]  ;;  %v2766_v10 = vadd.f32 %v10770_v34, %v2597_v61  ;;  %v12672_v22 = vld [vmem:[#allocation56_spill] sm:$0xff] }
 0x31e   :  { %4940 = vmatmul.mubr.bf16.gmra.mrb[72].mxu0 %v2837_v23  ;;  %5392 = vmatmul.mubr.bf16.gmra.mrb[72].mxu1 %v2837_v23  ;;  %v2751_v6 = vadd.f32 %v10804_v58, %v2582_v52  ;;  %v2749_v23 = vadd.f32 %v10778_v63, %v2580_v21  ;;  %v2590_v30 = vmul.f32 %v10720_v37, %v12671_v56  ;;  %v12673_v52 = vld [vmem:[#allocation58_spill] sm:$0xff]  ;;  %v12674_v56 = vld [vmem:[#allocation63_spill] sm:$0xff] }
 0x31f   :  { %4949 = vmatprep.mubr.bf16.mxu0 %v2846_v55  ;;  %5009 = vmatpush1.bf16.msra.mxu0 %v8523_v3  ;;  %v2758_v17 = vadd.f32 %v10770_v34, %v2589_v49  ;;  %v8540_v3 = vld [vmem:[#allocation10 + $0x2cc] ss:$16 sps:$4 sm:$0xff]   ;;  %v2606_v21 = vmul.f32 %v10720_v37, %v12673_v52  ;;  %v8535_v49 = vld [vmem:[#allocation10 + $0x2c0] ss:$16 sps:$4 sm:$0xff]   ;;  %v8538_v61 = vld [vmem:[#allocation10 + $0x2c8] ss:$16 sps:$4 sm:$0xff]  }
 0x320   :  { %5401 = vmatprep.mubr.bf16.mxu1 %v2846_v55  ;;  %5461 = vmatpush1.bf16.msra.mxu1 %v8526_v26  ;;  %v10862_v1 = vpack.c.bf16 %v2751_v6, %v2743_v40  ;;  %v2598_v55 = vmul.f32 %v10720_v37, %v12672_v22  ;;  %v2759_v26 = vadd.f32 %v10804_v58, %v2590_v30  ;;  %v12675_v40 = vld [vmem:[#allocation50_spill] sm:$0xff] }
 0x321   :  { %5010 = vmatprep.subr.bf16.mxu0 %v8531_v53  ;;  %5462 = vmatprep.subr.bf16.mxu1 %v8534_v15  ;;  %v2614_v15 = vmul.f32 %v10720_v37, %v12674_v56  ;;  %v2845_v53 = vpack.c.bf16 %v2749_v23, %v2741_v41  ;;  %v2588_v6 = vmul.f32 %v10714_v48, %v12675_v40  ;;  %v8546_v52 = vld [vmem:[#allocation10 + $0x2ec] ss:$16 sps:$4 sm:$0xff]   ;;  %v12677_v41 = vld [vmem:[#allocation79_spill] sm:$0xff] }
 0x322   :  { %v2767_v44 = vadd.f32 %v10804_v58, %v2598_v55  ;;  %v2775_v22 = vadd.f32 %v10804_v58, %v2606_v21  ;;  %v2854_v30 = vpack.c.bf16 %v2766_v10, %v2758_v17  ;;  %v12678_v23 = vld [vmem:[#allocation66_spill] sm:$0xff] }
 0x323   :  { %5011 = vmatpush1.bf16.msra.mxu0 %v8529_v0  ;;  %v12676_v0 = vld [vmem:[#allocation54_spill] sm:$0xff]  ;;  %v2783_v56 = vadd.f32 %v10804_v58, %v2614_v15  ;;  %v2757_v10 = vadd.f32 %v10778_v63, %v2588_v6 }
 0x324   :  { %5463 = vmatpush1.bf16.msra.mxu1 %v8532_v57  ;;  %5012 = vmatprep.subr.bf16.mxu0 %v8537_v62  ;;  %v2596_v43 = vmul.f32 %v10714_v48, %v12676_v0  ;;  %v10877_v55 = vpack.c.bf16 %v2767_v44, %v2759_v26  ;;  %v2605_v57 = vmul.f32 %v10717_v47, %v12677_v41  ;;  %v12679_v21 = vld [vmem:[#allocation70_spill] sm:$0xff]  ;;  %v12680_v26 = vld [vmem:[#allocation81_spill] sm:$0xff] }
 0x325   :  { %5464 = vmatprep.subr.bf16.mxu1 %v8540_v3  ;;  %v2622_v62 = vmul.f32 %v10720_v37, %v12678_v23  ;;  %v2630_v17 = vmul.f32 %v10720_v37, %v12679_v21  ;;  %v8541_v3 = vld [vmem:[#allocation10 + $0x2e0] ss:$16 sps:$4 sm:$0xff]   ;;  %v2613_v44 = vmul.f32 %v10717_v47, %v12680_v26  ;;  %v10889_v15 = vpack.c.bf16 %v2783_v56, %v2775_v22  ;;  %v8549_v0 = vld [vmem:[#allocation10 + $0x304] ss:$16 sps:$4 sm:$0xff]   ;;  %v12681_v26 = vld [vmem:[#allocation74_spill] sm:$0xff] }
 0x326   :  { %4950 = vmatmul.mubr.bf16.gmra.mrb[76].mxu0 %v2845_v53  ;;  %5402 = vmatmul.mubr.bf16.gmra.mrb[76].mxu1 %v2845_v53  ;;  %v8544_v53 = vld [vmem:[#allocation10 + $0x2e8] ss:$16 sps:$4 sm:$0xff]   ;;  %v2765_v40 = vadd.f32 %v10778_v63, %v2596_v43  ;;  %v2774_v6 = vadd.f32 %v10770_v34, %v2605_v57  ;;  %v2638_v22 = vmul.f32 %v10720_v37, %v12681_v26  ;;  %v8561_v26 = vld [vmem:[#allocation10 + $0x344] ss:$16 sps:$4 sm:$0xff]  }
 0x327   :  { %4959 = vmatprep.mubr.bf16.mxu0 %v2854_v30  ;;  %5013 = vmatpush1.bf16.msra.mxu0 %v8535_v49  ;;  %v2791_v41 = vadd.f32 %v10804_v58, %v2622_v62  ;;  %v2799_v23 = vadd.f32 %v10804_v58, %v2630_v17  ;;  %v8552_v49 = vld [vmem:[#allocation10 + $0x30c] ss:$16 sps:$4 sm:$0xff]   ;;  %v2782_v21 = vadd.f32 %v10770_v34, %v2613_v44  ;;  %v8555_v17 = vld [vmem:[#allocation10 + $0x324] ss:$16 sps:$4 sm:$0xff]  }
 0x328   :  { %5411 = vmatprep.mubr.bf16.mxu1 %v2854_v30  ;;  %5465 = vmatpush1.bf16.msra.mxu1 %v8538_v61  ;;  %v2646_v43 = vmul.f32 %v10720_v37, %v12592_v20  ;;  %v8547_v61 = vld [vmem:[#allocation10 + $0x300] ss:$16 sps:$4 sm:$0xff]   ;;  %v2807_v56 = vadd.f32 %v10804_v58, %v2638_v22  ;;  %v8558_v44 = vld [vmem:[#allocation10 + $0x32c] ss:$16 sps:$4 sm:$0xff]  }
 0x329   :  { %5014 = vmatprep.subr.bf16.mxu0 %v8543_v2  ;;  %5466 = vmatprep.subr.bf16.mxu1 %v8546_v52  ;;  %v10898_v30 = vpack.c.bf16 %v2799_v23, %v2791_v41  ;;  %v2853_v2 = vpack.c.bf16 %v2765_v40, %v2757_v10  ;;  %v8550_v52 = vld [vmem:[#allocation10 + $0x308] ss:$16 sps:$4 sm:$0xff]   ;;  %v2862_v62 = vpack.c.bf16 %v2782_v21, %v2774_v6  ;;  %v12682_v41 = vld [vmem:[#allocation57_spill] sm:$0xff]  ;;  %v8564_v22 = vld [vmem:[#allocation10 + $0x34c] ss:$16 sps:$4 sm:$0xff]  }
 0x32a   :  { %v2815_v57 = vadd.f32 %v10804_v58, %v2646_v43  ;;  %v2604_v23 = vmul.f32 %v10714_v48, %v12682_v41  ;;  %v12683_v20 = vld [vmem:[#allocation62_spill] sm:$0xff]  ;;  %v8553_v10 = vld [vmem:[#allocation10 + $0x320] ss:$16 sps:$4 sm:$0xff]  }
 0x32b   :  { %5015 = vmatpush1.bf16.msra.mxu0 %v8541_v3  ;;  %v2612_v37 = vmul.f32 %v10714_v48, %v12683_v20  ;;  %v12685_v40 = vld [vmem:[#allocation85_spill] sm:$0xff]  ;;  %v8570_v41 = vld [vmem:[#allocation10 + $0x36c] ss:$16 sps:$4 sm:$0xff]  }
 0x32c   :  { %5467 = vmatpush1.bf16.msra.mxu1 %v8544_v53  ;;  %5016 = vmatprep.subr.bf16.mxu0 %v8549_v0  ;;  %v10908_v3 = vpack.c.bf16 %v2815_v57, %v2807_v56  ;;  %v12684_v53 = vld [vmem:[#allocation83_spill] sm:$0xff]  ;;  %v2629_v0 = vmul.f32 %v10717_v47, %v12685_v40  ;;  %v2773_v6 = vadd.f32 %v10778_v63, %v2604_v23  ;;  %v8562_v57 = vld [vmem:[#allocation10 + $0x348] ss:$16 sps:$4 sm:$0xff]  }
 0x32d   :  { %5468 = vmatprep.subr.bf16.mxu1 %v8552_v49  ;;  %v2621_v58 = vmul.f32 %v10717_v47, %v12684_v53  ;;  %v8556_v49 = vld [vmem:[#allocation10 + $0x328] ss:$16 sps:$4 sm:$0xff]   ;;  %v2781_v21 = vadd.f32 %v10778_v63, %v2612_v37  ;;  %v8559_v56 = vld [vmem:[#allocation10 + $0x340] ss:$16 sps:$4 sm:$0xff]  }
 0x32e   :  { %4960 = vmatmul.mubr.bf16.gmra.mrb[80].mxu0 %v2853_v2  ;;  %5412 = vmatmul.mubr.bf16.gmra.mrb[80].mxu1 %v2853_v2  ;;  %v12686_v23 = vld [vmem:[#allocation64_spill] sm:$0xff]  ;;  %v8565_v37 = vld [vmem:[#allocation10 + $0x360] ss:$16 sps:$4 sm:$0xff]  }
 0x32f   :  { %4969 = vmatprep.mubr.bf16.mxu0 %v2862_v62  ;;  %5017 = vmatpush1.bf16.msra.mxu0 %v8547_v61  ;;  %v2790_v43 = vadd.f32 %v10770_v34, %v2621_v58  ;;  %v2798_v61 = vadd.f32 %v10770_v34, %v2629_v0  ;;  %v2861_v2 = vpack.c.bf16 %v2781_v21, %v2773_v6  ;;  %v12689_v58 = vld [vmem:[#allocation90_spill] sm:$0xff]  ;;  %v8573_v21 = vld [vmem:[#allocation10 + $0x384] ss:$16 sps:$4 sm:$0xff]  }
 0x330   :  { %5421 = vmatprep.mubr.bf16.mxu1 %v2862_v62  ;;  %5469 = vmatpush1.bf16.msra.mxu1 %v8550_v52  ;;  %v8567_v62 = vld [vmem:[#allocation10 + $0x364] ss:$16 sps:$4 sm:$0xff]   ;;  %v2645_v40 = vmul.f32 %v10717_v47, %v12689_v58  ;;  %v8568_v0 = vld [vmem:[#allocation10 + $0x368] ss:$16 sps:$4 sm:$0xff]  }
 0x331   :  { %5018 = vmatprep.subr.bf16.mxu0 %v8555_v17  ;;  %5470 = vmatprep.subr.bf16.mxu1 %v8558_v44  ;;  %v2870_v52 = vpack.c.bf16 %v2798_v61, %v2790_v43  ;;  %v2620_v17 = vmul.f32 %v10714_v48, %v12686_v23  ;;  %v12687_v44 = vld [vmem:[#allocation69_spill] sm:$0xff]  ;;  %v10932_v23 = vrot.slane %v10762_v31, %v12639_v46  ;;  %v8580_v58 = vld [vmem:[#allocation10 + $0x3a8] ss:$16 sps:$4 sm:$0xff]  }
 0x332   :  { %v2628_v20 = vmul.f32 %v10714_v48, %v12687_v44  ;;  %v2814_v43 = vadd.f32 %v10770_v34, %v2645_v40  ;;  %v8571_v61 = vld [vmem:[#allocation10 + $0x380] ss:$16 sps:$4 sm:$0xff]  }
 0x333   :  { %5019 = vmatpush1.bf16.msra.mxu0 %v8553_v10  ;;  %v12688_v10 = vld [vmem:[#allocation87_spill] sm:$0xff] }
 0x334   :  { %5471 = vmatpush1.bf16.msra.mxu1 %v8556_v49  ;;  %5020 = vmatprep.subr.bf16.mxu0 %v8561_v26  ;;  %v2637_v53 = vmul.f32 %v10717_v47, %v12688_v10  ;;  %v2789_v49 = vadd.f32 %v10778_v63, %v2620_v17  ;;  %v2797_v6 = vadd.f32 %v10778_v63, %v2628_v20  ;;  %v8576_v26 = vld [vmem:[#allocation10 + $0x38c] ss:$16 sps:$4 sm:$0xff]   ;;  %v8574_v47 = vld [vmem:[#allocation10 + $0x388] ss:$16 sps:$4 sm:$0xff]   ;;  %v8577_v44 = vld [vmem:[#allocation10 + $0x3a0] ss:$16 sps:$4 sm:$0xff]  }
 0x335   :  { %5472 = vmatprep.subr.bf16.mxu1 %v8564_v22  ;;  %v12692_v20 = vld [vmem:[#allocation45_spill] sm:$0xff]  ;;  %v12693_v10 = vld [vmem:[#allocation44_spill] sm:$0xff] }
 0x336   :  { %4970 = vmatmul.mubr.bf16.gmra.mrb[84].mxu0 %v2861_v2  ;;  %5422 = vmatmul.mubr.bf16.gmra.mrb[84].mxu1 %v2861_v2  ;;  %v2806_v22 = vadd.f32 %v10770_v34, %v2637_v53  ;;  %v12691_v34 = vld [vmem:[#allocation76_spill] sm:$0xff]  ;;  %v2535_v53 = vmul.f32 %v10723_v16, %v12693_v10 }
 0x337   :  { %4979 = vmatprep.mubr.bf16.mxu0 %v2870_v52  ;;  %5021 = vmatpush1.bf16.msra.mxu0 %v8559_v56  ;;  %v2869_v56 = vpack.c.bf16 %v2797_v6, %v2789_v49  ;;  %v2644_v17 = vmul.f32 %v10714_v48, %v12691_v34  ;;  %v8585_v49 = vld [vmem:[#allocation10 + $0x3c4] ss:$16 sps:$4 sm:$0xff]   ;;  %v8598_v10 = vld [vmem:[#allocation10 + $0x408] ss:$16 sps:$4 sm:$0xff]  }
 0x338   :  { %5431 = vmatprep.mubr.bf16.mxu1 %v2870_v52  ;;  %5473 = vmatpush1.bf16.msra.mxu1 %v8562_v57  ;;  %v2878_v2 = vpack.c.bf16 %v2814_v43, %v2806_v22  ;;  %v8579_v57 = vld [vmem:[#allocation10 + $0x3a4] ss:$16 sps:$4 sm:$0xff]   ;;  %v8582_v52 = vld [vmem:[#allocation10 + $0x3ac] ss:$16 sps:$4 sm:$0xff]   ;;  %v8586_v43 = vld [vmem:[#allocation10 + $0x3c8] ss:$16 sps:$4 sm:$0xff]  }
 0x339   :  { %5022 = vmatprep.subr.bf16.mxu0 %v8567_v62  ;;  %5474 = vmatprep.subr.bf16.mxu1 %v8570_v41  ;;  %v12690_v62 = vld [vmem:[#allocation72_spill] sm:$0xff]  ;;  %v8597_v34 = vld [vmem:[#allocation10 + $0x404] ss:$16 sps:$4 sm:$0xff]  }
 0x33a   :  { %v2636_v41 = vmul.f32 %v10714_v48, %v12690_v62  ;;  %v8588_v48 = vld [vmem:[#allocation10 + $0x3cc] ss:$16 sps:$4 sm:$0xff]  }
 0x33b   :  { %5023 = vmatpush1.bf16.msra.mxu0 %v8565_v37  ;;  %v2527_v37 = vmul.f32 %v10723_v16, %v12692_v20 }
 0x33c   :  { %5475 = vmatpush1.bf16.msra.mxu1 %v8568_v0  ;;  %5024 = vmatprep.subr.bf16.mxu0 %v8573_v21  ;;  %v2805_v40 = vadd.f32 %v10778_v63, %v2636_v41  ;;  %v2813_v0 = vadd.f32 %v10778_v63, %v2644_v17  ;;  %v2704_v21 = vadd.f32 %v10932_v23, %v2535_v53  ;;  %v8589_v63 = vld [vmem:[#allocation10 + $0x3e0] ss:$16 sps:$4 sm:$0xff]   ;;  %v8592_v41 = vld [vmem:[#allocation10 + $0x3e8] ss:$16 sps:$4 sm:$0xff]   ;;  %v8600_v17 = vld [vmem:[#allocation10 + $0x40c] ss:$16 sps:$4 sm:$0xff]  }
 0x33d   :  { %5476 = vmatprep.subr.bf16.mxu1 %v8576_v26  ;;  %v2696_v6 = vadd.f32 %v10932_v23, %v2527_v37  ;;  %v8583_v26 = vld [vmem:[#allocation10 + $0x3c0] ss:$16 sps:$4 sm:$0xff]  }
 0x33e   :  { %4980 = vmatmul.mubr.bf16.gmra.mrb[88].mxu0 %v2869_v56  ;;  %5432 = vmatmul.mubr.bf16.gmra.mrb[88].mxu1 %v2869_v56  ;;  %v2877_v22 = vpack.c.bf16 %v2813_v0, %v2805_v40  ;;  %v8591_v56 = vld [vmem:[#allocation10 + $0x3e4] ss:$16 sps:$4 sm:$0xff]   ;;  %v8595_v37 = vld [vmem:[#allocation10 + $0x400] ss:$16 sps:$4 sm:$0xff]   ;;  %v8606_v40 = vld [vmem:[#allocation10 + $0x42c] ss:$16 sps:$4 sm:$0xff]  }
 0x33f   :  { %4989 = vmatprep.mubr.bf16.mxu0 %v2878_v2  ;;  %5025 = vmatpush1.bf16.msra.mxu0 %v8571_v61  ;;  %v2824_v61 = vpack.c.bf16 %v2704_v21, %v2696_v6  ;;  %v12696_v0 = vld [vmem:[#allocation59_spill] sm:$0xff] }
 0x340   :  { %5441 = vmatprep.mubr.bf16.mxu1 %v2878_v2  ;;  %5477 = vmatpush1.bf16.msra.mxu1 %v8574_v47  ;;  %v8594_v47 = vld [vmem:[#allocation10 + $0x3ec] ss:$16 sps:$4 sm:$0xff]   ;;  %v8601_v21 = vld [vmem:[#allocation10 + $0x420] ss:$16 sps:$4 sm:$0xff]  }
 0x341   :  { %5026 = vmatprep.subr.bf16.mxu0 %v8579_v57  ;;  %5478 = vmatprep.subr.bf16.mxu1 %v8582_v52  ;;  %v12694_v2 = vld [vmem:[#allocation48_spill] sm:$0xff]  ;;  %v12695_v52 = vld [vmem:[#allocation53_spill] sm:$0xff] }
 0x342   :  { %v2543_v57 = vmul.f32 %v10723_v16, %v12694_v2  ;;  %v2551_v62 = vmul.f32 %v10723_v16, %v12695_v52  ;;  %v8615_v2 = vld [vmem:[#allocation10 + $0x464] ss:$16 sps:$4 sm:$0xff]  }
 0x343   :  { %5027 = vmatpush1.bf16.msra.mxu0 %v8577_v44  ;;  %v12698_v52 = vld [vmem:[#allocation67_spill] sm:$0xff] }
 0x344   :  { %5479 = vmatpush1.bf16.msra.mxu1 %v8580_v58  ;;  %5028 = vmatprep.subr.bf16.mxu0 %v8585_v49  ;;  %v2712_v44 = vadd.f32 %v10932_v23, %v2543_v57  ;;  %v2720_v20 = vadd.f32 %v10932_v23, %v2551_v62  ;;  %v8603_v58 = vld [vmem:[#allocation10 + $0x424] ss:$16 sps:$4 sm:$0xff]   ;;  %v2559_v49 = vmul.f32 %v10723_v16, %v12696_v0  ;;  %v8618_v57 = vld [vmem:[#allocation10 + $0x46c] ss:$16 sps:$4 sm:$0xff]  }
 0x345   :  { %5480 = vmatprep.subr.bf16.mxu1 %v8588_v48  ;;  %v12697_v48 = vld [vmem:[#allocation65_spill] sm:$0xff]  ;;  %v2575_v62 = vmul.f32 %v10723_v16, %v12698_v52  ;;  %v8642_v52 = vld [vmem:[#allocation10 + $0x4ec] ss:$16 sps:$4 sm:$0xff]  }
 0x346   :  { %4990 = vmatmul.mubr.bf16.gmra.mrb[92].mxu0 %v2877_v22  ;;  %5442 = vmatmul.mubr.bf16.gmra.mrb[92].mxu1 %v2877_v22  ;;  %v2832_v53 = vpack.c.bf16 %v2720_v20, %v2712_v44  ;;  %v2567_v6 = vmul.f32 %v10723_v16, %v12697_v48  ;;  %v8609_v22 = vld [vmem:[#allocation10 + $0x444] ss:$16 sps:$4 sm:$0xff]   ;;  %v8616_v44 = vld [vmem:[#allocation10 + $0x468] ss:$16 sps:$4 sm:$0xff]  }
 0x347   :  { %5029 = vmatpush1.bf16.msra.mxu0 %v8583_v26  ;;  %5032 = vmatprep.mubr.bf16.mxu0 %v2824_v61  ;;  %v8604_v26 = vld [vmem:[#allocation10 + $0x428] ss:$16 sps:$4 sm:$0xff]   ;;  %v8621_v20 = vld [vmem:[#allocation10 + $0x484] ss:$16 sps:$4 sm:$0xff]  }
 0x348   :  { %5481 = vmatpush1.bf16.msra.mxu1 %v8586_v43  ;;  %5484 = vmatprep.mubr.bf16.mxu1 %v2824_v61  ;;  %v2728_v43 = vadd.f32 %v10932_v23, %v2559_v49  ;;  %v2736_v61 = vadd.f32 %v10932_v23, %v2567_v6  ;;  %v8627_v0 = vld [vmem:[#allocation10 + $0x4a4] ss:$16 sps:$4 sm:$0xff]   ;;  %v8630_v49 = vld [vmem:[#allocation10 + $0x4ac] ss:$16 sps:$4 sm:$0xff]  }
 0x349   :  { %5030 = vmatprep.subr.bf16.mxu0 %v8591_v56  ;;  %5482 = vmatprep.subr.bf16.mxu1 %v8594_v47  ;;  %v8607_v56 = vld [vmem:[#allocation10 + $0x440] ss:$16 sps:$4 sm:$0xff]   ;;  %v8610_v47 = vld [vmem:[#allocation10 + $0x448] ss:$16 sps:$4 sm:$0xff]  }
 0x34a   :  { %v12700_v48 = vld [vmem:[#allocation77_spill] sm:$0xff] }
 0x34b   :  { %5031 = vmatpush1.bf16.msra.mxu0 %v8589_v63  ;;  %v2840_v63 = vpack.c.bf16 %v2736_v61, %v2728_v43  ;;  %v2591_v6 = vmul.f32 %v10723_v16, %v12700_v48  ;;  %v8628_v43 = vld [vmem:[#allocation10 + $0x4a8] ss:$16 sps:$4 sm:$0xff]   ;;  %v8633_v61 = vld [vmem:[#allocation10 + $0x4c4] ss:$16 sps:$4 sm:$0xff]  }
 0x34c   :  { %5483 = vmatpush1.bf16.msra.mxu1 %v8592_v41  ;;  %5113 = vmatprep.subr.bf16.mxu0 %v8597_v34  ;;  %v12699_v41 = vld [vmem:[#allocation73_spill] sm:$0xff]  ;;  %v12704_v48 = vld [vmem:[#allocation86_spill] sm:$0xff] }
 0x34d   :  { %5565 = vmatprep.subr.bf16.mxu1 %v8600_v17  ;;  %v2583_v34 = vmul.f32 %v10723_v16, %v12699_v41  ;;  %v8613_v17 = vld [vmem:[#allocation10 + $0x460] ss:$16 sps:$4 sm:$0xff]  }
 0x34e   :  { %5033 = vmatmul.mubr.bf16.vlgmr.msra.gmra.mrb[64].mxu0 %v10828_v12 }
 0x34f   :  { %5485 = vmatmul.mubr.bf16.vlgmr.msra.gmra.mrb[64].mxu1 %v10828_v12  ;;  %5042 = vmatprep.mubr.bf16.mxu0 %v2832_v53  ;;  %v8612_v12 = vld [vmem:[#allocation10 + $0x44c] ss:$16 sps:$4 sm:$0xff]  }
 0x350   :  { %5114 = vmatpush1.bf16.msra.mxu0 %v8595_v37  ;;  %5494 = vmatprep.mubr.bf16.mxu1 %v2832_v53  ;;  %v2744_v37 = vadd.f32 %v10932_v23, %v2575_v62  ;;  %v8619_v53 = vld [vmem:[#allocation10 + $0x480] ss:$16 sps:$4 sm:$0xff]   ;;  %v12702_v62 = vld [vmem:[#allocation82_spill] sm:$0xff] }
 0x351   :  { %5566 = vmatpush1.bf16.msra.mxu1 %v8598_v10  ;;  %5115 = vmatprep.subr.bf16.mxu0 %v8603_v58  ;;  %v2752_v10 = vadd.f32 %v10932_v23, %v2583_v34  ;;  %v8622_v58 = vld [vmem:[#allocation10 + $0x488] ss:$16 sps:$4 sm:$0xff]   ;;  %v2607_v41 = vmul.f32 %v10723_v16, %v12702_v62 }
 0x352   :  { %5567 = vmatprep.subr.bf16.mxu1 %v8606_v40  ;;  %v12703_v34 = vld [vmem:[#allocation84_spill] sm:$0xff] }
 0x353   :  { %v2848_v40 = vpack.c.bf16 %v2752_v10, %v2744_v37  ;;  %v8645_v37 = vld [vmem:[#allocation10 + $0x504] ss:$16 sps:$4 sm:$0xff]   ;;  %v2776_v10 = vadd.f32 %v10932_v23, %v2607_v41 }
 0x354   :  { %5116 = vmatpush1.bf16.msra.mxu0 %v8601_v21  ;;  %v12701_v21 = vld [vmem:[#allocation80_spill] sm:$0xff]  ;;  %v12707_v41 = vld [vmem:[#allocation95_spill] sm:$0xff] }
 0x355   :  { %5568 = vmatpush1.bf16.msra.mxu1 %v8604_v26  ;;  %5117 = vmatprep.subr.bf16.mxu0 %v8609_v22  ;;  %v2599_v26 = vmul.f32 %v10723_v16, %v12701_v21  ;;  %v8625_v22 = vld [vmem:[#allocation10 + $0x4a0] ss:$16 sps:$4 sm:$0xff]  }
 0x356   :  { %5043 = vmatmul.mubr.bf16.gmra.mrb[68].mxu0 %v10836_v4  ;;  %5569 = vmatprep.subr.bf16.mxu1 %v8612_v12  ;;  %v2760_v12 = vadd.f32 %v10932_v23, %v2591_v6  ;;  %v2623_v6 = vmul.f32 %v10723_v16, %v12704_v48  ;;  %v12705_v21 = vld [vmem:[#allocation89_spill] sm:$0xff] }
 0x357   :  { %5495 = vmatmul.mubr.bf16.gmra.mrb[68].mxu1 %v10836_v4  ;;  %5052 = vmatprep.mubr.bf16.mxu0 %v2840_v63  ;;  %v8624_v4 = vld [vmem:[#allocation10 + $0x48c] ss:$16 sps:$4 sm:$0xff]   ;;  %v8681_v48 = vld [vmem:[#allocation10 + $0x5c4] ss:$16 sps:$4 sm:$0xff]  }
 0x358   :  { %5118 = vmatpush1.bf16.msra.mxu0 %v8607_v56  ;;  %5504 = vmatprep.mubr.bf16.mxu1 %v2840_v63  ;;  %v2768_v56 = vadd.f32 %v10932_v23, %v2599_v26  ;;  %v8634_v63 = vld [vmem:[#allocation10 + $0x4c8] ss:$16 sps:$4 sm:$0xff]   ;;  %v2631_v26 = vmul.f32 %v10723_v16, %v12705_v21 }
 0x359   :  { %5570 = vmatpush1.bf16.msra.mxu1 %v8610_v47  ;;  %5119 = vmatprep.subr.bf16.mxu0 %v8615_v2  ;;  %v8631_v47 = vld [vmem:[#allocation10 + $0x4c0] ss:$16 sps:$4 sm:$0xff]  }
 0x35a   :  { %5571 = vmatprep.subr.bf16.mxu1 %v8618_v57  ;;  %v2856_v2 = vpack.c.bf16 %v2768_v56, %v2760_v12  ;;  %v8639_v57 = vld [vmem:[#allocation10 + $0x4e4] ss:$16 sps:$4 sm:$0xff]   ;;  %v2792_v12 = vadd.f32 %v10932_v23, %v2623_v6  ;;  %v2800_v56 = vadd.f32 %v10932_v23, %v2631_v26  ;;  %v8679_v26 = vld [vmem:[#allocation10 + $0x5c0] ss:$16 sps:$4 sm:$0xff]  }
 0x35c   :  { %5120 = vmatpush1.bf16.msra.mxu0 %v8613_v17  ;;  %v2615_v17 = vmul.f32 %v10723_v16, %v12703_v34  ;;  %v2647_v34 = vmul.f32 %v10723_v16, %v12707_v41 }
 0x35d   :  { %5572 = vmatpush1.bf16.msra.mxu1 %v8616_v44  ;;  %5121 = vmatprep.subr.bf16.mxu0 %v8621_v20  ;;  %v8637_v44 = vld [vmem:[#allocation10 + $0x4e0] ss:$16 sps:$4 sm:$0xff]   ;;  %v8640_v20 = vld [vmem:[#allocation10 + $0x4e8] ss:$16 sps:$4 sm:$0xff]  }
 0x35e   :  { %5053 = vmatmul.mubr.bf16.gmra.mrb[72].mxu0 %v10854_v33  ;;  %5573 = vmatprep.subr.bf16.mxu1 %v8624_v4  ;;  %v2784_v4 = vadd.f32 %v10932_v23, %v2615_v17  ;;  %v8661_v17 = vld [vmem:[#allocation10 + $0x560] ss:$16 sps:$4 sm:$0xff]  }
 0x35f   :  { %5505 = vmatmul.mubr.bf16.gmra.mrb[72].mxu1 %v10854_v33  ;;  %5062 = vmatprep.mubr.bf16.mxu0 %v2848_v40  ;;  %v8636_v33 = vld [vmem:[#allocation10 + $0x4cc] ss:$16 sps:$4 sm:$0xff]  }
 0x360   :  { %5122 = vmatpush1.bf16.msra.mxu0 %v8619_v53  ;;  %5514 = vmatprep.mubr.bf16.mxu1 %v2848_v40  ;;  %v8643_v53 = vld [vmem:[#allocation10 + $0x500] ss:$16 sps:$4 sm:$0xff]   ;;  %v2864_v40 = vpack.c.bf16 %v2784_v4, %v2776_v10  ;;  %v2816_v10 = vadd.f32 %v10932_v23, %v2647_v34 }
 0x361   :  { %5574 = vmatpush1.bf16.msra.mxu1 %v8622_v58  ;;  %5123 = vmatprep.subr.bf16.mxu0 %v8627_v0  ;;  %v8646_v58 = vld [vmem:[#allocation10 + $0x508] ss:$16 sps:$4 sm:$0xff]   ;;  %v8651_v0 = vld [vmem:[#allocation10 + $0x524] ss:$16 sps:$4 sm:$0xff]   ;;  %v8667_v4 = vld [vmem:[#allocation10 + $0x580] ss:$16 sps:$4 sm:$0xff]  }
 0x362   :  { %5575 = vmatprep.subr.bf16.mxu1 %v8630_v49  ;;  %v8654_v49 = vld [vmem:[#allocation10 + $0x52c] ss:$16 sps:$4 sm:$0xff]  }
 0x364   :  { %5124 = vmatpush1.bf16.msra.mxu0 %v8625_v22  ;;  %v8649_v22 = vld [vmem:[#allocation10 + $0x520] ss:$16 sps:$4 sm:$0xff]  }
 0x365   :  { %5576 = vmatpush1.bf16.msra.mxu1 %v8628_v43  ;;  %5125 = vmatprep.subr.bf16.mxu0 %v8633_v61  ;;  %v8652_v43 = vld [vmem:[#allocation10 + $0x528] ss:$16 sps:$4 sm:$0xff]   ;;  %v8657_v61 = vld [vmem:[#allocation10 + $0x544] ss:$16 sps:$4 sm:$0xff]  }
 0x366   :  { %5063 = vmatmul.mubr.bf16.gmra.mrb[76].mxu0 %v10862_v1  ;;  %5577 = vmatprep.subr.bf16.mxu1 %v8636_v33  ;;  %v8655_v33 = vld [vmem:[#allocation10 + $0x540] ss:$16 sps:$4 sm:$0xff]  }
 0x367   :  { %5515 = vmatmul.mubr.bf16.gmra.mrb[76].mxu1 %v10862_v1  ;;  %5072 = vmatprep.mubr.bf16.mxu0 %v2856_v2  ;;  %v8648_v1 = vld [vmem:[#allocation10 + $0x50c] ss:$16 sps:$4 sm:$0xff]  }
 0x368   :  { %5126 = vmatpush1.bf16.msra.mxu0 %v8631_v47  ;;  %5524 = vmatprep.mubr.bf16.mxu1 %v2856_v2  ;;  %v8658_v47 = vld [vmem:[#allocation10 + $0x548] ss:$16 sps:$4 sm:$0xff]   ;;  %v8663_v2 = vld [vmem:[#allocation10 + $0x564] ss:$16 sps:$4 sm:$0xff]  }
 0x369   :  { %5578 = vmatpush1.bf16.msra.mxu1 %v8634_v63  ;;  %5127 = vmatprep.subr.bf16.mxu0 %v8639_v57  ;;  %v2872_v63 = vpack.c.bf16 %v2800_v56, %v2792_v12  ;;  %v8666_v57 = vld [vmem:[#allocation10 + $0x56c] ss:$16 sps:$4 sm:$0xff]  }
 0x36a   :  { %5579 = vmatprep.subr.bf16.mxu1 %v8642_v52  ;;  %v12706_v52 = vld [vmem:[#allocation91_spill] sm:$0xff]  ;;  %v12708_v12 = vld [vmem:[#allocation118_spill] sm:$0xff] }
 0x36b   :  { %v2639_v62 = vmul.f32 %v10723_v16, %v12706_v52  ;;  %v8675_v16 = vld [vmem:[#allocation10 + $0x5a4] ss:$16 sps:$4 sm:$0xff]   ;;  %v2528_v56 = vmul.f32 %v10726_v36, %v12708_v12 }
 0x36c   :  { %5128 = vmatpush1.bf16.msra.mxu0 %v8637_v44  ;;  %v8664_v44 = vld [vmem:[#allocation10 + $0x568] ss:$16 sps:$4 sm:$0xff]   ;;  %v8693_v52 = vld [vmem:[#allocation10 + $0x604] ss:$16 sps:$4 sm:$0xff]  }
 0x36d   :  { %5580 = vmatpush1.bf16.msra.mxu1 %v8640_v20  ;;  %5129 = vmatprep.subr.bf16.mxu0 %v8645_v37  ;;  %v8669_v20 = vld [vmem:[#allocation10 + $0x584] ss:$16 sps:$4 sm:$0xff]   ;;  %v2808_v37 = vadd.f32 %v10932_v23, %v2639_v62  ;;  %v2529_v23 = vmul.f32 %v10729_v24, %v12599_v42  ;;  %v8682_v42 = vld [vmem:[#allocation10 + $0x5c8] ss:$16 sps:$4 sm:$0xff]   ;;  %v8696_v62 = vld [vmem:[#allocation10 + $0x60c] ss:$16 sps:$4 sm:$0xff]  }
 0x36e   :  { %5073 = vmatmul.mubr.bf16.gmra.mrb[80].mxu0 %v10877_v55  ;;  %5581 = vmatprep.subr.bf16.mxu1 %v8648_v1  ;;  %v8670_v1 = vld [vmem:[#allocation10 + $0x588] ss:$16 sps:$4 sm:$0xff]  }
 0x36f   :  { %5525 = vmatmul.mubr.bf16.gmra.mrb[80].mxu1 %v10877_v55  ;;  %5082 = vmatprep.mubr.bf16.mxu0 %v2864_v40  ;;  %v8660_v55 = vld [vmem:[#allocation10 + $0x54c] ss:$16 sps:$4 sm:$0xff]  }
 0x370   :  { %5130 = vmatpush1.bf16.msra.mxu0 %v8643_v53  ;;  %5534 = vmatprep.mubr.bf16.mxu1 %v2864_v40  ;;  %v2880_v53 = vpack.c.bf16 %v2816_v10, %v2808_v37  ;;  %v8678_v40 = vld [vmem:[#allocation10 + $0x5ac] ss:$16 sps:$4 sm:$0xff]   ;;  %v2544_v10 = vmul.f32 %v10726_v36, %v10015_v35  ;;  %v8700_v35 = vld [vmem:[#allocation10 + $0x628] ss:$16 sps:$4 sm:$0xff]  }
 0x371   :  { %5582 = vmatpush1.bf16.msra.mxu1 %v8646_v58  ;;  %5131 = vmatprep.subr.bf16.mxu0 %v8651_v0  ;;  %v11002_v58 = vrot.slane %v10762_v31, %v12641_v28  ;;  %v2537_v0 = vmul.f32 %v10729_v24, %v12600_v18  ;;  %v8676_v28 = vld [vmem:[#allocation10 + $0x5a8] ss:$16 sps:$4 sm:$0xff]   ;;  %v8687_v18 = vld [vmem:[#allocation10 + $0x5e4] ss:$16 sps:$4 sm:$0xff]   ;;  %v8702_v37 = vld [vmem:[#allocation10 + $0x62c] ss:$16 sps:$4 sm:$0xff]  }
 0x372   :  { %5583 = vmatprep.subr.bf16.mxu1 %v8654_v49  ;;  %v8673_v49 = vld [vmem:[#allocation10 + $0x5a0] ss:$16 sps:$4 sm:$0xff]  }
 0x373   :  { %v2698_v6 = vadd.f32 %v11002_v58, %v2529_v23  ;;  %v2706_v21 = vadd.f32 %v11002_v58, %v2537_v0  ;;  %v8705_v23 = vld [vmem:[#allocation10 + $0x644] ss:$16 sps:$4 sm:$0xff]  }
 0x374   :  { %5132 = vmatpush1.bf16.msra.mxu0 %v8649_v22 }
 0x375   :  { %5584 = vmatpush1.bf16.msra.mxu1 %v8652_v43  ;;  %5133 = vmatprep.subr.bf16.mxu0 %v8657_v61  ;;  %v2826_v22 = vpack.c.bf16 %v2706_v21, %v2698_v6  ;;  %v11014_v43 = vrot.slane %v10762_v31, %v12640_v7  ;;  %v8690_v61 = vld [vmem:[#allocation10 + $0x5ec] ss:$16 sps:$4 sm:$0xff]   ;;  %v2545_v7 = vmul.f32 %v10729_v24, %v10124_v29  ;;  %v8711_v6 = vld [vmem:[#allocation10 + $0x664] ss:$16 sps:$4 sm:$0xff]  }
 0x376   :  { %5083 = vmatmul.mubr.bf16.gmra.mrb[84].mxu0 %v10889_v15  ;;  %5585 = vmatprep.subr.bf16.mxu1 %v8660_v55  ;;  %v12709_v55 = vld [vmem:[#allocation114_spill] sm:$0xff] }
 0x377   :  { %5535 = vmatmul.mubr.bf16.gmra.mrb[84].mxu1 %v10889_v15  ;;  %5092 = vmatprep.mubr.bf16.mxu0 %v2872_v63  ;;  %v8672_v15 = vld [vmem:[#allocation10 + $0x58c] ss:$16 sps:$4 sm:$0xff]   ;;  %v2714_v41 = vadd.f32 %v11002_v58, %v2545_v7 }
 0x378   :  { %5134 = vmatpush1.bf16.msra.mxu0 %v8655_v33  ;;  %5544 = vmatprep.mubr.bf16.mxu1 %v2872_v63  ;;  %v2536_v33 = vmul.f32 %v10726_v36, %v12709_v55  ;;  %v2553_v63 = vmul.f32 %v10729_v24, %v10188_v11  ;;  %v8694_v11 = vld [vmem:[#allocation10 + $0x608] ss:$16 sps:$4 sm:$0xff]   ;;  %v8714_v21 = vld [vmem:[#allocation10 + $0x66c] ss:$16 sps:$4 sm:$0xff]   ;;  %v8717_v55 = vld [vmem:[#allocation10 + $0x684] ss:$16 sps:$4 sm:$0xff]  }
 0x379   :  { %5586 = vmatpush1.bf16.msra.mxu1 %v8658_v47  ;;  %5135 = vmatprep.subr.bf16.mxu0 %v8663_v2  ;;  %v8685_v47 = vld [vmem:[#allocation10 + $0x5e0] ss:$16 sps:$4 sm:$0xff]   ;;  %v8688_v2 = vld [vmem:[#allocation10 + $0x5e8] ss:$16 sps:$4 sm:$0xff]  }
 0x37a   :  { %5587 = vmatprep.subr.bf16.mxu1 %v8666_v57  ;;  %v2705_v57 = vadd.f32 %v11014_v43, %v2536_v33  ;;  %v2722_v34 = vadd.f32 %v11002_v58, %v2553_v63  ;;  %v8718_v63 = vld [vmem:[#allocation10 + $0x688] ss:$16 sps:$4 sm:$0xff]  }
 0x37c   :  { %5136 = vmatpush1.bf16.msra.mxu0 %v8661_v17  ;;  %v8691_v17 = vld [vmem:[#allocation10 + $0x600] ss:$16 sps:$4 sm:$0xff]  }
 0x37d   :  { %5588 = vmatpush1.bf16.msra.mxu1 %v8664_v44  ;;  %5137 = vmatprep.subr.bf16.mxu0 %v8669_v20  ;;  %v2834_v44 = vpack.c.bf16 %v2722_v34, %v2714_v41  ;;  %v8699_v20 = vld [vmem:[#allocation10 + $0x624] ss:$16 sps:$4 sm:$0xff]   ;;  %v2593_v41 = vmul.f32 %v10729_v24, %v12612_v27  ;;  %v2601_v34 = vmul.f32 %v10729_v24, %v12614_v38  ;;  %v8732_v27 = vld [vmem:[#allocation10 + $0x6cc] ss:$16 sps:$4 sm:$0xff]   ;;  %v8727_v38 = vld [vmem:[#allocation10 + $0x6c0] ss:$16 sps:$4 sm:$0xff]  }
 0x37e   :  { %5093 = vmatmul.mubr.bf16.gmra.mrb[88].mxu0 %v10898_v30  ;;  %5589 = vmatprep.subr.bf16.mxu1 %v8672_v15  ;;  %v2552_v15 = vmul.f32 %v10726_v36, %v10182_v14 }
 0x37f   :  { %5545 = vmatmul.mubr.bf16.gmra.mrb[88].mxu1 %v10898_v30  ;;  %5102 = vmatprep.mubr.bf16.mxu0 %v2880_v53  ;;  %v8684_v30 = vld [vmem:[#allocation10 + $0x5cc] ss:$16 sps:$4 sm:$0xff]  }
 0x380   :  { %5138 = vmatpush1.bf16.msra.mxu0 %v8667_v4  ;;  %5554 = vmatprep.mubr.bf16.mxu1 %v2880_v53  ;;  %v2561_v4 = vmul.f32 %v10729_v24, %v12603_v45  ;;  %v8697_v53 = vld [vmem:[#allocation10 + $0x620] ss:$16 sps:$4 sm:$0xff]   ;;  %v8708_v45 = vld [vmem:[#allocation10 + $0x64c] ss:$16 sps:$4 sm:$0xff]  }
 0x381   :  { %5590 = vmatpush1.bf16.msra.mxu1 %v8670_v1  ;;  %5139 = vmatprep.subr.bf16.mxu0 %v8675_v16  ;;  %v2569_v1 = vmul.f32 %v10729_v24, %v12605_v13  ;;  %v2713_v16 = vadd.f32 %v11014_v43, %v2544_v10  ;;  %v8703_v13 = vld [vmem:[#allocation10 + $0x640] ss:$16 sps:$4 sm:$0xff]   ;;  %v8730_v10 = vld [vmem:[#allocation10 + $0x6c8] ss:$16 sps:$4 sm:$0xff]  }
 0x382   :  { %5591 = vmatprep.subr.bf16.mxu1 %v8678_v40  ;;  %v2721_v40 = vadd.f32 %v11014_v43, %v2552_v15  ;;  %v2730_v14 = vadd.f32 %v11002_v58, %v2561_v4  ;;  %v8735_v4 = vld [vmem:[#allocation10 + $0x6e4] ss:$16 sps:$4 sm:$0xff]  }
 0x383   :  { %v2738_v0 = vadd.f32 %v11002_v58, %v2569_v1  ;;  %v8738_v1 = vld [vmem:[#allocation10 + $0x6ec] ss:$16 sps:$4 sm:$0xff]  }
 0x384   :  { %5140 = vmatpush1.bf16.msra.mxu0 %v8673_v49  ;;  %v2833_v49 = vpack.c.bf16 %v2721_v40, %v2713_v16  ;;  %v12712_v40 = vld [vmem:[#allocation111_spill] sm:$0xff] }
 0x385   :  { %5592 = vmatpush1.bf16.msra.mxu1 %v8676_v28  ;;  %5141 = vmatprep.subr.bf16.mxu0 %v8681_v48  ;;  %v8706_v28 = vld [vmem:[#allocation10 + $0x648] ss:$16 sps:$4 sm:$0xff]   ;;  %v2842_v48 = vpack.c.bf16 %v2738_v0, %v2730_v14 }
 0x386   :  { %5103 = vmatmul.mubr.bf16.gmra.mrb[92].mxu0 %v10908_v3  ;;  %5593 = vmatprep.subr.bf16.mxu1 %v8684_v30  ;;  %v2560_v30 = vmul.f32 %v10726_v36, %v10190_v59  ;;  %v8712_v59 = vld [vmem:[#allocation10 + $0x668] ss:$16 sps:$4 sm:$0xff]  }
 0x387   :  { %5555 = vmatmul.mubr.bf16.gmra.mrb[92].mxu1 %v10908_v3  ;;  %5145 = vmatprep.mubr.bf16.mxu0 %v2826_v22  ;;  %v2697_v3 = vadd.f32 %v11014_v43, %v2528_v56  ;;  %v12714_v0 = vld [vmem:[#allocation158_spill] sm:$0xff] }
 0x388   :  { %5142 = vmatpush1.bf16.msra.mxu0 %v8679_v26  ;;  %5597 = vmatprep.mubr.bf16.mxu1 %v2826_v22  ;;  %v12710_v26 = vld [vmem:[#allocation152_spill] sm:$0xff]  ;;  %v2577_v22 = vmul.f32 %v10729_v24, %v12608_v39  ;;  %v2729_v12 = vadd.f32 %v11014_v43, %v2560_v30 }
 0x389   :  { %5594 = vmatpush1.bf16.msra.mxu1 %v8682_v42  ;;  %5143 = vmatprep.subr.bf16.mxu0 %v8687_v18  ;;  %v2825_v29 = vpack.c.bf16 %v2705_v57, %v2697_v3  ;;  %v2568_v42 = vmul.f32 %v10726_v36, %v12710_v26  ;;  %v2585_v18 = vmul.f32 %v10729_v24, %v12611_v25  ;;  %v8720_v39 = vld [vmem:[#allocation10 + $0x68c] ss:$16 sps:$4 sm:$0xff]   ;;  %v8715_v25 = vld [vmem:[#allocation10 + $0x680] ss:$16 sps:$4 sm:$0xff]   ;;  %v8723_v3 = vld [vmem:[#allocation10 + $0x6a4] ss:$16 sps:$4 sm:$0xff]  }
 0x38a   :  { %5595 = vmatprep.subr.bf16.mxu1 %v8690_v61  ;;  %v8709_v61 = vld [vmem:[#allocation10 + $0x660] ss:$16 sps:$4 sm:$0xff]   ;;  %v2746_v33 = vadd.f32 %v11002_v58, %v2577_v22  ;;  %v8726_v57 = vld [vmem:[#allocation10 + $0x6ac] ss:$16 sps:$4 sm:$0xff]  }
 0x38b   :  { %v2737_v56 = vadd.f32 %v11014_v43, %v2568_v42  ;;  %v8744_v26 = vld [vmem:[#allocation10 + $0x70c] ss:$16 sps:$4 sm:$0xff]   ;;  %v8739_v22 = vld [vmem:[#allocation10 + $0x700] ss:$16 sps:$4 sm:$0xff]  }
 0x38c   :  { %5144 = vmatpush1.bf16.msra.mxu0 %v8685_v47  ;;  %v2754_v47 = vadd.f32 %v11002_v58, %v2585_v18  ;;  %v8742_v18 = vld [vmem:[#allocation10 + $0x708] ss:$16 sps:$4 sm:$0xff]  }
 0x38d   :  { %5596 = vmatpush1.bf16.msra.mxu1 %v8688_v2  ;;  %5226 = vmatprep.subr.bf16.mxu0 %v8693_v52  ;;  %v2841_v7 = vpack.c.bf16 %v2737_v56, %v2729_v12  ;;  %v2576_v52 = vmul.f32 %v10726_v36, %v10231_v54  ;;  %v8724_v54 = vld [vmem:[#allocation10 + $0x6a8] ss:$16 sps:$4 sm:$0xff]   ;;  %v8747_v12 = vld [vmem:[#allocation10 + $0x724] ss:$16 sps:$4 sm:$0xff]   ;;  %v8750_v56 = vld [vmem:[#allocation10 + $0x72c] ss:$16 sps:$4 sm:$0xff]  }
 0x38e   :  { %5678 = vmatprep.subr.bf16.mxu1 %v8696_v62  ;;  %v2850_v2 = vpack.c.bf16 %v2754_v47, %v2746_v33  ;;  %v2584_v62 = vmul.f32 %v10726_v36, %v10259_v19  ;;  %v2762_v19 = vadd.f32 %v11002_v58, %v2593_v41  ;;  %v12716_v33 = vld [vmem:[#allocation123_spill] sm:$0xff] }
 0x38f   :  { %5146 = vmatmul.mubr.bf16.vlgmr.msra.gmra.mrb[64].mxu0 %v2825_v29  ;;  %v2616_v47 = vmul.f32 %v10726_v36, %v12716_v33  ;;  %v8778_v33 = vld [vmem:[#allocation10 + $0x7c8] ss:$16 sps:$4 sm:$0xff]  }
 0x390   :  { %5598 = vmatmul.mubr.bf16.vlgmr.msra.gmra.mrb[64].mxu1 %v2825_v29  ;;  %5155 = vmatprep.mubr.bf16.mxu0 %v2834_v44  ;;  %v8721_v29 = vld [vmem:[#allocation10 + $0x6a0] ss:$16 sps:$4 sm:$0xff]  }
 0x391   :  { %5227 = vmatpush1.bf16.msra.mxu0 %v8691_v17  ;;  %5607 = vmatprep.mubr.bf16.mxu1 %v2834_v44  ;;  %v2745_v17 = vadd.f32 %v11014_v43, %v2576_v52  ;;  %v8729_v44 = vld [vmem:[#allocation10 + $0x6c4] ss:$16 sps:$4 sm:$0xff]  }
 0x392   :  { %5679 = vmatpush1.bf16.msra.mxu1 %v8694_v11  ;;  %5228 = vmatprep.subr.bf16.mxu0 %v8699_v20  ;;  %v2753_v11 = vadd.f32 %v11014_v43, %v2584_v62  ;;  %v2770_v20 = vadd.f32 %v11002_v58, %v2601_v34  ;;  %v8753_v52 = vld [vmem:[#allocation10 + $0x744] ss:$16 sps:$4 sm:$0xff]   ;;  %v8756_v34 = vld [vmem:[#allocation10 + $0x74c] ss:$16 sps:$4 sm:$0xff]  }
 0x393   :  { %5680 = vmatprep.subr.bf16.mxu1 %v8702_v37 }
 0x394   :  { %v2849_v37 = vpack.c.bf16 %v2753_v11, %v2745_v17  ;;  %v2858_v15 = vpack.c.bf16 %v2770_v20, %v2762_v19  ;;  %v8754_v17 = vld [vmem:[#allocation10 + $0x748] ss:$16 sps:$4 sm:$0xff]  }
 0x395   :  { %5229 = vmatpush1.bf16.msra.mxu0 %v8697_v53  ;;  %v12711_v53 = vld [vmem:[#allocation108_spill] sm:$0xff]  ;;  %v12718_v19 = vld [vmem:[#allocation126_spill] sm:$0xff] }
 0x396   :  { %5681 = vmatpush1.bf16.msra.mxu1 %v8700_v35  ;;  %5230 = vmatprep.subr.bf16.mxu0 %v8705_v23  ;;  %v2592_v16 = vmul.f32 %v10726_v36, %v12711_v53  ;;  %v2600_v35 = vmul.f32 %v10726_v36, %v12712_v40  ;;  %v12713_v23 = vld [vmem:[#allocation157_spill] sm:$0xff]  ;;  %v2624_v20 = vmul.f32 %v10726_v36, %v12718_v19  ;;  %v8760_v53 = vld [vmem:[#allocation10 + $0x768] ss:$16 sps:$4 sm:$0xff]  }
 0x397   :  { %5156 = vmatmul.mubr.bf16.gmra.mrb[68].mxu0 %v2833_v49  ;;  %5682 = vmatprep.subr.bf16.mxu1 %v8708_v45  ;;  %v2609_v14 = vmul.f32 %v10729_v24, %v12713_v23  ;;  %v2617_v45 = vmul.f32 %v10729_v24, %v12714_v0  ;;  %v8771_v0 = vld [vmem:[#allocation10 + $0x7a4] ss:$16 sps:$4 sm:$0xff]  }
 0x398   :  { %5608 = vmatmul.mubr.bf16.gmra.mrb[68].mxu1 %v2833_v49  ;;  %5165 = vmatprep.mubr.bf16.mxu0 %v2842_v48  ;;  %v8733_v49 = vld [vmem:[#allocation10 + $0x6e0] ss:$16 sps:$4 sm:$0xff]  }
 0x399   :  { %5231 = vmatpush1.bf16.msra.mxu0 %v8703_v13  ;;  %5617 = vmatprep.mubr.bf16.mxu1 %v2842_v48  ;;  %v2761_v13 = vadd.f32 %v11014_v43, %v2592_v16  ;;  %v8736_v48 = vld [vmem:[#allocation10 + $0x6e8] ss:$16 sps:$4 sm:$0xff]   ;;  %v2786_v30 = vadd.f32 %v11002_v58, %v2617_v45  ;;  %v8765_v16 = vld [vmem:[#allocation10 + $0x784] ss:$16 sps:$4 sm:$0xff]   ;;  %v11104_v45 = vrot.slane %v10762_v31, %v12643_v51  ;;  %v8769_v51 = vld [vmem:[#allocation10 + $0x7a0] ss:$16 sps:$4 sm:$0xff]  }
 0x39a   :  { %5683 = vmatpush1.bf16.msra.mxu1 %v8706_v28  ;;  %5232 = vmatprep.subr.bf16.mxu0 %v8711_v6  ;;  %v2769_v28 = vadd.f32 %v11014_v43, %v2600_v35  ;;  %v8741_v6 = vld [vmem:[#allocation10 + $0x704] ss:$16 sps:$4 sm:$0xff]  }
 0x39b   :  { %5684 = vmatprep.subr.bf16.mxu1 %v8714_v21  ;;  %v2778_v21 = vadd.f32 %v11002_v58, %v2609_v14 }
 0x39c   :  { %v2857_v42 = vpack.c.bf16 %v2769_v28, %v2761_v13  ;;  %v12720_v13 = vld [vmem:[#allocation134_spill] sm:$0xff]  ;;  %v12721_v28 = vld [vmem:[#allocation143_spill] sm:$0xff] }
 0x39d   :  { %5233 = vmatpush1.bf16.msra.mxu0 %v8709_v61  ;;  %v2866_v61 = vpack.c.bf16 %v2786_v30, %v2778_v21  ;;  %v12723_v30 = vld [vmem:[#allocation121_spill] sm:$0xff] }
 0x39e   :  { %5685 = vmatpush1.bf16.msra.mxu1 %v8712_v59  ;;  %5234 = vmatprep.subr.bf16.mxu0 %v8717_v55  ;;  %v12715_v59 = vld [vmem:[#allocation117_spill] sm:$0xff] }
 0x39f   :  { %5166 = vmatmul.mubr.bf16.gmra.mrb[72].mxu0 %v2841_v7  ;;  %5686 = vmatprep.subr.bf16.mxu1 %v8720_v39  ;;  %v2608_v55 = vmul.f32 %v10726_v36, %v12715_v59  ;;  %v12717_v39 = vld [vmem:[#allocation159_spill] sm:$0xff] }
 0x3a0   :  { %5618 = vmatmul.mubr.bf16.gmra.mrb[72].mxu1 %v2841_v7  ;;  %5175 = vmatprep.mubr.bf16.mxu0 %v2850_v2  ;;  %v2625_v7 = vmul.f32 %v10729_v24, %v12717_v39  ;;  %v8783_v39 = vld [vmem:[#allocation10 + $0x7e4] ss:$16 sps:$4 sm:$0xff]  }
 0x3a1   :  { %5235 = vmatpush1.bf16.msra.mxu0 %v8715_v25  ;;  %5627 = vmatprep.mubr.bf16.mxu1 %v2850_v2  ;;  %v2633_v25 = vmul.f32 %v10729_v24, %v12622_v9  ;;  %v2777_v2 = vadd.f32 %v11014_v43, %v2608_v55  ;;  %v8751_v9 = vld [vmem:[#allocation10 + $0x740] ss:$16 sps:$4 sm:$0xff]  }
 0x3a2   :  { %5687 = vmatpush1.bf16.msra.mxu1 %v8718_v63  ;;  %5236 = vmatprep.subr.bf16.mxu0 %v8723_v3  ;;  %v8745_v63 = vld [vmem:[#allocation10 + $0x720] ss:$16 sps:$4 sm:$0xff]   ;;  %v2785_v3 = vadd.f32 %v11014_v43, %v2616_v47  ;;  %v2794_v62 = vadd.f32 %v11002_v58, %v2625_v7  ;;  %v8786_v7 = vld [vmem:[#allocation10 + $0x7ec] ss:$16 sps:$4 sm:$0xff]  }
 0x3a3   :  { %5688 = vmatprep.subr.bf16.mxu1 %v8726_v57  ;;  %v8748_v57 = vld [vmem:[#allocation10 + $0x728] ss:$16 sps:$4 sm:$0xff]   ;;  %v2802_v41 = vadd.f32 %v11002_v58, %v2633_v25  ;;  %v8775_v55 = vld [vmem:[#allocation10 + $0x7c0] ss:$16 sps:$4 sm:$0xff]  }
 0x3a4   :  { %v12724_v25 = vld [vmem:[#allocation119_spill] sm:$0xff] }
 0x3a5   :  { %5237 = vmatpush1.bf16.msra.mxu0 %v8721_v29  ;;  %v2865_v29 = vpack.c.bf16 %v2785_v3, %v2777_v2  ;;  %v2874_v11 = vpack.c.bf16 %v2802_v41, %v2794_v62  ;;  %v12725_v2 = vld [vmem:[#allocation116_spill] sm:$0xff]  ;;  %v12727_v41 = vld [vmem:[#allocation94_spill] sm:$0xff] }
 0x3a6   :  { %5689 = vmatpush1.bf16.msra.mxu1 %v8724_v54  ;;  %5238 = vmatprep.subr.bf16.mxu0 %v8729_v44  ;;  %v8759_v54 = vld [vmem:[#allocation10 + $0x764] ss:$16 sps:$4 sm:$0xff]   ;;  %v8762_v44 = vld [vmem:[#allocation10 + $0x76c] ss:$16 sps:$4 sm:$0xff]   ;;  %v2538_v3 = vmul.f32 %v10732_v5, %v12725_v2 }
 0x3a7   :  { %5176 = vmatmul.mubr.bf16.gmra.mrb[76].mxu0 %v2849_v37  ;;  %5690 = vmatprep.subr.bf16.mxu1 %v8732_v27  ;;  %v12719_v27 = vld [vmem:[#allocation132_spill] sm:$0xff] }
 0x3a8   :  { %5628 = vmatmul.mubr.bf16.gmra.mrb[76].mxu1 %v2849_v37  ;;  %5185 = vmatprep.mubr.bf16.mxu0 %v2858_v15  ;;  %v2632_v37 = vmul.f32 %v10726_v36, %v12719_v27 }
 0x3a9   :  { %5239 = vmatpush1.bf16.msra.mxu0 %v8727_v38  ;;  %5637 = vmatprep.mubr.bf16.mxu1 %v2858_v15  ;;  %v2641_v38 = vmul.f32 %v10729_v24, %v12623_v8  ;;  %v8757_v15 = vld [vmem:[#allocation10 + $0x760] ss:$16 sps:$4 sm:$0xff]   ;;  %v8768_v8 = vld [vmem:[#allocation10 + $0x78c] ss:$16 sps:$4 sm:$0xff]  }
 0x3aa   :  { %5691 = vmatpush1.bf16.msra.mxu1 %v8730_v10  ;;  %5240 = vmatprep.subr.bf16.mxu0 %v8735_v4  ;;  %v2649_v10 = vmul.f32 %v10729_v24, %v12625_v60  ;;  %v2793_v4 = vadd.f32 %v11014_v43, %v2624_v20  ;;  %v8763_v60 = vld [vmem:[#allocation10 + $0x780] ss:$16 sps:$4 sm:$0xff]   ;;  %v8766_v24 = vld [vmem:[#allocation10 + $0x788] ss:$16 sps:$4 sm:$0xff]  }
 0x3ab   :  { %5692 = vmatprep.subr.bf16.mxu1 %v8738_v1  ;;  %v2801_v1 = vadd.f32 %v11014_v43, %v2632_v37  ;;  %v2810_v40 = vadd.f32 %v11002_v58, %v2641_v38  ;;  %v12729_v20 = vld [vmem:[#allocation151_spill] sm:$0xff]  ;;  %v12730_v37 = vld [vmem:[#allocation97_spill] sm:$0xff] }
 0x3ac   :  { %v2818_v35 = vadd.f32 %v11002_v58, %v2649_v10  ;;  %v2640_v58 = vmul.f32 %v10726_v36, %v12720_v13  ;;  %v2554_v27 = vmul.f32 %v10732_v5, %v12729_v20  ;;  %v2563_v38 = vmul.f32 %v10735_v50, %v12730_v37  ;;  %v12731_v10 = vld [vmem:[#allocation98_spill] sm:$0xff] }
 0x3ad   :  { %5241 = vmatpush1.bf16.msra.mxu0 %v8733_v49  ;;  %v2873_v23 = vpack.c.bf16 %v2801_v1, %v2793_v4  ;;  %v8774_v49 = vld [vmem:[#allocation10 + $0x7ac] ss:$16 sps:$4 sm:$0xff]  }
 0x3ae   :  { %5693 = vmatpush1.bf16.msra.mxu1 %v8736_v48  ;;  %5242 = vmatprep.subr.bf16.mxu0 %v8741_v6  ;;  %v2882_v14 = vpack.c.bf16 %v2818_v35, %v2810_v40  ;;  %v2648_v48 = vmul.f32 %v10726_v36, %v12721_v28  ;;  %v12722_v6 = vld [vmem:[#allocation125_spill] sm:$0xff] }
 0x3af   :  { %5186 = vmatmul.mubr.bf16.gmra.mrb[80].mxu0 %v2857_v42  ;;  %5694 = vmatprep.subr.bf16.mxu1 %v8744_v26  ;;  %v2531_v21 = vmul.f32 %v10735_v50, %v12722_v6  ;;  %v2539_v26 = vmul.f32 %v10735_v50, %v12723_v30 }
 0x3b0   :  { %5638 = vmatmul.mubr.bf16.gmra.mrb[80].mxu1 %v2857_v42  ;;  %5195 = vmatprep.mubr.bf16.mxu0 %v2866_v61  ;;  %v2809_v42 = vadd.f32 %v11014_v43, %v2640_v58 }
 0x3b1   :  { %5243 = vmatpush1.bf16.msra.mxu0 %v8739_v22  ;;  %5647 = vmatprep.mubr.bf16.mxu1 %v2866_v61  ;;  %v2817_v22 = vadd.f32 %v11014_v43, %v2648_v48  ;;  %v8777_v61 = vld [vmem:[#allocation10 + $0x7c4] ss:$16 sps:$4 sm:$0xff]   ;;  %v2700_v36 = vadd.f32 %v11104_v45, %v2531_v21  ;;  %v11120_v43 = vrot.slane %v10762_v31, %v12642_v32  ;;  %v8784_v31 = vld [vmem:[#allocation10 + $0x7e8] ss:$16 sps:$4 sm:$0xff]  }
 0x3b2   :  { %5695 = vmatpush1.bf16.msra.mxu1 %v8742_v18  ;;  %5244 = vmatprep.subr.bf16.mxu0 %v8747_v12  ;;  %v8772_v18 = vld [vmem:[#allocation10 + $0x7a8] ss:$16 sps:$4 sm:$0xff]   ;;  %v2708_v12 = vadd.f32 %v11104_v45, %v2539_v26  ;;  %v2555_v32 = vmul.f32 %v10735_v50, %v12727_v41 }
 0x3b3   :  { %5696 = vmatprep.subr.bf16.mxu1 %v8750_v56  ;;  %v8780_v56 = vld [vmem:[#allocation10 + $0x7cc] ss:$16 sps:$4 sm:$0xff]   ;;  %v2881_v59 = vpack.c.bf16 %v2817_v22, %v2809_v42  ;;  %v2723_v1 = vadd.f32 %v11120_v43, %v2554_v27  ;;  %v12747_v27 = vld [vmem:[#allocation139_spill] sm:$0xff] }
 0x3b4   :  { %v2828_v47 = vpack.c.bf16 %v2708_v12, %v2700_v36  ;;  %v12736_v26 = vld [vmem:[#allocation96_spill] sm:$0xff]  ;;  %v12739_v36 = vld [vmem:[#allocation122_spill] sm:$0xff]  ;;  %v2635_v37 = vmul.f32 %v10735_v50, %v12747_v27 }
 0x3b5   :  { %5245 = vmatpush1.bf16.msra.mxu0 %v8745_v63  ;;  %v2530_v63 = vmul.f32 %v10732_v5, %v12724_v25  ;;  %v12737_v42 = vld [vmem:[#allocation100_spill] sm:$0xff]  ;;  %v2603_v12 = vmul.f32 %v10735_v50, %v12739_v36 }
 0x3b6   :  { %5697 = vmatpush1.bf16.msra.mxu1 %v8748_v57  ;;  %5246 = vmatprep.subr.bf16.mxu0 %v8753_v52  ;;  %v8781_v57 = vld [vmem:[#allocation10 + $0x7e0] ss:$16 sps:$4 sm:$0xff]   ;;  %v12726_v52 = vld [vmem:[#allocation150_spill] sm:$0xff]  ;;  %v2586_v22 = vmul.f32 %v10732_v5, %v12737_v42 }
 0x3b7   :  { %5196 = vmatmul.mubr.bf16.gmra.mrb[84].mxu0 %v2865_v29  ;;  %5698 = vmatprep.subr.bf16.mxu1 %v8756_v34  ;;  %v2547_v62 = vmul.f32 %v10735_v50, %v12726_v52  ;;  %v2699_v34 = vadd.f32 %v11120_v43, %v2530_v63  ;;  %v12741_v63 = vld [vmem:[#allocation112_spill] sm:$0xff]  ;;  %v12743_v52 = vld [vmem:[#allocation129_spill] sm:$0xff] }
 0x3b8   :  { %5648 = vmatmul.mubr.bf16.gmra.mrb[84].mxu1 %v2865_v29  ;;  %5205 = vmatprep.mubr.bf16.mxu0 %v2874_v11  ;;  %v2707_v29 = vadd.f32 %v11120_v43, %v2538_v3  ;;  %v2602_v2 = vmul.f32 %v10732_v5, %v12741_v63  ;;  %v12742_v3 = vld [vmem:[#allocation127_spill] sm:$0xff]  ;;  %v12756_v63 = vld [vmem:[#allocation32_spill] sm:$0xff] }
 0x3b9   :  { %5247 = vmatpush1.bf16.msra.mxu0 %v8751_v9  ;;  %5657 = vmatprep.mubr.bf16.mxu1 %v2874_v11  ;;  %v2716_v9 = vadd.f32 %v11104_v45, %v2547_v62  ;;  %v2619_v62 = vmul.f32 %v10735_v50, %v12743_v52 }
 0x3ba   :  { %5699 = vmatpush1.bf16.msra.mxu1 %v8754_v17  ;;  %5248 = vmatprep.subr.bf16.mxu0 %v8759_v54  ;;  %v2724_v17 = vadd.f32 %v11104_v45, %v2555_v32  ;;  %v2827_v11 = vpack.c.bf16 %v2707_v29, %v2699_v34  ;;  %v2771_v32 = vadd.f32 %v11120_v43, %v2602_v2 }
 0x3bb   :  { %5700 = vmatprep.subr.bf16.mxu1 %v8762_v44  ;;  %v12728_v44 = vld [vmem:[#allocation130_spill] sm:$0xff]  ;;  %v2788_v34 = vadd.f32 %v11104_v45, %v2619_v62 }
 0x3bc   :  { %v2836_v54 = vpack.c.bf16 %v2724_v17, %v2716_v9  ;;  %v2546_v19 = vmul.f32 %v10732_v5, %v12728_v44  ;;  %v12744_v17 = vld [vmem:[#allocation113_spill] sm:$0xff] }
 0x3bd   :  { %5249 = vmatpush1.bf16.msra.mxu0 %v8757_v15  ;;  %v2571_v15 = vmul.f32 %v10735_v50, %v12731_v10 }
 0x3be   :  { %5701 = vmatpush1.bf16.msra.mxu1 %v8760_v53  ;;  %5250 = vmatprep.subr.bf16.mxu0 %v8765_v16  ;;  %v2715_v4 = vadd.f32 %v11120_v43, %v2546_v19  ;;  %v2732_v53 = vadd.f32 %v11104_v45, %v2563_v38  ;;  %v12746_v19 = vld [vmem:[#allocation131_spill] sm:$0xff] }
 0x3bf   :  { %5206 = vmatmul.mubr.bf16.gmra.mrb[88].mxu0 %v2873_v23  ;;  %5702 = vmatprep.subr.bf16.mxu1 %v8768_v8  ;;  %v2740_v16 = vadd.f32 %v11104_v45, %v2571_v15  ;;  %v12732_v8 = vld [vmem:[#allocation92_spill] sm:$0xff]  ;;  %v2627_v20 = vmul.f32 %v10735_v50, %v12746_v19 }
 0x3c0   :  { %5658 = vmatmul.mubr.bf16.gmra.mrb[88].mxu1 %v2873_v23  ;;  %5215 = vmatprep.mubr.bf16.mxu0 %v2882_v14  ;;  %v2835_v40 = vpack.c.bf16 %v2723_v1, %v2715_v4  ;;  %v2562_v23 = vmul.f32 %v10732_v5, %v12732_v8  ;;  %v2804_v4 = vadd.f32 %v11104_v45, %v2635_v37 }
 0x3c1   :  { %5251 = vmatpush1.bf16.msra.mxu0 %v8763_v60  ;;  %5667 = vmatprep.mubr.bf16.mxu1 %v2882_v14  ;;  %v2844_v35 = vpack.c.bf16 %v2740_v16, %v2732_v53  ;;  %v12733_v60 = vld [vmem:[#allocation153_spill] sm:$0xff]  ;;  %v12734_v14 = vld [vmem:[#allocation99_spill] sm:$0xff]  ;;  %v2796_v15 = vadd.f32 %v11104_v45, %v2627_v20 }
 0x3c2   :  { %5703 = vmatpush1.bf16.msra.mxu1 %v8766_v24  ;;  %5252 = vmatprep.subr.bf16.mxu0 %v8771_v0  ;;  %v2570_v24 = vmul.f32 %v10732_v5, %v12733_v60  ;;  %v2579_v0 = vmul.f32 %v10735_v50, %v12734_v14  ;;  %v2731_v58 = vadd.f32 %v11120_v43, %v2562_v23  ;;  %v12748_v16 = vld [vmem:[#allocation147_spill] sm:$0xff]  ;;  %v12750_v23 = vld [vmem:[#allocation149_spill] sm:$0xff] }
 0x3c3   :  { %5704 = vmatprep.subr.bf16.mxu1 %v8774_v49  ;;  %v12735_v49 = vld [vmem:[#allocation110_spill] sm:$0xff]  ;;  %v2876_v53 = vpack.c.bf16 %v2804_v4, %v2796_v15  ;;  %v2651_v60 = vmul.f32 %v10735_v50, %v12750_v23 }
 0x3c4   :  { %v2587_v13 = vmul.f32 %v10735_v50, %v12735_v49  ;;  %v2739_v28 = vadd.f32 %v11120_v43, %v2570_v24  ;;  %v2748_v48 = vadd.f32 %v11104_v45, %v2579_v0  ;;  %v12751_v24 = vld [vmem:[#allocation144_spill] sm:$0xff] }
 0x3c5   :  { %5253 = vmatpush1.bf16.msra.mxu0 %v8769_v51  ;;  %v2578_v51 = vmul.f32 %v10732_v5, %v12736_v26  ;;  %v2643_v14 = vmul.f32 %v10735_v50, %v12751_v24 }
 0x3c6   :  { %5705 = vmatpush1.bf16.msra.mxu1 %v8772_v18  ;;  %5254 = vmatprep.subr.bf16.mxu0 %v8777_v61  ;;  %v2756_v6 = vadd.f32 %v11104_v45, %v2587_v13  ;;  %v2843_v21 = vpack.c.bf16 %v2739_v28, %v2731_v58  ;;  %v12738_v18 = vld [vmem:[#allocation156_spill] sm:$0xff]  ;;  %v2820_v58 = vadd.f32 %v11104_v45, %v2651_v60 }
 0x3c7   :  { %5216 = vmatmul.mubr.bf16.gmra.mrb[92].mxu0 %v2881_v59  ;;  %5706 = vmatprep.subr.bf16.mxu1 %v8780_v56  ;;  %v2595_v61 = vmul.f32 %v10735_v50, %v12738_v18  ;;  %v2747_v56 = vadd.f32 %v11120_v43, %v2578_v51  ;;  %v2812_v13 = vadd.f32 %v11104_v45, %v2643_v14 }
 0x3c8   :  { %5668 = vmatmul.mubr.bf16.gmra.mrb[92].mxu1 %v2881_v59  ;;  %5258 = vmatprep.mubr.bf16.mxu0 %v2828_v47  ;;  %v2852_v30 = vpack.c.bf16 %v2756_v6, %v2748_v48  ;;  %v2755_v59 = vadd.f32 %v11120_v43, %v2586_v22  ;;  %v12752_v6 = vld [vmem:[#allocation136_spill] sm:$0xff] }
 0x3c9   :  { %5255 = vmatpush1.bf16.msra.mxu0 %v8775_v55  ;;  %5710 = vmatprep.mubr.bf16.mxu1 %v2828_v47  ;;  %v2764_v55 = vadd.f32 %v11104_v45, %v2595_v61  ;;  %v2884_v48 = vpack.c.bf16 %v2820_v58, %v2812_v13 }
 0x3ca   :  { %5707 = vmatpush1.bf16.msra.mxu1 %v8778_v33  ;;  %5256 = vmatprep.subr.bf16.mxu0 %v8783_v39  ;;  %v2772_v33 = vadd.f32 %v11104_v45, %v2603_v12  ;;  %v2851_v47 = vpack.c.bf16 %v2755_v59, %v2747_v56 }
 0x3cb   :  { %5708 = vmatprep.subr.bf16.mxu1 %v8786_v7  ;;  %v12740_v7 = vld [vmem:[#allocation109_spill] sm:$0xff] }
 0x3cc   :  { %v2860_v39 = vpack.c.bf16 %v2772_v33, %v2764_v55  ;;  %v2594_v25 = vmul.f32 %v10732_v5, %v12740_v7  ;;  %v12754_v33 = vld [vmem:[#allocation24_spill] sm:$0xff] }
 0x3cd   :  { %5257 = vmatpush1.bf16.msra.mxu0 %v8781_v57  ;;  %v2611_v57 = vmul.f32 %v10735_v50, %v12742_v3 }
 0x3ce   :  { %5709 = vmatpush1.bf16.msra.mxu1 %v8784_v31  ;;  %v2763_v41 = vadd.f32 %v11120_v43, %v2594_v25 }
 0x3cf   :  { %v2780_v31 = vadd.f32 %v11104_v45, %v2611_v57 }
 0x3d0   :  { %5259 = vmatmul.mubr.bf16.vlgmr.msra.gmra.mrb[64].mxu0 %v2827_v11  ;;  %v2859_v29 = vpack.c.bf16 %v2771_v32, %v2763_v41 }
 0x3d1   :  { %5711 = vmatmul.mubr.bf16.vlgmr.msra.gmra.mrb[64].mxu1 %v2827_v11  ;;  %5268 = vmatprep.mubr.bf16.mxu0 %v2836_v54  ;;  %v2868_v9 = vpack.c.bf16 %v2788_v34, %v2780_v31  ;;  %v2610_v11 = vmul.f32 %v10732_v5, %v12744_v17 }
 0x3d2   :  { %5720 = vmatprep.mubr.bf16.mxu1 %v2836_v54  ;;  %v12745_v54 = vld [vmem:[#allocation128_spill] sm:$0xff] }
 0x3d3   :  { %v2618_v44 = vmul.f32 %v10732_v5, %v12745_v54  ;;  %v2779_v38 = vadd.f32 %v11120_v43, %v2610_v11 }
 0x3d5   :  { %v2787_v10 = vadd.f32 %v11120_v43, %v2618_v44 }
 0x3d7   :  { %v2867_v1 = vpack.c.bf16 %v2787_v10, %v2779_v38 }
 0x3d8   :  { %5269 = vmatmul.mubr.bf16.gmra.mrb[68].mxu0 %v2835_v40 }
 0x3d9   :  { %5721 = vmatmul.mubr.bf16.gmra.mrb[68].mxu1 %v2835_v40  ;;  %5278 = vmatprep.mubr.bf16.mxu0 %v2844_v35  ;;  %v2626_v40 = vmul.f32 %v10732_v5, %v12748_v16 }
 0x3da   :  { %5730 = vmatprep.mubr.bf16.mxu1 %v2844_v35  ;;  %v12749_v35 = vld [vmem:[#allocation133_spill] sm:$0xff] }
 0x3db   :  { %v2634_v8 = vmul.f32 %v10732_v5, %v12749_v35  ;;  %v2795_v0 = vadd.f32 %v11120_v43, %v2626_v40 }
 0x3dd   :  { %v2803_v49 = vadd.f32 %v11120_v43, %v2634_v8 }
 0x3df   :  { %v2875_v28 = vpack.c.bf16 %v2803_v49, %v2795_v0 }
 0x3e0   :  { %5279 = vmatmul.mubr.bf16.gmra.mrb[72].mxu0 %v2843_v21 }
 0x3e1   :  { %5731 = vmatmul.mubr.bf16.gmra.mrb[72].mxu1 %v2843_v21  ;;  %5288 = vmatprep.mubr.bf16.mxu0 %v2852_v30  ;;  %v2642_v21 = vmul.f32 %v10732_v5, %v12752_v6 }
 0x3e2   :  { %5740 = vmatprep.mubr.bf16.mxu1 %v2852_v30  ;;  %v12753_v30 = vld [vmem:[#allocation145_spill] sm:$0xff] }
 0x3e3   :  { %v2650_v26 = vmul.f32 %v10732_v5, %v12753_v30  ;;  %v2811_v50 = vadd.f32 %v11120_v43, %v2642_v21  ;;  %v5791_v5 = vld [vmem:[%s12012_s8] sm:$0xf] }
 0x3e4   :  { %v11222_v2 = vrot.slane %v5791_v5, %v12756_v63  ;;  %v11225_v3 = vrot.slane %v5791_v5, %v12639_v46 }
 0x3e5   :  { %v2819_v51 = vadd.f32 %v11120_v43, %v2650_v26  ;;  %v12755_v43 = vld [vmem:[#allocation25_spill] sm:$0xff] }
 0x3e7   :  { %v2883_v42 = vpack.c.bf16 %v2819_v51, %v2811_v50 }
 0x3e8   :  { %5289 = vmatmul.mubr.bf16.gmra.mrb[76].mxu0 %v2851_v47 }
 0x3e9   :  { %5741 = vmatmul.mubr.bf16.gmra.mrb[76].mxu1 %v2851_v47  ;;  %5298 = vmatprep.mubr.bf16.mxu0 %v2860_v39  ;;  %v11216_v47 = vrot.slane %v5791_v5, %v12754_v33 }
 0x3ea   :  { %5750 = vmatprep.mubr.bf16.mxu1 %v2860_v39  ;;  %v11219_v39 = vrot.slane %v5791_v5, %v12755_v43 }
 0x3f0   :  { %5299 = vmatmul.mubr.bf16.gmra.mrb[80].mxu0 %v2859_v29 }
 0x3f1   :  { %5751 = vmatmul.mubr.bf16.gmra.mrb[80].mxu1 %v2859_v29  ;;  %5308 = vmatprep.mubr.bf16.mxu0 %v2868_v9 }
 0x3f2   :  { %5760 = vmatprep.mubr.bf16.mxu1 %v2868_v9 }
 0x3f8   :  { %5309 = vmatmul.mubr.bf16.gmra.mrb[84].mxu0 %v2867_v1 }
 0x3f9   :  { %5761 = vmatmul.mubr.bf16.gmra.mrb[84].mxu1 %v2867_v1  ;;  %5318 = vmatprep.mubr.bf16.mxu0 %v2876_v53 }
 0x3fa   :  { %5770 = vmatprep.mubr.bf16.mxu1 %v2876_v53 }
 0x400   :  { %5319 = vmatmul.mubr.bf16.gmra.mrb[88].mxu0 %v2875_v28 }
 0x401   :  { %5771 = vmatmul.mubr.bf16.gmra.mrb[88].mxu1 %v2875_v28  ;;  %5328 = vmatprep.mubr.bf16.mxu0 %v2884_v48 }
 0x402   :  { %5780 = vmatprep.mubr.bf16.mxu1 %v2884_v48 }
 0x408   :  { %5329 = vmatmul.mubr.bf16.gmra.mrb[92].mxu0 %v2883_v42 }
 0x409   :  { %5781 = vmatmul.mubr.bf16.gmra.mrb[92].mxu1 %v2883_v42 }
 0x4a3   :  { %v5260_v45 = vpop.f32.mrb[64].mxu0 }
 0x4a4   :  { %v5712_v22 = vpop.f32.mrb[64].mxu1  ;;  %v5262_v18 = vpop.f32.mrb[65].mxu0  ;;  %v5813_v34 = vadd.f32 %v11216_v47, %v5260_v45 }
 0x4a5   :  { %v5714_v61 = vpop.f32.mrb[65].mxu1  ;;  %v5264_v36 = vpop.f32.mrb[66].mxu0  ;;  %v5815_v29 = vadd.f32 %v11219_v39, %v5712_v22  ;;  %v5814_v11 = vadd.f32 %v11222_v2, %v5262_v18 }
 0x4a6   :  { %v5716_v12 = vpop.f32.mrb[66].mxu1  ;;  %v5266_v56 = vpop.f32.mrb[67].mxu0  ;;  %v5817_v32 = vadd.f32 %v11216_v47, %v5264_v36  ;;  %v5816_v54 = vadd.f32 %v11225_v3, %v5714_v61  ;;  %v11241_v15 = vmax.f32 %v5813_v34, 0.0 }
 0x4a7   :  { %v5718_v59 = vpop.f32.mrb[67].mxu1  ;;  %v5819_v9 = vadd.f32 %v11219_v39, %v5716_v12  ;;  %v5818_v17 = vadd.f32 %v11222_v2, %v5266_v56  ;;  %v11243_v4 = vmax.f32 %v5815_v29, 0.0  ;;  %v11249_v35 = vmax.f32 %v5814_v11, 0.0 }
 0x4a8   :  { %v5820_v44 = vadd.f32 %v11225_v3, %v5718_v59  ;;  %v11238_v37 = vmax.f32 %v5817_v32, 0.0  ;;  %v11251_v8 = vmax.f32 %v5816_v54, 0.0 }
 0x4a9   :  { %12758 = vst [vmem:[#allocation137_spill] sm:$0xff] %v11243_v4  ;;  %v11245_v1 = vmax.f32 %v5819_v9, 0.0  ;;  %v11247_v53 = vmax.f32 %v5818_v17, 0.0 }
 0x4aa   :  { %12757 = vst [vmem:[#allocation141_spill] sm:$0xff] %v11238_v37  ;;  %12760 = vst [vmem:[#allocation142_spill] sm:$0xff] %v11251_v8  ;;  %v11253_v23 = vmax.f32 %v5820_v44, 0.0  ;;  %v5943_v6 = vadd.f32 %v11238_v37, %v11241_v15 }
 0x4ab   :  { %v5270_v55 = vpop.f32.mrb[68].mxu0  ;;  %12759 = vst [vmem:[#allocation102_spill] sm:$0xff] %v11245_v1  ;;  %v5985_v51 = vadd.f32 %v11245_v1, %v11243_v4  ;;  %v5964_v42 = vadd.f32 %v11247_v53, %v11249_v35 }
 0x4ac   :  { %v5722_v7 = vpop.f32.mrb[68].mxu1  ;;  %v5272_v25 = vpop.f32.mrb[69].mxu0  ;;  %v5821_v19 = vadd.f32 %v11216_v47, %v5270_v55  ;;  %12761 = vst [vmem:[#allocation138_spill] sm:$0xff] %v11253_v23  ;;  %v6006_v22 = vadd.f32 %v11253_v23, %v11251_v8 }
 0x4ad   :  { %v5724_v57 = vpop.f32.mrb[69].mxu1  ;;  %v5274_v52 = vpop.f32.mrb[70].mxu0  ;;  %v5823_v20 = vadd.f32 %v11219_v39, %v5722_v7  ;;  %v5822_v27 = vadd.f32 %v11222_v2, %v5272_v25 }
 0x4ae   :  { %v5726_v62 = vpop.f32.mrb[70].mxu1  ;;  %v5276_v41 = vpop.f32.mrb[71].mxu0  ;;  %v5824_v38 = vadd.f32 %v11225_v3, %v5724_v57  ;;  %v11255_v60 = vmax.f32 %v5821_v19, 0.0  ;;  %v5825_v13 = vadd.f32 %v11216_v47, %v5274_v52 }
 0x4af   :  { %v5728_v31 = vpop.f32.mrb[71].mxu1  ;;  %v11257_v0 = vmax.f32 %v5823_v20, 0.0  ;;  %v11259_v49 = vmax.f32 %v5822_v27, 0.0  ;;  %v5827_v58 = vadd.f32 %v11219_v39, %v5726_v62  ;;  %v5826_v30 = vadd.f32 %v11222_v2, %v5276_v41 }
 0x4b0   :  { %12762 = vst [vmem:[#allocation78_spill] sm:$0xff] %v11255_v60  ;;  %v11265_v21 = vmax.f32 %v5824_v38, 0.0  ;;  %v5828_v26 = vadd.f32 %v11225_v3, %v5728_v31  ;;  %v5944_v18 = vadd.f32 %v5943_v6, %v11255_v60  ;;  %v11281_v59 = vmax.f32 %v5825_v13, 0.0 }
 0x4b1   :  { %v5986_v12 = vadd.f32 %v5985_v51, %v11257_v0  ;;  %v5965_v56 = vadd.f32 %v5964_v42, %v11259_v49  ;;  %v11283_v5 = vmax.f32 %v5827_v58, 0.0  ;;  %v11286_v7 = vmax.f32 %v5826_v30, 0.0 }
 0x4b2   :  { %12763 = vst [vmem:[#allocation124_spill] sm:$0xff] %v11265_v21  ;;  %12764 = vst [vmem:[#allocation120_spill] sm:$0xff] %v11281_v59  ;;  %v6007_v55 = vadd.f32 %v6006_v22, %v11265_v21  ;;  %v11288_v25 = vmax.f32 %v5828_v26, 0.0  ;;  %v5945_v44 = vadd.f32 %v5944_v18, %v11281_v59 }
 0x4b3   :  { %v5280_v10 = vpop.f32.mrb[72].mxu0  ;;  %v5987_v19 = vadd.f32 %v5986_v12, %v11283_v5 }
 0x4b4   :  { %v5732_v16 = vpop.f32.mrb[72].mxu1  ;;  %v5282_v40 = vpop.f32.mrb[73].mxu0  ;;  %v5829_v45 = vadd.f32 %v11216_v47, %v5280_v10  ;;  %12765 = vst [vmem:[#allocation93_spill] sm:$0xff] %v11288_v25  ;;  %v5966_v10 = vadd.f32 %v5965_v56, %v11286_v7 }
 0x4b5   :  { %v5734_v24 = vpop.f32.mrb[73].mxu1  ;;  %v5284_v14 = vpop.f32.mrb[74].mxu0  ;;  %v5831_v61 = vadd.f32 %v11219_v39, %v5732_v16  ;;  %v5830_v36 = vadd.f32 %v11222_v2, %v5282_v40  ;;  %v6008_v16 = vadd.f32 %v6007_v55, %v11288_v25 }
 0x4b6   :  { %v5736_v28 = vpop.f32.mrb[74].mxu1  ;;  %v5286_v48 = vpop.f32.mrb[75].mxu0  ;;  %v5832_v57 = vadd.f32 %v11225_v3, %v5734_v24  ;;  %v11291_v62 = vmax.f32 %v5829_v45, 0.0  ;;  %v5833_v41 = vadd.f32 %v11216_v47, %v5284_v14 }
 0x4b7   :  { %v5738_v50 = vpop.f32.mrb[75].mxu1  ;;  %v11294_v34 = vmax.f32 %v5831_v61, 0.0  ;;  %v11296_v29 = vmax.f32 %v5830_v36, 0.0  ;;  %v5835_v9 = vadd.f32 %v11219_v39, %v5736_v28  ;;  %v5834_v17 = vadd.f32 %v11222_v2, %v5286_v48 }
 0x4b8   :  { %12766 = vst [vmem:[#allocation154_spill] sm:$0xff] %v11291_v62  ;;  %v11305_v40 = vmax.f32 %v5832_v57, 0.0  ;;  %v5946_v13 = vadd.f32 %v5945_v44, %v11291_v62  ;;  %v11309_v58 = vmax.f32 %v5833_v41, 0.0  ;;  %v5836_v28 = vadd.f32 %v11225_v3, %v5738_v50 }
 0x4b9   :  { %v5988_v6 = vadd.f32 %v5987_v19, %v11294_v34  ;;  %v5967_v30 = vadd.f32 %v5966_v10, %v11296_v29  ;;  %v11315_v26 = vmax.f32 %v5835_v9, 0.0  ;;  %v11317_v51 = vmax.f32 %v5834_v17, 0.0 }
 0x4ba   :  { %12767 = vst [vmem:[#allocation155_spill] sm:$0xff] %v11305_v40  ;;  %12768 = vst [vmem:[#allocation107_spill] sm:$0xff] %v11309_v58  ;;  %v6009_v22 = vadd.f32 %v6008_v16, %v11305_v40  ;;  %v5947_v12 = vadd.f32 %v5946_v13, %v11309_v58  ;;  %v11328_v56 = vmax.f32 %v5836_v28, 0.0 }
 0x4bb   :  { %v5290_v52 = vpop.f32.mrb[76].mxu0 }
 0x4bc   :  { %v5742_v32 = vpop.f32.mrb[76].mxu1  ;;  %v5292_v31 = vpop.f32.mrb[77].mxu0  ;;  %v5837_v20 = vadd.f32 %v11216_v47, %v5290_v52  ;;  %12769 = vst [vmem:[#allocation101_spill] sm:$0xff] %v11328_v56 }
 0x4bd   :  { %v5744_v11 = vpop.f32.mrb[77].mxu1  ;;  %v5294_v54 = vpop.f32.mrb[78].mxu0  ;;  %v5839_v24 = vadd.f32 %v11219_v39, %v5742_v32  ;;  %v5838_v48 = vadd.f32 %v11222_v2, %v5292_v31  ;;  %v5989_v32 = vadd.f32 %v5988_v6, %v11315_v26  ;;  %v5968_v31 = vadd.f32 %v5967_v30, %v11317_v51 }
 0x4be   :  { %v5746_v27 = vpop.f32.mrb[78].mxu1  ;;  %v5296_v38 = vpop.f32.mrb[79].mxu0  ;;  %v11319_v42 = vmax.f32 %v5837_v20, 0.0  ;;  %v5840_v45 = vadd.f32 %v11225_v3, %v5744_v11  ;;  %v5841_v50 = vadd.f32 %v11216_v47, %v5294_v54 }
 0x4bf   :  { %v5748_v14 = vpop.f32.mrb[79].mxu1  ;;  %v11323_v18 = vmax.f32 %v5839_v24, 0.0  ;;  %v5843_v61 = vadd.f32 %v11219_v39, %v5746_v27  ;;  %v11330_v55 = vmax.f32 %v5838_v48, 0.0  ;;  %v5842_v57 = vadd.f32 %v11222_v2, %v5296_v38 }
 0x4c0   :  { %v5948_v54 = vadd.f32 %v5947_v12, %v11319_v42  ;;  %v11337_v44 = vmax.f32 %v5840_v45, 0.0  ;;  %v5844_v19 = vadd.f32 %v11225_v3, %v5748_v14  ;;  %v11342_v16 = vmax.f32 %v5841_v50, 0.0 }
 0x4c1   :  { %v5990_v10 = vadd.f32 %v5989_v32, %v11323_v18  ;;  %v11344_v24 = vmax.f32 %v5843_v61, 0.0  ;;  %v6010_v48 = vadd.f32 %v6009_v22, %v11328_v56  ;;  %v5969_v6 = vadd.f32 %v5968_v31, %v11330_v55 }
 0x4c2   :  { %12770 = vst [vmem:[#allocation115_spill] sm:$0xff] %v11337_v44  ;;  %v11349_v30 = vmax.f32 %v5842_v57, 0.0  ;;  %v11356_v12 = vmax.f32 %v5844_v19, 0.0  ;;  %v5949_v22 = vadd.f32 %v5948_v54, %v11342_v16 }
 0x4c3   :  { %v5300_v36 = vpop.f32.mrb[80].mxu0  ;;  %v6011_v50 = vadd.f32 %v6010_v48, %v11337_v44 }
 0x4c4   :  { %v5752_v52 = vpop.f32.mrb[80].mxu1  ;;  %v5302_v41 = vpop.f32.mrb[81].mxu0  ;;  %v5845_v9 = vadd.f32 %v11216_v47, %v5300_v36  ;;  %12772 = vst [vmem:[#allocation140_spill] sm:$0xff] %v11356_v12 }
 0x4c5   :  { %v5754_v17 = vpop.f32.mrb[81].mxu1  ;;  %v5304_v11 = vpop.f32.mrb[82].mxu0  ;;  %v5847_v20 = vadd.f32 %v11219_v39, %v5752_v52  ;;  %v5846_v13 = vadd.f32 %v11222_v2, %v5302_v41  ;;  %v5991_v41 = vadd.f32 %v5990_v10, %v11344_v24 }
 0x4c6   :  { %v5756_v27 = vpop.f32.mrb[82].mxu1  ;;  %v5306_v38 = vpop.f32.mrb[83].mxu0  ;;  %v5848_v14 = vadd.f32 %v11225_v3, %v5754_v17  ;;  %v11352_v45 = vmax.f32 %v5845_v9, 0.0  ;;  %v5849_v36 = vadd.f32 %v11216_v47, %v5304_v11  ;;  %v5970_v9 = vadd.f32 %v5969_v6, %v11349_v30 }
 0x4c7   :  { %v5758_v28 = vpop.f32.mrb[83].mxu1  ;;  %v11358_v61 = vmax.f32 %v5847_v20, 0.0  ;;  %v5851_v52 = vadd.f32 %v11219_v39, %v5756_v27  ;;  %v11363_v57 = vmax.f32 %v5846_v13, 0.0  ;;  %v5850_v32 = vadd.f32 %v11222_v2, %v5306_v38 }
 0x4c8   :  { %12771 = vst [vmem:[#allocation135_spill] sm:$0xff] %v11352_v45  ;;  %v11367_v17 = vmax.f32 %v5848_v14, 0.0  ;;  %v5852_v11 = vadd.f32 %v11225_v3, %v5758_v28  ;;  %v5950_v27 = vadd.f32 %v5949_v22, %v11352_v45  ;;  %v11372_v54 = vmax.f32 %v5849_v36, 0.0 }
 0x4c9   :  { %12773 = vst [vmem:[#allocation146_spill] sm:$0xff] %v11358_v61  ;;  %12774 = vst [vmem:[#allocation23_spill] sm:$0xff] %v11363_v57  ;;  %v6012_v6 = vadd.f32 %v6011_v50, %v11356_v12  ;;  %v5992_v14 = vadd.f32 %v5991_v41, %v11358_v61  ;;  %v11378_v43 = vmax.f32 %v5851_v52, 0.0  ;;  %v5971_v22 = vadd.f32 %v5970_v9, %v11363_v57 }
 0x4ca   :  { %12775 = vst [vmem:[#allocation103_spill] sm:$0xff] %v11367_v17  ;;  %12776 = vst [vmem:[#allocation105_spill] sm:$0xff] %v11372_v54  ;;  %v11382_v36 = vmax.f32 %v5850_v32, 0.0  ;;  %v11388_v50 = vmax.f32 %v5852_v11, 0.0 }
 0x4cb   :  { %v5310_v31 = vpop.f32.mrb[84].mxu0  ;;  %12777 = vst [vmem:[#allocation104_spill] sm:$0xff] %v11378_v43  ;;  %v6013_v44 = vadd.f32 %v6012_v6, %v11367_v17  ;;  %v5993_v32 = vadd.f32 %v5992_v14, %v11378_v43 }
 0x4cc   :  { %v5853_v19 = vadd.f32 %v11216_v47, %v5310_v31  ;;  %v5762_v20 = vpop.f32.mrb[84].mxu1  ;;  %v5312_v48 = vpop.f32.mrb[85].mxu0  ;;  %12778 = vst [vmem:[#allocation106_spill] sm:$0xff] %v11382_v36  ;;  %12780 = vst [vmem:[#allocation43_spill] sm:$0xff] %v11388_v50 }
 0x4cd   :  { %v5855_v10 = vadd.f32 %v11219_v39, %v5762_v20  ;;  %v5854_v13 = vadd.f32 %v11222_v2, %v5312_v48  ;;  %v5764_v38 = vpop.f32.mrb[85].mxu1  ;;  %v5314_v46 = vpop.f32.mrb[86].mxu0 }
 0x4ce   :  { %v5856_v28 = vadd.f32 %v11225_v3, %v5764_v38  ;;  %v5766_v31 = vpop.f32.mrb[86].mxu1  ;;  %v5316_v63 = vpop.f32.mrb[87].mxu0  ;;  %v11384_v33 = vmax.f32 %v5853_v19, 0.0  ;;  %v5857_v20 = vadd.f32 %v11216_v47, %v5314_v46  ;;  %v5951_v38 = vadd.f32 %v5950_v27, %v11372_v54 }
 0x4cf   :  { %v5768_v48 = vpop.f32.mrb[87].mxu1  ;;  %v11390_v41 = vmax.f32 %v5855_v10, 0.0  ;;  %v5859_v52 = vadd.f32 %v11219_v39, %v5766_v31  ;;  %v11394_v12 = vmax.f32 %v5854_v13, 0.0  ;;  %v5858_v19 = vadd.f32 %v11222_v2, %v5316_v63 }
 0x4d0   :  { %12779 = vst [vmem:[#allocation88_spill] sm:$0xff] %v11384_v33  ;;  %v11397_v9 = vmax.f32 %v5856_v28, 0.0  ;;  %v5972_v46 = vadd.f32 %v5971_v22, %v11382_v36  ;;  %v5952_v6 = vadd.f32 %v5951_v38, %v11384_v33  ;;  %v11402_v11 = vmax.f32 %v5857_v20, 0.0 }
 0x4d1   :  { %12781 = vst [vmem:[#allocation42_spill] sm:$0xff] %v11390_v41  ;;  %12782 = vst [vmem:[#allocation28_spill] sm:$0xff] %v11394_v12  ;;  %v5860_v10 = vadd.f32 %v11225_v3, %v5768_v48  ;;  %v6014_v31 = vadd.f32 %v6013_v44, %v11388_v50  ;;  %v5994_v27 = vadd.f32 %v5993_v32, %v11390_v41  ;;  %v11407_v13 = vmax.f32 %v5859_v52, 0.0 }
 0x4d2   :  { %12783 = vst [vmem:[#allocation26_spill] sm:$0xff] %v11397_v9  ;;  %12784 = vst [vmem:[#allocation46_spill] sm:$0xff] %v11402_v11  ;;  %v5973_v63 = vadd.f32 %v5972_v46, %v11394_v12  ;;  %v11414_v25 = vmax.f32 %v5858_v19, 0.0  ;;  %v5953_v50 = vadd.f32 %v5952_v6, %v11402_v11 }
 0x4d3   :  { %v5320_v17 = vpop.f32.mrb[88].mxu0  ;;  %12785 = vst [vmem:[#allocation52_spill] sm:$0xff] %v11407_v13  ;;  %v6015_v48 = vadd.f32 %v6014_v31, %v11397_v9  ;;  %v11420_v21 = vmax.f32 %v5860_v10, 0.0  ;;  %v5995_v12 = vadd.f32 %v5994_v27, %v11407_v13 }
 0x4d4   :  { %v5861_v14 = vadd.f32 %v11216_v47, %v5320_v17  ;;  %v5772_v28 = vpop.f32.mrb[88].mxu1  ;;  %v5322_v56 = vpop.f32.mrb[89].mxu0  ;;  %12786 = vst [vmem:[#allocation29_spill] sm:$0xff] %v11414_v25  ;;  %v5974_v6 = vadd.f32 %v5973_v63, %v11414_v25 }
 0x4d5   :  { %v5863_v22 = vadd.f32 %v11219_v39, %v5772_v28  ;;  %v5862_v20 = vadd.f32 %v11222_v2, %v5322_v56  ;;  %v5774_v38 = vpop.f32.mrb[89].mxu1  ;;  %v5324_v40 = vpop.f32.mrb[90].mxu0  ;;  %12788 = vst [vmem:[#allocation55_spill] sm:$0xff] %v11420_v21 }
 0x4d6   :  { %v11416_v44 = vmax.f32 %v5861_v14, 0.0  ;;  %v5865_v52 = vadd.f32 %v11216_v47, %v5324_v40  ;;  %v5776_v32 = vpop.f32.mrb[90].mxu1  ;;  %v5326_v17 = vpop.f32.mrb[91].mxu0  ;;  %v5864_v19 = vadd.f32 %v11225_v3, %v5774_v38 }
 0x4d7   :  { %v11422_v46 = vmax.f32 %v5863_v22, 0.0  ;;  %v5867_v56 = vadd.f32 %v11219_v39, %v5776_v32  ;;  %v5778_v28 = vpop.f32.mrb[91].mxu1  ;;  %v11426_v31 = vmax.f32 %v5862_v20, 0.0  ;;  %v5866_v14 = vadd.f32 %v11222_v2, %v5326_v17 }
 0x4d8   :  { %12787 = vst [vmem:[#allocation34_spill] sm:$0xff] %v11416_v44  ;;  %v5954_v40 = vadd.f32 %v5953_v50, %v11416_v44  ;;  %v11431_v9 = vmax.f32 %v5865_v52, 0.0  ;;  %v6016_v32 = vadd.f32 %v6015_v48, %v11420_v21  ;;  %v11439_v20 = vmax.f32 %v5864_v19, 0.0 }
 0x4d9   :  { %12789 = vst [vmem:[#allocation60_spill] sm:$0xff] %v11422_v46  ;;  %12790 = vst [vmem:[#allocation36_spill] sm:$0xff] %v11426_v31  ;;  %v5996_v10 = vadd.f32 %v5995_v12, %v11422_v46  ;;  %v11435_v22 = vmax.f32 %v5867_v56, 0.0  ;;  %v5975_v27 = vadd.f32 %v5974_v6, %v11426_v31  ;;  %v11441_v38 = vmax.f32 %v5866_v14, 0.0 }
 0x4da   :  { %12791 = vst [vmem:[#allocation38_spill] sm:$0xff] %v11431_v9  ;;  %12793 = vst [vmem:[#allocation30_spill] sm:$0xff] %v11439_v20  ;;  %v5955_v57 = vadd.f32 %v5954_v40, %v11431_v9  ;;  %v5868_v63 = vadd.f32 %v11225_v3, %v5778_v28 }
 0x4db   :  { %12792 = vst [vmem:[#allocation61_spill] sm:$0xff] %v11435_v22  ;;  %v5330_v36 = vpop.f32.mrb[92].mxu0  ;;  %12794 = vst [vmem:[#allocation27_spill] sm:$0xff] %v11441_v38  ;;  %v5997_v6 = vadd.f32 %v5996_v10, %v11435_v22  ;;  %v5976_v8 = vadd.f32 %v5975_v27, %v11441_v38 }
 0x4dc   :  { %v5869_v17 = vadd.f32 %v11216_v47, %v5330_v36  ;;  %v5782_v50 = vpop.f32.mrb[92].mxu1  ;;  %v5332_v52 = vpop.f32.mrb[93].mxu0 }
 0x4dd   :  { %v5871_v12 = vadd.f32 %v11219_v39, %v5782_v50  ;;  %v5870_v56 = vadd.f32 %v11222_v2, %v5332_v52  ;;  %v5784_v48 = vpop.f32.mrb[93].mxu1  ;;  %v5334_v21 = vpop.f32.mrb[94].mxu0 }
 0x4de   :  { %v11449_v19 = vmax.f32 %v5869_v17, 0.0  ;;  %v5872_v14 = vadd.f32 %v11225_v3, %v5784_v48  ;;  %v5873_v36 = vadd.f32 %v11216_v47, %v5334_v21  ;;  %v5786_v31 = vpop.f32.mrb[94].mxu1  ;;  %v5336_v25 = vpop.f32.mrb[95].mxu0  ;;  %v6017_v48 = vadd.f32 %v6016_v32, %v11439_v20 }
 0x4df   :  { %v11453_v23 = vmax.f32 %v5871_v12, 0.0  ;;  %v11455_v40 = vmax.f32 %v5870_v56, 0.0  ;;  %v5875_v28 = vadd.f32 %v11219_v39, %v5786_v31  ;;  %v5874_v50 = vadd.f32 %v11222_v2, %v5336_v25  ;;  %v5788_v52 = vpop.f32.mrb[95].mxu1 }
 0x4e0   :  { %12795 = vst [vmem:[#allocation68_spill] sm:$0xff] %v11449_v19  ;;  %v5956_v10 = vadd.f32 %v5955_v57, %v11449_v19  ;;  %v11461_v17 = vmax.f32 %v5873_v36, 0.0  ;;  %v11464_v47 = vmax.f32 %v5868_v63, 0.0  ;;  %v11473_v25 = vmax.f32 %v5872_v14, 0.0 }
 0x4e1   :  { %12796 = vst [vmem:[#allocation31_spill] sm:$0xff] %v11453_v23  ;;  %12797 = vst [vmem:[#allocation35_spill] sm:$0xff] %v11455_v40  ;;  %v5998_v21 = vadd.f32 %v5997_v6, %v11453_v23  ;;  %v11467_v12 = vmax.f32 %v5875_v28, 0.0  ;;  %v5977_v56 = vadd.f32 %v5976_v8, %v11455_v40  ;;  %v11471_v2 = vmax.f32 %v5874_v50, 0.0 }
 0x4e2   :  { %12798 = vst [vmem:[#allocation37_spill] sm:$0xff] %v11461_v17  ;;  %12799 = vst [vmem:[#allocation40_spill] sm:$0xff] %v11464_v47  ;;  %v5957_v39 = vadd.f32 %v5956_v10, %v11461_v17  ;;  %v5876_v31 = vadd.f32 %v11225_v3, %v5788_v52  ;;  %v6018_v32 = vadd.f32 %v6017_v48, %v11464_v47 }
 0x4e3   :  { %12800 = vst [vmem:[#allocation39_spill] sm:$0xff] %v11467_v12  ;;  %12801 = vst [vmem:[#allocation41_spill] sm:$0xff] %v11471_v2  ;;  %v5999_v57 = vadd.f32 %v5998_v21, %v11467_v12  ;;  %v5978_v6 = vadd.f32 %v5977_v56, %v11471_v2 }
 0x4e4   :  { %12802 = vst [vmem:[#allocation47_spill] sm:$0xff] %v11473_v25  ;;  %v5958_v27 = vrot.slane %v5957_v39, 4  ;;  %v6019_v28 = vadd.f32 %v6018_v32, %v11473_v25  ;;  %v11480_v20 = vmax.f32 %v5876_v31, 0.0 }
 0x4e5   :  { %v6000_v63 = vrot.slane %v5999_v57, 4  ;;  %v5979_v40 = vrot.slane %v5978_v6, 4 }
 0x4e6   :  { %v5959_v36 = vadd.f32 %v5958_v27, %v5957_v39  ;;  %12803 = vst [vmem:[#allocation49_spill] sm:$0xff] %v11480_v20  ;;  %v6020_v21 = vadd.f32 %v6019_v28, %v11480_v20  ;;  %v8790_v28 = vld [vmem:[#allocation13 + $0x80] sm:$0xff]  }
 0x4e7   :  { %v6001_v8 = vadd.f32 %v6000_v63, %v5999_v57  ;;  %v5980_v12 = vadd.f32 %v5979_v40, %v5978_v6  ;;  %v8787_v63 = vld [vmem:[#allocation13 + $0x40] sm:$0xff]  }
 0x4e8   :  { %v5960_v50 = vrot.slane %v5959_v36, 2  ;;  %v6021_v47 = vrot.slane %v6020_v21, 4  ;;  %7856 = vmatprep.subr.bf16.mxu0 %v8787_v63 }
 0x4e9   :  { %v6002_v10 = vrot.slane %v6001_v8, 2  ;;  %v5981_v31 = vrot.slane %v5980_v12, 2 }
 0x4ea   :  { %v5961_v14 = vadd.f32 %v5960_v50, %v5959_v36  ;;  %v6022_v32 = vadd.f32 %v6021_v47, %v6020_v21  ;;  %v8788_v36 = vld [vmem:[#allocation13] sm:$0xff]   ;;  %v8793_v47 = vld [vmem:[#allocation13 + $0xc8] sm:$0xff]  }
 0x4eb   :  { %v6003_v38 = vadd.f32 %v6002_v10, %v6001_v8  ;;  %v8789_v8 = vld [vmem:[#allocation13 + $0xc0] sm:$0xff]   ;;  %v5982_v10 = vadd.f32 %v5981_v31, %v5980_v12  ;;  %7857 = vmatpush3.bf16.msra.mxu0 %v8788_v36  ;;  %v8794_v21 = vld [vmem:[#allocation13 + $0x88] sm:$0xff]   ;;  %v8795_v31 = vld [vmem:[#allocation13 + $0x50] sm:$0xff]  }
 0x4ec   :  { %v5962_v3 = vrot.slane %v5961_v14, 1  ;;  %7920 = vmatprep.subr.bf16.mxu1 %v8789_v8  ;;  %v8796_v8 = vld [vmem:[#allocation13 + $0x10] sm:$0xff]  }
 0x4ed   :  { %v6004_v48 = vrot.slane %v6003_v38, 1  ;;  %7921 = vmatpush3.bf16.msra.mxu1 %v8790_v28  ;;  %v5983_v12 = vrot.slane %v5982_v10, 1 }
 0x4ee   :  { %v5963_v52 = vadd.f32 %v5962_v3, %v5961_v14  ;;  %v8791_v14 = vld [vmem:[#allocation13 + $0x48] sm:$0xff]   ;;  %7922 = vmatprep.subr.bf16.mxu1 %v8793_v47 }
 0x4ef   :  { %v6005_v27 = vadd.f32 %v6004_v48, %v6003_v38  ;;  %7858 = vmatprep.subr.bf16.mxu0 %v8791_v14 }
 0x4f0   :  { %v11483_v39 = vmul.f32 0.0078125, %v5963_v52  ;;  %v6023_v52 = vrot.slane %v6022_v32, 2 }
 0x4f1   :  { %v11491_v3 = vmul.f32 0.0078125, %v6005_v27  ;;  %7923 = vmatpush3.bf16.msra.mxu1 %v8794_v21 }
 0x4f2   :  { %v6031_v56 = vsub.f32 %v11241_v15, %v11483_v39  ;;  %v6035_v57 = vsub.f32 %v11238_v37, %v11483_v39  ;;  %v6039_v40 = vsub.f32 %v11255_v60, %v11483_v39  ;;  %v8792_v37 = vld [vmem:[#allocation13 + $0x8] sm:$0xff]   ;;  %v6043_v38 = vsub.f32 %v11281_v59, %v11483_v39 }
 0x4f3   :  { %v6047_v48 = vsub.f32 %v11291_v62, %v11483_v39  ;;  %v6033_v27 = vsub.f32 %v11243_v4, %v11491_v3  ;;  %v6037_v63 = vsub.f32 %v11245_v1, %v11491_v3  ;;  %v6024_v36 = vadd.f32 %v6023_v52, %v6022_v32  ;;  %7859 = vmatpush3.bf16.msra.mxu0 %v8792_v37  ;;  %v8799_v1 = vld [vmem:[#allocation13 + $0x58] sm:$0xff]  }
 0x4f4   :  { %v6095_v6 = vmul.f32 %v6031_v56, %v6031_v56  ;;  %v6099_v50 = vmul.f32 %v6035_v57, %v6035_v57  ;;  %v6103_v56 = vmul.f32 %v6039_v40, %v6039_v40  ;;  %v6051_v28 = vsub.f32 %v11309_v58, %v11483_v39  ;;  %v8797_v40 = vld [vmem:[#allocation13 + $0xd0] sm:$0xff]   ;;  %7860 = vmatprep.subr.bf16.mxu0 %v8795_v31 }
 0x4f5   :  { %v6107_v59 = vmul.f32 %v6043_v38, %v6043_v38  ;;  %v6111_v14 = vmul.f32 %v6047_v48, %v6047_v48  ;;  %v5984_v4 = vadd.f32 %v5983_v12, %v5982_v10  ;;  %v6041_v37 = vsub.f32 %v11257_v0, %v11491_v3  ;;  %v8800_v38 = vld [vmem:[#allocation13 + $0x18] sm:$0xff]   ;;  %7924 = vmatprep.subr.bf16.mxu1 %v8797_v40  ;;  %v8804_v40 = vld [vmem:[#allocation13 + $0x20] sm:$0xff]  }
 0x4f6   :  { %v6159_v57 = vadd.f32 %v6099_v50, %v6095_v6  ;;  %v8798_v6 = vld [vmem:[#allocation13 + $0x90] sm:$0xff]   ;;  %v6055_v50 = vsub.f32 %v11319_v42, %v11483_v39  ;;  %v6097_v32 = vmul.f32 %v6033_v27, %v6033_v27  ;;  %v6101_v52 = vmul.f32 %v6037_v63, %v6037_v63  ;;  %v8803_v27 = vld [vmem:[#allocation13 + $0x60] sm:$0xff]  }
 0x4f7   :  { %v6025_v58 = vrot.slane %v6024_v36, 1  ;;  %7861 = vmatpush3.bf16.msra.mxu0 %v8796_v8  ;;  %v6059_v47 = vsub.f32 %v11342_v16, %v11483_v39  ;;  %v6115_v21 = vmul.f32 %v6051_v28, %v6051_v28  ;;  %7925 = vmatpush3.bf16.msra.mxu1 %v8798_v6  ;;  %v6063_v10 = vsub.f32 %v11352_v45, %v11483_v39 }
 0x4f8   :  { %v6160_v60 = vadd.f32 %v6159_v57, %v6103_v56  ;;  %v8801_v57 = vld [vmem:[#allocation13 + $0xd8] sm:$0xff]   ;;  %v6119_v48 = vmul.f32 %v6055_v50, %v6055_v50  ;;  %v11513_v31 = vmul.f32 0.0078125, %v5984_v4  ;;  %7862 = vmatprep.subr.bf16.mxu0 %v8799_v1  ;;  %v6049_v63 = vsub.f32 %v11294_v34, %v11491_v3  ;;  %v8805_v1 = vld [vmem:[#allocation13 + $0xe0] sm:$0xff]  }
 0x4f9   :  { %v6201_v8 = vadd.f32 %v6101_v52, %v6097_v32  ;;  %v11517_v28 = vadd.f32 %v6025_v58, %v6024_v36  ;;  %v6067_v6 = vsub.f32 %v11372_v54, %v11483_v39  ;;  %v6071_v50 = vsub.f32 %v11384_v33, %v11483_v39  ;;  %7926 = vmatprep.subr.bf16.mxu1 %v8801_v57  ;;  %v8806_v32 = vld [vmem:[#allocation13 + $0xa0] sm:$0xff]   ;;  %v8807_v57 = vld [vmem:[#allocation13 + $0x68] sm:$0xff]  }
 0x4fa   :  { %v6161_v62 = vadd.f32 %v6160_v60, %v6107_v59  ;;  %v6045_v60 = vsub.f32 %v11283_v5, %v11491_v3  ;;  %v8802_v59 = vld [vmem:[#allocation13 + $0x98] sm:$0xff]   ;;  %v6127_v52 = vmul.f32 %v6063_v10, %v6063_v10  ;;  %v6083_v10 = vsub.f32 %v11431_v9, %v11483_v39 }
 0x4fb   :  { %7863 = vmatpush3.bf16.msra.mxu0 %v8800_v38  ;;  %7927 = vmatpush3.bf16.msra.mxu1 %v8802_v59  ;;  %v8808_v59 = vld [vmem:[#allocation13 + $0x28] sm:$0xff]  }
 0x4fc   :  { %v6162_v56 = vadd.f32 %v6161_v62, %v6111_v14  ;;  %v6105_v62 = vmul.f32 %v6041_v37, %v6041_v37  ;;  %v6123_v14 = vmul.f32 %v6059_v47, %v6059_v47  ;;  %v6053_v37 = vsub.f32 %v11315_v26, %v11491_v3  ;;  %7864 = vmatprep.subr.bf16.mxu0 %v8803_v27  ;;  %v8809_v27 = vld [vmem:[#allocation13 + $0xe8] sm:$0xff]  }
 0x4fd   :  { %v6109_v58 = vmul.f32 %v6045_v60, %v6045_v60  ;;  %v6036_v47 = vsub.f32 %v11247_v53, %v11513_v31  ;;  %v6113_v60 = vmul.f32 %v6049_v63, %v6049_v63  ;;  %7928 = vmatprep.subr.bf16.mxu1 %v8805_v1  ;;  %v8810_v63 = vld [vmem:[#allocation13 + $0xa8] sm:$0xff]   ;;  %v6091_v1 = vsub.f32 %v11461_v17, %v11483_v39 }
 0x4fe   :  { %v6163_v12 = vadd.f32 %v6162_v56, %v6115_v21  ;;  %v6075_v21 = vsub.f32 %v11402_v11, %v11483_v39  ;;  %v6202_v36 = vadd.f32 %v6201_v8, %v6105_v62  ;;  %v6032_v56 = vsub.f32 %v11249_v35, %v11513_v31 }
 0x4ff   :  { %7865 = vmatpush3.bf16.msra.mxu0 %v8804_v40  ;;  %v6087_v8 = vsub.f32 %v11449_v19, %v11483_v39  ;;  %v6135_v11 = vmul.f32 %v6071_v50, %v6071_v50  ;;  %v6117_v33 = vmul.f32 %v6053_v37, %v6053_v37  ;;  %7929 = vmatpush3.bf16.msra.mxu1 %v8806_v32  ;;  %v8811_v19 = vld [vmem:[#allocation13 + $0x70] sm:$0xff]  }
 0x500   :  { %v6164_v4 = vadd.f32 %v6163_v12, %v6119_v48  ;;  %v6079_v48 = vsub.f32 %v11416_v44, %v11483_v39  ;;  %v6057_v12 = vsub.f32 %v11323_v18, %v11491_v3  ;;  %v6203_v62 = vadd.f32 %v6202_v36, %v6109_v58  ;;  %7866 = vmatprep.subr.bf16.mxu0 %v8807_v57  ;;  %v8812_v32 = vld [vmem:[#allocation13 + $0x30] sm:$0xff]  }
 0x501   :  { %v6061_v44 = vsub.f32 %v11344_v24, %v11491_v3  ;;  %v6040_v58 = vsub.f32 %v11259_v49, %v11513_v31  ;;  %v6096_v36 = vmul.f32 %v6032_v56, %v6032_v56  ;;  %v6100_v9 = vmul.f32 %v6036_v47, %v6036_v47  ;;  %7930 = vmatprep.subr.bf16.mxu1 %v8809_v27  ;;  %v8815_v47 = vld [vmem:[#allocation13 + $0x78] sm:$0xff]  }
 0x502   :  { %v6165_v38 = vadd.f32 %v6164_v4, %v6123_v14  ;;  %v6131_v14 = vmul.f32 %v6067_v6, %v6067_v6  ;;  %v6204_v54 = vadd.f32 %v6203_v62, %v6113_v60  ;;  %v8813_v6 = vld [vmem:[#allocation13 + $0xf0] sm:$0xff]   ;;  %v6065_v50 = vsub.f32 %v11358_v61, %v11491_v3 }
 0x503   :  { %7867 = vmatpush3.bf16.msra.mxu0 %v8808_v59  ;;  %v6143_v60 = vmul.f32 %v6079_v48, %v6079_v48  ;;  %v6044_v56 = vsub.f32 %v11286_v7, %v11513_v31  ;;  %v6069_v57 = vsub.f32 %v11378_v43, %v11491_v3  ;;  %v6048_v17 = vsub.f32 %v11296_v29, %v11513_v31 }
 0x504   :  { %v6166_v4 = vadd.f32 %v6165_v38, %v6127_v52  ;;  %v6121_v52 = vmul.f32 %v6057_v12, %v6057_v12  ;;  %v6205_v37 = vadd.f32 %v6204_v54, %v6117_v33  ;;  %v6139_v38 = vmul.f32 %v6075_v21, %v6075_v21  ;;  %7931 = vmatpush3.bf16.msra.mxu1 %v8810_v63  ;;  %v8814_v33 = vld [vmem:[#allocation13 + $0xb0] sm:$0xff]  }
 0x505   :  { %v6104_v12 = vmul.f32 %v6040_v58, %v6040_v58  ;;  %v6180_v21 = vadd.f32 %v6100_v9, %v6096_v36  ;;  %7868 = vmatprep.subr.bf16.mxu0 %v8811_v19  ;;  %7932 = vmatprep.subr.bf16.mxu1 %v8813_v6  ;;  %v6147_v48 = vmul.f32 %v6083_v10, %v6083_v10  ;;  %v11560_v10 = vmul.f32 0.0078125, %v11517_v28  ;;  %v8818_v36 = vld [vmem:[#allocation13 + $0xb8] sm:$0xff]  }
 0x506   :  { %v6167_v40 = vadd.f32 %v6166_v4, %v6131_v14  ;;  %v6125_v14 = vmul.f32 %v6061_v44, %v6061_v44  ;;  %v6206_v4 = vadd.f32 %v6205_v37, %v6121_v52  ;;  %v6073_v59 = vsub.f32 %v11390_v41, %v11491_v3  ;;  %v8816_v44 = vld [vmem:[#allocation13 + $0x38] sm:$0xff]  }
 0x507   :  { %v6129_v27 = vmul.f32 %v6065_v50, %v6065_v50  ;;  %7869 = vmatpush3.bf16.msra.mxu0 %v8812_v32  ;;  %v6052_v37 = vsub.f32 %v11317_v51, %v11513_v31  ;;  %v6108_v63 = vmul.f32 %v6044_v56, %v6044_v56  ;;  %v6181_v43 = vadd.f32 %v6180_v21, %v6104_v12 }
 0x508   :  { %v6168_v62 = vadd.f32 %v6167_v40, %v6135_v11  ;;  %v8817_v11 = vld [vmem:[#allocation13 + $0xf8] sm:$0xff]   ;;  %v6207_v40 = vadd.f32 %v6206_v4, %v6125_v14  ;;  %7870 = vmatprep.subr.bf16.mxu0 %v8815_v47  ;;  %v6077_v9 = vsub.f32 %v11407_v13, %v11491_v3  ;;  %v6133_v19 = vmul.f32 %v6069_v57, %v6069_v57 }
 0x509   :  { %7933 = vmatpush3.bf16.msra.mxu1 %v8814_v33  ;;  %v6151_v6 = vmul.f32 %v6087_v8, %v6087_v8  ;;  %v6056_v50 = vsub.f32 %v11330_v55, %v11513_v31  ;;  %v6112_v32 = vmul.f32 %v6048_v17, %v6048_v17  ;;  %v6137_v56 = vmul.f32 %v6073_v59, %v6073_v59 }
 0x50a   :  { %v6169_v54 = vadd.f32 %v6168_v62, %v6139_v38  ;;  %v6208_v58 = vadd.f32 %v6207_v40, %v6129_v27  ;;  %v6182_v38 = vadd.f32 %v6181_v43, %v6108_v63  ;;  %7934 = vmatprep.subr.bf16.mxu1 %v8817_v11  ;;  %v6081_v62 = vsub.f32 %v11422_v46, %v11491_v3  ;;  %v12804_v43 = vld [vmem:[#allocation142_spill] sm:$0xff]  ;;  %v12806_v11 = vld [vmem:[#allocation23_spill] sm:$0xff] }
 0x50b   :  { %7871 = vmatpush3.bf16.msra.mxu0 %v8816_v44  ;;  %v6085_v28 = vsub.f32 %v11435_v22, %v11491_v3  ;;  %v6060_v57 = vsub.f32 %v11349_v30, %v11513_v31  ;;  %v6116_v8 = vmul.f32 %v6052_v37, %v6052_v37  ;;  %v6141_v4 = vmul.f32 %v6077_v9, %v6077_v9  ;;  %v12807_v9 = vld [vmem:[#allocation106_spill] sm:$0xff] }
 0x50c   :  { %v6170_v52 = vadd.f32 %v6169_v54, %v6143_v60  ;;  %v6209_v47 = vadd.f32 %v6208_v58, %v6133_v19  ;;  %v6183_v14 = vadd.f32 %v6182_v38, %v6112_v32  ;;  %v6034_v17 = vsub.f32 %v12804_v43, %v11560_v10  ;;  %v12805_v54 = vld [vmem:[#allocation138_spill] sm:$0xff] }
 0x50d   :  { %v6038_v12 = vsub.f32 %v12805_v54, %v11560_v10  ;;  %7935 = vmatpush3.bf16.msra.mxu1 %v8818_v36  ;;  %v6155_v21 = vmul.f32 %v6091_v1, %v6091_v1  ;;  %v6120_v59 = vmul.f32 %v6056_v50, %v6056_v50  ;;  %v6089_v44 = vsub.f32 %v11453_v23, %v11491_v3  ;;  %v12808_v1 = vld [vmem:[#allocation124_spill] sm:$0xff]  ;;  %v12809_v50 = vld [vmem:[#allocation39_spill] sm:$0xff] }
 0x50e   :  { %v6171_v60 = vadd.f32 %v6170_v52, %v6147_v48  ;;  %v6210_v33 = vadd.f32 %v6209_v47, %v6137_v56  ;;  %v6064_v48 = vsub.f32 %v12806_v11, %v11513_v31  ;;  %v6184_v27 = vadd.f32 %v6183_v14, %v6116_v8  ;;  %v12813_v23 = vld [vmem:[#allocation155_spill] sm:$0xff] }
 0x50f   :  { %v6145_v52 = vmul.f32 %v6081_v62, %v6081_v62  ;;  %v6149_v63 = vmul.f32 %v6085_v28, %v6085_v28  ;;  %v6068_v19 = vsub.f32 %v12807_v9, %v11513_v31  ;;  %v6124_v58 = vmul.f32 %v6060_v57, %v6060_v57  ;;  %v12811_v57 = vld [vmem:[#allocation93_spill] sm:$0xff] }
 0x510   :  { %v6172_v40 = vadd.f32 %v6171_v60, %v6151_v6  ;;  %v6211_v37 = vadd.f32 %v6210_v33, %v6141_v4  ;;  %v6185_v32 = vadd.f32 %v6184_v27, %v6120_v59  ;;  %v6042_v36 = vsub.f32 %v12808_v1, %v11560_v10  ;;  %v12810_v60 = vld [vmem:[#allocation28_spill] sm:$0xff]  ;;  %v12812_v27 = vld [vmem:[#allocation29_spill] sm:$0xff] }
 0x511   :  { %v6098_v56 = vmul.f32 %v6034_v17, %v6034_v17  ;;  %v6102_v47 = vmul.f32 %v6038_v12, %v6038_v12  ;;  %v6093_v6 = vsub.f32 %v12809_v50, %v11491_v3  ;;  %v6072_v8 = vsub.f32 %v12810_v60, %v11513_v31 }
 0x512   :  { %v6212_v38 = vadd.f32 %v6211_v37, %v6145_v52  ;;  %v6128_v62 = vmul.f32 %v6064_v48, %v6064_v48  ;;  %v6186_v14 = vadd.f32 %v6185_v32, %v6124_v58  ;;  %v6173_v28 = vadd.f32 %v6172_v40, %v6155_v21  ;;  %v12814_v48 = vld [vmem:[#allocation36_spill] sm:$0xff]  ;;  %v12815_v58 = vld [vmem:[#allocation101_spill] sm:$0xff] }
 0x513   :  { %v6153_v4 = vmul.f32 %v6089_v44, %v6089_v44  ;;  %v6046_v59 = vsub.f32 %v12811_v57, %v11560_v10  ;;  %v6076_v52 = vsub.f32 %v12812_v27, %v11513_v31  ;;  %v6132_v37 = vmul.f32 %v6068_v19, %v6068_v19 }
 0x514   :  { %v6213_v33 = vadd.f32 %v6212_v38, %v6149_v63  ;;  %v6187_v17 = vadd.f32 %v6186_v14, %v6128_v62  ;;  %v6050_v50 = vsub.f32 %v12813_v23, %v11560_v10  ;;  %v6106_v22 = vmul.f32 %v6042_v36, %v6042_v36  ;;  %v12816_v62 = vld [vmem:[#allocation27_spill] sm:$0xff] }
 0x515   :  { %v6222_v46 = vadd.f32 %v6102_v47, %v6098_v56  ;;  %v6157_v13 = vmul.f32 %v6093_v6, %v6093_v6  ;;  %v6080_v21 = vsub.f32 %v12814_v48, %v11513_v31  ;;  %v6136_v40 = vmul.f32 %v6072_v8, %v6072_v8  ;;  %v12817_v36 = vld [vmem:[#allocation115_spill] sm:$0xff] }
 0x516   :  { %v6214_v12 = vadd.f32 %v6213_v33, %v6153_v4  ;;  %v6188_v44 = vadd.f32 %v6187_v17, %v6132_v37  ;;  %v6174_v63 = vrot.slane %v6173_v28, 4  ;;  %v6054_v32 = vsub.f32 %v12815_v58, %v11560_v10  ;;  %v12818_v8 = vld [vmem:[#allocation35_spill] sm:$0xff] }
 0x517   :  { %v6110_v38 = vmul.f32 %v6046_v59, %v6046_v59  ;;  %v6223_v41 = vadd.f32 %v6222_v46, %v6106_v22  ;;  %v6084_v14 = vsub.f32 %v12816_v62, %v11513_v31  ;;  %v6140_v4 = vmul.f32 %v6076_v52, %v6076_v52  ;;  %v12819_v59 = vld [vmem:[#allocation140_spill] sm:$0xff] }
 0x518   :  { %v6215_v19 = vadd.f32 %v6214_v12, %v6157_v13  ;;  %v6189_v33 = vadd.f32 %v6188_v44, %v6136_v40  ;;  %v6058_v56 = vsub.f32 %v12817_v36, %v11560_v10  ;;  %v6114_v47 = vmul.f32 %v6050_v50, %v6050_v50  ;;  %v12820_v50 = vld [vmem:[#allocation103_spill] sm:$0xff] }
 0x519   :  { %v6224_v6 = vadd.f32 %v6223_v41, %v6110_v38  ;;  %v6088_v37 = vsub.f32 %v12818_v8, %v11513_v31  ;;  %v6144_v17 = vmul.f32 %v6080_v21, %v6080_v21  ;;  %v6175_v27 = vadd.f32 %v6174_v63, %v6173_v28  ;;  %v12821_v28 = vld [vmem:[#allocation43_spill] sm:$0xff] }
 0x51a   :  { %v6190_v48 = vadd.f32 %v6189_v33, %v6140_v4  ;;  %v6062_v46 = vsub.f32 %v12819_v59, %v11560_v10  ;;  %v6118_v13 = vmul.f32 %v6054_v32, %v6054_v32  ;;  %v6216_v12 = vrot.slane %v6215_v19, 4 }
 0x51b   :  { %v6225_v22 = vadd.f32 %v6224_v6, %v6114_v47  ;;  %v6092_v52 = vsub.f32 %v11471_v2, %v11513_v31  ;;  %v6148_v40 = vmul.f32 %v6084_v14, %v6084_v14  ;;  %v6066_v41 = vsub.f32 %v12820_v50, %v11560_v10  ;;  %v12822_v2 = vld [vmem:[#allocation26_spill] sm:$0xff] }
 0x51c   :  { %v6191_v44 = vadd.f32 %v6190_v48, %v6144_v17  ;;  %v6122_v38 = vmul.f32 %v6058_v56, %v6058_v56  ;;  %v6152_v8 = vmul.f32 %v6088_v37, %v6088_v37  ;;  %v6176_v4 = vrot.slane %v6175_v27, 2 }
 0x51d   :  { %v6226_v62 = vadd.f32 %v6225_v22, %v6118_v13  ;;  %v6070_v63 = vsub.f32 %v12821_v28, %v11560_v10  ;;  %v6126_v33 = vmul.f32 %v6062_v46, %v6062_v46  ;;  %v6217_v47 = vadd.f32 %v6216_v12, %v6215_v19  ;;  %v12823_v22 = vld [vmem:[#allocation55_spill] sm:$0xff]  ;;  %v12824_v19 = vld [vmem:[#allocation30_spill] sm:$0xff] }
 0x51e   :  { %v6192_v21 = vadd.f32 %v6191_v44, %v6148_v40  ;;  %v6156_v6 = vmul.f32 %v6092_v52, %v6092_v52  ;;  %v6074_v14 = vsub.f32 %v12822_v2, %v11560_v10  ;;  %v6130_v48 = vmul.f32 %v6066_v41, %v6066_v41  ;;  %v12825_v41 = vld [vmem:[#allocation40_spill] sm:$0xff] }
 0x51f   :  { %v6227_v32 = vadd.f32 %v6226_v62, %v6122_v38  ;;  %v6177_v61 = vadd.f32 %v6176_v4, %v6175_v27  ;;  %v6134_v56 = vmul.f32 %v6070_v63, %v6070_v63  ;;  %v6218_v37 = vrot.slane %v6217_v47, 2 }
 0x520   :  { %v6193_v60 = vadd.f32 %v6192_v21, %v6152_v8  ;;  %v6078_v40 = vsub.f32 %v12823_v22, %v11560_v10  ;;  %v6138_v28 = vmul.f32 %v6074_v14, %v6074_v14  ;;  %v6082_v62 = vsub.f32 %v12824_v19, %v11560_v10 }
 0x521   :  { %v6228_v17 = vadd.f32 %v6227_v32, %v6126_v33  ;;  %v6178_v8 = vrot.slane %v6177_v61, 1  ;;  %v6219_v38 = vadd.f32 %v6218_v37, %v6217_v47  ;;  %v6086_v27 = vsub.f32 %v12825_v41, %v11560_v10 }
 0x522   :  { %v6194_v45 = vadd.f32 %v6193_v60, %v6156_v6  ;;  %v6142_v60 = vmul.f32 %v6078_v40, %v6078_v40  ;;  %v6090_v4 = vsub.f32 %v11473_v25, %v11560_v10  ;;  %v6146_v63 = vmul.f32 %v6082_v62, %v6082_v62 }
 0x523   :  { %v6229_v13 = vadd.f32 %v6228_v17, %v6130_v48  ;;  %v6179_v32 = vadd.f32 %v6178_v8, %v6177_v61  ;;  %v6094_v6 = vsub.f32 %v11480_v20, %v11560_v10  ;;  %v6220_v14 = vrot.slane %v6219_v38, 1 }
 0x524   :  { %v6195_v44 = vrot.slane %v6194_v45, 4  ;;  %v6150_v17 = vmul.f32 %v6086_v27, %v6086_v27  ;;  %v6154_v47 = vmul.f32 %v6090_v4, %v6090_v4 }
 0x525   :  { %v6230_v46 = vadd.f32 %v6229_v13, %v6134_v56  ;;  %v6243_v13 = vmul.f32 0.0078125, %v6179_v32  ;;  %v6221_v37 = vadd.f32 %v6220_v14, %v6219_v38 }
 0x526   :  { %v6196_v12 = vadd.f32 %v6195_v44, %v6194_v45  ;;  %v6158_v44 = vmul.f32 %v6094_v6, %v6094_v6 }
 0x527   :  { %v6231_v52 = vadd.f32 %v6230_v46, %v6138_v28  ;;  %v6247_v62 = vadd.f32 1e-05, %v6243_v13 }
 0x528   :  { %v6197_v21 = vrot.slane %v6196_v12, 2 }
 0x529   :  { %v6232_v33 = vadd.f32 %v6231_v52, %v6142_v60  ;;  %v6245_v52 = vmul.f32 0.0078125, %v6221_v37  ;;  %8859 = vrsqrt.f32 %v6247_v62  ;;  %vm6253_vm0 = vcmp.eq.f32.partialorder %v6247_v62, inf }
 0x52a   :  { %v6198_v48 = vadd.f32 %v6197_v21, %v6196_v12  ;;  %vm6255_vm2 = vcmp.eq.f32.partialorder %v6247_v62, 0.0 }
 0x52b   :  { %v6233_v45 = vadd.f32 %v6232_v33, %v6146_v63  ;;  %v6249_v20 = vadd.f32 1e-05, %v6245_v52 }
 0x52c   :  { %v6199_v28 = vrot.slane %v6198_v48, 1 }
 0x52d   :  { %v6234_v56 = vadd.f32 %v6233_v45, %v6150_v17  ;;  %v6256_v17 = vand.u32 2147483648, %v6247_v62  ;;  %vm6267_vm4 = vcmp.eq.f32.partialorder %v6249_v20, inf  ;;  %v6270_v37 = vand.u32 2147483648, %v6249_v20 }
 0x52e   :  { %v6200_v40 = vadd.f32 %v6199_v28, %v6198_v48  ;;  %vm6269_vm5 = vcmp.eq.f32.partialorder %v6249_v20, 0.0 }
 0x52f   :  { %v6235_v46 = vadd.f32 %v6234_v56, %v6154_v47 }
 0x530   :  { %v6244_v41 = vmul.f32 0.0078125, %v6200_v40 }
 0x531   :  { %v6236_v25 = vadd.f32 %v6235_v46, %v6158_v44 }
 0x532   :  { %v6248_v61 = vadd.f32 1e-05, %v6244_v41 }
 0x533   :  { %v6237_v8 = vrot.slane %v6236_v25, 4  ;;  %v8860_v63 = vpop.eup %8859 }
 0x534   :  { %8861 = vrsqrt.f32 %v6248_v61  ;;  %v6252_v6 = vmul.f32 %v8860_v63, %v6247_v62  ;;  %vm6260_vm1 = vcmp.eq.f32.partialorder %v6248_v61, inf  ;;  %v6263_v28 = vand.u32 2147483648, %v6248_v61 }
 0x535   :  { %v6238_v60 = vadd.f32 %v6237_v8, %v6236_v25  ;;  %8863 = vrsqrt.f32 %v6249_v20  ;;  %vm6262_vm3 = vcmp.eq.f32.partialorder %v6248_v61, 0.0 }
 0x536   :  { %v6254_v41 = vsel %vm6253_vm0, %v6247_v62, %v6252_v6  ;;  %v5941_v6 = vld [vmem:[%s12013_s9] sm:$0xf] }
 0x537   :  { %v6239_v12 = vrot.slane %v6238_v60, 2  ;;  %v6257_v47 = vsel %vm6255_vm2, %v6256_v17, %v6254_v41  ;;  %v12828_v17 = vld [vmem:[#allocation32_spill] sm:$0xff] }
 0x539   :  { %v6240_v27 = vadd.f32 %v6239_v12, %v6238_v60 }
 0x53b   :  { %v6241_v21 = vrot.slane %v6240_v27, 1 }
 0x53d   :  { %v6242_v4 = vadd.f32 %v6241_v21, %v6240_v27 }
 0x53e   :  { %v8862_v33 = vpop.eup %8861 }
 0x53f   :  { %v6246_v38 = vmul.f32 0.0078125, %v6242_v4  ;;  %v6259_v14 = vmul.f32 %v8862_v33, %v6248_v61  ;;  %v8864_v48 = vpop.eup %8863  ;;  %v12826_v4 = vld [vmem:[#allocation148_spill] sm:$0xff] }
 0x540   :  { %v6266_v25 = vmul.f32 %v8864_v48, %v6249_v20  ;;  %v12827_v48 = vld [vmem:[#allocation24_spill] sm:$0xff] }
 0x541   :  { %v6250_v32 = vadd.f32 1e-05, %v6246_v38  ;;  %v6261_v45 = vsel %vm6260_vm1, %v6248_v61, %v6259_v14 }
 0x542   :  { %v6264_v56 = vsel %vm6262_vm3, %v6263_v28, %v6261_v45  ;;  %v6268_v13 = vsel %vm6267_vm4, %v6249_v20, %v6266_v25  ;;  %v12829_v45 = vld [vmem:[#allocation25_spill] sm:$0xff] }
 0x543   :  { %8865 = vrsqrt.f32 %v6250_v32  ;;  %v6271_v44 = vsel %vm6269_vm5, %v6270_v37, %v6268_v13  ;;  %vm6274_vm6 = vcmp.eq.f32.partialorder %v6250_v32, inf  ;;  %v6277_v52 = vand.u32 2147483648, %v6250_v32 }
 0x544   :  { %8867 = vrcp.f32 %v6257_v47  ;;  %vm6276_vm7 = vcmp.eq.f32.partialorder %v6250_v32, 0.0  ;;  %v12830_v47 = vld [vmem:[#allocation33_spill] sm:$0xff] }
 0x545   :  { %8869 = vrcp.f32 %v6264_v56 }
 0x546   :  { %8871 = vrcp.f32 %v6271_v44 }
 0x54d   :  { %v8866_v40 = vpop.eup %8865 }
 0x54e   :  { %v6273_v46 = vmul.f32 %v8866_v40, %v6250_v32  ;;  %v8868_v62 = vpop.eup %8867 }
 0x54f   :  { %v8870_v12 = vpop.eup %8869 }
 0x550   :  { %v6275_v8 = vsel %vm6274_vm6, %v6250_v32, %v6273_v46  ;;  %v6291_v61 = vcombine.low %v8868_v62, %v8870_v12  ;;  %v8872_v27 = vpop.eup %8871 }
 0x551   :  { %v6278_v60 = vsel %vm6276_vm7, %v6277_v52, %v6275_v8 }
 0x552   :  { %8873 = vrcp.f32 %v6278_v60  ;;  %v6299_v63 = vrot.slane %v6291_v61, %v12826_v4 }
 0x55c   :  { %v8874_v21 = vpop.eup %8873 }
 0x55d   :  { %v6292_v38 = vcombine.low %v8872_v27, %v8874_v21 }
 0x55f   :  { %v6306_v20 = vrot.slane %v6292_v38, %v12826_v4 }
 0x561   :  { %v6307_v33 = vcombine.low %v6299_v63, %v6306_v20  ;;  %v12831_v63 = vld [vmem:[#allocation141_spill] sm:$0xff] }
 0x563   :  { %v6314_v14 = vrot.slane %v6307_v33, %v12826_v4 }
 0x565   :  { %v6316_v32 = vmul.f32 %v6314_v14, %v5941_v6 }
 0x567   :  { %v11629_v41 = vrot.slane %v6316_v32, %v12827_v48  ;;  %v11632_v25 = vrot.slane %v6316_v32, %v12828_v17  ;;  %v11635_v28 = vrot.slane %v6316_v32, %v12829_v45  ;;  %v11638_v56 = vrot.slane %v6316_v32, %v12830_v47 }
 0x569   :  { %v6338_v13 = vmul.f32 %v11629_v41, %v11483_v39  ;;  %v6339_v37 = vmul.f32 %v11632_v25, %v11513_v31  ;;  %v6340_v40 = vmul.f32 %v11635_v28, %v11491_v3  ;;  %v6341_v44 = vmul.f32 %v11638_v56, %v11560_v10  ;;  %v5942_v39 = vld [vmem:[%s12014_s10] sm:$0xf] }
 0x56a   :  { %v6373_v31 = vmul.f32 %v11632_v25, %v11249_v35  ;;  %v6377_v10 = vmul.f32 %v11632_v25, %v11247_v53  ;;  %v6375_v61 = vmul.f32 %v11638_v56, %v12804_v43  ;;  %v6379_v27 = vmul.f32 %v11638_v56, %v12805_v54  ;;  %v12833_v35 = vld [vmem:[#allocation102_spill] sm:$0xff] }
 0x56b   :  { %v6346_v46 = vcombine.low %v6338_v13, %v6339_v37  ;;  %v6347_v52 = vcombine.low %v6340_v40, %v6341_v44  ;;  %v6372_v21 = vmul.f32 %v11629_v41, %v11241_v15  ;;  %v6376_v38 = vmul.f32 %v11629_v41, %v12831_v63 }
 0x56c   :  { %v6378_v33 = vmul.f32 %v11635_v28, %v12833_v35  ;;  %v6381_v6 = vmul.f32 %v11632_v25, %v11259_v49  ;;  %v6385_v14 = vmul.f32 %v11632_v25, %v11286_v7  ;;  %v6383_v32 = vmul.f32 %v11638_v56, %v12808_v1 }
 0x56d   :  { %v6354_v8 = vrot.slane %v6346_v46, %v12826_v4  ;;  %v6361_v60 = vrot.slane %v6347_v52, %v12826_v4  ;;  %v6386_v63 = vmul.f32 %v11635_v28, %v11283_v5  ;;  %v6395_v35 = vmul.f32 %v11638_v56, %v12815_v58 }
 0x56f   :  { %v6362_v62 = vcombine.low %v6354_v8, %v6361_v60 }
 0x571   :  { %v6369_v12 = vrot.slane %v6362_v62, %v12826_v4  ;;  %v12832_v4 = vld [vmem:[#allocation137_spill] sm:$0xff] }
 0x572   :  { %v6374_v20 = vmul.f32 %v11635_v28, %v12832_v4  ;;  %v6393_v4 = vmul.f32 %v11632_v25, %v11317_v51 }
 0x573   :  { %v6371_v3 = vsub.f32 %v5942_v39, %v6369_v12 }
 0x575   :  { %v11671_v53 = vrot.slane %v6371_v3, %v12828_v17  ;;  %v11674_v43 = vrot.slane %v6371_v3, %v12830_v47  ;;  %v11677_v54 = vrot.slane %v6371_v3, %v12827_v48  ;;  %v11680_v15 = vrot.slane %v6371_v3, %v12829_v45 }
 0x576   :  { %v6387_v17 = vmul.f32 %v11638_v56, %v12811_v57 }
 0x577   :  { %v6458_v47 = vadd.f32 %v11671_v53, %v6373_v31  ;;  %v6462_v13 = vadd.f32 %v11671_v53, %v6377_v10  ;;  %v6460_v37 = vadd.f32 %v11674_v43, %v6375_v61  ;;  %v6464_v45 = vadd.f32 %v11674_v43, %v6379_v27  ;;  %v12834_v31 = vld [vmem:[#allocation78_spill] sm:$0xff]  ;;  %v12835_v10 = vld [vmem:[#allocation120_spill] sm:$0xff] }
 0x578   :  { %v6457_v40 = vadd.f32 %v11677_v54, %v6372_v21  ;;  %v6461_v49 = vadd.f32 %v11677_v54, %v6376_v38  ;;  %v6459_v7 = vadd.f32 %v11680_v15, %v6374_v20  ;;  %v6463_v44 = vadd.f32 %v11680_v15, %v6378_v33 }
 0x579   :  { %v6522_v1 = vpack.c.bf16 %v6462_v13, %v6458_v47  ;;  %v6524_v46 = vpack.c.bf16 %v6464_v45, %v6460_v37  ;;  %v6466_v57 = vadd.f32 %v11671_v53, %v6381_v6  ;;  %v6470_v52 = vadd.f32 %v11671_v53, %v6385_v14  ;;  %v12836_v13 = vld [vmem:[#allocation154_spill] sm:$0xff]  ;;  %v12837_v45 = vld [vmem:[#allocation107_spill] sm:$0xff] }
 0x57a   :  { %v6521_v8 = vpack.c.bf16 %v6461_v49, %v6457_v40  ;;  %v6523_v60 = vpack.c.bf16 %v6463_v44, %v6459_v7  ;;  %v6468_v62 = vadd.f32 %v11674_v43, %v6383_v32  ;;  %v6472_v39 = vadd.f32 %v11674_v43, %v6387_v17 }
 0x57b   :  { %6848 = vmatprep.mubr.bf16.mxu0 %v6522_v1  ;;  %6945 = vmatprep.mubr.bf16.mxu1 %v6524_v46  ;;  %v6526_v12 = vpack.c.bf16 %v6470_v52, %v6466_v57  ;;  %v6380_v3 = vmul.f32 %v11629_v41, %v12834_v31  ;;  %v6384_v61 = vmul.f32 %v11629_v41, %v12835_v10 }
 0x57c   :  { %6849 = vmatmul.mubr.bf16.vlgmr.msra.gmra.mrb[96].mxu0 %v6521_v8  ;;  %6946 = vmatmul.mubr.bf16.vlgmr.msra.gmra.mrb[96].mxu1 %v6523_v60  ;;  %v6528_v27 = vpack.c.bf16 %v6472_v39, %v6468_v62  ;;  %v6382_v21 = vmul.f32 %v11635_v28, %v11257_v0  ;;  %v6389_v38 = vmul.f32 %v11632_v25, %v11296_v29 }
 0x57d   :  { %6856 = vmatprep.mubr.bf16.mxu0 %v6526_v12  ;;  %v6391_v20 = vmul.f32 %v11638_v56, %v12813_v23  ;;  %v6465_v33 = vadd.f32 %v11677_v54, %v6380_v3  ;;  %v6469_v0 = vadd.f32 %v11677_v54, %v6384_v61  ;;  %v6471_v6 = vadd.f32 %v11680_v15, %v6386_v63 }
 0x57e   :  { %6953 = vmatprep.mubr.bf16.mxu1 %v6528_v27  ;;  %v6467_v5 = vadd.f32 %v11680_v15, %v6382_v21  ;;  %v6474_v29 = vadd.f32 %v11671_v53, %v6389_v38  ;;  %v6478_v14 = vadd.f32 %v11671_v53, %v6393_v4  ;;  %v6480_v23 = vadd.f32 %v11674_v43, %v6395_v35 }
 0x57f   :  { %v6476_v51 = vadd.f32 %v11674_v43, %v6391_v20  ;;  %v6525_v32 = vpack.c.bf16 %v6469_v0, %v6465_v33  ;;  %v6388_v37 = vmul.f32 %v11629_v41, %v12836_v13  ;;  %v6392_v40 = vmul.f32 %v11629_v41, %v12837_v45 }
 0x580   :  { %v6527_v17 = vpack.c.bf16 %v6471_v6, %v6467_v5  ;;  %v6530_v58 = vpack.c.bf16 %v6478_v14, %v6474_v29  ;;  %v6390_v49 = vmul.f32 %v11635_v28, %v11294_v34  ;;  %v6394_v7 = vmul.f32 %v11635_v28, %v11315_v26  ;;  %v12839_v6 = vld [vmem:[#allocation135_spill] sm:$0xff]  ;;  %v12840_v14 = vld [vmem:[#allocation105_spill] sm:$0xff] }
 0x581   :  { %v6532_v47 = vpack.c.bf16 %v6480_v23, %v6476_v51  ;;  %v6397_v44 = vmul.f32 %v11632_v25, %v11330_v55  ;;  %v6401_v1 = vmul.f32 %v11632_v25, %v11349_v30  ;;  %v6399_v46 = vmul.f32 %v11638_v56, %v12817_v36  ;;  %v12841_v23 = vld [vmem:[#allocation146_spill] sm:$0xff] }
 0x582   :  { %v6403_v57 = vmul.f32 %v11638_v56, %v12819_v59  ;;  %v6473_v52 = vadd.f32 %v11677_v54, %v6388_v37  ;;  %v6477_v34 = vadd.f32 %v11677_v54, %v6392_v40  ;;  %v6475_v26 = vadd.f32 %v11680_v15, %v6390_v49  ;;  %v12844_v37 = vld [vmem:[#allocation29_spill] sm:$0xff] }
 0x583   :  { %v6479_v8 = vadd.f32 %v11680_v15, %v6394_v7  ;;  %v6482_v55 = vadd.f32 %v11671_v53, %v6397_v44  ;;  %v6486_v60 = vadd.f32 %v11671_v53, %v6401_v1  ;;  %v6484_v30 = vadd.f32 %v11674_v43, %v6399_v46 }
 0x584   :  { %6857 = vmatmul.mubr.bf16.gmra.mrb[100].mxu0 %v6525_v32  ;;  %6954 = vmatmul.mubr.bf16.gmra.mrb[100].mxu1 %v6527_v17  ;;  %v6488_v62 = vadd.f32 %v11674_v43, %v6403_v57  ;;  %v6529_v36 = vpack.c.bf16 %v6477_v34, %v6473_v52  ;;  %v6396_v31 = vmul.f32 %v11629_v41, %v11319_v42  ;;  %v12842_v17 = vld [vmem:[#allocation104_spill] sm:$0xff] }
 0x585   :  { %6864 = vmatprep.mubr.bf16.mxu0 %v6530_v58  ;;  %6961 = vmatprep.mubr.bf16.mxu1 %v6532_v47  ;;  %v6531_v39 = vpack.c.bf16 %v6479_v8, %v6475_v26  ;;  %v6534_v12 = vpack.c.bf16 %v6486_v60, %v6482_v55  ;;  %v6400_v3 = vmul.f32 %v11629_v41, %v11342_v16  ;;  %v12838_v16 = vld [vmem:[#allocation43_spill] sm:$0xff]  ;;  %v12843_v47 = vld [vmem:[#allocation28_spill] sm:$0xff] }
 0x586   :  { %v6536_v59 = vpack.c.bf16 %v6488_v62, %v6484_v30  ;;  %v6398_v10 = vmul.f32 %v11635_v28, %v11323_v18  ;;  %v6402_v61 = vmul.f32 %v11635_v28, %v11344_v24  ;;  %v6405_v27 = vmul.f32 %v11632_v25, %v12806_v11  ;;  %v12845_v60 = vld [vmem:[#allocation88_spill] sm:$0xff]  ;;  %v12846_v62 = vld [vmem:[#allocation46_spill] sm:$0xff] }
 0x587   :  { %v6409_v21 = vmul.f32 %v11632_v25, %v12807_v9  ;;  %v6407_v42 = vmul.f32 %v11638_v56, %v12820_v50  ;;  %v6411_v63 = vmul.f32 %v11638_v56, %v12838_v16  ;;  %v6481_v38 = vadd.f32 %v11677_v54, %v6396_v31 }
 0x588   :  { %v6485_v18 = vadd.f32 %v11677_v54, %v6400_v3  ;;  %v6483_v24 = vadd.f32 %v11680_v15, %v6398_v10  ;;  %v6487_v4 = vadd.f32 %v11680_v15, %v6402_v61  ;;  %v6490_v11 = vadd.f32 %v11671_v53, %v6405_v27  ;;  %v12849_v3 = vld [vmem:[#allocation36_spill] sm:$0xff]  ;;  %v12850_v61 = vld [vmem:[#allocation27_spill] sm:$0xff] }
 0x589   :  { %v6494_v20 = vadd.f32 %v11671_v53, %v6409_v21  ;;  %v6492_v9 = vadd.f32 %v11674_v43, %v6407_v42  ;;  %v6496_v35 = vadd.f32 %v11674_v43, %v6411_v63  ;;  %v6404_v29 = vmul.f32 %v11629_v41, %v12839_v6  ;;  %v12851_v42 = vld [vmem:[#allocation40_spill] sm:$0xff]  ;;  %v12853_v6 = vld [vmem:[#allocation34_spill] sm:$0xff] }
 0x58a   :  { %v6533_v50 = vpack.c.bf16 %v6485_v18, %v6481_v38  ;;  %v6535_v33 = vpack.c.bf16 %v6487_v4, %v6483_v24  ;;  %v6408_v51 = vmul.f32 %v11629_v41, %v12840_v14  ;;  %v6406_v32 = vmul.f32 %v11635_v28, %v12841_v23  ;;  %v12854_v14 = vld [vmem:[#allocation38_spill] sm:$0xff]  ;;  %v12855_v23 = vld [vmem:[#allocation60_spill] sm:$0xff] }
 0x58b   :  { %v6538_v0 = vpack.c.bf16 %v6494_v20, %v6490_v11  ;;  %v6540_v5 = vpack.c.bf16 %v6496_v35, %v6492_v9  ;;  %v6410_v58 = vmul.f32 %v11635_v28, %v12842_v17  ;;  %v6413_v13 = vmul.f32 %v11632_v25, %v12843_v47  ;;  %v12856_v17 = vld [vmem:[#allocation61_spill] sm:$0xff]  ;;  %v12857_v47 = vld [vmem:[#allocation35_spill] sm:$0xff] }
 0x58c   :  { %6865 = vmatmul.mubr.bf16.gmra.mrb[104].mxu0 %v6529_v36  ;;  %6962 = vmatmul.mubr.bf16.gmra.mrb[104].mxu1 %v6531_v39  ;;  %v6417_v45 = vmul.f32 %v11632_v25, %v12844_v37  ;;  %v6415_v40 = vmul.f32 %v11638_v56, %v12822_v2  ;;  %v6419_v49 = vmul.f32 %v11638_v56, %v12823_v22  ;;  %v12847_v39 = vld [vmem:[#allocation42_spill] sm:$0xff]  ;;  %v12858_v37 = vld [vmem:[#allocation41_spill] sm:$0xff] }
 0x58d   :  { %6872 = vmatprep.mubr.bf16.mxu0 %v6534_v12  ;;  %6969 = vmatprep.mubr.bf16.mxu1 %v6536_v59  ;;  %v6489_v7 = vadd.f32 %v11677_v54, %v6404_v29  ;;  %v6493_v44 = vadd.f32 %v11677_v54, %v6408_v51  ;;  %v6491_v1 = vadd.f32 %v11680_v15, %v6406_v32  ;;  %v12848_v59 = vld [vmem:[#allocation52_spill] sm:$0xff] }
 0x58e   :  { %v6495_v46 = vadd.f32 %v11680_v15, %v6410_v58  ;;  %v6498_v57 = vadd.f32 %v11671_v53, %v6413_v13  ;;  %v6502_v52 = vadd.f32 %v11671_v53, %v6417_v45  ;;  %v6500_v34 = vadd.f32 %v11674_v43, %v6415_v40  ;;  %v12859_v40 = vld [vmem:[#allocation47_spill] sm:$0xff] }
 0x58f   :  { %v6504_v26 = vadd.f32 %v11674_v43, %v6419_v49  ;;  %v6537_v2 = vpack.c.bf16 %v6493_v44, %v6489_v7  ;;  %v6412_v30 = vmul.f32 %v11629_v41, %v12845_v60  ;;  %v6416_v36 = vmul.f32 %v11629_v41, %v12846_v62  ;;  %v12861_v60 = vld [vmem:[#allocation37_spill] sm:$0xff]  ;;  %v12862_v62 = vld [vmem:[#allocation31_spill] sm:$0xff] }
 0x590   :  { %v6539_v8 = vpack.c.bf16 %v6495_v46, %v6491_v1  ;;  %v6542_v55 = vpack.c.bf16 %v6502_v52, %v6498_v57  ;;  %v6414_v12 = vmul.f32 %v11635_v28, %v12847_v39  ;;  %v6418_v31 = vmul.f32 %v11635_v28, %v12848_v59 }
 0x591   :  { %v6544_v22 = vpack.c.bf16 %v6504_v26, %v6500_v34  ;;  %v6421_v10 = vmul.f32 %v11632_v25, %v12849_v3  ;;  %v6425_v27 = vmul.f32 %v11632_v25, %v12850_v61  ;;  %v6423_v21 = vmul.f32 %v11638_v56, %v12824_v19 }
 0x592   :  { %v6427_v16 = vmul.f32 %v11638_v56, %v12851_v42  ;;  %v6497_v63 = vadd.f32 %v11677_v54, %v6412_v30  ;;  %v6501_v38 = vadd.f32 %v11677_v54, %v6416_v36  ;;  %v6499_v18 = vadd.f32 %v11680_v15, %v6414_v12 }
 0x593   :  { %v6503_v24 = vadd.f32 %v11680_v15, %v6418_v31  ;;  %v6506_v4 = vadd.f32 %v11671_v53, %v6421_v10  ;;  %v6510_v11 = vadd.f32 %v11671_v53, %v6425_v27  ;;  %v6508_v20 = vadd.f32 %v11674_v43, %v6423_v21 }
 0x594   :  { %6873 = vmatmul.mubr.bf16.gmra.mrb[108].mxu0 %v6533_v50  ;;  %6970 = vmatmul.mubr.bf16.gmra.mrb[108].mxu1 %v6535_v33  ;;  %v6512_v9 = vadd.f32 %v11674_v43, %v6427_v16  ;;  %v6541_v19 = vpack.c.bf16 %v6501_v38, %v6497_v63  ;;  %v12852_v50 = vld [vmem:[#allocation49_spill] sm:$0xff]  ;;  %v6420_v29 = vmul.f32 %v11629_v41, %v12853_v6 }
 0x595   :  { %6880 = vmatprep.mubr.bf16.mxu0 %v6538_v0  ;;  %6977 = vmatprep.mubr.bf16.mxu1 %v6540_v5  ;;  %v6543_v35 = vpack.c.bf16 %v6503_v24, %v6499_v18  ;;  %v6435_v33 = vmul.f32 %v11638_v56, %v12852_v50  ;;  %v6546_v0 = vpack.c.bf16 %v6510_v11, %v6506_v4 }
 0x596   :  { %v6548_v5 = vpack.c.bf16 %v6512_v9, %v6508_v20  ;;  %v6424_v51 = vmul.f32 %v11629_v41, %v12854_v14  ;;  %v6422_v32 = vmul.f32 %v11635_v28, %v12855_v23  ;;  %v6426_v58 = vmul.f32 %v11635_v28, %v12856_v17 }
 0x597   :  { %v6429_v13 = vmul.f32 %v11632_v25, %v12857_v47  ;;  %v6433_v45 = vmul.f32 %v11632_v25, %v12858_v37  ;;  %v6431_v49 = vmul.f32 %v11638_v56, %v12859_v40  ;;  %v6505_v7 = vadd.f32 %v11677_v54, %v6420_v29 }
 0x598   :  { %v6509_v44 = vadd.f32 %v11677_v54, %v6424_v51  ;;  %v6507_v1 = vadd.f32 %v11680_v15, %v6422_v32  ;;  %v6511_v46 = vadd.f32 %v11680_v15, %v6426_v58  ;;  %v6520_v26 = vadd.f32 %v11674_v43, %v6435_v33 }
 0x599   :  { %v6514_v57 = vadd.f32 %v11671_v53, %v6429_v13  ;;  %v6518_v52 = vadd.f32 %v11671_v53, %v6433_v45  ;;  %v6516_v34 = vadd.f32 %v11674_v43, %v6431_v49  ;;  %v6432_v30 = vmul.f32 %v11629_v41, %v12861_v60  ;;  %v12863_v53 = vld [vmem:[#allocation39_spill] sm:$0xff] }
 0x59a   :  { %v6545_v25 = vpack.c.bf16 %v6509_v44, %v6505_v7  ;;  %v6430_v36 = vmul.f32 %v11635_v28, %v12862_v62  ;;  %v6434_v39 = vmul.f32 %v11635_v28, %v12863_v53  ;;  %v11861_v28 = vld [vmem:[%s12016_s12] ss:$0 sm:$0xff] }
 0x59b   :  { %v6552_v56 = vpack.c.bf16 %v6520_v26, %v6516_v34  ;;  %v6517_v12 = vadd.f32 %v11677_v54, %v6432_v30 }
 0x59c   :  { %6881 = vmatmul.mubr.bf16.gmra.mrb[112].mxu0 %v6537_v2  ;;  %6978 = vmatmul.mubr.bf16.gmra.mrb[112].mxu1 %v6539_v8  ;;  %v6547_v2 = vpack.c.bf16 %v6511_v46, %v6507_v1  ;;  %v6550_v8 = vpack.c.bf16 %v6518_v52, %v6514_v57  ;;  %v6515_v59 = vadd.f32 %v11680_v15, %v6430_v36 }
 0x59d   :  { %6888 = vmatprep.mubr.bf16.mxu0 %v6542_v55  ;;  %6985 = vmatprep.mubr.bf16.mxu1 %v6544_v22  ;;  %v12860_v55 = vld [vmem:[#allocation68_spill] sm:$0xff]  ;;  %v6519_v31 = vadd.f32 %v11680_v15, %v6434_v39 }
 0x59e   :  { %v6428_v22 = vmul.f32 %v11629_v41, %v12860_v55 }
 0x59f   :  { %v6551_v10 = vpack.c.bf16 %v6519_v31, %v6515_v59 }
 0x5a0   :  { %v6513_v43 = vadd.f32 %v11677_v54, %v6428_v22 }
 0x5a2   :  { %v6549_v3 = vpack.c.bf16 %v6517_v12, %v6513_v43 }
 0x5a4   :  { %6889 = vmatmul.mubr.bf16.gmra.mrb[116].mxu0 %v6541_v19  ;;  %6986 = vmatmul.mubr.bf16.gmra.mrb[116].mxu1 %v6543_v35 }
 0x5a5   :  { %6896 = vmatprep.mubr.bf16.mxu0 %v6546_v0  ;;  %6993 = vmatprep.mubr.bf16.mxu1 %v6548_v5 }
 0x5ac   :  { %6897 = vmatmul.mubr.bf16.gmra.mrb[120].mxu0 %v6545_v25  ;;  %6994 = vmatmul.mubr.bf16.gmra.mrb[120].mxu1 %v6547_v2 }
 0x5ad   :  { %6904 = vmatprep.mubr.bf16.mxu0 %v6550_v8  ;;  %7001 = vmatprep.mubr.bf16.mxu1 %v6552_v56 }
 0x5b4   :  { %6905 = vmatmul.mubr.bf16.gmra.mrb[124].mxu0 %v6549_v3  ;;  %7002 = vmatmul.mubr.bf16.gmra.mrb[124].mxu1 %v6551_v10 }
 0x64f   :  { %v7872_v41 = vpop.f32.mrb[96].mxu0  ;;  %v7936_v61 = vpop.f32.mrb[96].mxu1 }
 0x650   :  { %v7873_v27 = vpop.f32.mrb[97].mxu0  ;;  %v7937_v21 = vpop.f32.mrb[97].mxu1 }
 0x651   :  { %v7874_v42 = vadd.f32 %v7873_v27, %v7872_v41  ;;  %v7938_v16 = vadd.f32 %v7937_v21, %v7936_v61  ;;  %v7875_v54 = vpop.f32.mrb[98].mxu0  ;;  %v7939_v63 = vpop.f32.mrb[98].mxu1 }
 0x652   :  { %v7876_v38 = vpop.f32.mrb[99].mxu0  ;;  %v7940_v18 = vpop.f32.mrb[99].mxu1 }
 0x653   :  { %v6851_v15 = vadd.f32 %v7874_v42, %v11861_v28  ;;  %v7877_v24 = vadd.f32 %v7876_v38, %v7875_v54  ;;  %v7941_v4 = vadd.f32 %v7940_v18, %v7939_v63 }
 0x655   :  { %v6948_v11 = vadd.f32 %v7938_v16, %v6851_v15  ;;  %v6854_v20 = vadd.f32 %v7877_v24, %v11861_v28 }
 0x657   :  { %v6951_v9 = vadd.f32 %v7941_v4, %v6854_v20  ;;  %v7878_v19 = vpop.f32.mrb[100].mxu0  ;;  %v7942_v35 = vpop.f32.mrb[100].mxu1  ;;  %v11871_v30 = vmax.f32 %v6948_v11, 0.0 }
 0x658   :  { %v7879_v50 = vpop.f32.mrb[101].mxu0  ;;  %v7943_v33 = vpop.f32.mrb[101].mxu1 }
 0x659   :  { %v7880_v0 = vadd.f32 %v7879_v50, %v7878_v19  ;;  %v7944_v5 = vadd.f32 %v7943_v33, %v7942_v35  ;;  %v7881_v6 = vpop.f32.mrb[102].mxu0  ;;  %v7945_v29 = vpop.f32.mrb[102].mxu1  ;;  %v11869_v56 = vmax.f32 %v6951_v9, 0.0 }
 0x65a   :  { %v7882_v14 = vpop.f32.mrb[103].mxu0  ;;  %v7946_v51 = vpop.f32.mrb[103].mxu1 }
 0x65b   :  { %v6859_v23 = vadd.f32 %v7880_v0, %v11861_v28  ;;  %v7883_v32 = vadd.f32 %v7882_v14, %v7881_v6  ;;  %v7947_v17 = vadd.f32 %v7946_v51, %v7945_v29  ;;  %v7028_v31 = vadd.f32 %v11869_v56, %v11871_v30 }
 0x65d   :  { %v6956_v58 = vadd.f32 %v7944_v5, %v6859_v23  ;;  %v6862_v47 = vadd.f32 %v7883_v32, %v11861_v28 }
 0x65f   :  { %v6959_v13 = vadd.f32 %v7947_v17, %v6862_v47  ;;  %v7884_v37 = vpop.f32.mrb[104].mxu0  ;;  %v7948_v45 = vpop.f32.mrb[104].mxu1  ;;  %v11873_v62 = vmax.f32 %v6956_v58, 0.0 }
 0x660   :  { %v7885_v40 = vpop.f32.mrb[105].mxu0  ;;  %v7949_v49 = vpop.f32.mrb[105].mxu1 }
 0x661   :  { %v7886_v7 = vadd.f32 %v7885_v40, %v7884_v37  ;;  %v7950_v44 = vadd.f32 %v7949_v49, %v7948_v45  ;;  %v7887_v1 = vpop.f32.mrb[106].mxu0  ;;  %v7951_v46 = vpop.f32.mrb[106].mxu1  ;;  %v7029_v21 = vadd.f32 %v7028_v31, %v11873_v62  ;;  %v11879_v42 = vmax.f32 %v6959_v13, 0.0 }
 0x662   :  { %v7888_v57 = vpop.f32.mrb[107].mxu0  ;;  %v7952_v52 = vpop.f32.mrb[107].mxu1 }
 0x663   :  { %v6867_v34 = vadd.f32 %v7886_v7, %v11861_v28  ;;  %v7889_v26 = vadd.f32 %v7888_v57, %v7887_v1  ;;  %v7953_v25 = vadd.f32 %v7952_v52, %v7951_v46  ;;  %v7030_v24 = vadd.f32 %v7029_v21, %v11879_v42  ;;  %v8819_v57 = vld [vmem:[#allocation14] sm:$0xff]   ;;  %v8820_v52 = vld [vmem:[#allocation14 + $0x8] sm:$0xff]  }
 0x664   :  { %8000 = vmatprep.subr.bf16.mxu0 %v8819_v57  ;;  %8032 = vmatprep.subr.bf16.mxu1 %v8819_v57 }
 0x665   :  { %v6964_v2 = vadd.f32 %v7950_v44, %v6867_v34  ;;  %v6870_v8 = vadd.f32 %v7889_v26, %v11861_v28  ;;  %8001 = vmatpush3.bf16.msra.mxu0 %v8819_v57  ;;  %8040 = vmatpush3.bf16.msra.mxu1 %v8819_v57 }
 0x666   :  { %8002 = vmatprep.subr.bf16.mxu0 %v8820_v52  ;;  %8033 = vmatprep.subr.bf16.mxu1 %v8820_v52 }
 0x667   :  { %v6967_v55 = vadd.f32 %v7953_v25, %v6870_v8  ;;  %v7890_v22 = vpop.f32.mrb[108].mxu0  ;;  %v7954_v60 = vpop.f32.mrb[108].mxu1  ;;  %v11882_v63 = vmax.f32 %v6964_v2, 0.0 }
 0x668   :  { %v7891_v36 = vpop.f32.mrb[109].mxu0  ;;  %v7955_v53 = vpop.f32.mrb[109].mxu1 }
 0x669   :  { %v7892_v39 = vadd.f32 %v7891_v36, %v7890_v22  ;;  %v7956_v43 = vadd.f32 %v7955_v53, %v7954_v60  ;;  %v7893_v12 = vpop.f32.mrb[110].mxu0  ;;  %v7957_v59 = vpop.f32.mrb[110].mxu1  ;;  %v7031_v50 = vadd.f32 %v7030_v24, %v11882_v63  ;;  %v11886_v33 = vmax.f32 %v6967_v55, 0.0  ;;  %v8821_v53 = vld [vmem:[#allocation14 + $0x10] sm:$0xff]   ;;  %8003 = vmatpush3.bf16.msra.mxu0 %v8820_v52  ;;  %8041 = vmatpush3.bf16.msra.mxu1 %v8820_v52 }
 0x66a   :  { %v7894_v3 = vpop.f32.mrb[111].mxu0  ;;  %v7958_v10 = vpop.f32.mrb[111].mxu1  ;;  %8004 = vmatprep.subr.bf16.mxu0 %v8821_v53  ;;  %8034 = vmatprep.subr.bf16.mxu1 %v8821_v53 }
 0x66b   :  { %v6875_v41 = vadd.f32 %v7892_v39, %v11861_v28  ;;  %v7895_v61 = vadd.f32 %v7894_v3, %v7893_v12  ;;  %v7959_v27 = vadd.f32 %v7958_v10, %v7957_v59  ;;  %v7032_v17 = vadd.f32 %v7031_v50, %v11886_v33  ;;  %v8823_v50 = vld [vmem:[#allocation14 + $0x20] sm:$0xff]  }
 0x66d   :  { %v6972_v16 = vadd.f32 %v7956_v43, %v6875_v41  ;;  %v6878_v54 = vadd.f32 %v7895_v61, %v11861_v28  ;;  %8005 = vmatpush3.bf16.msra.mxu0 %v8821_v53  ;;  %8042 = vmatpush3.bf16.msra.mxu1 %v8821_v53 }
 0x66f   :  { %v6975_v38 = vadd.f32 %v7959_v27, %v6878_v54  ;;  %v7896_v18 = vpop.f32.mrb[112].mxu0  ;;  %v7960_v15 = vpop.f32.mrb[112].mxu1  ;;  %v11889_v51 = vmax.f32 %v6972_v16, 0.0  ;;  %v8822_v54 = vld [vmem:[#allocation14 + $0x18] sm:$0xff]  }
 0x670   :  { %v7897_v4 = vpop.f32.mrb[113].mxu0  ;;  %v7961_v11 = vpop.f32.mrb[113].mxu1  ;;  %8006 = vmatprep.subr.bf16.mxu0 %v8822_v54  ;;  %8035 = vmatprep.subr.bf16.mxu1 %v8822_v54 }
 0x671   :  { %v7898_v20 = vadd.f32 %v7897_v4, %v7896_v18  ;;  %v7962_v9 = vadd.f32 %v7961_v11, %v7960_v15  ;;  %v7899_v19 = vpop.f32.mrb[114].mxu0  ;;  %v7963_v35 = vpop.f32.mrb[114].mxu1  ;;  %v7033_v37 = vadd.f32 %v7032_v17, %v11889_v51  ;;  %v11894_v45 = vmax.f32 %v6975_v38, 0.0  ;;  %8007 = vmatpush3.bf16.msra.mxu0 %v8822_v54  ;;  %8043 = vmatpush3.bf16.msra.mxu1 %v8822_v54 }
 0x672   :  { %v7900_v0 = vpop.f32.mrb[115].mxu0  ;;  %v7964_v5 = vpop.f32.mrb[115].mxu1  ;;  %8008 = vmatprep.subr.bf16.mxu0 %v8823_v50  ;;  %8036 = vmatprep.subr.bf16.mxu1 %v8823_v50 }
 0x673   :  { %v6883_v6 = vadd.f32 %v7898_v20, %v11861_v28  ;;  %v7901_v29 = vadd.f32 %v7900_v0, %v7899_v19  ;;  %v7965_v14 = vadd.f32 %v7964_v5, %v7963_v35  ;;  %v7034_v22 = vadd.f32 %v7033_v37, %v11894_v45  ;;  %v8824_v37 = vld [vmem:[#allocation14 + $0x28] sm:$0xff]  }
 0x675   :  { %v6980_v23 = vadd.f32 %v7962_v9, %v6883_v6  ;;  %v6886_v32 = vadd.f32 %v7901_v29, %v11861_v28  ;;  %8009 = vmatpush3.bf16.msra.mxu0 %v8823_v50  ;;  %8044 = vmatpush3.bf16.msra.mxu1 %v8823_v50 }
 0x676   :  { %8010 = vmatprep.subr.bf16.mxu0 %v8824_v37  ;;  %8037 = vmatprep.subr.bf16.mxu1 %v8824_v37 }
 0x677   :  { %v6983_v58 = vadd.f32 %v7965_v14, %v6886_v32  ;;  %v7902_v47 = vpop.f32.mrb[116].mxu0  ;;  %v7966_v13 = vpop.f32.mrb[116].mxu1  ;;  %v11896_v34 = vmax.f32 %v6980_v23, 0.0 }
 0x678   :  { %v7903_v40 = vpop.f32.mrb[117].mxu0  ;;  %v7967_v49 = vpop.f32.mrb[117].mxu1 }
 0x679   :  { %v7904_v7 = vadd.f32 %v7903_v40, %v7902_v47  ;;  %v7968_v44 = vadd.f32 %v7967_v49, %v7966_v13  ;;  %v7905_v1 = vpop.f32.mrb[118].mxu0  ;;  %v7969_v46 = vpop.f32.mrb[118].mxu1  ;;  %v7035_v39 = vadd.f32 %v7034_v22, %v11896_v34  ;;  %v11902_v43 = vmax.f32 %v6983_v58, 0.0  ;;  %8011 = vmatpush3.bf16.msra.mxu0 %v8824_v37  ;;  %8045 = vmatpush3.bf16.msra.mxu1 %v8824_v37 }
 0x67a   :  { %v7906_v26 = vpop.f32.mrb[119].mxu0  ;;  %v7970_v25 = vpop.f32.mrb[119].mxu1 }
 0x67b   :  { %v6891_v2 = vadd.f32 %v7904_v7, %v11861_v28  ;;  %v7907_v8 = vadd.f32 %v7906_v26, %v7905_v1  ;;  %v7971_v55 = vadd.f32 %v7970_v25, %v7969_v46  ;;  %v7036_v38 = vadd.f32 %v7035_v39, %v11902_v43  ;;  %v8825_v25 = vld [vmem:[#allocation14 + $0x30] sm:$0xff]  }
 0x67c   :  { %8012 = vmatprep.subr.bf16.mxu0 %v8825_v25  ;;  %8038 = vmatprep.subr.bf16.mxu1 %v8825_v25 }
 0x67d   :  { %v6988_v60 = vadd.f32 %v7968_v44, %v6891_v2  ;;  %v6894_v36 = vadd.f32 %v7907_v8, %v11861_v28  ;;  %8013 = vmatpush3.bf16.msra.mxu0 %v8825_v25  ;;  %8046 = vmatpush3.bf16.msra.mxu1 %v8825_v25 }
 0x67f   :  { %v6991_v12 = vadd.f32 %v7971_v55, %v6894_v36  ;;  %v7908_v59 = vpop.f32.mrb[120].mxu0  ;;  %v7972_v31 = vpop.f32.mrb[120].mxu1  ;;  %v11904_v3 = vmax.f32 %v6988_v60, 0.0  ;;  %v8826_v36 = vld [vmem:[#allocation14 + $0x38] sm:$0xff]  }
 0x680   :  { %v7909_v10 = vpop.f32.mrb[121].mxu0  ;;  %v7973_v41 = vpop.f32.mrb[121].mxu1  ;;  %8014 = vmatprep.subr.bf16.mxu0 %v8826_v36  ;;  %8039 = vmatprep.subr.bf16.mxu1 %v8826_v36 }
 0x681   :  { %v7910_v61 = vadd.f32 %v7909_v10, %v7908_v59  ;;  %v7974_v27 = vadd.f32 %v7973_v41, %v7972_v31  ;;  %v7911_v21 = vpop.f32.mrb[122].mxu0  ;;  %v7975_v16 = vpop.f32.mrb[122].mxu1  ;;  %v7037_v20 = vadd.f32 %v7036_v38, %v11904_v3  ;;  %v11909_v9 = vmax.f32 %v6991_v12, 0.0  ;;  %8015 = vmatpush3.bf16.msra.mxu0 %v8826_v36  ;;  %8047 = vmatpush3.bf16.msra.mxu1 %v8826_v36 }
 0x682   :  { %v7912_v18 = vpop.f32.mrb[123].mxu0  ;;  %v7976_v15 = vpop.f32.mrb[123].mxu1 }
 0x683   :  { %v6899_v24 = vadd.f32 %v7910_v61, %v11861_v28  ;;  %v7913_v4 = vadd.f32 %v7912_v18, %v7911_v21  ;;  %v7977_v11 = vadd.f32 %v7976_v15, %v7975_v16  ;;  %v7038_v14 = vadd.f32 %v7037_v20, %v11909_v9 }
 0x685   :  { %v6996_v19 = vadd.f32 %v7974_v27, %v6899_v24  ;;  %v6902_v35 = vadd.f32 %v7913_v4, %v11861_v28 }
 0x687   :  { %v11912_v0 = vmax.f32 %v6996_v19, 0.0  ;;  %v6999_v5 = vadd.f32 %v7977_v11, %v6902_v35  ;;  %v7914_v6 = vpop.f32.mrb[124].mxu0  ;;  %v7978_v29 = vpop.f32.mrb[124].mxu1 }
 0x688   :  { %v7915_v23 = vpop.f32.mrb[125].mxu0  ;;  %v7979_v32 = vpop.f32.mrb[125].mxu1 }
 0x689   :  { %v7916_v17 = vadd.f32 %v7915_v23, %v7914_v6  ;;  %v7980_v58 = vadd.f32 %v7979_v32, %v7978_v29  ;;  %v7917_v47 = vpop.f32.mrb[126].mxu0  ;;  %v7981_v13 = vpop.f32.mrb[126].mxu1  ;;  %v7039_v40 = vadd.f32 %v7038_v14, %v11912_v0  ;;  %v11916_v44 = vmax.f32 %v6999_v5, 0.0 }
 0x68a   :  { %v7918_v49 = vpop.f32.mrb[127].mxu0  ;;  %v7982_v7 = vpop.f32.mrb[127].mxu1 }
 0x68b   :  { %v6907_v1 = vadd.f32 %v7916_v17, %v11861_v28  ;;  %v7919_v46 = vadd.f32 %v7918_v49, %v7917_v47  ;;  %v7983_v57 = vadd.f32 %v7982_v7, %v7981_v13  ;;  %v7040_v2 = vadd.f32 %v7039_v40, %v11916_v44 }
 0x68d   :  { %v7004_v52 = vadd.f32 %v7980_v58, %v6907_v1  ;;  %v6910_v26 = vadd.f32 %v7919_v46, %v11861_v28 }
 0x68f   :  { %v11921_v8 = vmax.f32 %v7004_v52, 0.0  ;;  %v7007_v55 = vadd.f32 %v7983_v57, %v6910_v26 }
 0x691   :  { %v7041_v22 = vadd.f32 %v7040_v2, %v11921_v8  ;;  %v11924_v60 = vmax.f32 %v7007_v55, 0.0 }
 0x693   :  { %v7042_v28 = vadd.f32 %v7041_v22, %v11924_v60 }
 0x695   :  { %v7043_v53 = vrot.slane %v7042_v28, 4 }
 0x697   :  { %v7044_v39 = vadd.f32 %v7043_v53, %v7042_v28 }
 0x699   :  { %v7045_v12 = vrot.slane %v7044_v39, 2 }
 0x69b   :  { %v7046_v59 = vadd.f32 %v7045_v12, %v7044_v39 }
 0x69d   :  { %v7047_v31 = vrot.slane %v7046_v59, 1 }
 0x69f   :  { %v7048_v10 = vadd.f32 %v7047_v31, %v7046_v59 }
 0x6a1   :  { %v11927_v41 = vmul.f32 0.0078125, %v7048_v10 }
 0x6a3   :  { %v7050_v61 = vsub.f32 %v11871_v30, %v11927_v41  ;;  %v7051_v27 = vsub.f32 %v11869_v56, %v11927_v41  ;;  %v7052_v21 = vsub.f32 %v11873_v62, %v11927_v41  ;;  %v7053_v38 = vsub.f32 %v11879_v42, %v11927_v41 }
 0x6a4   :  { %v7054_v18 = vsub.f32 %v11882_v63, %v11927_v41  ;;  %v7055_v4 = vsub.f32 %v11886_v33, %v11927_v41  ;;  %v7056_v19 = vsub.f32 %v11889_v51, %v11927_v41  ;;  %v7057_v5 = vsub.f32 %v11894_v45, %v11927_v41 }
 0x6a5   :  { %v7066_v16 = vmul.f32 %v7050_v61, %v7050_v61  ;;  %v7067_v54 = vmul.f32 %v7051_v27, %v7051_v27  ;;  %v7068_v15 = vmul.f32 %v7052_v21, %v7052_v21  ;;  %v7069_v11 = vmul.f32 %v7053_v38, %v7053_v38 }
 0x6a6   :  { %v7070_v35 = vmul.f32 %v7054_v18, %v7054_v18  ;;  %v7071_v6 = vmul.f32 %v7055_v4, %v7055_v4  ;;  %v7058_v14 = vsub.f32 %v11896_v34, %v11927_v41  ;;  %v7072_v23 = vmul.f32 %v7056_v19, %v7056_v19 }
 0x6a7   :  { %v7082_v24 = vadd.f32 %v7067_v54, %v7066_v16  ;;  %v7059_v17 = vsub.f32 %v11902_v43, %v11927_v41  ;;  %v7073_v58 = vmul.f32 %v7057_v5, %v7057_v5  ;;  %v7060_v13 = vsub.f32 %v11904_v3, %v11927_v41 }
 0x6a8   :  { %v7074_v37 = vmul.f32 %v7058_v14, %v7058_v14  ;;  %v7061_v49 = vsub.f32 %v11909_v9, %v11927_v41  ;;  %v7062_v46 = vsub.f32 %v11912_v0, %v11927_v41  ;;  %v7063_v26 = vsub.f32 %v11916_v44, %v11927_v41 }
 0x6a9   :  { %v7083_v20 = vadd.f32 %v7082_v24, %v7068_v15  ;;  %v7075_v7 = vmul.f32 %v7059_v17, %v7059_v17  ;;  %v7076_v57 = vmul.f32 %v7060_v13, %v7060_v13  ;;  %v7064_v55 = vsub.f32 %v11921_v8, %v11927_v41 }
 0x6aa   :  { %v7077_v25 = vmul.f32 %v7061_v49, %v7061_v49  ;;  %v7078_v22 = vmul.f32 %v7062_v46, %v7062_v46  ;;  %v7065_v28 = vsub.f32 %v11924_v60, %v11927_v41  ;;  %v7079_v53 = vmul.f32 %v7063_v26, %v7063_v26 }
 0x6ab   :  { %v7084_v50 = vadd.f32 %v7083_v20, %v7069_v11  ;;  %v7080_v12 = vmul.f32 %v7064_v55, %v7064_v55 }
 0x6ac   :  { %v7081_v31 = vmul.f32 %v7065_v28, %v7065_v28 }
 0x6ad   :  { %v7085_v29 = vadd.f32 %v7084_v50, %v7070_v35  ;;  %v7026_v50 = vld [vmem:[%s12017_s13] sm:$0x1] }
 0x6af   :  { %v7086_v32 = vadd.f32 %v7085_v29, %v7071_v6  ;;  %v7027_v29 = vld [vmem:[%s12018_s14] sm:$0x1] }
 0x6b1   :  { %v7087_v47 = vadd.f32 %v7086_v32, %v7072_v23 }
 0x6b3   :  { %v7088_v40 = vadd.f32 %v7087_v47, %v7073_v58 }
 0x6b5   :  { %v7089_v1 = vadd.f32 %v7088_v40, %v7074_v37 }
 0x6b7   :  { %v7090_v52 = vadd.f32 %v7089_v1, %v7075_v7 }
 0x6b9   :  { %v7091_v2 = vadd.f32 %v7090_v52, %v7076_v57 }
 0x6bb   :  { %v7092_v36 = vadd.f32 %v7091_v2, %v7077_v25 }
 0x6bd   :  { %v7093_v39 = vadd.f32 %v7092_v36, %v7078_v22 }
 0x6bf   :  { %v7094_v59 = vadd.f32 %v7093_v39, %v7079_v53 }
 0x6c1   :  { %v7095_v10 = vadd.f32 %v7094_v59, %v7080_v12 }
 0x6c3   :  { %v7096_v61 = vadd.f32 %v7095_v10, %v7081_v31 }
 0x6c5   :  { %v7097_v27 = vrot.slane %v7096_v61, 4 }
 0x6c7   :  { %v7098_v21 = vadd.f32 %v7097_v27, %v7096_v61 }
 0x6c9   :  { %v7099_v16 = vrot.slane %v7098_v21, 2 }
 0x6cb   :  { %v7100_v54 = vadd.f32 %v7099_v16, %v7098_v21 }
 0x6cd   :  { %v7101_v38 = vrot.slane %v7100_v54, 1 }
 0x6cf   :  { %v7102_v18 = vadd.f32 %v7101_v38, %v7100_v54 }
 0x6d1   :  { %v7103_v15 = vmul.f32 0.0078125, %v7102_v18 }
 0x6d3   :  { %v7104_v24 = vadd.f32 1e-05, %v7103_v15 }
 0x6d5   :  { %8875 = vrsqrt.f32 %v7104_v24  ;;  %vm7107_vm8 = vcmp.eq.f32.partialorder %v7104_v24, inf  ;;  %v7110_v20 = vand.u32 2147483648, %v7104_v24  ;;  %vm7109_vm9 = vcmp.eq.f32.partialorder %v7104_v24, 0.0 }
 0x6df   :  { %v8876_v4 = vpop.eup %8875 }
 0x6e0   :  { %v7106_v11 = vmul.f32 %v8876_v4, %v7104_v24 }
 0x6e2   :  { %v7108_v19 = vsel %vm7107_vm8, %v7104_v24, %v7106_v11 }
 0x6e3   :  { %v7111_v35 = vsel %vm7109_vm9, %v7110_v20, %v7108_v19 }
 0x6e4   :  { %8877 = vrcp.f32 %v7111_v35 }
 0x6ee   :  { %v8878_v5 = vpop.eup %8877 }
 0x6ef   :  { %v7114_v6 = vmul.f32 %v8878_v5, %v7026_v50 }
 0x6f1   :  { %v7115_v14 = vmul.f32 %v7114_v6, %v11927_v41  ;;  %v7121_v23 = vrot.slane %v7114_v6, %v12827_v48 }
 0x6f3   :  { %v7116_v32 = vsub.f32 %v7027_v29, %v7115_v14  ;;  %v7123_v17 = vmul.f32 %v7121_v23, %v11871_v30  ;;  %v7124_v58 = vmul.f32 %v7121_v23, %v11869_v56  ;;  %v7131_v47 = vmul.f32 %v7121_v23, %v11896_v34 }
 0x6f4   :  { %v7132_v13 = vmul.f32 %v7121_v23, %v11902_v43  ;;  %v7125_v37 = vmul.f32 %v7121_v23, %v11873_v62  ;;  %v7126_v49 = vmul.f32 %v7121_v23, %v11879_v42  ;;  %v7133_v7 = vmul.f32 %v7121_v23, %v11904_v3 }
 0x6f5   :  { %v7143_v40 = vrot.slane %v7116_v32, %v12827_v48  ;;  %v7134_v41 = vmul.f32 %v7121_v23, %v11909_v9  ;;  %v7127_v1 = vmul.f32 %v7121_v23, %v11882_v63  ;;  %v7128_v30 = vmul.f32 %v7121_v23, %v11886_v33 }
 0x6f6   :  { %v7135_v56 = vmul.f32 %v7121_v23, %v11912_v0  ;;  %v7136_v34 = vmul.f32 %v7121_v23, %v11916_v44  ;;  %v7138_v0 = vmul.f32 %v7121_v23, %v11924_v60  ;;  %v7129_v36 = vmul.f32 %v7121_v23, %v11889_v51  ;;  %v7847_v51 = vld [vmem:[%s12020_s16] ss:$0 sm:$0xff]  ;;  %s9108_s16 = smov [#allocation16]  }
 0x6f7   :  { %v7145_v46 = vadd.f32 %v7143_v40, %v7123_v17  ;;  %v7146_v43 = vadd.f32 %v7143_v40, %v7124_v58  ;;  %v7153_v57 = vadd.f32 %v7143_v40, %v7131_v47  ;;  %v7154_v62 = vadd.f32 %v7143_v40, %v7132_v13  ;;  %s7358_s19 = sshll.u32 %s9108_s16, 4  ;;  %s7359_s19 = int_to_ptr.vmem [resolvable:$true] %s7358_s19 }
 0x6f8   :  { %v7147_v52 = vadd.f32 %v7143_v40, %v7125_v37  ;;  %v7148_v48 = vadd.f32 %v7143_v40, %v7126_v49  ;;  %v7155_v26 = vadd.f32 %v7143_v40, %v7133_v7  ;;  %v7156_v42 = vadd.f32 %v7143_v40, %v7134_v41  ;;  %s9056_s1 = scalar_lea.vmem %s7359_s19, 2048  ;;  %p9061_p9 = scmp.lt.s32.totalorder %s7359_s19, %s7359_s19 }
 0x6f9   :  { %v7161_v25 = vpack.c.bf16 %v7146_v43, %v7145_v46  ;;  %v7165_v3 = vpack.c.bf16 %v7154_v62, %v7153_v57  ;;  %v7149_v2 = vadd.f32 %v7143_v40, %v7127_v1  ;;  %v7150_v9 = vadd.f32 %v7143_v40, %v7128_v30  ;;  %p9057_p8 = scmp.ne.s32.totalorder %s7359_s19, %s9056_s1  ;;  %p9062_p10 = scmp.lt.s32.totalorder %s9056_s1, %s9056_s1 }
 0x6fa   :  { %v7162_v55 = vpack.c.bf16 %v7148_v48, %v7147_v52  ;;  %v7166_v63 = vpack.c.bf16 %v7156_v42, %v7155_v26  ;;  %v7157_v22 = vadd.f32 %v7143_v40, %v7135_v56  ;;  %v7158_v33 = vadd.f32 %v7143_v40, %v7136_v34 }
 0x6fb   :  { %8016 = vmatprep.mubr.bf16.mxu0 %v7161_v25  ;;  %8024 = vmatprep.mubr.bf16.mxu1 %v7165_v3  ;;  %v7163_v44 = vpack.c.bf16 %v7150_v9, %v7149_v2  ;;  %v7130_v53 = vmul.f32 %v7121_v23, %v11894_v45  ;;  %v7137_v39 = vmul.f32 %v7121_v23, %v11921_v8  ;;  %p9063_p11 = por %p9062_p10, %p9061_p9 }
 0x6fc   :  { %8017 = vmatmul.mubr.bf16.vlgmr.msra.gmra.mrb[128].mxu0 %v7162_v55  ;;  %8025 = vmatmul.mubr.bf16.vlgmr.msra.gmra.mrb[128].mxu1 %v7166_v63  ;;  %v7167_v28 = vpack.c.bf16 %v7158_v33, %v7157_v22  ;;  %v7151_v12 = vadd.f32 %v7143_v40, %v7129_v36  ;;  %v7160_v10 = vadd.f32 %v7143_v40, %v7138_v0 }
 0x6fd   :  { %8020 = vmatprep.mubr.bf16.mxu0 %v7163_v44  ;;  %v7152_v59 = vadd.f32 %v7143_v40, %v7130_v53  ;;  %v7159_v31 = vadd.f32 %v7143_v40, %v7137_v39  ;;  %p9064_p12 = pnand %p9063_p11, %p9057_p8 }
 0x6fe   :  { %8028 = vmatprep.mubr.bf16.mxu1 %v7167_v28 }
 0x6ff   :  { %v7164_v61 = vpack.c.bf16 %v7152_v59, %v7151_v12  ;;  %v7168_v60 = vpack.c.bf16 %v7160_v10, %v7159_v31 }
 0x704   :  { %8021 = vmatmul.mubr.bf16.gmra.mrb[132].mxu0 %v7164_v61  ;;  %8029 = vmatmul.mubr.bf16.gmra.mrb[132].mxu1 %v7168_v60 }
 0x7cf   :  { %v8018_v27 = vpop.f32.mrb[128].mxu0  ;;  %v8026_v21 = vpop.f32.mrb[128].mxu1 }
 0x7d0   :  { %v7283_v16 = vadd.f32 %v8018_v27, %v7847_v51  ;;  %v7315_v45 = vadd.f32 %v8026_v21, %v7847_v51  ;;  %v7274_v54 = vpop.f32.mrb[129].mxu0  ;;  %v7306_v8 = vpop.f32.mrb[129].mxu1 }
 0x7d1   :  { %v7275_v38 = vadd.f32 %v7847_v51, %v7274_v54  ;;  %v7307_v18 = vadd.f32 %v7847_v51, %v7306_v8  ;;  %v8019_v15 = vpop.f32.mrb[130].mxu0  ;;  %v8027_v24 = vpop.f32.mrb[130].mxu1 }
 0x7d2   :  { %7339 = vst [vmem:[#allocation16 + $0x10] sm:$0xff] %v7283_v16  ;;  %7347 = vst [vmem:[#allocation16 + $0x50] sm:$0xff] %v7315_v45  ;;  %v7286_v4 = vadd.f32 %v8019_v15, %v7847_v51  ;;  %v7318_v11 = vadd.f32 %v8027_v24, %v7847_v51  ;;  %v7277_v20 = vpop.f32.mrb[131].mxu0  ;;  %v7309_v19 = vpop.f32.mrb[131].mxu1 }
 0x7d3   :  { %7337 = vst [vmem:[#allocation16] sm:$0xff] %v7275_v38  ;;  %7345 = vst [vmem:[#allocation16 + $0x40] sm:$0xff] %v7307_v18  ;;  %v7278_v35 = vadd.f32 %v7847_v51, %v7277_v20  ;;  %v7310_v50 = vadd.f32 %v7847_v51, %v7309_v19 }
 0x7d4   :  { %7340 = vst [vmem:[#allocation16 + $0x18] sm:$0xff] %v7286_v4  ;;  %7348 = vst [vmem:[#allocation16 + $0x58] sm:$0xff] %v7318_v11 }
 0x7d5   :  { %7338 = vst [vmem:[#allocation16 + $0x8] sm:$0xff] %v7278_v35  ;;  %7346 = vst [vmem:[#allocation16 + $0x48] sm:$0xff] %v7310_v50 }
 0x7d7   :  { %v8022_v5 = vpop.f32.mrb[132].mxu0  ;;  %v8030_v6 = vpop.f32.mrb[132].mxu1 }
 0x7d8   :  { %v7299_v29 = vadd.f32 %v8022_v5, %v7847_v51  ;;  %v7331_v14 = vadd.f32 %v8030_v6, %v7847_v51  ;;  %v7290_v23 = vpop.f32.mrb[133].mxu0  ;;  %v7322_v32 = vpop.f32.mrb[133].mxu1 }
 0x7d9   :  { %v7291_v17 = vadd.f32 %v7847_v51, %v7290_v23  ;;  %v7323_v58 = vadd.f32 %v7847_v51, %v7322_v32  ;;  %v8023_v47 = vpop.f32.mrb[134].mxu0  ;;  %v8031_v13 = vpop.f32.mrb[134].mxu1 }
 0x7da   :  { %7343 = vst [vmem:[#allocation16 + $0x30] sm:$0xff] %v7299_v29  ;;  %7351 = vst [vmem:[#allocation16 + $0x70] sm:$0xff] %v7331_v14  ;;  %v7302_v37 = vadd.f32 %v8023_v47, %v7847_v51  ;;  %v7334_v40 = vadd.f32 %v8031_v13, %v7847_v51  ;;  %v7293_v49 = vpop.f32.mrb[135].mxu0  ;;  %v7325_v7 = vpop.f32.mrb[135].mxu1 }
 0x7db   :  { %7341 = vst [vmem:[#allocation16 + $0x20] sm:$0xff] %v7291_v17  ;;  %7349 = vst [vmem:[#allocation16 + $0x60] sm:$0xff] %v7323_v58  ;;  %v7294_v41 = vadd.f32 %v7847_v51, %v7293_v49  ;;  %v7326_v1 = vadd.f32 %v7847_v51, %v7325_v7 }
 0x7dc   :  { %7344 = vst [vmem:[#allocation16 + $0x38] sm:$0xff] %v7302_v37  ;;  %7352 = vst [vmem:[#allocation16 + $0x78] sm:$0xff] %v7334_v40 }
 0x7dd   :  { %7342 = vst [vmem:[#allocation16 + $0x28] sm:$0xff] %v7294_v41  ;;  %7350 = vst [vmem:[#allocation16 + $0x68] sm:$0xff] %v7326_v1 }
 0x7de   :  { %9067 = shalt.err (!%p9064_p12)
}
 0x7df   :  { %s12864_s2 = sld [smem:[#allocation162_spill]] }
 0x7e5   :  { %s9068_s29 = scalar_lea.hbm %s12864_s2, 2048 }
 0x7e6   :  { %p9069_p13 = scmp.ne.s32.totalorder %s12864_s2, %s9068_s29  ;;  %p9072_p0 = scmp.lt.u32.totalorder %s9068_s29, %s12864_s2 }
 0x7e8   :  { %p9074_p1 = pnand %p9072_p0, %p9069_p13 }
 0x7ea   :  { %9077 = shalt.err (!%p9074_p1)
}
 0x7eb   :  { %s12865_s11 = smov 8   ;;  %s12866_s18 = smov 128  }
 0x7ec   :  { %7364 = dma.vmem_to_hbm [thread:$0]  %s7359_s19, 2048, %s12864_s2, [#allocation4], %s12866_s18, %s12866_s18, %s12865_s11  }
 0x7ed   :  { %9088 = dma.done.wait [#allocation4], 2048  }
 0x7ee   :  { %9089 = vsyncadd [#allocation4], 4294965248 }
 0x7ef   :  { %7368 = vsyncpa [#allocation3], 1 }
 0x7f0   :  { %7369 = vsyncpa [#allocation6], 1 }
 0x7f1   :  { %7370 = vsyncpa [#allocation9], 1 }
 0x7f2   :  { %7371 = vsyncpa [#allocation12], 1 }
 0x7f3   :  { %7372 = vsyncpa [#allocation15], 1 }
 0x7f4   :  { %7373 = vsyncpa [#allocation4], 1 }

</bundles_post_ra>
